<compile_context>
chip_gen: v6e
topology: v6e:2x2x1
jax: 0.10.0
libtpu: 0.0.40
codegen_flags: <defaults>
</compile_context>

<pallas_src>
import functools
import math

import jax
import jax.numpy as jnp
from jax.experimental import pallas as pl
from jax.experimental.pallas import tpu as pltpu  # noqa: F401  (TPU backend)

# ---------------- model hyper-parameters (small, synthetic) ----------------
D_MODEL = 32
N_HEAD = 4
DH = D_MODEL // N_HEAD
FF_DIM = 64
NUM_CLASS = 3
VOCAB = 100
NUM_ASPECT = 5
MAX_NUM_SENT = 4
NUM_TOKEN = 8
LN_EPS = 1e-5
C_PAD = 128          # lane-dense classifier output width (sliced back to 3)
NEG_BIAS = -1e9      # additive key-padding bias (f32-safe large negative)


# ------------------------------ fused kernel --------------------------------
def _softmax_last(x):
    m = jnp.max(x, axis=-1, keepdims=True)
    e = jnp.exp(x - m)
    s = jnp.sum(e, axis=-1, keepdims=True)
    return e * pl.reciprocal(s, approx=True)


def dart_fused_kernel(
    tok_ref,        # (BN, T, D)   token+type+pos embeddings
    tab_ref,        # (BN*T, BN*T) block-diag + key-padding bias (token level)
    sab_ref,        # (B*N, B*N)   block-diag + key-padding bias (sentence level)
    locb_ref,       # (BN, T, 1)   additive bias for local pooling scores
    globb_ref,      # (B, N, 1)    additive bias for global pooling scores
    pos_ref,        # (B, N, D)    sentence position embeddings
    asp_ref,        # (B, 1, D)    aspect query embeddings
    wqkv_ref,       # (3*3*H, D+8, dh)  [layer, q/k/v, head]: rows 0:D = W, row D = b
    wo_ref,         # (3*H, dh, D)      per-layer per-head output projection
    w1_ref,         # (3, D+8, FF)      rows 0:D = W1, row D = b1
    w2_ref,         # (3, FF, D)
    lvec_ref,       # (3, 8, D)         rows = [bo, b2, ln1_g, ln1_b, ln2_g, ln2_b, 0, 0]
    pool_ref,       # (3, D+16, D)      [local | global | clf1]: W, row D = b, row D+8 = u
    cout_ref,       # (D+8, C_PAD)      rows 0:D = clf W2 (lane-padded), row D = b2
    out_ref,        # (B, C_PAD)
    *, num_heads):
    BN, T, D = tok_ref.shape
    B, N, _ = pos_ref.shape
    dh = D // num_heads
    scale = 1.0 / math.sqrt(dh)

    def layer_norm(x, g, b):
        mu = jnp.mean(x, axis=-1, keepdims=True)
        var = jnp.mean((x - mu) ** 2, axis=-1, keepdims=True)
        return (x - mu) * jax.lax.rsqrt(var + LN_EPS) * g + b

    def encoder_layer(x2, attn_bias, li):
        # x2: (R, D) flattened rows of one attention batch;
        # attn_bias: (R, R) block-diagonal (same sentence/doc) + key-padding
        # additive bias.  Post-norm TransformerEncoderLayer (dropout = id).
        attn = None
        for h in range(num_heads):                      # static, 4 iterations
            iq = (li * 3 + 0) * num_heads + h
            ik = (li * 3 + 1) * num_heads + h
            iv = (li * 3 + 2) * num_heads + h
            q = jnp.dot(x2, wqkv_ref[iq, 0:D, :],
                        preferred_element_type=jnp.float32) + wqkv_ref[iq, D:D + 1, :]
            k = jnp.dot(x2, wqkv_ref[ik, 0:D, :],
                        preferred_element_type=jnp.float32) + wqkv_ref[ik, D:D + 1, :]
            v = jnp.dot(x2, wqkv_ref[iv, 0:D, :],
                        preferred_element_type=jnp.float32) + wqkv_ref[iv, D:D + 1, :]
            # plain 2-D matmuls over the flattened row dim; cross-block
            # entries are killed exactly by the -1e9 bias through softmax.
            s = jnp.einsum('qd,kd->qk', q, k,
                           preferred_element_type=jnp.float32) * scale + attn_bias
            p = _softmax_last(s)
            ctx = jnp.dot(p, v, preferred_element_type=jnp.float32)        # (R, dh)
            part = jnp.dot(ctx, wo_ref[li * num_heads + h],
                           preferred_element_type=jnp.float32)             # (R, D)
            attn = part if attn is None else attn + part
        attn = attn + lvec_ref[li, 0:1, :]                                 # + bo
        h1 = layer_norm(x2 + attn, lvec_ref[li, 2:3, :], lvec_ref[li, 3:4, :])
        ff = jnp.dot(
            jnp.maximum(
                jnp.dot(h1, w1_ref[li, 0:D, :],
                        preferred_element_type=jnp.float32) + w1_ref[li, D:D + 1, :],
                0.0),
            w2_ref[li], preferred_element_type=jnp.float32) + lvec_ref[li, 1:2, :]
        h2 = layer_norm(h1 + ff, lvec_ref[li, 4:5, :], lvec_ref[li, 5:6, :])
        return h2

    tab = tab_ref[...]
    sab = sab_ref[...]

    # ---- 1st: sentence encoding block (all B*N sentences, flattened) ----
    sent = encoder_layer(tok_ref[...].reshape(BN * T, D), tab, 0)      # (BN*T, D)

    # ---- 2nd: global context interaction block over CLS embeddings ----
    cls = sent.reshape(BN, T, D)[:, 0, :].reshape(B, N, D) + pos_ref[...]
    cls = encoder_layer(cls.reshape(B * N, D), sab, 1)                 # (B*N, D)

    # replace row 0 of every sentence with the refined CLS (in-VMEM select)
    row_idx = jax.lax.broadcasted_iota(jnp.int32, (BN, T, 1), 1)
    refine_in = jnp.where(row_idx == 0, cls.reshape(BN, 1, D),
                          sent.reshape(BN, T, D))
    refined = encoder_layer(refine_in.reshape(BN * T, D), tab, 2)      # (BN*T, D)

    # ---- 3rd: aspect aggregation block ----
    # local attentive pooling over tokens of each sentence
    lh = jnp.tanh(jnp.dot(refined, pool_ref[0, 0:D, :],
                          preferred_element_type=jnp.float32) + pool_ref[0, D:D + 1, :])
    lsc = jnp.sum(lh * pool_ref[0, D + 8:D + 9, :], axis=-1, keepdims=True)
    lsc = lsc.reshape(BN, T, 1) + locb_ref[...]
    lm = jnp.max(lsc, axis=1, keepdims=True)
    le = jnp.exp(lsc - lm)
    lp = le * pl.reciprocal(jnp.sum(le, axis=1, keepdims=True), approx=True)
    local = jnp.sum(lp * refined.reshape(BN, T, D), axis=1)            # (BN, D)

    # global attentive pooling over sentences with aspect query
    gh = jnp.tanh(jnp.dot(local, pool_ref[1, 0:D, :],
                          preferred_element_type=jnp.float32) + pool_ref[1, D:D + 1, :])
    gsc = jnp.sum(gh.reshape(B, N, D) * asp_ref[...], axis=-1, keepdims=True)
    gsc = gsc + globb_ref[...]
    gm = jnp.max(gsc, axis=1, keepdims=True)
    ge = jnp.exp(gsc - gm)
    gp = ge * pl.reciprocal(jnp.sum(ge, axis=1, keepdims=True), approx=True)
    doc = jnp.sum(gp * local.reshape(B, N, D), axis=1)                 # (B, D)

    # ---- 4th: MLP head (dropout = identity at inference) ----
    ch = jnp.tanh(jnp.dot(doc, pool_ref[2, 0:D, :],
                          preferred_element_type=jnp.float32) + pool_ref[2, D:D + 1, :])
    out_ref[...] = jnp.dot(ch, cout_ref[0:D, :],
                           preferred_element_type=jnp.float32) + cout_ref[D:D + 1, :]


# ------------------------------ full forward --------------------------------
def dart_forward(packed, input_ids, attention_mask, token_type_ids,
                 sent_pos_ids, aspect_ids):
    bsz, num_sent, num_token = input_ids.shape
    bn = bsz * num_sent
    # cloned *before* the in-place edit of attention_mask (as in torch)
    sent_mask = attention_mask[:, :, 0].astype(jnp.float32)

    flat_ids = input_ids.reshape(bn, num_token)
    flat_att = attention_mask.reshape(bn, num_token).astype(jnp.float32)
    flat_att = flat_att.at[:, 0].set(1.0)   # torch edits the reshape-view in place
    flat_tt = token_type_ids.reshape(bn, num_token)

    # Embedding lookups (plain-JAX glue; gathers stay outside the kernel).
    tok = (packed['tok_emb'][flat_ids]
           + packed['type_emb'][flat_tt]
           + packed['tok_pos_emb'][None, :, :])                      # (BN, T, D)

    # Additive attention biases for the flattened (block-diagonal) attention.
    # Built here once per call (cheap elementwise, fused by XLA); avoids any
    # data-dependent index math inside the kernel.
    tok_group = jnp.repeat(jnp.arange(bn, dtype=jnp.int32), num_token)
    tok_valid = flat_att.reshape(-1) > 0
    tok_attn_bias = jnp.where(
        (tok_group[:, None] == tok_group[None, :]) & tok_valid[None, :],
        0.0, NEG_BIAS).astype(jnp.float32)                           # (BN*T, BN*T)

    sent_group = jnp.repeat(jnp.arange(bsz, dtype=jnp.int32), num_sent)
    sent_valid = sent_mask.reshape(-1) > 0
    sent_attn_bias = jnp.where(
        (sent_group[:, None] == sent_group[None, :]) & sent_valid[None, :],
        0.0, NEG_BIAS).astype(jnp.float32)                           # (B*N, B*N)

    loc_bias = jnp.where(flat_att > 0, 0.0, NEG_BIAS).reshape(bn, num_token, 1)
    glob_bias = jnp.where(sent_mask > 0, 0.0, NEG_BIAS).reshape(bsz, num_sent, 1)

    pos = packed['pos_emb'][sent_pos_ids]                            # (B, N, D)
    asp = packed['aspect_emb'][aspect_ids].reshape(bsz, 1, -1)       # (B, 1, D)

    kernel = functools.partial(dart_fused_kernel, num_heads=N_HEAD)
    logits_pad = pl.pallas_call(
        kernel,
        out_shape=jax.ShapeDtypeStruct((bsz, C_PAD), jnp.float32),
    )(tok, tok_attn_bias, sent_attn_bias, loc_bias, glob_bias, pos, asp,
      packed['wqkv'], packed['wo'], packed['w1'], packed['w2'],
      packed['lvec'], packed['pool'], packed['cout'])

    return {'logits': logits_pad[:, :NUM_CLASS]}


# --------------------------- one-time weight packing --------------------------
def pack_params(p):
    """Pre-pack weights into a few kernel-ready slabs (runs ONCE at init)."""
    dh = DH
    layers = [p['sent_layer'], p['interact_layer'], p['refine_layer']]

    # per-layer / per-(q,k,v) / per-head projection blocks, bias in row D
    qkv_blocks = []
    for l in layers:
        for wname, bname in (('wq', 'bq'), ('wk', 'bk'), ('wv', 'bv')):
            W, bvec = l[wname], l[bname]
            for h in range(N_HEAD):
                blk = jnp.zeros((D_MODEL + 8, dh), jnp.float32)
                blk = blk.at[:D_MODEL, :].set(W[:, h * dh:(h + 1) * dh])
                blk = blk.at[D_MODEL, :].set(bvec[0, h * dh:(h + 1) * dh])
                qkv_blocks.append(blk)
    wqkv = jnp.stack(qkv_blocks, axis=0)                              # (36, D+8, dh)

    wo = jnp.stack([l['wo'][h * dh:(h + 1) * dh, :]
                    for l in layers for h in range(N_HEAD)], axis=0)  # (12, dh, D)

    w1 = jnp.stack([jnp.concatenate(
        [l['w1'], l['b1'], jnp.zeros((7, FF_DIM), jnp.float32)], axis=0)
        for l in layers], axis=0)                                     # (3, D+8, FF)

    w2 = jnp.stack([l['w2'] for l in layers], axis=0)                 # (3, FF, D)

    lvec = jnp.stack([jnp.concatenate(
        [l['bo'], l['b2'], l['ln1_g'], l['ln1_b'], l['ln2_g'], l['ln2_b'],
         jnp.zeros((2, D_MODEL), jnp.float32)], axis=0)
        for l in layers], axis=0)                                     # (3, 8, D)

    def pool_block(W, b, u=None):
        blk = jnp.zeros((D_MODEL + 16, D_MODEL), jnp.float32)
        blk = blk.at[:D_MODEL, :].set(W).at[D_MODEL, :].set(b[0])
        if u is not None:
            blk = blk.at[D_MODEL + 8, :].set(u[0])
        return blk

    pool = jnp.stack([
        pool_block(p['local_pool']['w'], p['local_pool']['b'], p['local_pool']['u']),
        pool_block(p['global_pool']['w'], p['global_pool']['b']),
        pool_block(p['clf']['w1'], p['clf']['b1']),
    ], axis=0)                                                        # (3, D+16, D)

    # classifier output padded to 128 lanes for an unmasked lane-dense store
    cout = jnp.zeros((D_MODEL + 8, C_PAD), jnp.float32)
    cout = cout.at[:D_MODEL, :NUM_CLASS].set(p['clf']['w2'])
    cout = cout.at[D_MODEL, :NUM_CLASS].set(p['clf']['b2'][0])

    return {
        'tok_emb': p['tok_emb'], 'type_emb': p['type_emb'],
        'tok_pos_emb': p['tok_pos_emb'], 'pos_emb': p['pos_emb'],
        'aspect_emb': p['aspect_emb'],
        'wqkv': wqkv, 'wo': wo, 'w1': w1, 'w2': w2,
        'lvec': lvec, 'pool': pool, 'cout': cout,
    }


# ------------------------------ initialization -------------------------------
def _lin(key, din, dout):
    w = (0.02 * jax.random.normal(key, (din, dout))).astype(jnp.float32)
    b = jnp.zeros((1, dout), jnp.float32)
    return w, b


def _layer_params(key):
    ks = jax.random.split(key, 6)
    wq, bq = _lin(ks[0], D_MODEL, D_MODEL)
    wk, bk = _lin(ks[1], D_MODEL, D_MODEL)
    wv, bv = _lin(ks[2], D_MODEL, D_MODEL)
    wo, bo = _lin(ks[3], D_MODEL, D_MODEL)
    w1, b1 = _lin(ks[4], D_MODEL, FF_DIM)
    w2, b2 = _lin(ks[5], FF_DIM, D_MODEL)
    ones = jnp.ones((1, D_MODEL), jnp.float32)
    zeros = jnp.zeros((1, D_MODEL), jnp.float32)
    return dict(wq=wq, bq=bq, wk=wk, bk=bk, wv=wv, bv=bv, wo=wo, bo=bo,
                ln1_g=ones, ln1_b=zeros, w1=w1, b1=b1, w2=w2, b2=b2,
                ln2_g=ones, ln2_b=zeros)


def init_params(key):
    ks = jax.random.split(key, 12)
    lw, lb = _lin(ks[8], D_MODEL, D_MODEL)
    lu = (0.02 * jax.random.normal(ks[9], (1, D_MODEL))).astype(jnp.float32)
    gw, gb = _lin(ks[10], D_MODEL, D_MODEL)
    cw1, cb1 = _lin(ks[11], D_MODEL, D_MODEL)
    cw2, cb2 = _lin(ks[7], D_MODEL, NUM_CLASS)
    return {
        'tok_emb': (0.02 * jax.random.normal(ks[0], (VOCAB, D_MODEL))).astype(jnp.float32),
        'type_emb': (0.02 * jax.random.normal(ks[1], (2, D_MODEL))).astype(jnp.float32),
        'tok_pos_emb': (0.02 * jax.random.normal(ks[2], (NUM_TOKEN, D_MODEL))).astype(jnp.float32),
        # nn.Embedding(padding_idx=0): row 0 is zeros
        'pos_emb': (0.02 * jax.random.normal(ks[3], (MAX_NUM_SENT + 1, D_MODEL))
                    ).astype(jnp.float32).at[0].set(0.0),
        'aspect_emb': (0.02 * jax.random.normal(ks[4], (NUM_ASPECT, D_MODEL))).astype(jnp.float32),
        'sent_layer': _layer_params(ks[5]),
        'interact_layer': _layer_params(ks[6]),
        'refine_layer': _layer_params(jax.random.fold_in(key, 99)),
        # TODO(synk): Local/AttentiveAggregation source not given; standard
        # tanh(Wx+b)·query masked-softmax pooling is used.
        'local_pool': dict(w=lw, b=lb, u=lu),
        'global_pool': dict(w=gw, b=gb),
        'clf': dict(w1=cw1, b1=cb1, w2=cw2, b2=cb2),
    }


# ----------------------------------- main ------------------------------------
if __name__ == "__main__":
    key = jax.random.PRNGKey(0)
    k_param, k_ids = jax.random.split(key)

    bsz, num_sent, num_token = 2, MAX_NUM_SENT, NUM_TOKEN
    input_ids = jax.random.randint(k_ids, (bsz, num_sent, num_token), 0, VOCAB)
    # per-sentence valid lengths (doc 0 has a fully padded 4th sentence)
    lengths = jnp.array([[8, 6, 4, 0],
                         [8, 8, 5, 3]], jnp.int32)
    tok_idx = jnp.arange(num_token)
    attention_mask = (tok_idx[None, None, :] < lengths[:, :, None]).astype(jnp.int32)
    token_type_ids = ((tok_idx[None, None, :] >= 2).astype(jnp.int32) * attention_mask)
    sent_pos_ids = jnp.where(lengths > 0,
                             jnp.arange(1, num_sent + 1, dtype=jnp.int32)[None, :], 0)
    aspect_ids = jnp.array([1, 3], jnp.int32)

    params = init_params(k_param)
    packed = jax.tree.map(jax.block_until_ready, pack_params(params))  # one-time pre-pack

    fwd = jax.jit(dart_forward)
    out = fwd(packed, input_ids, attention_mask, token_type_ids,
              sent_pos_ids, aspect_ids)
    logits = jax.block_until_ready(out['logits'])
    assert logits.shape == (bsz, NUM_CLASS)
    assert bool(jnp.all(jnp.isfinite(logits)))
    print("KERNEL_OK")
</pallas_src>

<mosaic_0001>
module attributes {stable_mosaic.version = 11 : i64} {
  func.func @dart_fused_kernel(%arg0: memref<8x8x32xf32, #tpu.memory_space<vmem>>, %arg1: memref<64x64xf32, #tpu.memory_space<vmem>>, %arg2: memref<8x8xf32, #tpu.memory_space<vmem>>, %arg3: memref<8x8x1xf32, #tpu.memory_space<vmem>>, %arg4: memref<2x4x1xf32, #tpu.memory_space<vmem>>, %arg5: memref<2x4x32xf32, #tpu.memory_space<vmem>>, %arg6: memref<2x1x32xf32, #tpu.memory_space<vmem>>, %arg7: memref<36x40x8xf32, #tpu.memory_space<vmem>>, %arg8: memref<12x8x32xf32, #tpu.memory_space<vmem>>, %arg9: memref<3x40x64xf32, #tpu.memory_space<vmem>>, %arg10: memref<3x64x32xf32, #tpu.memory_space<vmem>>, %arg11: memref<3x8x32xf32, #tpu.memory_space<vmem>>, %arg12: memref<3x48x32xf32, #tpu.memory_space<vmem>>, %arg13: memref<40x128xf32, #tpu.memory_space<vmem>>, %arg14: memref<2x128xf32, #tpu.memory_space<vmem>>) attributes {dimension_semantics = [], scalar_prefetch = 0 : i64, scratch_operands = 0 : i64, tpu.core_type = #tpu.core_type<tc>} {
    %c0 = arith.constant 0 : index
    %c0_0 = arith.constant 0 : index
    %0 = vector.load %arg1[%c0, %c0_0] : memref<64x64xf32, #tpu.memory_space<vmem>>, vector<64x64xf32>
    %c0_1 = arith.constant 0 : index
    %c0_2 = arith.constant 0 : index
    %1 = vector.load %arg2[%c0_1, %c0_2] : memref<8x8xf32, #tpu.memory_space<vmem>>, vector<8x8xf32>
    %c0_3 = arith.constant 0 : index
    %c0_4 = arith.constant 0 : index
    %c0_5 = arith.constant 0 : index
    %2 = vector.load %arg0[%c0_3, %c0_4, %c0_5] : memref<8x8x32xf32, #tpu.memory_space<vmem>>, vector<8x8x32xf32>
    %3 = vector.shape_cast %2 : vector<8x8x32xf32> to vector<64x32xf32>
    %c0_6 = arith.constant 0 : index
    %c0_7 = arith.constant 0 : index
    %c0_8 = arith.constant 0 : index
    %4 = vector.load %arg7[%c0_6, %c0_7, %c0_8] : memref<36x40x8xf32, #tpu.memory_space<vmem>>, vector<1x32x8xf32>
    %5 = vector.shape_cast %4 : vector<1x32x8xf32> to vector<32x8xf32>
    %cst = arith.constant dense<0.000000e+00> : vector<64x8xf32>
    %6 = tpu.matmul %3, %5, %cst {dimension_numbers = #tpu.dot_dimension_numbers<[1], [0], [0], [1], [0, 0, 1, 1], [], []>} : vector<64x32xf32>, vector<32x8xf32>, vector<64x8xf32> -> vector<64x8xf32>
    %c0_9 = arith.constant 0 : index
    %c32 = arith.constant 32 : index
    %c0_10 = arith.constant 0 : index
    %7 = vector.load %arg7[%c0_9, %c32, %c0_10] : memref<36x40x8xf32, #tpu.memory_space<vmem>>, vector<1x1x8xf32>
    %8 = vector.shape_cast %7 : vector<1x1x8xf32> to vector<1x8xf32>
    %9 = vector.broadcast %8 : vector<1x8xf32> to vector<64x8xf32>
    %10 = arith.addf %6, %9 : vector<64x8xf32>
    %c4 = arith.constant 4 : index
    %c0_11 = arith.constant 0 : index
    %c0_12 = arith.constant 0 : index
    %11 = vector.load %arg7[%c4, %c0_11, %c0_12] : memref<36x40x8xf32, #tpu.memory_space<vmem>>, vector<1x32x8xf32>
    %12 = vector.shape_cast %11 : vector<1x32x8xf32> to vector<32x8xf32>
    %cst_13 = arith.constant dense<0.000000e+00> : vector<64x8xf32>
    %13 = tpu.matmul %3, %12, %cst_13 {dimension_numbers = #tpu.dot_dimension_numbers<[1], [0], [0], [1], [0, 0, 1, 1], [], []>} : vector<64x32xf32>, vector<32x8xf32>, vector<64x8xf32> -> vector<64x8xf32>
    %c4_14 = arith.constant 4 : index
    %c32_15 = arith.constant 32 : index
    %c0_16 = arith.constant 0 : index
    %14 = vector.load %arg7[%c4_14, %c32_15, %c0_16] : memref<36x40x8xf32, #tpu.memory_space<vmem>>, vector<1x1x8xf32>
    %15 = vector.shape_cast %14 : vector<1x1x8xf32> to vector<1x8xf32>
    %16 = vector.broadcast %15 : vector<1x8xf32> to vector<64x8xf32>
    %17 = arith.addf %13, %16 : vector<64x8xf32>
    %c8 = arith.constant 8 : index
    %c0_17 = arith.constant 0 : index
    %c0_18 = arith.constant 0 : index
    %18 = vector.load %arg7[%c8, %c0_17, %c0_18] : memref<36x40x8xf32, #tpu.memory_space<vmem>>, vector<1x32x8xf32>
    %19 = vector.shape_cast %18 : vector<1x32x8xf32> to vector<32x8xf32>
    %cst_19 = arith.constant dense<0.000000e+00> : vector<64x8xf32>
    %20 = tpu.matmul %3, %19, %cst_19 {dimension_numbers = #tpu.dot_dimension_numbers<[1], [0], [0], [1], [0, 0, 1, 1], [], []>} : vector<64x32xf32>, vector<32x8xf32>, vector<64x8xf32> -> vector<64x8xf32>
    %c8_20 = arith.constant 8 : index
    %c32_21 = arith.constant 32 : index
    %c0_22 = arith.constant 0 : index
    %21 = vector.load %arg7[%c8_20, %c32_21, %c0_22] : memref<36x40x8xf32, #tpu.memory_space<vmem>>, vector<1x1x8xf32>
    %22 = vector.shape_cast %21 : vector<1x1x8xf32> to vector<1x8xf32>
    %23 = vector.broadcast %22 : vector<1x8xf32> to vector<64x8xf32>
    %24 = arith.addf %20, %23 : vector<64x8xf32>
    "tpu.trace_start"() <{level = 10 : i32, message = "qd,kd->qk"}> : () -> ()
    %cst_23 = arith.constant dense<0.000000e+00> : vector<64x64xf32>
    %25 = tpu.matmul %10, %17, %cst_23 {dimension_numbers = #tpu.dot_dimension_numbers<[1], [1], [0], [0], [0, 0, 1, 0], [], []>} : vector<64x8xf32>, vector<64x8xf32>, vector<64x64xf32> -> vector<64x64xf32>
    "tpu.trace_stop"() : () -> ()
    %cst_24 = arith.constant 0.353553385 : f32
    %26 = vector.broadcast %cst_24 : f32 to vector<64x64xf32>
    %27 = arith.mulf %25, %26 : vector<64x64xf32>
    %28 = arith.addf %27, %0 : vector<64x64xf32>
    %cst_25 = arith.constant dense<0xFF800000> : vector<64xf32>
    %29 = vector.multi_reduction <maximumf>, %28, %cst_25 [1] : vector<64x64xf32> to vector<64xf32>
    %30 = vector.shape_cast %29 : vector<64xf32> to vector<64x1xf32>
    %31 = vector.broadcast %30 : vector<64x1xf32> to vector<64x64xf32>
    %32 = arith.subf %28, %31 : vector<64x64xf32>
    %33 = math.exp %32 : vector<64x64xf32>
    %cst_26 = arith.constant dense<0.000000e+00> : vector<64xf32>
    %34 = vector.multi_reduction <add>, %33, %cst_26 [1] : vector<64x64xf32> to vector<64xf32>
    %35 = vector.shape_cast %34 : vector<64xf32> to vector<64x1xf32>
    %36 = tpu.reciprocal %35 {approx = true} : vector<64x1xf32> -> vector<64x1xf32>
    %37 = vector.broadcast %36 : vector<64x1xf32> to vector<64x64xf32>
    %38 = arith.mulf %33, %37 : vector<64x64xf32>
    %cst_27 = arith.constant dense<0.000000e+00> : vector<64x8xf32>
    %39 = tpu.matmul %38, %24, %cst_27 {dimension_numbers = #tpu.dot_dimension_numbers<[1], [0], [0], [1], [0, 0, 1, 1], [], []>} : vector<64x64xf32>, vector<64x8xf32>, vector<64x8xf32> -> vector<64x8xf32>
    %c0_28 = arith.constant 0 : index
    %c0_29 = arith.constant 0 : index
    %c0_30 = arith.constant 0 : index
    %40 = vector.load %arg8[%c0_28, %c0_29, %c0_30] : memref<12x8x32xf32, #tpu.memory_space<vmem>>, vector<1x8x32xf32>
    %41 = vector.shape_cast %40 : vector<1x8x32xf32> to vector<8x32xf32>
    %cst_31 = arith.constant dense<0.000000e+00> : vector<64x32xf32>
    %42 = tpu.matmul %39, %41, %cst_31 {dimension_numbers = #tpu.dot_dimension_numbers<[1], [0], [0], [1], [0, 0, 1, 1], [], []>} : vector<64x8xf32>, vector<8x32xf32>, vector<64x32xf32> -> vector<64x32xf32>
    %c1 = arith.constant 1 : index
    %c0_32 = arith.constant 0 : index
    %c0_33 = arith.constant 0 : index
    %43 = vector.load %arg7[%c1, %c0_32, %c0_33] : memref<36x40x8xf32, #tpu.memory_space<vmem>>, vector<1x32x8xf32>
    %44 = vector.shape_cast %43 : vector<1x32x8xf32> to vector<32x8xf32>
    %cst_34 = arith.constant dense<0.000000e+00> : vector<64x8xf32>
    %45 = tpu.matmul %3, %44, %cst_34 {dimension_numbers = #tpu.dot_dimension_numbers<[1], [0], [0], [1], [0, 0, 1, 1], [], []>} : vector<64x32xf32>, vector<32x8xf32>, vector<64x8xf32> -> vector<64x8xf32>
    %c1_35 = arith.constant 1 : index
    %c32_36 = arith.constant 32 : index
    %c0_37 = arith.constant 0 : index
    %46 = vector.load %arg7[%c1_35, %c32_36, %c0_37] : memref<36x40x8xf32, #tpu.memory_space<vmem>>, vector<1x1x8xf32>
    %47 = vector.shape_cast %46 : vector<1x1x8xf32> to vector<1x8xf32>
    %48 = vector.broadcast %47 : vector<1x8xf32> to vector<64x8xf32>
    %49 = arith.addf %45, %48 : vector<64x8xf32>
    %c5 = arith.constant 5 : index
    %c0_38 = arith.constant 0 : index
    %c0_39 = arith.constant 0 : index
    %50 = vector.load %arg7[%c5, %c0_38, %c0_39] : memref<36x40x8xf32, #tpu.memory_space<vmem>>, vector<1x32x8xf32>
    %51 = vector.shape_cast %50 : vector<1x32x8xf32> to vector<32x8xf32>
    %cst_40 = arith.constant dense<0.000000e+00> : vector<64x8xf32>
    %52 = tpu.matmul %3, %51, %cst_40 {dimension_numbers = #tpu.dot_dimension_numbers<[1], [0], [0], [1], [0, 0, 1, 1], [], []>} : vector<64x32xf32>, vector<32x8xf32>, vector<64x8xf32> -> vector<64x8xf32>
    %c5_41 = arith.constant 5 : index
    %c32_42 = arith.constant 32 : index
    %c0_43 = arith.constant 0 : index
    %53 = vector.load %arg7[%c5_41, %c32_42, %c0_43] : memref<36x40x8xf32, #tpu.memory_space<vmem>>, vector<1x1x8xf32>
    %54 = vector.shape_cast %53 : vector<1x1x8xf32> to vector<1x8xf32>
    %55 = vector.broadcast %54 : vector<1x8xf32> to vector<64x8xf32>
    %56 = arith.addf %52, %55 : vector<64x8xf32>
    %c9 = arith.constant 9 : index
    %c0_44 = arith.constant 0 : index
    %c0_45 = arith.constant 0 : index
    %57 = vector.load %arg7[%c9, %c0_44, %c0_45] : memref<36x40x8xf32, #tpu.memory_space<vmem>>, vector<1x32x8xf32>
    %58 = vector.shape_cast %57 : vector<1x32x8xf32> to vector<32x8xf32>
    %cst_46 = arith.constant dense<0.000000e+00> : vector<64x8xf32>
    %59 = tpu.matmul %3, %58, %cst_46 {dimension_numbers = #tpu.dot_dimension_numbers<[1], [0], [0], [1], [0, 0, 1, 1], [], []>} : vector<64x32xf32>, vector<32x8xf32>, vector<64x8xf32> -> vector<64x8xf32>
    %c9_47 = arith.constant 9 : index
    %c32_48 = arith.constant 32 : index
    %c0_49 = arith.constant 0 : index
    %60 = vector.load %arg7[%c9_47, %c32_48, %c0_49] : memref<36x40x8xf32, #tpu.memory_space<vmem>>, vector<1x1x8xf32>
    %61 = vector.shape_cast %60 : vector<1x1x8xf32> to vector<1x8xf32>
    %62 = vector.broadcast %61 : vector<1x8xf32> to vector<64x8xf32>
    %63 = arith.addf %59, %62 : vector<64x8xf32>
    "tpu.trace_start"() <{level = 10 : i32, message = "qd,kd->qk"}> : () -> ()
    %cst_50 = arith.constant dense<0.000000e+00> : vector<64x64xf32>
    %64 = tpu.matmul %49, %56, %cst_50 {dimension_numbers = #tpu.dot_dimension_numbers<[1], [1], [0], [0], [0, 0, 1, 0], [], []>} : vector<64x8xf32>, vector<64x8xf32>, vector<64x64xf32> -> vector<64x64xf32>
    "tpu.trace_stop"() : () -> ()
    %cst_51 = arith.constant 0.353553385 : f32
    %65 = vector.broadcast %cst_51 : f32 to vector<64x64xf32>
    %66 = arith.mulf %64, %65 : vector<64x64xf32>
    %67 = arith.addf %66, %0 : vector<64x64xf32>
    %cst_52 = arith.constant dense<0xFF800000> : vector<64xf32>
    %68 = vector.multi_reduction <maximumf>, %67, %cst_52 [1] : vector<64x64xf32> to vector<64xf32>
    %69 = vector.shape_cast %68 : vector<64xf32> to vector<64x1xf32>
    %70 = vector.broadcast %69 : vector<64x1xf32> to vector<64x64xf32>
    %71 = arith.subf %67, %70 : vector<64x64xf32>
    %72 = math.exp %71 : vector<64x64xf32>
    %cst_53 = arith.constant dense<0.000000e+00> : vector<64xf32>
    %73 = vector.multi_reduction <add>, %72, %cst_53 [1] : vector<64x64xf32> to vector<64xf32>
    %74 = vector.shape_cast %73 : vector<64xf32> to vector<64x1xf32>
    %75 = tpu.reciprocal %74 {approx = true} : vector<64x1xf32> -> vector<64x1xf32>
    %76 = vector.broadcast %75 : vector<64x1xf32> to vector<64x64xf32>
    %77 = arith.mulf %72, %76 : vector<64x64xf32>
    %cst_54 = arith.constant dense<0.000000e+00> : vector<64x8xf32>
    %78 = tpu.matmul %77, %63, %cst_54 {dimension_numbers = #tpu.dot_dimension_numbers<[1], [0], [0], [1], [0, 0, 1, 1], [], []>} : vector<64x64xf32>, vector<64x8xf32>, vector<64x8xf32> -> vector<64x8xf32>
    %c1_55 = arith.constant 1 : index
    %c0_56 = arith.constant 0 : index
    %c0_57 = arith.constant 0 : index
    %79 = vector.load %arg8[%c1_55, %c0_56, %c0_57] : memref<12x8x32xf32, #tpu.memory_space<vmem>>, vector<1x8x32xf32>
    %80 = vector.shape_cast %79 : vector<1x8x32xf32> to vector<8x32xf32>
    %cst_58 = arith.constant dense<0.000000e+00> : vector<64x32xf32>
    %81 = tpu.matmul %78, %80, %cst_58 {dimension_numbers = #tpu.dot_dimension_numbers<[1], [0], [0], [1], [0, 0, 1, 1], [], []>} : vector<64x8xf32>, vector<8x32xf32>, vector<64x32xf32> -> vector<64x32xf32>
    %82 = arith.addf %42, %81 : vector<64x32xf32>
    %c2 = arith.constant 2 : index
    %c0_59 = arith.constant 0 : index
    %c0_60 = arith.constant 0 : index
    %83 = vector.load %arg7[%c2, %c0_59, %c0_60] : memref<36x40x8xf32, #tpu.memory_space<vmem>>, vector<1x32x8xf32>
    %84 = vector.shape_cast %83 : vector<1x32x8xf32> to vector<32x8xf32>
    %cst_61 = arith.constant dense<0.000000e+00> : vector<64x8xf32>
    %85 = tpu.matmul %3, %84, %cst_61 {dimension_numbers = #tpu.dot_dimension_numbers<[1], [0], [0], [1], [0, 0, 1, 1], [], []>} : vector<64x32xf32>, vector<32x8xf32>, vector<64x8xf32> -> vector<64x8xf32>
    %c2_62 = arith.constant 2 : index
    %c32_63 = arith.constant 32 : index
    %c0_64 = arith.constant 0 : index
    %86 = vector.load %arg7[%c2_62, %c32_63, %c0_64] : memref<36x40x8xf32, #tpu.memory_space<vmem>>, vector<1x1x8xf32>
    %87 = vector.shape_cast %86 : vector<1x1x8xf32> to vector<1x8xf32>
    %88 = vector.broadcast %87 : vector<1x8xf32> to vector<64x8xf32>
    %89 = arith.addf %85, %88 : vector<64x8xf32>
    %c6 = arith.constant 6 : index
    %c0_65 = arith.constant 0 : index
    %c0_66 = arith.constant 0 : index
    %90 = vector.load %arg7[%c6, %c0_65, %c0_66] : memref<36x40x8xf32, #tpu.memory_space<vmem>>, vector<1x32x8xf32>
    %91 = vector.shape_cast %90 : vector<1x32x8xf32> to vector<32x8xf32>
    %cst_67 = arith.constant dense<0.000000e+00> : vector<64x8xf32>
    %92 = tpu.matmul %3, %91, %cst_67 {dimension_numbers = #tpu.dot_dimension_numbers<[1], [0], [0], [1], [0, 0, 1, 1], [], []>} : vector<64x32xf32>, vector<32x8xf32>, vector<64x8xf32> -> vector<64x8xf32>
    %c6_68 = arith.constant 6 : index
    %c32_69 = arith.constant 32 : index
    %c0_70 = arith.constant 0 : index
    %93 = vector.load %arg7[%c6_68, %c32_69, %c0_70] : memref<36x40x8xf32, #tpu.memory_space<vmem>>, vector<1x1x8xf32>
    %94 = vector.shape_cast %93 : vector<1x1x8xf32> to vector<1x8xf32>
    %95 = vector.broadcast %94 : vector<1x8xf32> to vector<64x8xf32>
    %96 = arith.addf %92, %95 : vector<64x8xf32>
    %c10 = arith.constant 10 : index
    %c0_71 = arith.constant 0 : index
    %c0_72 = arith.constant 0 : index
    %97 = vector.load %arg7[%c10, %c0_71, %c0_72] : memref<36x40x8xf32, #tpu.memory_space<vmem>>, vector<1x32x8xf32>
    %98 = vector.shape_cast %97 : vector<1x32x8xf32> to vector<32x8xf32>
    %cst_73 = arith.constant dense<0.000000e+00> : vector<64x8xf32>
    %99 = tpu.matmul %3, %98, %cst_73 {dimension_numbers = #tpu.dot_dimension_numbers<[1], [0], [0], [1], [0, 0, 1, 1], [], []>} : vector<64x32xf32>, vector<32x8xf32>, vector<64x8xf32> -> vector<64x8xf32>
    %c10_74 = arith.constant 10 : index
    %c32_75 = arith.constant 32 : index
    %c0_76 = arith.constant 0 : index
    %100 = vector.load %arg7[%c10_74, %c32_75, %c0_76] : memref<36x40x8xf32, #tpu.memory_space<vmem>>, vector<1x1x8xf32>
    %101 = vector.shape_cast %100 : vector<1x1x8xf32> to vector<1x8xf32>
    %102 = vector.broadcast %101 : vector<1x8xf32> to vector<64x8xf32>
    %103 = arith.addf %99, %102 : vector<64x8xf32>
    "tpu.trace_start"() <{level = 10 : i32, message = "qd,kd->qk"}> : () -> ()
    %cst_77 = arith.constant dense<0.000000e+00> : vector<64x64xf32>
    %104 = tpu.matmul %89, %96, %cst_77 {dimension_numbers = #tpu.dot_dimension_numbers<[1], [1], [0], [0], [0, 0, 1, 0], [], []>} : vector<64x8xf32>, vector<64x8xf32>, vector<64x64xf32> -> vector<64x64xf32>
    "tpu.trace_stop"() : () -> ()
    %cst_78 = arith.constant 0.353553385 : f32
    %105 = vector.broadcast %cst_78 : f32 to vector<64x64xf32>
    %106 = arith.mulf %104, %105 : vector<64x64xf32>
    %107 = arith.addf %106, %0 : vector<64x64xf32>
    %cst_79 = arith.constant dense<0xFF800000> : vector<64xf32>
    %108 = vector.multi_reduction <maximumf>, %107, %cst_79 [1] : vector<64x64xf32> to vector<64xf32>
    %109 = vector.shape_cast %108 : vector<64xf32> to vector<64x1xf32>
    %110 = vector.broadcast %109 : vector<64x1xf32> to vector<64x64xf32>
    %111 = arith.subf %107, %110 : vector<64x64xf32>
    %112 = math.exp %111 : vector<64x64xf32>
    %cst_80 = arith.constant dense<0.000000e+00> : vector<64xf32>
    %113 = vector.multi_reduction <add>, %112, %cst_80 [1] : vector<64x64xf32> to vector<64xf32>
    %114 = vector.shape_cast %113 : vector<64xf32> to vector<64x1xf32>
    %115 = tpu.reciprocal %114 {approx = true} : vector<64x1xf32> -> vector<64x1xf32>
    %116 = vector.broadcast %115 : vector<64x1xf32> to vector<64x64xf32>
    %117 = arith.mulf %112, %116 : vector<64x64xf32>
    %cst_81 = arith.constant dense<0.000000e+00> : vector<64x8xf32>
    %118 = tpu.matmul %117, %103, %cst_81 {dimension_numbers = #tpu.dot_dimension_numbers<[1], [0], [0], [1], [0, 0, 1, 1], [], []>} : vector<64x64xf32>, vector<64x8xf32>, vector<64x8xf32> -> vector<64x8xf32>
    %c2_82 = arith.constant 2 : index
    %c0_83 = arith.constant 0 : index
    %c0_84 = arith.constant 0 : index
    %119 = vector.load %arg8[%c2_82, %c0_83, %c0_84] : memref<12x8x32xf32, #tpu.memory_space<vmem>>, vector<1x8x32xf32>
    %120 = vector.shape_cast %119 : vector<1x8x32xf32> to vector<8x32xf32>
    %cst_85 = arith.constant dense<0.000000e+00> : vector<64x32xf32>
    %121 = tpu.matmul %118, %120, %cst_85 {dimension_numbers = #tpu.dot_dimension_numbers<[1], [0], [0], [1], [0, 0, 1, 1], [], []>} : vector<64x8xf32>, vector<8x32xf32>, vector<64x32xf32> -> vector<64x32xf32>
    %122 = arith.addf %82, %121 : vector<64x32xf32>
    %c3 = arith.constant 3 : index
    %c0_86 = arith.constant 0 : index
    %c0_87 = arith.constant 0 : index
    %123 = vector.load %arg7[%c3, %c0_86, %c0_87] : memref<36x40x8xf32, #tpu.memory_space<vmem>>, vector<1x32x8xf32>
    %124 = vector.shape_cast %123 : vector<1x32x8xf32> to vector<32x8xf32>
    %cst_88 = arith.constant dense<0.000000e+00> : vector<64x8xf32>
    %125 = tpu.matmul %3, %124, %cst_88 {dimension_numbers = #tpu.dot_dimension_numbers<[1], [0], [0], [1], [0, 0, 1, 1], [], []>} : vector<64x32xf32>, vector<32x8xf32>, vector<64x8xf32> -> vector<64x8xf32>
    %c3_89 = arith.constant 3 : index
    %c32_90 = arith.constant 32 : index
    %c0_91 = arith.constant 0 : index
    %126 = vector.load %arg7[%c3_89, %c32_90, %c0_91] : memref<36x40x8xf32, #tpu.memory_space<vmem>>, vector<1x1x8xf32>
    %127 = vector.shape_cast %126 : vector<1x1x8xf32> to vector<1x8xf32>
    %128 = vector.broadcast %127 : vector<1x8xf32> to vector<64x8xf32>
    %129 = arith.addf %125, %128 : vector<64x8xf32>
    %c7 = arith.constant 7 : index
    %c0_92 = arith.constant 0 : index
    %c0_93 = arith.constant 0 : index
    %130 = vector.load %arg7[%c7, %c0_92, %c0_93] : memref<36x40x8xf32, #tpu.memory_space<vmem>>, vector<1x32x8xf32>
    %131 = vector.shape_cast %130 : vector<1x32x8xf32> to vector<32x8xf32>
    %cst_94 = arith.constant dense<0.000000e+00> : vector<64x8xf32>
    %132 = tpu.matmul %3, %131, %cst_94 {dimension_numbers = #tpu.dot_dimension_numbers<[1], [0], [0], [1], [0, 0, 1, 1], [], []>} : vector<64x32xf32>, vector<32x8xf32>, vector<64x8xf32> -> vector<64x8xf32>
    %c7_95 = arith.constant 7 : index
    %c32_96 = arith.constant 32 : index
    %c0_97 = arith.constant 0 : index
    %133 = vector.load %arg7[%c7_95, %c32_96, %c0_97] : memref<36x40x8xf32, #tpu.memory_space<vmem>>, vector<1x1x8xf32>
    %134 = vector.shape_cast %133 : vector<1x1x8xf32> to vector<1x8xf32>
    %135 = vector.broadcast %134 : vector<1x8xf32> to vector<64x8xf32>
    %136 = arith.addf %132, %135 : vector<64x8xf32>
    %c11 = arith.constant 11 : index
    %c0_98 = arith.constant 0 : index
    %c0_99 = arith.constant 0 : index
    %137 = vector.load %arg7[%c11, %c0_98, %c0_99] : memref<36x40x8xf32, #tpu.memory_space<vmem>>, vector<1x32x8xf32>
    %138 = vector.shape_cast %137 : vector<1x32x8xf32> to vector<32x8xf32>
    %cst_100 = arith.constant dense<0.000000e+00> : vector<64x8xf32>
    %139 = tpu.matmul %3, %138, %cst_100 {dimension_numbers = #tpu.dot_dimension_numbers<[1], [0], [0], [1], [0, 0, 1, 1], [], []>} : vector<64x32xf32>, vector<32x8xf32>, vector<64x8xf32> -> vector<64x8xf32>
    %c11_101 = arith.constant 11 : index
    %c32_102 = arith.constant 32 : index
    %c0_103 = arith.constant 0 : index
    %140 = vector.load %arg7[%c11_101, %c32_102, %c0_103] : memref<36x40x8xf32, #tpu.memory_space<vmem>>, vector<1x1x8xf32>
    %141 = vector.shape_cast %140 : vector<1x1x8xf32> to vector<1x8xf32>
    %142 = vector.broadcast %141 : vector<1x8xf32> to vector<64x8xf32>
    %143 = arith.addf %139, %142 : vector<64x8xf32>
    "tpu.trace_start"() <{level = 10 : i32, message = "qd,kd->qk"}> : () -> ()
    %cst_104 = arith.constant dense<0.000000e+00> : vector<64x64xf32>
    %144 = tpu.matmul %129, %136, %cst_104 {dimension_numbers = #tpu.dot_dimension_numbers<[1], [1], [0], [0], [0, 0, 1, 0], [], []>} : vector<64x8xf32>, vector<64x8xf32>, vector<64x64xf32> -> vector<64x64xf32>
    "tpu.trace_stop"() : () -> ()
    %cst_105 = arith.constant 0.353553385 : f32
    %145 = vector.broadcast %cst_105 : f32 to vector<64x64xf32>
    %146 = arith.mulf %144, %145 : vector<64x64xf32>
    %147 = arith.addf %146, %0 : vector<64x64xf32>
    %cst_106 = arith.constant dense<0xFF800000> : vector<64xf32>
    %148 = vector.multi_reduction <maximumf>, %147, %cst_106 [1] : vector<64x64xf32> to vector<64xf32>
    %149 = vector.shape_cast %148 : vector<64xf32> to vector<64x1xf32>
    %150 = vector.broadcast %149 : vector<64x1xf32> to vector<64x64xf32>
    %151 = arith.subf %147, %150 : vector<64x64xf32>
    %152 = math.exp %151 : vector<64x64xf32>
    %cst_107 = arith.constant dense<0.000000e+00> : vector<64xf32>
    %153 = vector.multi_reduction <add>, %152, %cst_107 [1] : vector<64x64xf32> to vector<64xf32>
    %154 = vector.shape_cast %153 : vector<64xf32> to vector<64x1xf32>
    %155 = tpu.reciprocal %154 {approx = true} : vector<64x1xf32> -> vector<64x1xf32>
    %156 = vector.broadcast %155 : vector<64x1xf32> to vector<64x64xf32>
    %157 = arith.mulf %152, %156 : vector<64x64xf32>
    %cst_108 = arith.constant dense<0.000000e+00> : vector<64x8xf32>
    %158 = tpu.matmul %157, %143, %cst_108 {dimension_numbers = #tpu.dot_dimension_numbers<[1], [0], [0], [1], [0, 0, 1, 1], [], []>} : vector<64x64xf32>, vector<64x8xf32>, vector<64x8xf32> -> vector<64x8xf32>
    %c3_109 = arith.constant 3 : index
    %c0_110 = arith.constant 0 : index
    %c0_111 = arith.constant 0 : index
    %159 = vector.load %arg8[%c3_109, %c0_110, %c0_111] : memref<12x8x32xf32, #tpu.memory_space<vmem>>, vector<1x8x32xf32>
    %160 = vector.shape_cast %159 : vector<1x8x32xf32> to vector<8x32xf32>
    %cst_112 = arith.constant dense<0.000000e+00> : vector<64x32xf32>
    %161 = tpu.matmul %158, %160, %cst_112 {dimension_numbers = #tpu.dot_dimension_numbers<[1], [0], [0], [1], [0, 0, 1, 1], [], []>} : vector<64x8xf32>, vector<8x32xf32>, vector<64x32xf32> -> vector<64x32xf32>
    %162 = arith.addf %122, %161 : vector<64x32xf32>
    %c0_113 = arith.constant 0 : index
    %c0_114 = arith.constant 0 : index
    %c0_115 = arith.constant 0 : index
    %163 = vector.load %arg11[%c0_113, %c0_114, %c0_115] : memref<3x8x32xf32, #tpu.memory_space<vmem>>, vector<1x1x32xf32>
    %164 = vector.shape_cast %163 : vector<1x1x32xf32> to vector<1x32xf32>
    %165 = vector.broadcast %164 : vector<1x32xf32> to vector<64x32xf32>
    %166 = arith.addf %162, %165 : vector<64x32xf32>
    %167 = arith.addf %3, %166 : vector<64x32xf32>
    %c0_116 = arith.constant 0 : index
    %c2_117 = arith.constant 2 : index
    %c0_118 = arith.constant 0 : index
    %168 = vector.load %arg11[%c0_116, %c2_117, %c0_118] : memref<3x8x32xf32, #tpu.memory_space<vmem>>, vector<1x1x32xf32>
    %169 = vector.shape_cast %168 : vector<1x1x32xf32> to vector<1x32xf32>
    %c0_119 = arith.constant 0 : index
    %c3_120 = arith.constant 3 : index
    %c0_121 = arith.constant 0 : index
    %170 = vector.load %arg11[%c0_119, %c3_120, %c0_121] : memref<3x8x32xf32, #tpu.memory_space<vmem>>, vector<1x1x32xf32>
    %171 = vector.shape_cast %170 : vector<1x1x32xf32> to vector<1x32xf32>
    %cst_122 = arith.constant dense<0.000000e+00> : vector<64xf32>
    %172 = vector.multi_reduction <add>, %167, %cst_122 [1] : vector<64x32xf32> to vector<64xf32>
    %173 = vector.shape_cast %172 : vector<64xf32> to vector<64x1xf32>
    %cst_123 = arith.constant 3.200000e+01 : f32
    %174 = vector.broadcast %cst_123 : f32 to vector<64x1xf32>
    %175 = arith.divf %173, %174 : vector<64x1xf32>
    %176 = vector.broadcast %175 : vector<64x1xf32> to vector<64x32xf32>
    %177 = arith.subf %167, %176 : vector<64x32xf32>
    %178 = arith.mulf %177, %177 : vector<64x32xf32>
    %cst_124 = arith.constant dense<0.000000e+00> : vector<64xf32>
    %179 = vector.multi_reduction <add>, %178, %cst_124 [1] : vector<64x32xf32> to vector<64xf32>
    %180 = vector.shape_cast %179 : vector<64xf32> to vector<64x1xf32>
    %cst_125 = arith.constant 3.200000e+01 : f32
    %181 = vector.broadcast %cst_125 : f32 to vector<64x1xf32>
    %182 = arith.divf %180, %181 : vector<64x1xf32>
    %183 = vector.broadcast %175 : vector<64x1xf32> to vector<64x32xf32>
    %184 = arith.subf %167, %183 : vector<64x32xf32>
    %cst_126 = arith.constant 9.99999974E-6 : f32
    %185 = vector.broadcast %cst_126 : f32 to vector<64x1xf32>
    %186 = arith.addf %182, %185 : vector<64x1xf32>
    %187 = math.rsqrt %186 : vector<64x1xf32>
    %188 = vector.broadcast %187 : vector<64x1xf32> to vector<64x32xf32>
    %189 = arith.mulf %184, %188 : vector<64x32xf32>
    %190 = vector.broadcast %169 : vector<1x32xf32> to vector<64x32xf32>
    %191 = arith.mulf %189, %190 : vector<64x32xf32>
    %192 = vector.broadcast %171 : vector<1x32xf32> to vector<64x32xf32>
    %193 = arith.addf %191, %192 : vector<64x32xf32>
    %c0_127 = arith.constant 0 : index
    %c0_128 = arith.constant 0 : index
    %c0_129 = arith.constant 0 : index
    %194 = vector.load %arg9[%c0_127, %c0_128, %c0_129] : memref<3x40x64xf32, #tpu.memory_space<vmem>>, vector<1x32x64xf32>
    %195 = vector.shape_cast %194 : vector<1x32x64xf32> to vector<32x64xf32>
    %cst_130 = arith.constant dense<0.000000e+00> : vector<64x64xf32>
    %196 = tpu.matmul %193, %195, %cst_130 {dimension_numbers = #tpu.dot_dimension_numbers<[1], [0], [0], [1], [0, 0, 1, 1], [], []>} : vector<64x32xf32>, vector<32x64xf32>, vector<64x64xf32> -> vector<64x64xf32>
    %c0_131 = arith.constant 0 : index
    %c32_132 = arith.constant 32 : index
    %c0_133 = arith.constant 0 : index
    %197 = vector.load %arg9[%c0_131, %c32_132, %c0_133] : memref<3x40x64xf32, #tpu.memory_space<vmem>>, vector<1x1x64xf32>
    %198 = vector.shape_cast %197 : vector<1x1x64xf32> to vector<1x64xf32>
    %199 = vector.broadcast %198 : vector<1x64xf32> to vector<64x64xf32>
    %200 = arith.addf %196, %199 : vector<64x64xf32>
    %cst_134 = arith.constant 0.000000e+00 : f32
    %201 = vector.broadcast %cst_134 : f32 to vector<64x64xf32>
    %202 = arith.maximumf %200, %201 : vector<64x64xf32>
    %c0_135 = arith.constant 0 : index
    %c0_136 = arith.constant 0 : index
    %c0_137 = arith.constant 0 : index
    %203 = vector.load %arg10[%c0_135, %c0_136, %c0_137] : memref<3x64x32xf32, #tpu.memory_space<vmem>>, vector<1x64x32xf32>
    %204 = vector.shape_cast %203 : vector<1x64x32xf32> to vector<64x32xf32>
    %cst_138 = arith.constant dense<0.000000e+00> : vector<64x32xf32>
    %205 = tpu.matmul %202, %204, %cst_138 {dimension_numbers = #tpu.dot_dimension_numbers<[1], [0], [0], [1], [0, 0, 1, 1], [], []>} : vector<64x64xf32>, vector<64x32xf32>, vector<64x32xf32> -> vector<64x32xf32>
    %c0_139 = arith.constant 0 : index
    %c1_140 = arith.constant 1 : index
    %c0_141 = arith.constant 0 : index
    %206 = vector.load %arg11[%c0_139, %c1_140, %c0_141] : memref<3x8x32xf32, #tpu.memory_space<vmem>>, vector<1x1x32xf32>
    %207 = vector.shape_cast %206 : vector<1x1x32xf32> to vector<1x32xf32>
    %208 = vector.broadcast %207 : vector<1x32xf32> to vector<64x32xf32>
    %209 = arith.addf %205, %208 : vector<64x32xf32>
    %210 = arith.addf %193, %209 : vector<64x32xf32>
    %c0_142 = arith.constant 0 : index
    %c4_143 = arith.constant 4 : index
    %c0_144 = arith.constant 0 : index
    %211 = vector.load %arg11[%c0_142, %c4_143, %c0_144] : memref<3x8x32xf32, #tpu.memory_space<vmem>>, vector<1x1x32xf32>
    %212 = vector.shape_cast %211 : vector<1x1x32xf32> to vector<1x32xf32>
    %c0_145 = arith.constant 0 : index
    %c5_146 = arith.constant 5 : index
    %c0_147 = arith.constant 0 : index
    %213 = vector.load %arg11[%c0_145, %c5_146, %c0_147] : memref<3x8x32xf32, #tpu.memory_space<vmem>>, vector<1x1x32xf32>
    %214 = vector.shape_cast %213 : vector<1x1x32xf32> to vector<1x32xf32>
    %cst_148 = arith.constant dense<0.000000e+00> : vector<64xf32>
    %215 = vector.multi_reduction <add>, %210, %cst_148 [1] : vector<64x32xf32> to vector<64xf32>
    %216 = vector.shape_cast %215 : vector<64xf32> to vector<64x1xf32>
    %cst_149 = arith.constant 3.200000e+01 : f32
    %217 = vector.broadcast %cst_149 : f32 to vector<64x1xf32>
    %218 = arith.divf %216, %217 : vector<64x1xf32>
    %219 = vector.broadcast %218 : vector<64x1xf32> to vector<64x32xf32>
    %220 = arith.subf %210, %219 : vector<64x32xf32>
    %221 = arith.mulf %220, %220 : vector<64x32xf32>
    %cst_150 = arith.constant dense<0.000000e+00> : vector<64xf32>
    %222 = vector.multi_reduction <add>, %221, %cst_150 [1] : vector<64x32xf32> to vector<64xf32>
    %223 = vector.shape_cast %222 : vector<64xf32> to vector<64x1xf32>
    %cst_151 = arith.constant 3.200000e+01 : f32
    %224 = vector.broadcast %cst_151 : f32 to vector<64x1xf32>
    %225 = arith.divf %223, %224 : vector<64x1xf32>
    %226 = vector.broadcast %218 : vector<64x1xf32> to vector<64x32xf32>
    %227 = arith.subf %210, %226 : vector<64x32xf32>
    %cst_152 = arith.constant 9.99999974E-6 : f32
    %228 = vector.broadcast %cst_152 : f32 to vector<64x1xf32>
    %229 = arith.addf %225, %228 : vector<64x1xf32>
    %230 = math.rsqrt %229 : vector<64x1xf32>
    %231 = vector.broadcast %230 : vector<64x1xf32> to vector<64x32xf32>
    %232 = arith.mulf %227, %231 : vector<64x32xf32>
    %233 = vector.broadcast %212 : vector<1x32xf32> to vector<64x32xf32>
    %234 = arith.mulf %232, %233 : vector<64x32xf32>
    %235 = vector.broadcast %214 : vector<1x32xf32> to vector<64x32xf32>
    %236 = arith.addf %234, %235 : vector<64x32xf32>
    %237 = vector.shape_cast %236 : vector<64x32xf32> to vector<8x8x32xf32>
    %238 = vector.extract_strided_slice %237 {offsets = [0, 0, 0], sizes = [8, 1, 32], strides = [1, 1, 1]} : vector<8x8x32xf32> to vector<8x1x32xf32>
    %239 = vector.shape_cast %238 : vector<8x1x32xf32> to vector<8x32xf32>
    %240 = vector.shape_cast %239 : vector<8x32xf32> to vector<2x4x32xf32>
    %c0_153 = arith.constant 0 : index
    %c0_154 = arith.constant 0 : index
    %c0_155 = arith.constant 0 : index
    %241 = vector.load %arg5[%c0_153, %c0_154, %c0_155] : memref<2x4x32xf32, #tpu.memory_space<vmem>>, vector<2x4x32xf32>
    %242 = arith.addf %240, %241 : vector<2x4x32xf32>
    %243 = vector.shape_cast %242 : vector<2x4x32xf32> to vector<8x32xf32>
    %c12 = arith.constant 12 : index
    %c0_156 = arith.constant 0 : index
    %c0_157 = arith.constant 0 : index
    %244 = vector.load %arg7[%c12, %c0_156, %c0_157] : memref<36x40x8xf32, #tpu.memory_space<vmem>>, vector<1x32x8xf32>
    %245 = vector.shape_cast %244 : vector<1x32x8xf32> to vector<32x8xf32>
    %cst_158 = arith.constant dense<0.000000e+00> : vector<8x8xf32>
    %246 = tpu.matmul %243, %245, %cst_158 {dimension_numbers = #tpu.dot_dimension_numbers<[1], [0], [0], [1], [0, 0, 1, 1], [], []>} : vector<8x32xf32>, vector<32x8xf32>, vector<8x8xf32> -> vector<8x8xf32>
    %c12_159 = arith.constant 12 : index
    %c32_160 = arith.constant 32 : index
    %c0_161 = arith.constant 0 : index
    %247 = vector.load %arg7[%c12_159, %c32_160, %c0_161] : memref<36x40x8xf32, #tpu.memory_space<vmem>>, vector<1x1x8xf32>
    %248 = vector.shape_cast %247 : vector<1x1x8xf32> to vector<1x8xf32>
    %249 = vector.broadcast %248 : vector<1x8xf32> to vector<8x8xf32>
    %250 = arith.addf %246, %249 : vector<8x8xf32>
    %c16 = arith.constant 16 : index
    %c0_162 = arith.constant 0 : index
    %c0_163 = arith.constant 0 : index
    %251 = vector.load %arg7[%c16, %c0_162, %c0_163] : memref<36x40x8xf32, #tpu.memory_space<vmem>>, vector<1x32x8xf32>
    %252 = vector.shape_cast %251 : vector<1x32x8xf32> to vector<32x8xf32>
    %cst_164 = arith.constant dense<0.000000e+00> : vector<8x8xf32>
    %253 = tpu.matmul %243, %252, %cst_164 {dimension_numbers = #tpu.dot_dimension_numbers<[1], [0], [0], [1], [0, 0, 1, 1], [], []>} : vector<8x32xf32>, vector<32x8xf32>, vector<8x8xf32> -> vector<8x8xf32>
    %c16_165 = arith.constant 16 : index
    %c32_166 = arith.constant 32 : index
    %c0_167 = arith.constant 0 : index
    %254 = vector.load %arg7[%c16_165, %c32_166, %c0_167] : memref<36x40x8xf32, #tpu.memory_space<vmem>>, vector<1x1x8xf32>
    %255 = vector.shape_cast %254 : vector<1x1x8xf32> to vector<1x8xf32>
    %256 = vector.broadcast %255 : vector<1x8xf32> to vector<8x8xf32>
    %257 = arith.addf %253, %256 : vector<8x8xf32>
    %c20 = arith.constant 20 : index
    %c0_168 = arith.constant 0 : index
    %c0_169 = arith.constant 0 : index
    %258 = vector.load %arg7[%c20, %c0_168, %c0_169] : memref<36x40x8xf32, #tpu.memory_space<vmem>>, vector<1x32x8xf32>
    %259 = vector.shape_cast %258 : vector<1x32x8xf32> to vector<32x8xf32>
    %cst_170 = arith.constant dense<0.000000e+00> : vector<8x8xf32>
    %260 = tpu.matmul %243, %259, %cst_170 {dimension_numbers = #tpu.dot_dimension_numbers<[1], [0], [0], [1], [0, 0, 1, 1], [], []>} : vector<8x32xf32>, vector<32x8xf32>, vector<8x8xf32> -> vector<8x8xf32>
    %c20_171 = arith.constant 20 : index
    %c32_172 = arith.constant 32 : index
    %c0_173 = arith.constant 0 : index
    %261 = vector.load %arg7[%c20_171, %c32_172, %c0_173] : memref<36x40x8xf32, #tpu.memory_space<vmem>>, vector<1x1x8xf32>
    %262 = vector.shape_cast %261 : vector<1x1x8xf32> to vector<1x8xf32>
    %263 = vector.broadcast %262 : vector<1x8xf32> to vector<8x8xf32>
    %264 = arith.addf %260, %263 : vector<8x8xf32>
    "tpu.trace_start"() <{level = 10 : i32, message = "qd,kd->qk"}> : () -> ()
    %cst_174 = arith.constant dense<0.000000e+00> : vector<8x8xf32>
    %265 = tpu.matmul %250, %257, %cst_174 {dimension_numbers = #tpu.dot_dimension_numbers<[1], [1], [0], [0], [0, 0, 1, 0], [], []>} : vector<8x8xf32>, vector<8x8xf32>, vector<8x8xf32> -> vector<8x8xf32>
    "tpu.trace_stop"() : () -> ()
    %cst_175 = arith.constant 0.353553385 : f32
    %266 = vector.broadcast %cst_175 : f32 to vector<8x8xf32>
    %267 = arith.mulf %265, %266 : vector<8x8xf32>
    %268 = arith.addf %267, %1 : vector<8x8xf32>
    %cst_176 = arith.constant dense<0xFF800000> : vector<8xf32>
    %269 = vector.multi_reduction <maximumf>, %268, %cst_176 [1] : vector<8x8xf32> to vector<8xf32>
    %270 = vector.shape_cast %269 : vector<8xf32> to vector<8x1xf32>
    %271 = vector.broadcast %270 : vector<8x1xf32> to vector<8x8xf32>
    %272 = arith.subf %268, %271 : vector<8x8xf32>
    %273 = math.exp %272 : vector<8x8xf32>
    %cst_177 = arith.constant dense<0.000000e+00> : vector<8xf32>
    %274 = vector.multi_reduction <add>, %273, %cst_177 [1] : vector<8x8xf32> to vector<8xf32>
    %275 = vector.shape_cast %274 : vector<8xf32> to vector<8x1xf32>
    %276 = tpu.reciprocal %275 {approx = true} : vector<8x1xf32> -> vector<8x1xf32>
    %277 = vector.broadcast %276 : vector<8x1xf32> to vector<8x8xf32>
    %278 = arith.mulf %273, %277 : vector<8x8xf32>
    %cst_178 = arith.constant dense<0.000000e+00> : vector<8x8xf32>
    %279 = tpu.matmul %278, %264, %cst_178 {dimension_numbers = #tpu.dot_dimension_numbers<[1], [0], [0], [1], [0, 0, 1, 1], [], []>} : vector<8x8xf32>, vector<8x8xf32>, vector<8x8xf32> -> vector<8x8xf32>
    %c4_179 = arith.constant 4 : index
    %c0_180 = arith.constant 0 : index
    %c0_181 = arith.constant 0 : index
    %280 = vector.load %arg8[%c4_179, %c0_180, %c0_181] : memref<12x8x32xf32, #tpu.memory_space<vmem>>, vector<1x8x32xf32>
    %281 = vector.shape_cast %280 : vector<1x8x32xf32> to vector<8x32xf32>
    %cst_182 = arith.constant dense<0.000000e+00> : vector<8x32xf32>
    %282 = tpu.matmul %279, %281, %cst_182 {dimension_numbers = #tpu.dot_dimension_numbers<[1], [0], [0], [1], [0, 0, 1, 1], [], []>} : vector<8x8xf32>, vector<8x32xf32>, vector<8x32xf32> -> vector<8x32xf32>
    %c13 = arith.constant 13 : index
    %c0_183 = arith.constant 0 : index
    %c0_184 = arith.constant 0 : index
    %283 = vector.load %arg7[%c13, %c0_183, %c0_184] : memref<36x40x8xf32, #tpu.memory_space<vmem>>, vector<1x32x8xf32>
    %284 = vector.shape_cast %283 : vector<1x32x8xf32> to vector<32x8xf32>
    %cst_185 = arith.constant dense<0.000000e+00> : vector<8x8xf32>
    %285 = tpu.matmul %243, %284, %cst_185 {dimension_numbers = #tpu.dot_dimension_numbers<[1], [0], [0], [1], [0, 0, 1, 1], [], []>} : vector<8x32xf32>, vector<32x8xf32>, vector<8x8xf32> -> vector<8x8xf32>
    %c13_186 = arith.constant 13 : index
    %c32_187 = arith.constant 32 : index
    %c0_188 = arith.constant 0 : index
    %286 = vector.load %arg7[%c13_186, %c32_187, %c0_188] : memref<36x40x8xf32, #tpu.memory_space<vmem>>, vector<1x1x8xf32>
    %287 = vector.shape_cast %286 : vector<1x1x8xf32> to vector<1x8xf32>
    %288 = vector.broadcast %287 : vector<1x8xf32> to vector<8x8xf32>
    %289 = arith.addf %285, %288 : vector<8x8xf32>
    %c17 = arith.constant 17 : index
    %c0_189 = arith.constant 0 : index
    %c0_190 = arith.constant 0 : index
    %290 = vector.load %arg7[%c17, %c0_189, %c0_190] : memref<36x40x8xf32, #tpu.memory_space<vmem>>, vector<1x32x8xf32>
    %291 = vector.shape_cast %290 : vector<1x32x8xf32> to vector<32x8xf32>
    %cst_191 = arith.constant dense<0.000000e+00> : vector<8x8xf32>
    %292 = tpu.matmul %243, %291, %cst_191 {dimension_numbers = #tpu.dot_dimension_numbers<[1], [0], [0], [1], [0, 0, 1, 1], [], []>} : vector<8x32xf32>, vector<32x8xf32>, vector<8x8xf32> -> vector<8x8xf32>
    %c17_192 = arith.constant 17 : index
    %c32_193 = arith.constant 32 : index
    %c0_194 = arith.constant 0 : index
    %293 = vector.load %arg7[%c17_192, %c32_193, %c0_194] : memref<36x40x8xf32, #tpu.memory_space<vmem>>, vector<1x1x8xf32>
    %294 = vector.shape_cast %293 : vector<1x1x8xf32> to vector<1x8xf32>
    %295 = vector.broadcast %294 : vector<1x8xf32> to vector<8x8xf32>
    %296 = arith.addf %292, %295 : vector<8x8xf32>
    %c21 = arith.constant 21 : index
    %c0_195 = arith.constant 0 : index
    %c0_196 = arith.constant 0 : index
    %297 = vector.load %arg7[%c21, %c0_195, %c0_196] : memref<36x40x8xf32, #tpu.memory_space<vmem>>, vector<1x32x8xf32>
    %298 = vector.shape_cast %297 : vector<1x32x8xf32> to vector<32x8xf32>
    %cst_197 = arith.constant dense<0.000000e+00> : vector<8x8xf32>
    %299 = tpu.matmul %243, %298, %cst_197 {dimension_numbers = #tpu.dot_dimension_numbers<[1], [0], [0], [1], [0, 0, 1, 1], [], []>} : vector<8x32xf32>, vector<32x8xf32>, vector<8x8xf32> -> vector<8x8xf32>
    %c21_198 = arith.constant 21 : index
    %c32_199 = arith.constant 32 : index
    %c0_200 = arith.constant 0 : index
    %300 = vector.load %arg7[%c21_198, %c32_199, %c0_200] : memref<36x40x8xf32, #tpu.memory_space<vmem>>, vector<1x1x8xf32>
    %301 = vector.shape_cast %300 : vector<1x1x8xf32> to vector<1x8xf32>
    %302 = vector.broadcast %301 : vector<1x8xf32> to vector<8x8xf32>
    %303 = arith.addf %299, %302 : vector<8x8xf32>
    "tpu.trace_start"() <{level = 10 : i32, message = "qd,kd->qk"}> : () -> ()
    %cst_201 = arith.constant dense<0.000000e+00> : vector<8x8xf32>
    %304 = tpu.matmul %289, %296, %cst_201 {dimension_numbers = #tpu.dot_dimension_numbers<[1], [1], [0], [0], [0, 0, 1, 0], [], []>} : vector<8x8xf32>, vector<8x8xf32>, vector<8x8xf32> -> vector<8x8xf32>
    "tpu.trace_stop"() : () -> ()
    %cst_202 = arith.constant 0.353553385 : f32
    %305 = vector.broadcast %cst_202 : f32 to vector<8x8xf32>
    %306 = arith.mulf %304, %305 : vector<8x8xf32>
    %307 = arith.addf %306, %1 : vector<8x8xf32>
    %cst_203 = arith.constant dense<0xFF800000> : vector<8xf32>
    %308 = vector.multi_reduction <maximumf>, %307, %cst_203 [1] : vector<8x8xf32> to vector<8xf32>
    %309 = vector.shape_cast %308 : vector<8xf32> to vector<8x1xf32>
    %310 = vector.broadcast %309 : vector<8x1xf32> to vector<8x8xf32>
    %311 = arith.subf %307, %310 : vector<8x8xf32>
    %312 = math.exp %311 : vector<8x8xf32>
    %cst_204 = arith.constant dense<0.000000e+00> : vector<8xf32>
    %313 = vector.multi_reduction <add>, %312, %cst_204 [1] : vector<8x8xf32> to vector<8xf32>
    %314 = vector.shape_cast %313 : vector<8xf32> to vector<8x1xf32>
    %315 = tpu.reciprocal %314 {approx = true} : vector<8x1xf32> -> vector<8x1xf32>
    %316 = vector.broadcast %315 : vector<8x1xf32> to vector<8x8xf32>
    %317 = arith.mulf %312, %316 : vector<8x8xf32>
    %cst_205 = arith.constant dense<0.000000e+00> : vector<8x8xf32>
    %318 = tpu.matmul %317, %303, %cst_205 {dimension_numbers = #tpu.dot_dimension_numbers<[1], [0], [0], [1], [0, 0, 1, 1], [], []>} : vector<8x8xf32>, vector<8x8xf32>, vector<8x8xf32> -> vector<8x8xf32>
    %c5_206 = arith.constant 5 : index
    %c0_207 = arith.constant 0 : index
    %c0_208 = arith.constant 0 : index
    %319 = vector.load %arg8[%c5_206, %c0_207, %c0_208] : memref<12x8x32xf32, #tpu.memory_space<vmem>>, vector<1x8x32xf32>
    %320 = vector.shape_cast %319 : vector<1x8x32xf32> to vector<8x32xf32>
    %cst_209 = arith.constant dense<0.000000e+00> : vector<8x32xf32>
    %321 = tpu.matmul %318, %320, %cst_209 {dimension_numbers = #tpu.dot_dimension_numbers<[1], [0], [0], [1], [0, 0, 1, 1], [], []>} : vector<8x8xf32>, vector<8x32xf32>, vector<8x32xf32> -> vector<8x32xf32>
    %322 = arith.addf %282, %321 : vector<8x32xf32>
    %c14 = arith.constant 14 : index
    %c0_210 = arith.constant 0 : index
    %c0_211 = arith.constant 0 : index
    %323 = vector.load %arg7[%c14, %c0_210, %c0_211] : memref<36x40x8xf32, #tpu.memory_space<vmem>>, vector<1x32x8xf32>
    %324 = vector.shape_cast %323 : vector<1x32x8xf32> to vector<32x8xf32>
    %cst_212 = arith.constant dense<0.000000e+00> : vector<8x8xf32>
    %325 = tpu.matmul %243, %324, %cst_212 {dimension_numbers = #tpu.dot_dimension_numbers<[1], [0], [0], [1], [0, 0, 1, 1], [], []>} : vector<8x32xf32>, vector<32x8xf32>, vector<8x8xf32> -> vector<8x8xf32>
    %c14_213 = arith.constant 14 : index
    %c32_214 = arith.constant 32 : index
    %c0_215 = arith.constant 0 : index
    %326 = vector.load %arg7[%c14_213, %c32_214, %c0_215] : memref<36x40x8xf32, #tpu.memory_space<vmem>>, vector<1x1x8xf32>
    %327 = vector.shape_cast %326 : vector<1x1x8xf32> to vector<1x8xf32>
    %328 = vector.broadcast %327 : vector<1x8xf32> to vector<8x8xf32>
    %329 = arith.addf %325, %328 : vector<8x8xf32>
    %c18 = arith.constant 18 : index
    %c0_216 = arith.constant 0 : index
    %c0_217 = arith.constant 0 : index
    %330 = vector.load %arg7[%c18, %c0_216, %c0_217] : memref<36x40x8xf32, #tpu.memory_space<vmem>>, vector<1x32x8xf32>
    %331 = vector.shape_cast %330 : vector<1x32x8xf32> to vector<32x8xf32>
    %cst_218 = arith.constant dense<0.000000e+00> : vector<8x8xf32>
    %332 = tpu.matmul %243, %331, %cst_218 {dimension_numbers = #tpu.dot_dimension_numbers<[1], [0], [0], [1], [0, 0, 1, 1], [], []>} : vector<8x32xf32>, vector<32x8xf32>, vector<8x8xf32> -> vector<8x8xf32>
    %c18_219 = arith.constant 18 : index
    %c32_220 = arith.constant 32 : index
    %c0_221 = arith.constant 0 : index
    %333 = vector.load %arg7[%c18_219, %c32_220, %c0_221] : memref<36x40x8xf32, #tpu.memory_space<vmem>>, vector<1x1x8xf32>
    %334 = vector.shape_cast %333 : vector<1x1x8xf32> to vector<1x8xf32>
    %335 = vector.broadcast %334 : vector<1x8xf32> to vector<8x8xf32>
    %336 = arith.addf %332, %335 : vector<8x8xf32>
    %c22 = arith.constant 22 : index
    %c0_222 = arith.constant 0 : index
    %c0_223 = arith.constant 0 : index
    %337 = vector.load %arg7[%c22, %c0_222, %c0_223] : memref<36x40x8xf32, #tpu.memory_space<vmem>>, vector<1x32x8xf32>
    %338 = vector.shape_cast %337 : vector<1x32x8xf32> to vector<32x8xf32>
    %cst_224 = arith.constant dense<0.000000e+00> : vector<8x8xf32>
    %339 = tpu.matmul %243, %338, %cst_224 {dimension_numbers = #tpu.dot_dimension_numbers<[1], [0], [0], [1], [0, 0, 1, 1], [], []>} : vector<8x32xf32>, vector<32x8xf32>, vector<8x8xf32> -> vector<8x8xf32>
    %c22_225 = arith.constant 22 : index
    %c32_226 = arith.constant 32 : index
    %c0_227 = arith.constant 0 : index
    %340 = vector.load %arg7[%c22_225, %c32_226, %c0_227] : memref<36x40x8xf32, #tpu.memory_space<vmem>>, vector<1x1x8xf32>
    %341 = vector.shape_cast %340 : vector<1x1x8xf32> to vector<1x8xf32>
    %342 = vector.broadcast %341 : vector<1x8xf32> to vector<8x8xf32>
    %343 = arith.addf %339, %342 : vector<8x8xf32>
    "tpu.trace_start"() <{level = 10 : i32, message = "qd,kd->qk"}> : () -> ()
    %cst_228 = arith.constant dense<0.000000e+00> : vector<8x8xf32>
    %344 = tpu.matmul %329, %336, %cst_228 {dimension_numbers = #tpu.dot_dimension_numbers<[1], [1], [0], [0], [0, 0, 1, 0], [], []>} : vector<8x8xf32>, vector<8x8xf32>, vector<8x8xf32> -> vector<8x8xf32>
    "tpu.trace_stop"() : () -> ()
    %cst_229 = arith.constant 0.353553385 : f32
    %345 = vector.broadcast %cst_229 : f32 to vector<8x8xf32>
    %346 = arith.mulf %344, %345 : vector<8x8xf32>
    %347 = arith.addf %346, %1 : vector<8x8xf32>
    %cst_230 = arith.constant dense<0xFF800000> : vector<8xf32>
    %348 = vector.multi_reduction <maximumf>, %347, %cst_230 [1] : vector<8x8xf32> to vector<8xf32>
    %349 = vector.shape_cast %348 : vector<8xf32> to vector<8x1xf32>
    %350 = vector.broadcast %349 : vector<8x1xf32> to vector<8x8xf32>
    %351 = arith.subf %347, %350 : vector<8x8xf32>
    %352 = math.exp %351 : vector<8x8xf32>
    %cst_231 = arith.constant dense<0.000000e+00> : vector<8xf32>
    %353 = vector.multi_reduction <add>, %352, %cst_231 [1] : vector<8x8xf32> to vector<8xf32>
    %354 = vector.shape_cast %353 : vector<8xf32> to vector<8x1xf32>
    %355 = tpu.reciprocal %354 {approx = true} : vector<8x1xf32> -> vector<8x1xf32>
    %356 = vector.broadcast %355 : vector<8x1xf32> to vector<8x8xf32>
    %357 = arith.mulf %352, %356 : vector<8x8xf32>
    %cst_232 = arith.constant dense<0.000000e+00> : vector<8x8xf32>
    %358 = tpu.matmul %357, %343, %cst_232 {dimension_numbers = #tpu.dot_dimension_numbers<[1], [0], [0], [1], [0, 0, 1, 1], [], []>} : vector<8x8xf32>, vector<8x8xf32>, vector<8x8xf32> -> vector<8x8xf32>
    %c6_233 = arith.constant 6 : index
    %c0_234 = arith.constant 0 : index
    %c0_235 = arith.constant 0 : index
    %359 = vector.load %arg8[%c6_233, %c0_234, %c0_235] : memref<12x8x32xf32, #tpu.memory_space<vmem>>, vector<1x8x32xf32>
    %360 = vector.shape_cast %359 : vector<1x8x32xf32> to vector<8x32xf32>
    %cst_236 = arith.constant dense<0.000000e+00> : vector<8x32xf32>
    %361 = tpu.matmul %358, %360, %cst_236 {dimension_numbers = #tpu.dot_dimension_numbers<[1], [0], [0], [1], [0, 0, 1, 1], [], []>} : vector<8x8xf32>, vector<8x32xf32>, vector<8x32xf32> -> vector<8x32xf32>
    %362 = arith.addf %322, %361 : vector<8x32xf32>
    %c15 = arith.constant 15 : index
    %c0_237 = arith.constant 0 : index
    %c0_238 = arith.constant 0 : index
    %363 = vector.load %arg7[%c15, %c0_237, %c0_238] : memref<36x40x8xf32, #tpu.memory_space<vmem>>, vector<1x32x8xf32>
    %364 = vector.shape_cast %363 : vector<1x32x8xf32> to vector<32x8xf32>
    %cst_239 = arith.constant dense<0.000000e+00> : vector<8x8xf32>
    %365 = tpu.matmul %243, %364, %cst_239 {dimension_numbers = #tpu.dot_dimension_numbers<[1], [0], [0], [1], [0, 0, 1, 1], [], []>} : vector<8x32xf32>, vector<32x8xf32>, vector<8x8xf32> -> vector<8x8xf32>
    %c15_240 = arith.constant 15 : index
    %c32_241 = arith.constant 32 : index
    %c0_242 = arith.constant 0 : index
    %366 = vector.load %arg7[%c15_240, %c32_241, %c0_242] : memref<36x40x8xf32, #tpu.memory_space<vmem>>, vector<1x1x8xf32>
    %367 = vector.shape_cast %366 : vector<1x1x8xf32> to vector<1x8xf32>
    %368 = vector.broadcast %367 : vector<1x8xf32> to vector<8x8xf32>
    %369 = arith.addf %365, %368 : vector<8x8xf32>
    %c19 = arith.constant 19 : index
    %c0_243 = arith.constant 0 : index
    %c0_244 = arith.constant 0 : index
    %370 = vector.load %arg7[%c19, %c0_243, %c0_244] : memref<36x40x8xf32, #tpu.memory_space<vmem>>, vector<1x32x8xf32>
    %371 = vector.shape_cast %370 : vector<1x32x8xf32> to vector<32x8xf32>
    %cst_245 = arith.constant dense<0.000000e+00> : vector<8x8xf32>
    %372 = tpu.matmul %243, %371, %cst_245 {dimension_numbers = #tpu.dot_dimension_numbers<[1], [0], [0], [1], [0, 0, 1, 1], [], []>} : vector<8x32xf32>, vector<32x8xf32>, vector<8x8xf32> -> vector<8x8xf32>
    %c19_246 = arith.constant 19 : index
    %c32_247 = arith.constant 32 : index
    %c0_248 = arith.constant 0 : index
    %373 = vector.load %arg7[%c19_246, %c32_247, %c0_248] : memref<36x40x8xf32, #tpu.memory_space<vmem>>, vector<1x1x8xf32>
    %374 = vector.shape_cast %373 : vector<1x1x8xf32> to vector<1x8xf32>
    %375 = vector.broadcast %374 : vector<1x8xf32> to vector<8x8xf32>
    %376 = arith.addf %372, %375 : vector<8x8xf32>
    %c23 = arith.constant 23 : index
    %c0_249 = arith.constant 0 : index
    %c0_250 = arith.constant 0 : index
    %377 = vector.load %arg7[%c23, %c0_249, %c0_250] : memref<36x40x8xf32, #tpu.memory_space<vmem>>, vector<1x32x8xf32>
    %378 = vector.shape_cast %377 : vector<1x32x8xf32> to vector<32x8xf32>
    %cst_251 = arith.constant dense<0.000000e+00> : vector<8x8xf32>
    %379 = tpu.matmul %243, %378, %cst_251 {dimension_numbers = #tpu.dot_dimension_numbers<[1], [0], [0], [1], [0, 0, 1, 1], [], []>} : vector<8x32xf32>, vector<32x8xf32>, vector<8x8xf32> -> vector<8x8xf32>
    %c23_252 = arith.constant 23 : index
    %c32_253 = arith.constant 32 : index
    %c0_254 = arith.constant 0 : index
    %380 = vector.load %arg7[%c23_252, %c32_253, %c0_254] : memref<36x40x8xf32, #tpu.memory_space<vmem>>, vector<1x1x8xf32>
    %381 = vector.shape_cast %380 : vector<1x1x8xf32> to vector<1x8xf32>
    %382 = vector.broadcast %381 : vector<1x8xf32> to vector<8x8xf32>
    %383 = arith.addf %379, %382 : vector<8x8xf32>
    "tpu.trace_start"() <{level = 10 : i32, message = "qd,kd->qk"}> : () -> ()
    %cst_255 = arith.constant dense<0.000000e+00> : vector<8x8xf32>
    %384 = tpu.matmul %369, %376, %cst_255 {dimension_numbers = #tpu.dot_dimension_numbers<[1], [1], [0], [0], [0, 0, 1, 0], [], []>} : vector<8x8xf32>, vector<8x8xf32>, vector<8x8xf32> -> vector<8x8xf32>
    "tpu.trace_stop"() : () -> ()
    %cst_256 = arith.constant 0.353553385 : f32
    %385 = vector.broadcast %cst_256 : f32 to vector<8x8xf32>
    %386 = arith.mulf %384, %385 : vector<8x8xf32>
    %387 = arith.addf %386, %1 : vector<8x8xf32>
    %cst_257 = arith.constant dense<0xFF800000> : vector<8xf32>
    %388 = vector.multi_reduction <maximumf>, %387, %cst_257 [1] : vector<8x8xf32> to vector<8xf32>
    %389 = vector.shape_cast %388 : vector<8xf32> to vector<8x1xf32>
    %390 = vector.broadcast %389 : vector<8x1xf32> to vector<8x8xf32>
    %391 = arith.subf %387, %390 : vector<8x8xf32>
    %392 = math.exp %391 : vector<8x8xf32>
    %cst_258 = arith.constant dense<0.000000e+00> : vector<8xf32>
    %393 = vector.multi_reduction <add>, %392, %cst_258 [1] : vector<8x8xf32> to vector<8xf32>
    %394 = vector.shape_cast %393 : vector<8xf32> to vector<8x1xf32>
    %395 = tpu.reciprocal %394 {approx = true} : vector<8x1xf32> -> vector<8x1xf32>
    %396 = vector.broadcast %395 : vector<8x1xf32> to vector<8x8xf32>
    %397 = arith.mulf %392, %396 : vector<8x8xf32>
    %cst_259 = arith.constant dense<0.000000e+00> : vector<8x8xf32>
    %398 = tpu.matmul %397, %383, %cst_259 {dimension_numbers = #tpu.dot_dimension_numbers<[1], [0], [0], [1], [0, 0, 1, 1], [], []>} : vector<8x8xf32>, vector<8x8xf32>, vector<8x8xf32> -> vector<8x8xf32>
    %c7_260 = arith.constant 7 : index
    %c0_261 = arith.constant 0 : index
    %c0_262 = arith.constant 0 : index
    %399 = vector.load %arg8[%c7_260, %c0_261, %c0_262] : memref<12x8x32xf32, #tpu.memory_space<vmem>>, vector<1x8x32xf32>
    %400 = vector.shape_cast %399 : vector<1x8x32xf32> to vector<8x32xf32>
    %cst_263 = arith.constant dense<0.000000e+00> : vector<8x32xf32>
    %401 = tpu.matmul %398, %400, %cst_263 {dimension_numbers = #tpu.dot_dimension_numbers<[1], [0], [0], [1], [0, 0, 1, 1], [], []>} : vector<8x8xf32>, vector<8x32xf32>, vector<8x32xf32> -> vector<8x32xf32>
    %402 = arith.addf %362, %401 : vector<8x32xf32>
    %c1_264 = arith.constant 1 : index
    %c0_265 = arith.constant 0 : index
    %c0_266 = arith.constant 0 : index
    %403 = vector.load %arg11[%c1_264, %c0_265, %c0_266] : memref<3x8x32xf32, #tpu.memory_space<vmem>>, vector<1x1x32xf32>
    %404 = vector.shape_cast %403 : vector<1x1x32xf32> to vector<1x32xf32>
    %405 = vector.broadcast %404 : vector<1x32xf32> to vector<8x32xf32>
    %406 = arith.addf %402, %405 : vector<8x32xf32>
    %407 = arith.addf %243, %406 : vector<8x32xf32>
    %c1_267 = arith.constant 1 : index
    %c2_268 = arith.constant 2 : index
    %c0_269 = arith.constant 0 : index
    %408 = vector.load %arg11[%c1_267, %c2_268, %c0_269] : memref<3x8x32xf32, #tpu.memory_space<vmem>>, vector<1x1x32xf32>
    %409 = vector.shape_cast %408 : vector<1x1x32xf32> to vector<1x32xf32>
    %c1_270 = arith.constant 1 : index
    %c3_271 = arith.constant 3 : index
    %c0_272 = arith.constant 0 : index
    %410 = vector.load %arg11[%c1_270, %c3_271, %c0_272] : memref<3x8x32xf32, #tpu.memory_space<vmem>>, vector<1x1x32xf32>
    %411 = vector.shape_cast %410 : vector<1x1x32xf32> to vector<1x32xf32>
    %cst_273 = arith.constant dense<0.000000e+00> : vector<8xf32>
    %412 = vector.multi_reduction <add>, %407, %cst_273 [1] : vector<8x32xf32> to vector<8xf32>
    %413 = vector.shape_cast %412 : vector<8xf32> to vector<8x1xf32>
    %cst_274 = arith.constant 3.200000e+01 : f32
    %414 = vector.broadcast %cst_274 : f32 to vector<8x1xf32>
    %415 = arith.divf %413, %414 : vector<8x1xf32>
    %416 = vector.broadcast %415 : vector<8x1xf32> to vector<8x32xf32>
    %417 = arith.subf %407, %416 : vector<8x32xf32>
    %418 = arith.mulf %417, %417 : vector<8x32xf32>
    %cst_275 = arith.constant dense<0.000000e+00> : vector<8xf32>
    %419 = vector.multi_reduction <add>, %418, %cst_275 [1] : vector<8x32xf32> to vector<8xf32>
    %420 = vector.shape_cast %419 : vector<8xf32> to vector<8x1xf32>
    %cst_276 = arith.constant 3.200000e+01 : f32
    %421 = vector.broadcast %cst_276 : f32 to vector<8x1xf32>
    %422 = arith.divf %420, %421 : vector<8x1xf32>
    %423 = vector.broadcast %415 : vector<8x1xf32> to vector<8x32xf32>
    %424 = arith.subf %407, %423 : vector<8x32xf32>
    %cst_277 = arith.constant 9.99999974E-6 : f32
    %425 = vector.broadcast %cst_277 : f32 to vector<8x1xf32>
    %426 = arith.addf %422, %425 : vector<8x1xf32>
    %427 = math.rsqrt %426 : vector<8x1xf32>
    %428 = vector.broadcast %427 : vector<8x1xf32> to vector<8x32xf32>
    %429 = arith.mulf %424, %428 : vector<8x32xf32>
    %430 = vector.broadcast %409 : vector<1x32xf32> to vector<8x32xf32>
    %431 = arith.mulf %429, %430 : vector<8x32xf32>
    %432 = vector.broadcast %411 : vector<1x32xf32> to vector<8x32xf32>
    %433 = arith.addf %431, %432 : vector<8x32xf32>
    %c1_278 = arith.constant 1 : index
    %c0_279 = arith.constant 0 : index
    %c0_280 = arith.constant 0 : index
    %434 = vector.load %arg9[%c1_278, %c0_279, %c0_280] : memref<3x40x64xf32, #tpu.memory_space<vmem>>, vector<1x32x64xf32>
    %435 = vector.shape_cast %434 : vector<1x32x64xf32> to vector<32x64xf32>
    %cst_281 = arith.constant dense<0.000000e+00> : vector<8x64xf32>
    %436 = tpu.matmul %433, %435, %cst_281 {dimension_numbers = #tpu.dot_dimension_numbers<[1], [0], [0], [1], [0, 0, 1, 1], [], []>} : vector<8x32xf32>, vector<32x64xf32>, vector<8x64xf32> -> vector<8x64xf32>
    %c1_282 = arith.constant 1 : index
    %c32_283 = arith.constant 32 : index
    %c0_284 = arith.constant 0 : index
    %437 = vector.load %arg9[%c1_282, %c32_283, %c0_284] : memref<3x40x64xf32, #tpu.memory_space<vmem>>, vector<1x1x64xf32>
    %438 = vector.shape_cast %437 : vector<1x1x64xf32> to vector<1x64xf32>
    %439 = vector.broadcast %438 : vector<1x64xf32> to vector<8x64xf32>
    %440 = arith.addf %436, %439 : vector<8x64xf32>
    %cst_285 = arith.constant 0.000000e+00 : f32
    %441 = vector.broadcast %cst_285 : f32 to vector<8x64xf32>
    %442 = arith.maximumf %440, %441 : vector<8x64xf32>
    %c1_286 = arith.constant 1 : index
    %c0_287 = arith.constant 0 : index
    %c0_288 = arith.constant 0 : index
    %443 = vector.load %arg10[%c1_286, %c0_287, %c0_288] : memref<3x64x32xf32, #tpu.memory_space<vmem>>, vector<1x64x32xf32>
    %444 = vector.shape_cast %443 : vector<1x64x32xf32> to vector<64x32xf32>
    %cst_289 = arith.constant dense<0.000000e+00> : vector<8x32xf32>
    %445 = tpu.matmul %442, %444, %cst_289 {dimension_numbers = #tpu.dot_dimension_numbers<[1], [0], [0], [1], [0, 0, 1, 1], [], []>} : vector<8x64xf32>, vector<64x32xf32>, vector<8x32xf32> -> vector<8x32xf32>
    %c1_290 = arith.constant 1 : index
    %c1_291 = arith.constant 1 : index
    %c0_292 = arith.constant 0 : index
    %446 = vector.load %arg11[%c1_290, %c1_291, %c0_292] : memref<3x8x32xf32, #tpu.memory_space<vmem>>, vector<1x1x32xf32>
    %447 = vector.shape_cast %446 : vector<1x1x32xf32> to vector<1x32xf32>
    %448 = vector.broadcast %447 : vector<1x32xf32> to vector<8x32xf32>
    %449 = arith.addf %445, %448 : vector<8x32xf32>
    %450 = arith.addf %433, %449 : vector<8x32xf32>
    %c1_293 = arith.constant 1 : index
    %c4_294 = arith.constant 4 : index
    %c0_295 = arith.constant 0 : index
    %451 = vector.load %arg11[%c1_293, %c4_294, %c0_295] : memref<3x8x32xf32, #tpu.memory_space<vmem>>, vector<1x1x32xf32>
    %452 = vector.shape_cast %451 : vector<1x1x32xf32> to vector<1x32xf32>
    %c1_296 = arith.constant 1 : index
    %c5_297 = arith.constant 5 : index
    %c0_298 = arith.constant 0 : index
    %453 = vector.load %arg11[%c1_296, %c5_297, %c0_298] : memref<3x8x32xf32, #tpu.memory_space<vmem>>, vector<1x1x32xf32>
    %454 = vector.shape_cast %453 : vector<1x1x32xf32> to vector<1x32xf32>
    %cst_299 = arith.constant dense<0.000000e+00> : vector<8xf32>
    %455 = vector.multi_reduction <add>, %450, %cst_299 [1] : vector<8x32xf32> to vector<8xf32>
    %456 = vector.shape_cast %455 : vector<8xf32> to vector<8x1xf32>
    %cst_300 = arith.constant 3.200000e+01 : f32
    %457 = vector.broadcast %cst_300 : f32 to vector<8x1xf32>
    %458 = arith.divf %456, %457 : vector<8x1xf32>
    %459 = vector.broadcast %458 : vector<8x1xf32> to vector<8x32xf32>
    %460 = arith.subf %450, %459 : vector<8x32xf32>
    %461 = arith.mulf %460, %460 : vector<8x32xf32>
    %cst_301 = arith.constant dense<0.000000e+00> : vector<8xf32>
    %462 = vector.multi_reduction <add>, %461, %cst_301 [1] : vector<8x32xf32> to vector<8xf32>
    %463 = vector.shape_cast %462 : vector<8xf32> to vector<8x1xf32>
    %cst_302 = arith.constant 3.200000e+01 : f32
    %464 = vector.broadcast %cst_302 : f32 to vector<8x1xf32>
    %465 = arith.divf %463, %464 : vector<8x1xf32>
    %466 = vector.broadcast %458 : vector<8x1xf32> to vector<8x32xf32>
    %467 = arith.subf %450, %466 : vector<8x32xf32>
    %cst_303 = arith.constant 9.99999974E-6 : f32
    %468 = vector.broadcast %cst_303 : f32 to vector<8x1xf32>
    %469 = arith.addf %465, %468 : vector<8x1xf32>
    %470 = math.rsqrt %469 : vector<8x1xf32>
    %471 = vector.broadcast %470 : vector<8x1xf32> to vector<8x32xf32>
    %472 = arith.mulf %467, %471 : vector<8x32xf32>
    %473 = vector.broadcast %452 : vector<1x32xf32> to vector<8x32xf32>
    %474 = arith.mulf %472, %473 : vector<8x32xf32>
    %475 = vector.broadcast %454 : vector<1x32xf32> to vector<8x32xf32>
    %476 = arith.addf %474, %475 : vector<8x32xf32>
    %477 = tpu.iota {dimensions = array<i32: 1>} : vector<8x8x1xi32>
    %c0_i32 = arith.constant 0 : i32
    %478 = vector.broadcast %c0_i32 : i32 to vector<8x8x1xi32>
    %479 = arith.cmpi eq, %477, %478 : vector<8x8x1xi32>
    %480 = vector.shape_cast %476 : vector<8x32xf32> to vector<8x1x32xf32>
    %481 = vector.shape_cast %236 : vector<64x32xf32> to vector<8x8x32xf32>
    %482 = vector.shape_cast %479 : vector<8x8x1xi1> to vector<8x8x1xi1>
    %483 = vector.broadcast %482 : vector<8x8x1xi1> to vector<8x8x32xi1>
    %484 = vector.shape_cast %480 : vector<8x1x32xf32> to vector<8x1x32xf32>
    %485 = vector.broadcast %484 : vector<8x1x32xf32> to vector<8x8x32xf32>
    %486 = arith.select %483, %485, %481 : vector<8x8x32xi1>, vector<8x8x32xf32>
    %487 = vector.shape_cast %486 : vector<8x8x32xf32> to vector<64x32xf32>
    %c24 = arith.constant 24 : index
    %c0_304 = arith.constant 0 : index
    %c0_305 = arith.constant 0 : index
    %488 = vector.load %arg7[%c24, %c0_304, %c0_305] : memref<36x40x8xf32, #tpu.memory_space<vmem>>, vector<1x32x8xf32>
    %489 = vector.shape_cast %488 : vector<1x32x8xf32> to vector<32x8xf32>
    %cst_306 = arith.constant dense<0.000000e+00> : vector<64x8xf32>
    %490 = tpu.matmul %487, %489, %cst_306 {dimension_numbers = #tpu.dot_dimension_numbers<[1], [0], [0], [1], [0, 0, 1, 1], [], []>} : vector<64x32xf32>, vector<32x8xf32>, vector<64x8xf32> -> vector<64x8xf32>
    %c24_307 = arith.constant 24 : index
    %c32_308 = arith.constant 32 : index
    %c0_309 = arith.constant 0 : index
    %491 = vector.load %arg7[%c24_307, %c32_308, %c0_309] : memref<36x40x8xf32, #tpu.memory_space<vmem>>, vector<1x1x8xf32>
    %492 = vector.shape_cast %491 : vector<1x1x8xf32> to vector<1x8xf32>
    %493 = vector.broadcast %492 : vector<1x8xf32> to vector<64x8xf32>
    %494 = arith.addf %490, %493 : vector<64x8xf32>
    %c28 = arith.constant 28 : index
    %c0_310 = arith.constant 0 : index
    %c0_311 = arith.constant 0 : index
    %495 = vector.load %arg7[%c28, %c0_310, %c0_311] : memref<36x40x8xf32, #tpu.memory_space<vmem>>, vector<1x32x8xf32>
    %496 = vector.shape_cast %495 : vector<1x32x8xf32> to vector<32x8xf32>
    %cst_312 = arith.constant dense<0.000000e+00> : vector<64x8xf32>
    %497 = tpu.matmul %487, %496, %cst_312 {dimension_numbers = #tpu.dot_dimension_numbers<[1], [0], [0], [1], [0, 0, 1, 1], [], []>} : vector<64x32xf32>, vector<32x8xf32>, vector<64x8xf32> -> vector<64x8xf32>
    %c28_313 = arith.constant 28 : index
    %c32_314 = arith.constant 32 : index
    %c0_315 = arith.constant 0 : index
    %498 = vector.load %arg7[%c28_313, %c32_314, %c0_315] : memref<36x40x8xf32, #tpu.memory_space<vmem>>, vector<1x1x8xf32>
    %499 = vector.shape_cast %498 : vector<1x1x8xf32> to vector<1x8xf32>
    %500 = vector.broadcast %499 : vector<1x8xf32> to vector<64x8xf32>
    %501 = arith.addf %497, %500 : vector<64x8xf32>
    %c32_316 = arith.constant 32 : index
    %c0_317 = arith.constant 0 : index
    %c0_318 = arith.constant 0 : index
    %502 = vector.load %arg7[%c32_316, %c0_317, %c0_318] : memref<36x40x8xf32, #tpu.memory_space<vmem>>, vector<1x32x8xf32>
    %503 = vector.shape_cast %502 : vector<1x32x8xf32> to vector<32x8xf32>
    %cst_319 = arith.constant dense<0.000000e+00> : vector<64x8xf32>
    %504 = tpu.matmul %487, %503, %cst_319 {dimension_numbers = #tpu.dot_dimension_numbers<[1], [0], [0], [1], [0, 0, 1, 1], [], []>} : vector<64x32xf32>, vector<32x8xf32>, vector<64x8xf32> -> vector<64x8xf32>
    %c32_320 = arith.constant 32 : index
    %c32_321 = arith.constant 32 : index
    %c0_322 = arith.constant 0 : index
    %505 = vector.load %arg7[%c32_320, %c32_321, %c0_322] : memref<36x40x8xf32, #tpu.memory_space<vmem>>, vector<1x1x8xf32>
    %506 = vector.shape_cast %505 : vector<1x1x8xf32> to vector<1x8xf32>
    %507 = vector.broadcast %506 : vector<1x8xf32> to vector<64x8xf32>
    %508 = arith.addf %504, %507 : vector<64x8xf32>
    "tpu.trace_start"() <{level = 10 : i32, message = "qd,kd->qk"}> : () -> ()
    %cst_323 = arith.constant dense<0.000000e+00> : vector<64x64xf32>
    %509 = tpu.matmul %494, %501, %cst_323 {dimension_numbers = #tpu.dot_dimension_numbers<[1], [1], [0], [0], [0, 0, 1, 0], [], []>} : vector<64x8xf32>, vector<64x8xf32>, vector<64x64xf32> -> vector<64x64xf32>
    "tpu.trace_stop"() : () -> ()
    %cst_324 = arith.constant 0.353553385 : f32
    %510 = vector.broadcast %cst_324 : f32 to vector<64x64xf32>
    %511 = arith.mulf %509, %510 : vector<64x64xf32>
    %512 = arith.addf %511, %0 : vector<64x64xf32>
    %cst_325 = arith.constant dense<0xFF800000> : vector<64xf32>
    %513 = vector.multi_reduction <maximumf>, %512, %cst_325 [1] : vector<64x64xf32> to vector<64xf32>
    %514 = vector.shape_cast %513 : vector<64xf32> to vector<64x1xf32>
    %515 = vector.broadcast %514 : vector<64x1xf32> to vector<64x64xf32>
    %516 = arith.subf %512, %515 : vector<64x64xf32>
    %517 = math.exp %516 : vector<64x64xf32>
    %cst_326 = arith.constant dense<0.000000e+00> : vector<64xf32>
    %518 = vector.multi_reduction <add>, %517, %cst_326 [1] : vector<64x64xf32> to vector<64xf32>
    %519 = vector.shape_cast %518 : vector<64xf32> to vector<64x1xf32>
    %520 = tpu.reciprocal %519 {approx = true} : vector<64x1xf32> -> vector<64x1xf32>
    %521 = vector.broadcast %520 : vector<64x1xf32> to vector<64x64xf32>
    %522 = arith.mulf %517, %521 : vector<64x64xf32>
    %cst_327 = arith.constant dense<0.000000e+00> : vector<64x8xf32>
    %523 = tpu.matmul %522, %508, %cst_327 {dimension_numbers = #tpu.dot_dimension_numbers<[1], [0], [0], [1], [0, 0, 1, 1], [], []>} : vector<64x64xf32>, vector<64x8xf32>, vector<64x8xf32> -> vector<64x8xf32>
    %c8_328 = arith.constant 8 : index
    %c0_329 = arith.constant 0 : index
    %c0_330 = arith.constant 0 : index
    %524 = vector.load %arg8[%c8_328, %c0_329, %c0_330] : memref<12x8x32xf32, #tpu.memory_space<vmem>>, vector<1x8x32xf32>
    %525 = vector.shape_cast %524 : vector<1x8x32xf32> to vector<8x32xf32>
    %cst_331 = arith.constant dense<0.000000e+00> : vector<64x32xf32>
    %526 = tpu.matmul %523, %525, %cst_331 {dimension_numbers = #tpu.dot_dimension_numbers<[1], [0], [0], [1], [0, 0, 1, 1], [], []>} : vector<64x8xf32>, vector<8x32xf32>, vector<64x32xf32> -> vector<64x32xf32>
    %c25 = arith.constant 25 : index
    %c0_332 = arith.constant 0 : index
    %c0_333 = arith.constant 0 : index
    %527 = vector.load %arg7[%c25, %c0_332, %c0_333] : memref<36x40x8xf32, #tpu.memory_space<vmem>>, vector<1x32x8xf32>
    %528 = vector.shape_cast %527 : vector<1x32x8xf32> to vector<32x8xf32>
    %cst_334 = arith.constant dense<0.000000e+00> : vector<64x8xf32>
    %529 = tpu.matmul %487, %528, %cst_334 {dimension_numbers = #tpu.dot_dimension_numbers<[1], [0], [0], [1], [0, 0, 1, 1], [], []>} : vector<64x32xf32>, vector<32x8xf32>, vector<64x8xf32> -> vector<64x8xf32>
    %c25_335 = arith.constant 25 : index
    %c32_336 = arith.constant 32 : index
    %c0_337 = arith.constant 0 : index
    %530 = vector.load %arg7[%c25_335, %c32_336, %c0_337] : memref<36x40x8xf32, #tpu.memory_space<vmem>>, vector<1x1x8xf32>
    %531 = vector.shape_cast %530 : vector<1x1x8xf32> to vector<1x8xf32>
    %532 = vector.broadcast %531 : vector<1x8xf32> to vector<64x8xf32>
    %533 = arith.addf %529, %532 : vector<64x8xf32>
    %c29 = arith.constant 29 : index
    %c0_338 = arith.constant 0 : index
    %c0_339 = arith.constant 0 : index
    %534 = vector.load %arg7[%c29, %c0_338, %c0_339] : memref<36x40x8xf32, #tpu.memory_space<vmem>>, vector<1x32x8xf32>
    %535 = vector.shape_cast %534 : vector<1x32x8xf32> to vector<32x8xf32>
    %cst_340 = arith.constant dense<0.000000e+00> : vector<64x8xf32>
    %536 = tpu.matmul %487, %535, %cst_340 {dimension_numbers = #tpu.dot_dimension_numbers<[1], [0], [0], [1], [0, 0, 1, 1], [], []>} : vector<64x32xf32>, vector<32x8xf32>, vector<64x8xf32> -> vector<64x8xf32>
    %c29_341 = arith.constant 29 : index
    %c32_342 = arith.constant 32 : index
    %c0_343 = arith.constant 0 : index
    %537 = vector.load %arg7[%c29_341, %c32_342, %c0_343] : memref<36x40x8xf32, #tpu.memory_space<vmem>>, vector<1x1x8xf32>
    %538 = vector.shape_cast %537 : vector<1x1x8xf32> to vector<1x8xf32>
    %539 = vector.broadcast %538 : vector<1x8xf32> to vector<64x8xf32>
    %540 = arith.addf %536, %539 : vector<64x8xf32>
    %c33 = arith.constant 33 : index
    %c0_344 = arith.constant 0 : index
    %c0_345 = arith.constant 0 : index
    %541 = vector.load %arg7[%c33, %c0_344, %c0_345] : memref<36x40x8xf32, #tpu.memory_space<vmem>>, vector<1x32x8xf32>
    %542 = vector.shape_cast %541 : vector<1x32x8xf32> to vector<32x8xf32>
    %cst_346 = arith.constant dense<0.000000e+00> : vector<64x8xf32>
    %543 = tpu.matmul %487, %542, %cst_346 {dimension_numbers = #tpu.dot_dimension_numbers<[1], [0], [0], [1], [0, 0, 1, 1], [], []>} : vector<64x32xf32>, vector<32x8xf32>, vector<64x8xf32> -> vector<64x8xf32>
    %c33_347 = arith.constant 33 : index
    %c32_348 = arith.constant 32 : index
    %c0_349 = arith.constant 0 : index
    %544 = vector.load %arg7[%c33_347, %c32_348, %c0_349] : memref<36x40x8xf32, #tpu.memory_space<vmem>>, vector<1x1x8xf32>
    %545 = vector.shape_cast %544 : vector<1x1x8xf32> to vector<1x8xf32>
    %546 = vector.broadcast %545 : vector<1x8xf32> to vector<64x8xf32>
    %547 = arith.addf %543, %546 : vector<64x8xf32>
    "tpu.trace_start"() <{level = 10 : i32, message = "qd,kd->qk"}> : () -> ()
    %cst_350 = arith.constant dense<0.000000e+00> : vector<64x64xf32>
    %548 = tpu.matmul %533, %540, %cst_350 {dimension_numbers = #tpu.dot_dimension_numbers<[1], [1], [0], [0], [0, 0, 1, 0], [], []>} : vector<64x8xf32>, vector<64x8xf32>, vector<64x64xf32> -> vector<64x64xf32>
    "tpu.trace_stop"() : () -> ()
    %cst_351 = arith.constant 0.353553385 : f32
    %549 = vector.broadcast %cst_351 : f32 to vector<64x64xf32>
    %550 = arith.mulf %548, %549 : vector<64x64xf32>
    %551 = arith.addf %550, %0 : vector<64x64xf32>
    %cst_352 = arith.constant dense<0xFF800000> : vector<64xf32>
    %552 = vector.multi_reduction <maximumf>, %551, %cst_352 [1] : vector<64x64xf32> to vector<64xf32>
    %553 = vector.shape_cast %552 : vector<64xf32> to vector<64x1xf32>
    %554 = vector.broadcast %553 : vector<64x1xf32> to vector<64x64xf32>
    %555 = arith.subf %551, %554 : vector<64x64xf32>
    %556 = math.exp %555 : vector<64x64xf32>
    %cst_353 = arith.constant dense<0.000000e+00> : vector<64xf32>
    %557 = vector.multi_reduction <add>, %556, %cst_353 [1] : vector<64x64xf32> to vector<64xf32>
    %558 = vector.shape_cast %557 : vector<64xf32> to vector<64x1xf32>
    %559 = tpu.reciprocal %558 {approx = true} : vector<64x1xf32> -> vector<64x1xf32>
    %560 = vector.broadcast %559 : vector<64x1xf32> to vector<64x64xf32>
    %561 = arith.mulf %556, %560 : vector<64x64xf32>
    %cst_354 = arith.constant dense<0.000000e+00> : vector<64x8xf32>
    %562 = tpu.matmul %561, %547, %cst_354 {dimension_numbers = #tpu.dot_dimension_numbers<[1], [0], [0], [1], [0, 0, 1, 1], [], []>} : vector<64x64xf32>, vector<64x8xf32>, vector<64x8xf32> -> vector<64x8xf32>
    %c9_355 = arith.constant 9 : index
    %c0_356 = arith.constant 0 : index
    %c0_357 = arith.constant 0 : index
    %563 = vector.load %arg8[%c9_355, %c0_356, %c0_357] : memref<12x8x32xf32, #tpu.memory_space<vmem>>, vector<1x8x32xf32>
    %564 = vector.shape_cast %563 : vector<1x8x32xf32> to vector<8x32xf32>
    %cst_358 = arith.constant dense<0.000000e+00> : vector<64x32xf32>
    %565 = tpu.matmul %562, %564, %cst_358 {dimension_numbers = #tpu.dot_dimension_numbers<[1], [0], [0], [1], [0, 0, 1, 1], [], []>} : vector<64x8xf32>, vector<8x32xf32>, vector<64x32xf32> -> vector<64x32xf32>
    %566 = arith.addf %526, %565 : vector<64x32xf32>
    %c26 = arith.constant 26 : index
    %c0_359 = arith.constant 0 : index
    %c0_360 = arith.constant 0 : index
    %567 = vector.load %arg7[%c26, %c0_359, %c0_360] : memref<36x40x8xf32, #tpu.memory_space<vmem>>, vector<1x32x8xf32>
    %568 = vector.shape_cast %567 : vector<1x32x8xf32> to vector<32x8xf32>
    %cst_361 = arith.constant dense<0.000000e+00> : vector<64x8xf32>
    %569 = tpu.matmul %487, %568, %cst_361 {dimension_numbers = #tpu.dot_dimension_numbers<[1], [0], [0], [1], [0, 0, 1, 1], [], []>} : vector<64x32xf32>, vector<32x8xf32>, vector<64x8xf32> -> vector<64x8xf32>
    %c26_362 = arith.constant 26 : index
    %c32_363 = arith.constant 32 : index
    %c0_364 = arith.constant 0 : index
    %570 = vector.load %arg7[%c26_362, %c32_363, %c0_364] : memref<36x40x8xf32, #tpu.memory_space<vmem>>, vector<1x1x8xf32>
    %571 = vector.shape_cast %570 : vector<1x1x8xf32> to vector<1x8xf32>
    %572 = vector.broadcast %571 : vector<1x8xf32> to vector<64x8xf32>
    %573 = arith.addf %569, %572 : vector<64x8xf32>
    %c30 = arith.constant 30 : index
    %c0_365 = arith.constant 0 : index
    %c0_366 = arith.constant 0 : index
    %574 = vector.load %arg7[%c30, %c0_365, %c0_366] : memref<36x40x8xf32, #tpu.memory_space<vmem>>, vector<1x32x8xf32>
    %575 = vector.shape_cast %574 : vector<1x32x8xf32> to vector<32x8xf32>
    %cst_367 = arith.constant dense<0.000000e+00> : vector<64x8xf32>
    %576 = tpu.matmul %487, %575, %cst_367 {dimension_numbers = #tpu.dot_dimension_numbers<[1], [0], [0], [1], [0, 0, 1, 1], [], []>} : vector<64x32xf32>, vector<32x8xf32>, vector<64x8xf32> -> vector<64x8xf32>
    %c30_368 = arith.constant 30 : index
    %c32_369 = arith.constant 32 : index
    %c0_370 = arith.constant 0 : index
    %577 = vector.load %arg7[%c30_368, %c32_369, %c0_370] : memref<36x40x8xf32, #tpu.memory_space<vmem>>, vector<1x1x8xf32>
    %578 = vector.shape_cast %577 : vector<1x1x8xf32> to vector<1x8xf32>
    %579 = vector.broadcast %578 : vector<1x8xf32> to vector<64x8xf32>
    %580 = arith.addf %576, %579 : vector<64x8xf32>
    %c34 = arith.constant 34 : index
    %c0_371 = arith.constant 0 : index
    %c0_372 = arith.constant 0 : index
    %581 = vector.load %arg7[%c34, %c0_371, %c0_372] : memref<36x40x8xf32, #tpu.memory_space<vmem>>, vector<1x32x8xf32>
    %582 = vector.shape_cast %581 : vector<1x32x8xf32> to vector<32x8xf32>
    %cst_373 = arith.constant dense<0.000000e+00> : vector<64x8xf32>
    %583 = tpu.matmul %487, %582, %cst_373 {dimension_numbers = #tpu.dot_dimension_numbers<[1], [0], [0], [1], [0, 0, 1, 1], [], []>} : vector<64x32xf32>, vector<32x8xf32>, vector<64x8xf32> -> vector<64x8xf32>
    %c34_374 = arith.constant 34 : index
    %c32_375 = arith.constant 32 : index
    %c0_376 = arith.constant 0 : index
    %584 = vector.load %arg7[%c34_374, %c32_375, %c0_376] : memref<36x40x8xf32, #tpu.memory_space<vmem>>, vector<1x1x8xf32>
    %585 = vector.shape_cast %584 : vector<1x1x8xf32> to vector<1x8xf32>
    %586 = vector.broadcast %585 : vector<1x8xf32> to vector<64x8xf32>
    %587 = arith.addf %583, %586 : vector<64x8xf32>
    "tpu.trace_start"() <{level = 10 : i32, message = "qd,kd->qk"}> : () -> ()
    %cst_377 = arith.constant dense<0.000000e+00> : vector<64x64xf32>
    %588 = tpu.matmul %573, %580, %cst_377 {dimension_numbers = #tpu.dot_dimension_numbers<[1], [1], [0], [0], [0, 0, 1, 0], [], []>} : vector<64x8xf32>, vector<64x8xf32>, vector<64x64xf32> -> vector<64x64xf32>
    "tpu.trace_stop"() : () -> ()
    %cst_378 = arith.constant 0.353553385 : f32
    %589 = vector.broadcast %cst_378 : f32 to vector<64x64xf32>
    %590 = arith.mulf %588, %589 : vector<64x64xf32>
    %591 = arith.addf %590, %0 : vector<64x64xf32>
    %cst_379 = arith.constant dense<0xFF800000> : vector<64xf32>
    %592 = vector.multi_reduction <maximumf>, %591, %cst_379 [1] : vector<64x64xf32> to vector<64xf32>
    %593 = vector.shape_cast %592 : vector<64xf32> to vector<64x1xf32>
    %594 = vector.broadcast %593 : vector<64x1xf32> to vector<64x64xf32>
    %595 = arith.subf %591, %594 : vector<64x64xf32>
    %596 = math.exp %595 : vector<64x64xf32>
    %cst_380 = arith.constant dense<0.000000e+00> : vector<64xf32>
    %597 = vector.multi_reduction <add>, %596, %cst_380 [1] : vector<64x64xf32> to vector<64xf32>
    %598 = vector.shape_cast %597 : vector<64xf32> to vector<64x1xf32>
    %599 = tpu.reciprocal %598 {approx = true} : vector<64x1xf32> -> vector<64x1xf32>
    %600 = vector.broadcast %599 : vector<64x1xf32> to vector<64x64xf32>
    %601 = arith.mulf %596, %600 : vector<64x64xf32>
    %cst_381 = arith.constant dense<0.000000e+00> : vector<64x8xf32>
    %602 = tpu.matmul %601, %587, %cst_381 {dimension_numbers = #tpu.dot_dimension_numbers<[1], [0], [0], [1], [0, 0, 1, 1], [], []>} : vector<64x64xf32>, vector<64x8xf32>, vector<64x8xf32> -> vector<64x8xf32>
    %c10_382 = arith.constant 10 : index
    %c0_383 = arith.constant 0 : index
    %c0_384 = arith.constant 0 : index
    %603 = vector.load %arg8[%c10_382, %c0_383, %c0_384] : memref<12x8x32xf32, #tpu.memory_space<vmem>>, vector<1x8x32xf32>
    %604 = vector.shape_cast %603 : vector<1x8x32xf32> to vector<8x32xf32>
    %cst_385 = arith.constant dense<0.000000e+00> : vector<64x32xf32>
    %605 = tpu.matmul %602, %604, %cst_385 {dimension_numbers = #tpu.dot_dimension_numbers<[1], [0], [0], [1], [0, 0, 1, 1], [], []>} : vector<64x8xf32>, vector<8x32xf32>, vector<64x32xf32> -> vector<64x32xf32>
    %606 = arith.addf %566, %605 : vector<64x32xf32>
    %c27 = arith.constant 27 : index
    %c0_386 = arith.constant 0 : index
    %c0_387 = arith.constant 0 : index
    %607 = vector.load %arg7[%c27, %c0_386, %c0_387] : memref<36x40x8xf32, #tpu.memory_space<vmem>>, vector<1x32x8xf32>
    %608 = vector.shape_cast %607 : vector<1x32x8xf32> to vector<32x8xf32>
    %cst_388 = arith.constant dense<0.000000e+00> : vector<64x8xf32>
    %609 = tpu.matmul %487, %608, %cst_388 {dimension_numbers = #tpu.dot_dimension_numbers<[1], [0], [0], [1], [0, 0, 1, 1], [], []>} : vector<64x32xf32>, vector<32x8xf32>, vector<64x8xf32> -> vector<64x8xf32>
    %c27_389 = arith.constant 27 : index
    %c32_390 = arith.constant 32 : index
    %c0_391 = arith.constant 0 : index
    %610 = vector.load %arg7[%c27_389, %c32_390, %c0_391] : memref<36x40x8xf32, #tpu.memory_space<vmem>>, vector<1x1x8xf32>
    %611 = vector.shape_cast %610 : vector<1x1x8xf32> to vector<1x8xf32>
    %612 = vector.broadcast %611 : vector<1x8xf32> to vector<64x8xf32>
    %613 = arith.addf %609, %612 : vector<64x8xf32>
    %c31 = arith.constant 31 : index
    %c0_392 = arith.constant 0 : index
    %c0_393 = arith.constant 0 : index
    %614 = vector.load %arg7[%c31, %c0_392, %c0_393] : memref<36x40x8xf32, #tpu.memory_space<vmem>>, vector<1x32x8xf32>
    %615 = vector.shape_cast %614 : vector<1x32x8xf32> to vector<32x8xf32>
    %cst_394 = arith.constant dense<0.000000e+00> : vector<64x8xf32>
    %616 = tpu.matmul %487, %615, %cst_394 {dimension_numbers = #tpu.dot_dimension_numbers<[1], [0], [0], [1], [0, 0, 1, 1], [], []>} : vector<64x32xf32>, vector<32x8xf32>, vector<64x8xf32> -> vector<64x8xf32>
    %c31_395 = arith.constant 31 : index
    %c32_396 = arith.constant 32 : index
    %c0_397 = arith.constant 0 : index
    %617 = vector.load %arg7[%c31_395, %c32_396, %c0_397] : memref<36x40x8xf32, #tpu.memory_space<vmem>>, vector<1x1x8xf32>
    %618 = vector.shape_cast %617 : vector<1x1x8xf32> to vector<1x8xf32>
    %619 = vector.broadcast %618 : vector<1x8xf32> to vector<64x8xf32>
    %620 = arith.addf %616, %619 : vector<64x8xf32>
    %c35 = arith.constant 35 : index
    %c0_398 = arith.constant 0 : index
    %c0_399 = arith.constant 0 : index
    %621 = vector.load %arg7[%c35, %c0_398, %c0_399] : memref<36x40x8xf32, #tpu.memory_space<vmem>>, vector<1x32x8xf32>
    %622 = vector.shape_cast %621 : vector<1x32x8xf32> to vector<32x8xf32>
    %cst_400 = arith.constant dense<0.000000e+00> : vector<64x8xf32>
    %623 = tpu.matmul %487, %622, %cst_400 {dimension_numbers = #tpu.dot_dimension_numbers<[1], [0], [0], [1], [0, 0, 1, 1], [], []>} : vector<64x32xf32>, vector<32x8xf32>, vector<64x8xf32> -> vector<64x8xf32>
    %c35_401 = arith.constant 35 : index
    %c32_402 = arith.constant 32 : index
    %c0_403 = arith.constant 0 : index
    %624 = vector.load %arg7[%c35_401, %c32_402, %c0_403] : memref<36x40x8xf32, #tpu.memory_space<vmem>>, vector<1x1x8xf32>
    %625 = vector.shape_cast %624 : vector<1x1x8xf32> to vector<1x8xf32>
    %626 = vector.broadcast %625 : vector<1x8xf32> to vector<64x8xf32>
    %627 = arith.addf %623, %626 : vector<64x8xf32>
    "tpu.trace_start"() <{level = 10 : i32, message = "qd,kd->qk"}> : () -> ()
    %cst_404 = arith.constant dense<0.000000e+00> : vector<64x64xf32>
    %628 = tpu.matmul %613, %620, %cst_404 {dimension_numbers = #tpu.dot_dimension_numbers<[1], [1], [0], [0], [0, 0, 1, 0], [], []>} : vector<64x8xf32>, vector<64x8xf32>, vector<64x64xf32> -> vector<64x64xf32>
    "tpu.trace_stop"() : () -> ()
    %cst_405 = arith.constant 0.353553385 : f32
    %629 = vector.broadcast %cst_405 : f32 to vector<64x64xf32>
    %630 = arith.mulf %628, %629 : vector<64x64xf32>
    %631 = arith.addf %630, %0 : vector<64x64xf32>
    %cst_406 = arith.constant dense<0xFF800000> : vector<64xf32>
    %632 = vector.multi_reduction <maximumf>, %631, %cst_406 [1] : vector<64x64xf32> to vector<64xf32>
    %633 = vector.shape_cast %632 : vector<64xf32> to vector<64x1xf32>
    %634 = vector.broadcast %633 : vector<64x1xf32> to vector<64x64xf32>
    %635 = arith.subf %631, %634 : vector<64x64xf32>
    %636 = math.exp %635 : vector<64x64xf32>
    %cst_407 = arith.constant dense<0.000000e+00> : vector<64xf32>
    %637 = vector.multi_reduction <add>, %636, %cst_407 [1] : vector<64x64xf32> to vector<64xf32>
    %638 = vector.shape_cast %637 : vector<64xf32> to vector<64x1xf32>
    %639 = tpu.reciprocal %638 {approx = true} : vector<64x1xf32> -> vector<64x1xf32>
    %640 = vector.broadcast %639 : vector<64x1xf32> to vector<64x64xf32>
    %641 = arith.mulf %636, %640 : vector<64x64xf32>
    %cst_408 = arith.constant dense<0.000000e+00> : vector<64x8xf32>
    %642 = tpu.matmul %641, %627, %cst_408 {dimension_numbers = #tpu.dot_dimension_numbers<[1], [0], [0], [1], [0, 0, 1, 1], [], []>} : vector<64x64xf32>, vector<64x8xf32>, vector<64x8xf32> -> vector<64x8xf32>
    %c11_409 = arith.constant 11 : index
    %c0_410 = arith.constant 0 : index
    %c0_411 = arith.constant 0 : index
    %643 = vector.load %arg8[%c11_409, %c0_410, %c0_411] : memref<12x8x32xf32, #tpu.memory_space<vmem>>, vector<1x8x32xf32>
    %644 = vector.shape_cast %643 : vector<1x8x32xf32> to vector<8x32xf32>
    %cst_412 = arith.constant dense<0.000000e+00> : vector<64x32xf32>
    %645 = tpu.matmul %642, %644, %cst_412 {dimension_numbers = #tpu.dot_dimension_numbers<[1], [0], [0], [1], [0, 0, 1, 1], [], []>} : vector<64x8xf32>, vector<8x32xf32>, vector<64x32xf32> -> vector<64x32xf32>
    %646 = arith.addf %606, %645 : vector<64x32xf32>
    %c2_413 = arith.constant 2 : index
    %c0_414 = arith.constant 0 : index
    %c0_415 = arith.constant 0 : index
    %647 = vector.load %arg11[%c2_413, %c0_414, %c0_415] : memref<3x8x32xf32, #tpu.memory_space<vmem>>, vector<1x1x32xf32>
    %648 = vector.shape_cast %647 : vector<1x1x32xf32> to vector<1x32xf32>
    %649 = vector.broadcast %648 : vector<1x32xf32> to vector<64x32xf32>
    %650 = arith.addf %646, %649 : vector<64x32xf32>
    %651 = arith.addf %487, %650 : vector<64x32xf32>
    %c2_416 = arith.constant 2 : index
    %c2_417 = arith.constant 2 : index
    %c0_418 = arith.constant 0 : index
    %652 = vector.load %arg11[%c2_416, %c2_417, %c0_418] : memref<3x8x32xf32, #tpu.memory_space<vmem>>, vector<1x1x32xf32>
    %653 = vector.shape_cast %652 : vector<1x1x32xf32> to vector<1x32xf32>
    %c2_419 = arith.constant 2 : index
    %c3_420 = arith.constant 3 : index
    %c0_421 = arith.constant 0 : index
    %654 = vector.load %arg11[%c2_419, %c3_420, %c0_421] : memref<3x8x32xf32, #tpu.memory_space<vmem>>, vector<1x1x32xf32>
    %655 = vector.shape_cast %654 : vector<1x1x32xf32> to vector<1x32xf32>
    %cst_422 = arith.constant dense<0.000000e+00> : vector<64xf32>
    %656 = vector.multi_reduction <add>, %651, %cst_422 [1] : vector<64x32xf32> to vector<64xf32>
    %657 = vector.shape_cast %656 : vector<64xf32> to vector<64x1xf32>
    %cst_423 = arith.constant 3.200000e+01 : f32
    %658 = vector.broadcast %cst_423 : f32 to vector<64x1xf32>
    %659 = arith.divf %657, %658 : vector<64x1xf32>
    %660 = vector.broadcast %659 : vector<64x1xf32> to vector<64x32xf32>
    %661 = arith.subf %651, %660 : vector<64x32xf32>
    %662 = arith.mulf %661, %661 : vector<64x32xf32>
    %cst_424 = arith.constant dense<0.000000e+00> : vector<64xf32>
    %663 = vector.multi_reduction <add>, %662, %cst_424 [1] : vector<64x32xf32> to vector<64xf32>
    %664 = vector.shape_cast %663 : vector<64xf32> to vector<64x1xf32>
    %cst_425 = arith.constant 3.200000e+01 : f32
    %665 = vector.broadcast %cst_425 : f32 to vector<64x1xf32>
    %666 = arith.divf %664, %665 : vector<64x1xf32>
    %667 = vector.broadcast %659 : vector<64x1xf32> to vector<64x32xf32>
    %668 = arith.subf %651, %667 : vector<64x32xf32>
    %cst_426 = arith.constant 9.99999974E-6 : f32
    %669 = vector.broadcast %cst_426 : f32 to vector<64x1xf32>
    %670 = arith.addf %666, %669 : vector<64x1xf32>
    %671 = math.rsqrt %670 : vector<64x1xf32>
    %672 = vector.broadcast %671 : vector<64x1xf32> to vector<64x32xf32>
    %673 = arith.mulf %668, %672 : vector<64x32xf32>
    %674 = vector.broadcast %653 : vector<1x32xf32> to vector<64x32xf32>
    %675 = arith.mulf %673, %674 : vector<64x32xf32>
    %676 = vector.broadcast %655 : vector<1x32xf32> to vector<64x32xf32>
    %677 = arith.addf %675, %676 : vector<64x32xf32>
    %c2_427 = arith.constant 2 : index
    %c0_428 = arith.constant 0 : index
    %c0_429 = arith.constant 0 : index
    %678 = vector.load %arg9[%c2_427, %c0_428, %c0_429] : memref<3x40x64xf32, #tpu.memory_space<vmem>>, vector<1x32x64xf32>
    %679 = vector.shape_cast %678 : vector<1x32x64xf32> to vector<32x64xf32>
    %cst_430 = arith.constant dense<0.000000e+00> : vector<64x64xf32>
    %680 = tpu.matmul %677, %679, %cst_430 {dimension_numbers = #tpu.dot_dimension_numbers<[1], [0], [0], [1], [0, 0, 1, 1], [], []>} : vector<64x32xf32>, vector<32x64xf32>, vector<64x64xf32> -> vector<64x64xf32>
    %c2_431 = arith.constant 2 : index
    %c32_432 = arith.constant 32 : index
    %c0_433 = arith.constant 0 : index
    %681 = vector.load %arg9[%c2_431, %c32_432, %c0_433] : memref<3x40x64xf32, #tpu.memory_space<vmem>>, vector<1x1x64xf32>
    %682 = vector.shape_cast %681 : vector<1x1x64xf32> to vector<1x64xf32>
    %683 = vector.broadcast %682 : vector<1x64xf32> to vector<64x64xf32>
    %684 = arith.addf %680, %683 : vector<64x64xf32>
    %cst_434 = arith.constant 0.000000e+00 : f32
    %685 = vector.broadcast %cst_434 : f32 to vector<64x64xf32>
    %686 = arith.maximumf %684, %685 : vector<64x64xf32>
    %c2_435 = arith.constant 2 : index
    %c0_436 = arith.constant 0 : index
    %c0_437 = arith.constant 0 : index
    %687 = vector.load %arg10[%c2_435, %c0_436, %c0_437] : memref<3x64x32xf32, #tpu.memory_space<vmem>>, vector<1x64x32xf32>
    %688 = vector.shape_cast %687 : vector<1x64x32xf32> to vector<64x32xf32>
    %cst_438 = arith.constant dense<0.000000e+00> : vector<64x32xf32>
    %689 = tpu.matmul %686, %688, %cst_438 {dimension_numbers = #tpu.dot_dimension_numbers<[1], [0], [0], [1], [0, 0, 1, 1], [], []>} : vector<64x64xf32>, vector<64x32xf32>, vector<64x32xf32> -> vector<64x32xf32>
    %c2_439 = arith.constant 2 : index
    %c1_440 = arith.constant 1 : index
    %c0_441 = arith.constant 0 : index
    %690 = vector.load %arg11[%c2_439, %c1_440, %c0_441] : memref<3x8x32xf32, #tpu.memory_space<vmem>>, vector<1x1x32xf32>
    %691 = vector.shape_cast %690 : vector<1x1x32xf32> to vector<1x32xf32>
    %692 = vector.broadcast %691 : vector<1x32xf32> to vector<64x32xf32>
    %693 = arith.addf %689, %692 : vector<64x32xf32>
    %694 = arith.addf %677, %693 : vector<64x32xf32>
    %c2_442 = arith.constant 2 : index
    %c4_443 = arith.constant 4 : index
    %c0_444 = arith.constant 0 : index
    %695 = vector.load %arg11[%c2_442, %c4_443, %c0_444] : memref<3x8x32xf32, #tpu.memory_space<vmem>>, vector<1x1x32xf32>
    %696 = vector.shape_cast %695 : vector<1x1x32xf32> to vector<1x32xf32>
    %c2_445 = arith.constant 2 : index
    %c5_446 = arith.constant 5 : index
    %c0_447 = arith.constant 0 : index
    %697 = vector.load %arg11[%c2_445, %c5_446, %c0_447] : memref<3x8x32xf32, #tpu.memory_space<vmem>>, vector<1x1x32xf32>
    %698 = vector.shape_cast %697 : vector<1x1x32xf32> to vector<1x32xf32>
    %cst_448 = arith.constant dense<0.000000e+00> : vector<64xf32>
    %699 = vector.multi_reduction <add>, %694, %cst_448 [1] : vector<64x32xf32> to vector<64xf32>
    %700 = vector.shape_cast %699 : vector<64xf32> to vector<64x1xf32>
    %cst_449 = arith.constant 3.200000e+01 : f32
    %701 = vector.broadcast %cst_449 : f32 to vector<64x1xf32>
    %702 = arith.divf %700, %701 : vector<64x1xf32>
    %703 = vector.broadcast %702 : vector<64x1xf32> to vector<64x32xf32>
    %704 = arith.subf %694, %703 : vector<64x32xf32>
    %705 = arith.mulf %704, %704 : vector<64x32xf32>
    %cst_450 = arith.constant dense<0.000000e+00> : vector<64xf32>
    %706 = vector.multi_reduction <add>, %705, %cst_450 [1] : vector<64x32xf32> to vector<64xf32>
    %707 = vector.shape_cast %706 : vector<64xf32> to vector<64x1xf32>
    %cst_451 = arith.constant 3.200000e+01 : f32
    %708 = vector.broadcast %cst_451 : f32 to vector<64x1xf32>
    %709 = arith.divf %707, %708 : vector<64x1xf32>
    %710 = vector.broadcast %702 : vector<64x1xf32> to vector<64x32xf32>
    %711 = arith.subf %694, %710 : vector<64x32xf32>
    %cst_452 = arith.constant 9.99999974E-6 : f32
    %712 = vector.broadcast %cst_452 : f32 to vector<64x1xf32>
    %713 = arith.addf %709, %712 : vector<64x1xf32>
    %714 = math.rsqrt %713 : vector<64x1xf32>
    %715 = vector.broadcast %714 : vector<64x1xf32> to vector<64x32xf32>
    %716 = arith.mulf %711, %715 : vector<64x32xf32>
    %717 = vector.broadcast %696 : vector<1x32xf32> to vector<64x32xf32>
    %718 = arith.mulf %716, %717 : vector<64x32xf32>
    %719 = vector.broadcast %698 : vector<1x32xf32> to vector<64x32xf32>
    %720 = arith.addf %718, %719 : vector<64x32xf32>
    %c0_453 = arith.constant 0 : index
    %c0_454 = arith.constant 0 : index
    %c0_455 = arith.constant 0 : index
    %721 = vector.load %arg12[%c0_453, %c0_454, %c0_455] : memref<3x48x32xf32, #tpu.memory_space<vmem>>, vector<1x32x32xf32>
    %722 = vector.shape_cast %721 : vector<1x32x32xf32> to vector<32x32xf32>
    %cst_456 = arith.constant dense<0.000000e+00> : vector<64x32xf32>
    %723 = tpu.matmul %720, %722, %cst_456 {dimension_numbers = #tpu.dot_dimension_numbers<[1], [0], [0], [1], [0, 0, 1, 1], [], []>} : vector<64x32xf32>, vector<32x32xf32>, vector<64x32xf32> -> vector<64x32xf32>
    %c0_457 = arith.constant 0 : index
    %c32_458 = arith.constant 32 : index
    %c0_459 = arith.constant 0 : index
    %724 = vector.load %arg12[%c0_457, %c32_458, %c0_459] : memref<3x48x32xf32, #tpu.memory_space<vmem>>, vector<1x1x32xf32>
    %725 = vector.shape_cast %724 : vector<1x1x32xf32> to vector<1x32xf32>
    %726 = vector.broadcast %725 : vector<1x32xf32> to vector<64x32xf32>
    %727 = arith.addf %723, %726 : vector<64x32xf32>
    %728 = math.tanh %727 : vector<64x32xf32>
    %c0_460 = arith.constant 0 : index
    %c40 = arith.constant 40 : index
    %c0_461 = arith.constant 0 : index
    %729 = vector.load %arg12[%c0_460, %c40, %c0_461] : memref<3x48x32xf32, #tpu.memory_space<vmem>>, vector<1x1x32xf32>
    %730 = vector.shape_cast %729 : vector<1x1x32xf32> to vector<1x32xf32>
    %731 = vector.broadcast %730 : vector<1x32xf32> to vector<64x32xf32>
    %732 = arith.mulf %728, %731 : vector<64x32xf32>
    %cst_462 = arith.constant dense<0.000000e+00> : vector<64xf32>
    %733 = vector.multi_reduction <add>, %732, %cst_462 [1] : vector<64x32xf32> to vector<64xf32>
    %734 = vector.shape_cast %733 : vector<64xf32> to vector<64x1xf32>
    %735 = vector.shape_cast %734 : vector<64x1xf32> to vector<8x8x1xf32>
    %c0_463 = arith.constant 0 : index
    %c0_464 = arith.constant 0 : index
    %c0_465 = arith.constant 0 : index
    %736 = vector.load %arg3[%c0_463, %c0_464, %c0_465] : memref<8x8x1xf32, #tpu.memory_space<vmem>>, vector<8x8x1xf32>
    %737 = vector.shape_cast %736 : vector<8x8x1xf32> to vector<8x8x1xf32>
    %738 = arith.addf %735, %737 : vector<8x8x1xf32>
    %cst_466 = arith.constant dense<0xFF800000> : vector<8x1xf32>
    %739 = vector.multi_reduction <maximumf>, %738, %cst_466 [1] : vector<8x8x1xf32> to vector<8x1xf32>
    %740 = vector.shape_cast %739 : vector<8x1xf32> to vector<8x1x1xf32>
    %741 = vector.broadcast %740 : vector<8x1x1xf32> to vector<8x8x1xf32>
    %742 = arith.subf %738, %741 : vector<8x8x1xf32>
    %743 = math.exp %742 : vector<8x8x1xf32>
    %cst_467 = arith.constant dense<0.000000e+00> : vector<8x1xf32>
    %744 = vector.multi_reduction <add>, %743, %cst_467 [1] : vector<8x8x1xf32> to vector<8x1xf32>
    %745 = vector.shape_cast %744 : vector<8x1xf32> to vector<8x1x1xf32>
    %746 = tpu.reciprocal %745 {approx = true} : vector<8x1x1xf32> -> vector<8x1x1xf32>
    %747 = vector.broadcast %746 : vector<8x1x1xf32> to vector<8x8x1xf32>
    %748 = arith.mulf %743, %747 : vector<8x8x1xf32>
    %749 = vector.shape_cast %720 : vector<64x32xf32> to vector<8x8x32xf32>
    %750 = vector.broadcast %748 : vector<8x8x1xf32> to vector<8x8x32xf32>
    %751 = arith.mulf %750, %749 : vector<8x8x32xf32>
    %cst_468 = arith.constant dense<0.000000e+00> : vector<8x32xf32>
    %752 = vector.multi_reduction <add>, %751, %cst_468 [1] : vector<8x8x32xf32> to vector<8x32xf32>
    %c1_469 = arith.constant 1 : index
    %c0_470 = arith.constant 0 : index
    %c0_471 = arith.constant 0 : index
    %753 = vector.load %arg12[%c1_469, %c0_470, %c0_471] : memref<3x48x32xf32, #tpu.memory_space<vmem>>, vector<1x32x32xf32>
    %754 = vector.shape_cast %753 : vector<1x32x32xf32> to vector<32x32xf32>
    %cst_472 = arith.constant dense<0.000000e+00> : vector<8x32xf32>
    %755 = tpu.matmul %752, %754, %cst_472 {dimension_numbers = #tpu.dot_dimension_numbers<[1], [0], [0], [1], [0, 0, 1, 1], [], []>} : vector<8x32xf32>, vector<32x32xf32>, vector<8x32xf32> -> vector<8x32xf32>
    %c1_473 = arith.constant 1 : index
    %c32_474 = arith.constant 32 : index
    %c0_475 = arith.constant 0 : index
    %756 = vector.load %arg12[%c1_473, %c32_474, %c0_475] : memref<3x48x32xf32, #tpu.memory_space<vmem>>, vector<1x1x32xf32>
    %757 = vector.shape_cast %756 : vector<1x1x32xf32> to vector<1x32xf32>
    %758 = vector.broadcast %757 : vector<1x32xf32> to vector<8x32xf32>
    %759 = arith.addf %755, %758 : vector<8x32xf32>
    %760 = math.tanh %759 : vector<8x32xf32>
    %761 = vector.shape_cast %760 : vector<8x32xf32> to vector<2x4x32xf32>
    %c0_476 = arith.constant 0 : index
    %c0_477 = arith.constant 0 : index
    %c0_478 = arith.constant 0 : index
    %762 = vector.load %arg6[%c0_476, %c0_477, %c0_478] : memref<2x1x32xf32, #tpu.memory_space<vmem>>, vector<2x1x32xf32>
    %763 = vector.broadcast %762 : vector<2x1x32xf32> to vector<2x4x32xf32>
    %764 = arith.mulf %761, %763 : vector<2x4x32xf32>
    %cst_479 = arith.constant dense<0.000000e+00> : vector<2x4xf32>
    %765 = vector.multi_reduction <add>, %764, %cst_479 [2] : vector<2x4x32xf32> to vector<2x4xf32>
    %766 = vector.shape_cast %765 : vector<2x4xf32> to vector<2x4x1xf32>
    %c0_480 = arith.constant 0 : index
    %c0_481 = arith.constant 0 : index
    %c0_482 = arith.constant 0 : index
    %767 = vector.load %arg4[%c0_480, %c0_481, %c0_482] : memref<2x4x1xf32, #tpu.memory_space<vmem>>, vector<2x4x1xf32>
    %768 = vector.shape_cast %767 : vector<2x4x1xf32> to vector<2x4x1xf32>
    %769 = arith.addf %766, %768 : vector<2x4x1xf32>
    %cst_483 = arith.constant dense<0xFF800000> : vector<2x1xf32>
    %770 = vector.multi_reduction <maximumf>, %769, %cst_483 [1] : vector<2x4x1xf32> to vector<2x1xf32>
    %771 = vector.shape_cast %770 : vector<2x1xf32> to vector<2x1x1xf32>
    %772 = vector.broadcast %771 : vector<2x1x1xf32> to vector<2x4x1xf32>
    %773 = arith.subf %769, %772 : vector<2x4x1xf32>
    %774 = math.exp %773 : vector<2x4x1xf32>
    %cst_484 = arith.constant dense<0.000000e+00> : vector<2x1xf32>
    %775 = vector.multi_reduction <add>, %774, %cst_484 [1] : vector<2x4x1xf32> to vector<2x1xf32>
    %776 = vector.shape_cast %775 : vector<2x1xf32> to vector<2x1x1xf32>
    %777 = tpu.reciprocal %776 {approx = true} : vector<2x1x1xf32> -> vector<2x1x1xf32>
    %778 = vector.broadcast %777 : vector<2x1x1xf32> to vector<2x4x1xf32>
    %779 = arith.mulf %774, %778 : vector<2x4x1xf32>
    %780 = vector.shape_cast %752 : vector<8x32xf32> to vector<2x4x32xf32>
    %781 = vector.broadcast %779 : vector<2x4x1xf32> to vector<2x4x32xf32>
    %782 = arith.mulf %781, %780 : vector<2x4x32xf32>
    %cst_485 = arith.constant dense<0.000000e+00> : vector<2x32xf32>
    %783 = vector.multi_reduction <add>, %782, %cst_485 [1] : vector<2x4x32xf32> to vector<2x32xf32>
    %c2_486 = arith.constant 2 : index
    %c0_487 = arith.constant 0 : index
    %c0_488 = arith.constant 0 : index
    %784 = vector.load %arg12[%c2_486, %c0_487, %c0_488] : memref<3x48x32xf32, #tpu.memory_space<vmem>>, vector<1x32x32xf32>
    %785 = vector.shape_cast %784 : vector<1x32x32xf32> to vector<32x32xf32>
    %cst_489 = arith.constant dense<0.000000e+00> : vector<2x32xf32>
    %786 = tpu.matmul %783, %785, %cst_489 {dimension_numbers = #tpu.dot_dimension_numbers<[1], [0], [0], [1], [0, 0, 1, 1], [], []>} : vector<2x32xf32>, vector<32x32xf32>, vector<2x32xf32> -> vector<2x32xf32>
    %c2_490 = arith.constant 2 : index
    %c32_491 = arith.constant 32 : index
    %c0_492 = arith.constant 0 : index
    %787 = vector.load %arg12[%c2_490, %c32_491, %c0_492] : memref<3x48x32xf32, #tpu.memory_space<vmem>>, vector<1x1x32xf32>
    %788 = vector.shape_cast %787 : vector<1x1x32xf32> to vector<1x32xf32>
    %789 = vector.broadcast %788 : vector<1x32xf32> to vector<2x32xf32>
    %790 = arith.addf %786, %789 : vector<2x32xf32>
    %791 = math.tanh %790 : vector<2x32xf32>
    %c0_493 = arith.constant 0 : index
    %c0_494 = arith.constant 0 : index
    %792 = vector.load %arg13[%c0_493, %c0_494] : memref<40x128xf32, #tpu.memory_space<vmem>>, vector<32x128xf32>
    %cst_495 = arith.constant dense<0.000000e+00> : vector<2x128xf32>
    %793 = tpu.matmul %791, %792, %cst_495 {dimension_numbers = #tpu.dot_dimension_numbers<[1], [0], [0], [1], [0, 0, 1, 1], [], []>} : vector<2x32xf32>, vector<32x128xf32>, vector<2x128xf32> -> vector<2x128xf32>
    %c32_496 = arith.constant 32 : index
    %c0_497 = arith.constant 0 : index
    %794 = vector.load %arg13[%c32_496, %c0_497] : memref<40x128xf32, #tpu.memory_space<vmem>>, vector<1x128xf32>
    %795 = vector.broadcast %794 : vector<1x128xf32> to vector<2x128xf32>
    %796 = arith.addf %793, %795 : vector<2x128xf32>
    %c0_498 = arith.constant 0 : index
    %c0_499 = arith.constant 0 : index
    %797 = vector.load %arg14[%c0_498, %c0_499] : memref<2x128xf32, #tpu.memory_space<vmem>>, vector<2x128xf32>
    tpu.vector_store %arg14[%c0_498, %c0_499], %796 {strides = array<i32>} : memref<2x128xf32, #tpu.memory_space<vmem>>, vector<2x128xf32>,
    return
  }
}

</mosaic_0001>

<bundles_post_ra>
// kernel: eq.15
= control target key start
LH: loop header
LB: loop body
LE: loop exit
PB: predicated region body
PF: predicated region fallthrough
CT: control target
= control target key end

     0   :  { %s69_s10 = smov 56   ;;  %s70_s11 = smov 40   ;;  %vm3_vm0 = vcmask 64512   ;;  %vm9_vm1 = vcmask 523712   ;;  %vm15_vm2 = vcmask 458112   ;;  %vm21_vm3 = vcmask 392512   ;;  %s113_s0 = inlined_call_operand.vmem [shape: s32[8,8], index: 0, kind: input, shape index: {}]   ;;  %s114_s1 = inlined_call_operand.vmem [shape: s32[64], index: 1, kind: output, shape index: {}]  }
   0x1   :  { %v55_v0 = vld [vmem:[%s113_s0 + $0x7] sm:$0x1]   ;;  %v57_v1 = vld [vmem:[%s113_s0 + $0x5] sm:$0x1]   ;;  %v56_v2 = vld [vmem:[%s113_s0 + $0x6] sm:$0x1]  }
   0x2   :  { %7 = vrot.lane.b32.xlu0 %v55_v0, %s69_s10  ;;  %19 = vrot.lane.b32.xlu1 %v57_v1, %s70_s11  ;;  %v58_v3 = vld [vmem:[%s113_s0 + $0x4] sm:$0x1]   ;;  %v2_v4 = vld [vmem:[%s113_s0] sm:$0x1]   ;;  %s71_s18 = smov 48   ;;  %s72_s19 = smov 32  }
   0x3   :  { %4 = vst.msk [vmem:[#allocation0] sm:$0x1] %vm3_vm0, %v2_v4   ;;  %v59_v5 = vld [vmem:[%s113_s0 + $0x3] sm:$0x1]   ;;  %v60_v6 = vld [vmem:[%s113_s0 + $0x2] sm:$0x1]  }
   0x4   :  { %s73_s24 = smov 24   ;;  %s74_s25 = smov 16   ;;  %v61_v7 = vld [vmem:[%s113_s0 + $0x1] sm:$0x1]   ;;  %vm27_vm4 = vcmask 326912   ;;  %vm33_vm5 = vcmask 261312  }
   0x5   :  { %s75_s0 = smov 8   ;;  %vm39_vm6 = vcmask 195712   ;;  %vm45_vm7 = vcmask 130112  }
   0x6   :  { %13 = vrot.lane.b32.xlu0 %v56_v2, %s71_s18  ;;  %25 = vrot.lane.b32.xlu1 %v58_v3, %s72_s19 }
   0xa   :  { %31 = vrot.lane.b32.xlu0 %v59_v5, %s73_s24  ;;  %37 = vrot.lane.b32.xlu1 %v60_v6, %s74_s25 }
   0xe   :  { %43 = vrot.lane.b32.xlu0 %v61_v7, %s75_s0 }
  0x74   :  { %v8_v8 = vpop.permute.xlu0 %7   ;;  %v20_v9 = vpop.permute.xlu1 %19  }
  0x75   :  { %10 = vst.msk [vmem:[#allocation0] sm:$0x1] %vm9_vm1, %v8_v8  }
  0x78   :  { %v14_v10 = vpop.permute.xlu0 %13   ;;  %v26_v11 = vpop.permute.xlu1 %25  }
  0x79   :  { %16 = vst.msk [vmem:[#allocation0] sm:$0x1] %vm15_vm2, %v14_v10  }
  0x7a   :  { %22 = vst.msk [vmem:[#allocation0] sm:$0x1] %vm21_vm3, %v20_v9  }
  0x7b   :  { %28 = vst.msk [vmem:[#allocation0] sm:$0x1] %vm27_vm4, %v26_v11  }
  0x7c   :  { %v32_v12 = vpop.permute.xlu0 %31   ;;  %v38_v13 = vpop.permute.xlu1 %37  }
  0x7d   :  { %34 = vst.msk [vmem:[#allocation0] sm:$0x1] %vm33_vm5, %v32_v12  }
  0x7e   :  { %40 = vst.msk [vmem:[#allocation0] sm:$0x1] %vm39_vm6, %v38_v13  }
  0x80   :  { %v44_v14 = vpop.permute.xlu0 %43  }
  0x81   :  { %46 = vst.msk [vmem:[#allocation0] sm:$0x1] %vm45_vm7, %v44_v14  }
  0x88   :  { %v51_v15 = vld [vmem:[#allocation0] sm:$0x1] }
  0x89   :  { %54 = vst [vmem:[%s114_s1] sm:$0x1] %v51_v15 }

// kernel: dart_forward.1
= control target key start
LH: loop header
LB: loop body
LE: loop exit
PB: predicated region body
PF: predicated region fallthrough
CT: control target
= control target key end

     0   :  { %vm74_vm0 = vcmask 261120   ;;  %s18585_s0 = inlined_call_operand.vmem [shape: f32[8,8,32], index: 0, kind: input, shape index: {}]   ;;  %s18586_s1 = inlined_call_operand.vmem [shape: f32[64,64], index: 1, kind: input, shape index: {}]   ;;  %s18587_s2 = inlined_call_operand.vmem [shape: f32[8,8], index: 2, kind: input, shape index: {}]   ;;  %s18588_s3 = inlined_call_operand.vmem [shape: f32[8,8,1], index: 3, kind: input, shape index: {}]   ;;  %s18589_s4 = inlined_call_operand.vmem [shape: f32[2,4,1], index: 4, kind: input, shape index: {}]   ;;  %s18590_s5 = inlined_call_operand.vmem [shape: f32[2,4,32], index: 5, kind: input, shape index: {}]   ;;  %s18591_s6 = inlined_call_operand.vmem [shape: f32[2,1,32], index: 6, kind: input, shape index: {}]   ;;  %s18592_s7 = inlined_call_operand.vmem [shape: f32[36,40,8], index: 7, kind: input, shape index: {}]   ;;  %s18593_s8 = inlined_call_operand.vmem [shape: f32[12,8,32], index: 8, kind: input, shape index: {}]   ;;  %s18594_s9 = inlined_call_operand.vmem [shape: f32[3,40,64], index: 9, kind: input, shape index: {}]   ;;  %s18595_s10 = inlined_call_operand.vmem [shape: f32[3,64,32], index: 10, kind: input, shape index: {}]   ;;  %s18596_s11 = inlined_call_operand.vmem [shape: f32[3,8,32], index: 11, kind: input, shape index: {}]   ;;  %s18597_s12 = inlined_call_operand.vmem [shape: f32[3,48,32], index: 12, kind: input, shape index: {}]   ;;  %s18598_s13 = inlined_call_operand.vmem [shape: f32[40,128], index: 13, kind: input, shape index: {}]   ;;  %s18599_s14 = inlined_call_operand.hbm [shape: f32[2,128], index: 14, kind: output, shape index: {}]  }
   0x1   :  { %v11584_v0 = vld [vmem:[%s18592_s7 + $0xb8] sm:$0xff]  ;;  %v11583_v1 = vld [vmem:[%s18592_s7 + $0xb0] sm:$0xff]  ;;  %v15155_v2 = vld [vmem:[%s18585_s0] sm:$0xff] }
   0x2   :  { %13208 = vmatprep.subr.mxu1 %v11584_v0  ;;  %v11582_v3 = vld [vmem:[%s18592_s7 + $0xa8] sm:$0xff]  ;;  %13216 = vmatprep.mubr.msk.f32.mxu1 %vm74_vm0, %v15155_v2  ;;  %v11581_v4 = vld [vmem:[%s18592_s7 + $0xa0] sm:$0xff]  ;;  %v68_v5 = vld [vmem:[%s18592_s7 + $0x18] sm:$0xff] }
   0x3   :  { %13209 = vmatpush3.msra.mxu1 %v11584_v0  ;;  %13196 = vmatprep.mubr.msk.f32.mxu0 %vm74_vm0, %v15155_v2  ;;  %v67_v6 = vld [vmem:[%s18592_s7 + $0x10] sm:$0xff] }
   0x4   :  { %13210 = vmatprep.subr.mxu1 %v11583_v1  ;;  %13188 = vmatprep.subr.mxu0 %v68_v5 }
   0x5   :  { %13211 = vmatpush3.msra.mxu1 %v11583_v1 }
   0x6   :  { %13212 = vmatprep.subr.mxu1 %v11582_v3 }
   0x7   :  { %19 = vsyncpa [#allocation3], 0  ;;  %13213 = vmatpush3.msra.mxu1 %v11582_v3  ;;  %v15176_v7 = vld [vmem:[%s18585_s0 + $0x8] sm:$0xff]  ;;  %13189 = vmatpush3.msra.mxu0 %v68_v5  ;;  %v15184_v9 = vld [vmem:[%s18585_s0 + $0x10] sm:$0xff]  ;;  %vm434_vm1 = vcmask 64512   ;;  %vm604_vm2 = vcmask 523264  }
   0x8   :  { %v66_v8 = vld [vmem:[%s18592_s7 + $0x8] sm:$0xff]  ;;  %13214 = vmatprep.subr.mxu1 %v11581_v4  ;;  %13190 = vmatprep.subr.mxu0 %v67_v6  ;;  %v65_v10 = vld [vmem:[%s18592_s7] sm:$0xff]  ;;  %v15196_v11 = vld [vmem:[%s18585_s0 + $0x18] sm:$0xff]  ;;  %vm15068_vm3 = vmmov 0   ;;  %vm4177_vm4 = vcmask 1041409   ;;  %vm4180_vm5 = vcmask 1042434  }
   0x9   :  { %13215 = vmatpush3.msra.mxu1 %v11581_v4  ;;  %13191 = vmatpush3.msra.mxu0 %v67_v6  ;;  %v15201_v12 = vld [vmem:[%s18585_s0 + $0x20] sm:$0xff]  ;;  %v15212_v13 = vld [vmem:[%s18585_s0 + $0x28] sm:$0xff]  ;;  %v15219_v14 = vld [vmem:[%s18585_s0 + $0x30] sm:$0xff]  ;;  %vm4183_vm6 = vcmask 1043459   ;;  %vm4186_vm7 = vcmask 1044484   ;;  %vm4189_vm8 = vcmask 1045509  }
   0xa   :  { %13217 = vmatmul.mubr.msk.f32.vlgmr.msra.gmra.mxu1 %vm74_vm0, %v15176_v7  ;;  %13192 = vmatprep.subr.mxu0 %v66_v8  ;;  %v15230_v15 = vld [vmem:[%s18585_s0 + $0x38] sm:$0xff]  ;;  %v11572_v20 = vld [vmem:[%s18592_s7 + $0x20] ss:$0 sm:$0xff]  ;;  %v11597_v51 = vld [vmem:[%s18592_s7 + $0x150] sm:$0xff]  ;;  %vm4192_vm9 = vcmask 1046534   ;;  %vm4195_vm10 = vcmask 1047559  }
   0xb   :  { %13219 = vmatprep.mubr.msk.f32.mxu1 %vm74_vm0, %v15184_v9  ;;  %13193 = vmatpush3.msra.mxu0 %v66_v8  ;;  %v11586_v26 = vld [vmem:[%s18592_s7 + $0xc0] ss:$0 sm:$0xff]  ;;  %v11598_v50 = vld [vmem:[%s18592_s7 + $0x158] sm:$0xff]  ;;  %v11596_v52 = vld [vmem:[%s18592_s7 + $0x148] sm:$0xff]  ;;  %vm10934_vm12 = vcmask 7168   ;;  %vm11308_vm13 = vcmask 257024  }
   0xc   :  { %13194 = vmatprep.subr.mxu0 %v65_v10  ;;  %v11595_v53 = vld [vmem:[%s18592_s7 + $0x140] sm:$0xff]  ;;  %v15310_v60 = vld [vmem:[%s18586_s1 + $0x8] sm:$0xff]  ;;  %v15318_v0 = vld [vmem:[%s18586_s1 + $0x10] sm:$0xff]  ;;  %vm11319_vm14 = vcmask 3072   ;;  %s15070_s27 = smov [#allocation2]  }
   0xd   :  { %13195 = vmatpush3.msra.mxu0 %v65_v10  ;;  %v15305_v56 = vld [vmem:[%s18586_s1] sm:$0xff]  ;;  %v15328_v5 = vld [vmem:[%s18586_s1 + $0x18] sm:$0xff]  ;;  %s11564_s28 = sshll.u32 %s15070_s27, 4  ;;  %s11565_s28 = int_to_ptr.vmem [resolvable:$true] %s11564_s28 }
   0xe   :  { %13220 = vmatmul.mubr.msk.f32.gmra.mxu1 %vm74_vm0, %v15196_v11  ;;  %13197 = vmatmul.mubr.msk.f32.vlgmr.msra.gmra.mxu0 %vm74_vm0, %v15176_v7  ;;  %s15045_s29 = scalar_lea.vmem %s11565_s28, 32  ;;  %p15050_p1 = scmp.lt.s32.totalorder %s11565_s28, %s11565_s28 }
   0xf   :  { %13222 = vmatprep.mubr.msk.f32.mxu1 %vm74_vm0, %v15201_v12  ;;  %13199 = vmatprep.mubr.msk.f32.mxu0 %vm74_vm0, %v15184_v9  ;;  %p15046_p0 = scmp.ne.s32.totalorder %s11565_s28, %s15045_s29  ;;  %p15051_p2 = scmp.lt.s32.totalorder %s15045_s29, %s15045_s29 }
  0x10   :  { %13228 = vmatprep.subr.mxu0 %v11598_v50 }
  0x11   :  { %13229 = vmatpush3.msra.mxu0 %v11598_v50  ;;  %p15052_p3 = por %p15051_p2, %p15050_p1 }
  0x12   :  { %13223 = vmatmul.mubr.msk.f32.gmra.mxu1 %vm74_vm0, %v15212_v13  ;;  %13200 = vmatmul.mubr.msk.f32.gmra.mxu0 %vm74_vm0, %v15196_v11 }
  0x13   :  { %13225 = vmatprep.mubr.msk.f32.mxu1 %vm74_vm0, %v15219_v14  ;;  %13202 = vmatprep.mubr.msk.f32.mxu0 %vm74_vm0, %v15201_v12  ;;  %p15053_p4 = pnand %p15052_p3, %p15046_p0 }
  0x14   :  { %13230 = vmatprep.subr.mxu0 %v11597_v51 }
  0x15   :  { %13231 = vmatpush3.msra.mxu0 %v11597_v51 }
  0x16   :  { %13226 = vmatmul.mubr.msk.f32.gmra.mxu1 %vm74_vm0, %v15230_v15  ;;  %13203 = vmatmul.mubr.msk.f32.gmra.mxu0 %vm74_vm0, %v15212_v13 }
  0x17   :  { %13205 = vmatprep.mubr.msk.f32.mxu0 %vm74_vm0, %v15219_v14  ;;  %13232 = vmatprep.subr.mxu0 %v11596_v52 }
  0x18   :  { %13233 = vmatpush3.msra.mxu0 %v11596_v52 }
  0x19   :  { %13234 = vmatprep.subr.mxu0 %v11595_v53 }
  0x1a   :  { %13206 = vmatmul.mubr.msk.f32.gmra.mxu0 %vm74_vm0, %v15230_v15 }
  0x1b   :  { %13236 = vmatprep.mubr.msk.f32.mxu0 %vm74_vm0, %v15155_v2  ;;  %13235 = vmatpush3.msra.mxu0 %v11595_v53 }
  0x1e   :  { %13237 = vmatmul.mubr.msk.f32.vlgmr.msra.gmra.mxu0 %vm74_vm0, %v15176_v7 }
  0x1f   :  { %13239 = vmatprep.mubr.msk.f32.mxu0 %vm74_vm0, %v15184_v9 }
  0x22   :  { %13240 = vmatmul.mubr.msk.f32.gmra.mxu0 %vm74_vm0, %v15196_v11 }
  0x23   :  { %13242 = vmatprep.mubr.msk.f32.mxu0 %vm74_vm0, %v15201_v12 }
  0x26   :  { %13243 = vmatmul.mubr.msk.f32.gmra.mxu0 %vm74_vm0, %v15212_v13 }
  0x27   :  { %13245 = vmatprep.mubr.msk.f32.mxu0 %vm74_vm0, %v15219_v14 }
  0x2a   :  { %13246 = vmatmul.mubr.msk.f32.gmra.mxu0 %vm74_vm0, %v15230_v15 }
  0xca   :  { %v13218_v16 = vpop.f32.mrf.mxu1 }
  0xcb   :  { %v286_v36 = vadd.f32 %v13218_v16, %v11586_v26 }
  0xcc   :  { %v280_v17 = vpop.f32.mrf.mxu1 }
  0xcd   :  { %v281_v39 = vadd.f32 %v11586_v26, %v280_v17  ;;  %v15339_v17 = vld [vmem:[%s18586_s1 + $0x20] sm:$0xff] }
  0xce   :  { %v13221_v18 = vpop.f32.mrf.mxu1  ;;  %v13198_v19 = vpop.f32.mrf.mxu0 }
  0xcf   :  { %v296_v33 = vadd.f32 %v13221_v18, %v11586_v26  ;;  %v171_v42 = vadd.f32 %v13198_v19, %v11572_v20 }
  0xd0   :  { %v290_v21 = vpop.f32.mrf.mxu1  ;;  %v165_v22 = vpop.f32.mrf.mxu0 }
  0xd1   :  { %v166_v23 = vadd.f32 %v11572_v20, %v165_v22  ;;  %v291_v34 = vadd.f32 %v11586_v26, %v290_v21 }
  0xd2   :  { %v13224_v24 = vpop.f32.mrf.mxu1  ;;  %v13201_v35 = vpop.f32.mrf.mxu0 }
  0xd3   :  { %13264 = vmatprep.mubr.msk.f32.mxu1 %vm434_vm1, %v166_v23  ;;  %v306_v31 = vadd.f32 %v13224_v24, %v11586_v26  ;;  %v181_v45 = vadd.f32 %v13201_v35, %v11572_v20  ;;  %v15348_v23 = vld [vmem:[%s18586_s1 + $0x28] sm:$0xff] }
  0xd4   :  { %v300_v25 = vpop.f32.mrf.mxu1  ;;  %v175_v37 = vpop.f32.mrf.mxu0 }
  0xd5   :  { %v301_v32 = vadd.f32 %v11586_v26, %v300_v25  ;;  %v176_v41 = vadd.f32 %v11572_v20, %v175_v37 }
  0xd6   :  { %v13227_v27 = vpop.f32.mrf.mxu1  ;;  %v13204_v38 = vpop.f32.mrf.mxu0 }
  0xd7   :  { %v316_v28 = vadd.f32 %v13227_v27, %v11586_v26  ;;  %v191_v47 = vadd.f32 %v13204_v38, %v11572_v20  ;;  %v15358_v27 = vld [vmem:[%s18586_s1 + $0x30] sm:$0xff]  ;;  %v11650_v38 = vld [vmem:[%s18592_s7 + $0xe0] sm:$0xff] }
  0xd8   :  { %v310_v29 = vpop.f32.mrf.mxu1  ;;  %v185_v40 = vpop.f32.mrf.mxu0 }
  0xd9   :  { %v311_v30 = vadd.f32 %v11586_v26, %v310_v29  ;;  %13248 = vmatprep.subr.msk.mxu1 %vm434_vm1, %v316_v28  ;;  %v186_v44 = vadd.f32 %v11572_v20, %v185_v40  ;;  %v11648_v40 = vld [vmem:[%s18592_s7 + $0xd0] sm:$0xff] }
  0xda   :  { %13249 = vmatpush3.xpose.msk.msra.mxu1 %vm434_vm1, %v316_v28  ;;  %v13207_v43 = vpop.f32.mrf.mxu0 }
  0xdb   :  { %13250 = vmatprep.subr.msk.mxu1 %vm434_vm1, %v311_v30  ;;  %v201_v49 = vadd.f32 %v13207_v43, %v11572_v20 }
  0xdc   :  { %v195_v46 = vpop.f32.mrf.mxu0 }
  0xdd   :  { %v196_v48 = vadd.f32 %v11572_v20, %v195_v46 }
  0xde   :  { %13251 = vmatpush3.xpose.msk.msra.mxu1 %vm434_vm1, %v311_v30 }
  0xdf   :  { %13252 = vmatprep.subr.msk.mxu1 %vm434_vm1, %v306_v31 }
  0xe2   :  { %13253 = vmatpush3.xpose.msk.msra.mxu1 %vm434_vm1, %v306_v31 }
  0xe3   :  { %13254 = vmatprep.subr.msk.mxu1 %vm434_vm1, %v301_v32 }
  0xe6   :  { %13255 = vmatpush3.xpose.msk.msra.mxu1 %vm434_vm1, %v301_v32  ;;  %v15368_v32 = vld [vmem:[%s18586_s1 + $0x38] sm:$0xff] }
  0xe7   :  { %13256 = vmatprep.subr.msk.mxu1 %vm434_vm1, %v296_v33 }
  0xea   :  { %13257 = vmatpush3.xpose.msk.msra.mxu1 %vm434_vm1, %v296_v33 }
  0xeb   :  { %13258 = vmatprep.subr.msk.mxu1 %vm434_vm1, %v291_v34 }
  0xee   :  { %13259 = vmatpush3.xpose.msk.msra.mxu1 %vm434_vm1, %v291_v34 }
  0xef   :  { %13260 = vmatprep.subr.msk.mxu1 %vm434_vm1, %v286_v36 }
  0xf2   :  { %13261 = vmatpush3.xpose.msk.msra.mxu1 %vm434_vm1, %v286_v36 }
  0xf3   :  { %13262 = vmatprep.subr.msk.mxu1 %vm434_vm1, %v281_v39 }
  0xf6   :  { %13263 = vmatpush3.xpose.msk.msra.mxu1 %vm434_vm1, %v281_v39  ;;  %v11649_v39 = vld [vmem:[%s18592_s7 + $0xd8] sm:$0xff] }
  0xf7   :  { %13324 = vmatprep.subr.mxu1 %v11650_v38 }
  0xf9   :  { %13265 = vmatmul.mubr.msk.f32.vlgmr.msra.gmra.mxu1 %vm434_vm1, %v171_v42  ;;  %v13238_v42 = vpop.f32.mrf.mxu0 }
  0xfa   :  { %13267 = vmatprep.mubr.msk.f32.mxu1 %vm434_vm1, %v176_v41  ;;  %13325 = vmatpush3.msra.mxu1 %v11650_v38  ;;  %v11647_v41 = vld [vmem:[%s18592_s7 + $0xc8] sm:$0xff] }
  0xfb   :  { %13326 = vmatprep.subr.mxu1 %v11649_v39  ;;  %v395_v43 = vpop.f32.mrf.mxu0 }
  0xfc   :  { %13327 = vmatpush3.msra.mxu1 %v11649_v39 }
  0xfd   :  { %13268 = vmatmul.mubr.msk.f32.gmra.mxu1 %vm434_vm1, %v181_v45  ;;  %13328 = vmatprep.subr.mxu1 %v11648_v40 }
  0xfe   :  { %13270 = vmatprep.mubr.msk.f32.mxu1 %vm434_vm1, %v186_v44  ;;  %13329 = vmatpush3.msra.mxu1 %v11648_v40  ;;  %v13241_v44 = vpop.f32.mrf.mxu0 }
  0xff   :  { %13330 = vmatprep.subr.mxu1 %v11647_v41 }
 0x100   :  { %13331 = vmatpush3.msra.mxu1 %v11647_v41  ;;  %v405_v45 = vpop.f32.mrf.mxu0 }
 0x101   :  { %13271 = vmatmul.mubr.msk.f32.gmra.mxu1 %vm434_vm1, %v191_v47  ;;  %v11600_v47 = vld [vmem:[%s18592_s7 + $0x160] ss:$0 sm:$0xff] }
 0x102   :  { %13273 = vmatprep.mubr.msk.f32.mxu1 %vm434_vm1, %v196_v48  ;;  %v13244_v46 = vpop.f32.mrf.mxu0 }
 0x103   :  { %v421_v52 = vadd.f32 %v13244_v46, %v11600_v47 }
 0x104   :  { %v415_v48 = vpop.f32.mrf.mxu0 }
 0x105   :  { %13274 = vmatmul.mubr.msk.f32.gmra.mxu1 %vm434_vm1, %v201_v49 }
 0x106   :  { %13332 = vmatprep.mubr.msk.f32.mxu1 %vm74_vm0, %v15155_v2  ;;  %v13247_v49 = vpop.f32.mrf.mxu0 }
 0x107   :  { %v431_v50 = vadd.f32 %v13247_v49, %v11600_v47 }
 0x108   :  { %v425_v51 = vpop.f32.mrf.mxu0 }
 0x109   :  { %13333 = vmatmul.mubr.msk.f32.vlgmr.msra.gmra.mxu1 %vm74_vm0, %v15176_v7  ;;  %v426_v53 = vadd.f32 %v11600_v47, %v425_v51  ;;  %13276 = vmatprep.subr.mxu0 %v431_v50  ;;  %v11636_v51 = vld [vmem:[%s18592_s7 + $0x40] sm:$0xff] }
 0x10a   :  { %13335 = vmatprep.mubr.msk.f32.mxu1 %vm74_vm0, %v15184_v9  ;;  %13277 = vmatpush3.msra.mxu0 %v431_v50 }
 0x10b   :  { %13278 = vmatprep.subr.mxu0 %v426_v53 }
 0x10c   :  { %13279 = vmatpush3.msra.mxu0 %v426_v53 }
 0x10d   :  { %13336 = vmatmul.mubr.msk.f32.gmra.mxu1 %vm74_vm0, %v15196_v11  ;;  %13280 = vmatprep.subr.mxu0 %v421_v52 }
 0x10e   :  { %13338 = vmatprep.mubr.msk.f32.mxu1 %vm74_vm0, %v15201_v12  ;;  %13281 = vmatpush3.msra.mxu0 %v421_v52 }
 0x111   :  { %13339 = vmatmul.mubr.msk.f32.gmra.mxu1 %vm74_vm0, %v15212_v13 }
 0x112   :  { %13341 = vmatprep.mubr.msk.f32.mxu1 %vm74_vm0, %v15219_v14 }
 0x115   :  { %13342 = vmatmul.mubr.msk.f32.gmra.mxu1 %vm74_vm0, %v15230_v15 }
 0x1b9   :  { %v13266_v54 = vpop.f32.mrf.mxu1 }
 0x1ba   :  { %v589_v57 = vmul.f32 0.35355338, %v13266_v54  ;;  %v416_v54 = vadd.f32 %v11600_v47, %v415_v48 }
 0x1bb   :  { %v549_v55 = vpop.f32.mrf.mxu1 }
 0x1bc   :  { %v588_v58 = vmul.f32 0.35355338, %v549_v55  ;;  %v15323_v4 = vadd.f32 %v589_v57, %v15310_v60  ;;  %v411_v55 = vadd.f32 %v13241_v44, %v11600_v47  ;;  %v406_v57 = vadd.f32 %v11600_v47, %v405_v45  ;;  %13282 = vmatprep.subr.mxu0 %v416_v54 }
 0x1bd   :  { %v13269_v59 = vpop.f32.mrf.mxu1  ;;  %13283 = vmatpush3.msra.mxu0 %v416_v54 }
 0x1be   :  { %v15313_v61 = vadd.f32 %v588_v58, %v15305_v56  ;;  %v591_v62 = vmul.f32 0.35355338, %v13269_v59  ;;  %v608_v21 = vsel %vm604_vm2, %v15323_v4, -inf  ;;  %v401_v58 = vadd.f32 %v13238_v42, %v11600_v47  ;;  %13284 = vmatprep.subr.mxu0 %v411_v55 }
 0x1bf   :  { %v559_v63 = vpop.f32.mrf.mxu1  ;;  %13285 = vmatpush3.msra.mxu0 %v411_v55  ;;  %v396_v59 = vadd.f32 %v11600_v47, %v395_v43 }
 0x1c0   :  { %v590_v1 = vmul.f32 0.35355338, %v559_v63  ;;  %v605_v3 = vsel %vm604_vm2, %v15313_v61, -inf  ;;  %v15334_v16 = vadd.f32 %v591_v62, %v15328_v5  ;;  %13286 = vmatprep.subr.mxu0 %v406_v57 }
 0x1c1   :  { %v13272_v6 = vpop.f32.mrf.mxu1  ;;  %606 = vmax.xlane.f32.xlu0 %v605_v3  ;;  %13287 = vmatpush3.msra.mxu0 %v406_v57 }
 0x1c2   :  { %v15331_v8 = vadd.f32 %v590_v1, %v15318_v0  ;;  %v593_v18 = vmul.f32 0.35355338, %v13272_v6  ;;  %v614_v26 = vsel %vm604_vm2, %v15334_v16, -inf  ;;  %13288 = vmatprep.subr.mxu0 %v401_v58 }
 0x1c3   :  { %v569_v10 = vpop.f32.mrf.mxu1  ;;  %13289 = vmatpush3.msra.mxu0 %v401_v58  ;;  %v11652_v58 = vld [vmem:[%s18592_s7 + $0xe8] ss:$0 sm:$0xff] }
 0x1c4   :  { %v592_v19 = vmul.f32 0.35355338, %v569_v10  ;;  %v611_v20 = vsel %vm604_vm2, %v15331_v8, -inf  ;;  %v15363_v31 = vadd.f32 %v593_v18, %v15348_v23  ;;  %13290 = vmatprep.subr.mxu0 %v396_v59 }
 0x1c5   :  { %v13275_v22 = vpop.f32.mrf.mxu1  ;;  %612 = vmax.xlane.f32.xlu1 %v611_v20  ;;  %609 = vmax.xlane.f32.xlu0 %v608_v21 }
 0x1c6   :  { %v15351_v24 = vadd.f32 %v592_v19, %v15339_v17  ;;  %v595_v28 = vmul.f32 0.35355338, %v13275_v22  ;;  %v620_v34 = vsel %vm604_vm2, %v15363_v31, -inf  ;;  %13291 = vmatpush3.msra.mxu0 %v396_v59 }
 0x1c7   :  { %v579_v25 = vpop.f32.mrf.mxu1  ;;  %13304 = vmatprep.subr.mxu0 %v11636_v51 }
 0x1c8   :  { %v594_v29 = vmul.f32 0.35355338, %v579_v25  ;;  %v617_v30 = vsel %vm604_vm2, %v15351_v24, -inf  ;;  %v15378_v36 = vadd.f32 %v595_v28, %v15368_v32 }
 0x1c9   :  { %615 = vmax.xlane.f32.xlu1 %v614_v26  ;;  %618 = vmax.xlane.f32.xlu0 %v617_v30  ;;  %v13334_v52 = vpop.f32.mrf.mxu1 }
 0x1ca   :  { %v15371_v33 = vadd.f32 %v594_v29, %v15358_v27  ;;  %v626_v37 = vsel %vm604_vm2, %v15378_v36, -inf }
 0x1cb   :  { %v1014_v53 = vpop.f32.mrf.mxu1 }
 0x1cc   :  { %v623_v35 = vsel %vm604_vm2, %v15371_v33, -inf }
 0x1cd   :  { %621 = vmax.xlane.f32.xlu1 %v620_v34  ;;  %624 = vmax.xlane.f32.xlu0 %v623_v35  ;;  %v13337_v54 = vpop.f32.mrf.mxu1 }
 0x1cf   :  { %v1024_v55 = vpop.f32.mrf.mxu1 }
 0x1d1   :  { %627 = vmax.xlane.f32.xlu1 %v626_v37  ;;  %v13340_v57 = vpop.f32.mrf.mxu1 }
 0x1d3   :  { %v1034_v59 = vpop.f32.mrf.mxu1 }
 0x24a   :  { %v607_v62 = vpop.xlane.xlu0 %606 }
 0x24b   :  { %v629_v63 = vsub.f32 %v15313_v61, %v607_v62  ;;  %v13343_v62 = vpop.f32.mrf.mxu1 }
 0x24d   :  { %v637_v1 = vmul.f32 1.442695, %v629_v63  ;;  %v1050_v63 = vadd.f32 %v13343_v62, %v11652_v58 }
 0x24e   :  { %v613_v3 = vpop.xlane.xlu1 %612  ;;  %v610_v6 = vpop.xlane.xlu0 %609 }
 0x24f   :  { %14605 = vpow2.f32 %v637_v1  ;;  %v631_v10 = vsub.f32 %v15331_v8, %v613_v3  ;;  %v630_v18 = vsub.f32 %v15323_v4, %v610_v6  ;;  %v1044_v1 = vpop.f32.mrf.mxu1  ;;  %13364 = vmatprep.subr.msk.mxu1 %vm434_vm1, %v1050_v63  ;;  %v1040_v6 = vadd.f32 %v13340_v57, %v11652_v58 }
 0x250   :  { %v1045_v3 = vadd.f32 %v11652_v58, %v1044_v1  ;;  %13365 = vmatpush3.xpose.msk.msra.mxu1 %vm434_vm1, %v1050_v63 }
 0x251   :  { %v641_v19 = vmul.f32 1.442695, %v631_v10  ;;  %v639_v20 = vmul.f32 1.442695, %v630_v18  ;;  %v1035_v10 = vadd.f32 %v11652_v58, %v1034_v59  ;;  %v1030_v18 = vadd.f32 %v13337_v54, %v11652_v58  ;;  %v11638_v59 = vld [vmem:[%s18592_s7 + $0x48] ss:$0 sm:$0xff] }
 0x252   :  { %v616_v21 = vpop.xlane.xlu1 %615  ;;  %v619_v22 = vpop.xlane.xlu0 %618  ;;  %13366 = vmatprep.subr.msk.mxu1 %vm434_vm1, %v1045_v3 }
 0x253   :  { %14607 = vpow2.f32 %v641_v19  ;;  %v632_v25 = vsub.f32 %v15334_v16, %v616_v21  ;;  %v633_v26 = vsub.f32 %v15351_v24, %v619_v22  ;;  %v1025_v19 = vadd.f32 %v11652_v58, %v1024_v55 }
 0x254   :  { %14609 = vpow2.f32 %v639_v20  ;;  %13367 = vmatpush3.xpose.msk.msra.mxu1 %vm434_vm1, %v1045_v3  ;;  %v1020_v20 = vadd.f32 %v13334_v52, %v11652_v58  ;;  %v1015_v21 = vadd.f32 %v11652_v58, %v1014_v53 }
 0x255   :  { %v643_v28 = vmul.f32 1.442695, %v632_v25  ;;  %v645_v61 = vmul.f32 1.442695, %v633_v26  ;;  %13368 = vmatprep.subr.msk.mxu1 %vm434_vm1, %v1040_v6 }
 0x256   :  { %v622_v29 = vpop.xlane.xlu1 %621  ;;  %v625_v30 = vpop.xlane.xlu0 %624 }
 0x257   :  { %14611 = vpow2.f32 %v643_v28  ;;  %v634_v34 = vsub.f32 %v15363_v31, %v622_v29  ;;  %v635_v8 = vsub.f32 %v15371_v33, %v625_v30 }
 0x258   :  { %14613 = vpow2.f32 %v645_v61  ;;  %13369 = vmatpush3.xpose.msk.msra.mxu1 %vm434_vm1, %v1040_v6 }
 0x259   :  { %v647_v4 = vmul.f32 1.442695, %v634_v34  ;;  %v649_v35 = vmul.f32 1.442695, %v635_v8  ;;  %13370 = vmatprep.subr.msk.mxu1 %vm434_vm1, %v1035_v10 }
 0x25a   :  { %v628_v37 = vpop.xlane.xlu1 %627 }
 0x25b   :  { %14615 = vpow2.f32 %v647_v4  ;;  %v636_v38 = vsub.f32 %v15378_v36, %v628_v37 }
 0x25c   :  { %v15419_v16 = vpop.eup %14605  ;;  %14617 = vpow2.f32 %v649_v35  ;;  %13371 = vmatpush3.xpose.msk.msra.mxu1 %vm434_vm1, %v1035_v10 }
 0x25d   :  { %v651_v24 = vmul.f32 1.442695, %v636_v38  ;;  %v653_v39 = vsel %vm604_vm2, %v15419_v16, 0.0  ;;  %13372 = vmatprep.subr.msk.mxu1 %vm434_vm1, %v1030_v18 }
 0x25e   :  { %654 = vadd.xlane.f32.xlu0 %v653_v39  ;;  %v11635_v39 = vld [vmem:[%s18592_s7 + $0x38] sm:$0xff] }
 0x25f   :  { %14619 = vpow2.f32 %v651_v24 }
 0x260   :  { %v15423_v40 = vpop.eup %14607  ;;  %13373 = vmatpush3.xpose.msk.msra.mxu1 %vm434_vm1, %v1030_v18 }
 0x261   :  { %v15425_v31 = vpop.eup %14609  ;;  %v659_v33 = vsel %vm604_vm2, %v15423_v40, 0.0  ;;  %13374 = vmatprep.subr.msk.mxu1 %vm434_vm1, %v1025_v19 }
 0x262   :  { %660 = vadd.xlane.f32.xlu0 %v659_v33  ;;  %v656_v36 = vsel %vm604_vm2, %v15425_v31, 0.0 }
 0x263   :  { %657 = vadd.xlane.f32.xlu1 %v656_v36 }
 0x264   :  { %v15431_v41 = vpop.eup %14611  ;;  %13375 = vmatpush3.xpose.msk.msra.mxu1 %vm434_vm1, %v1025_v19 }
 0x265   :  { %v15433_v42 = vpop.eup %14613  ;;  %v662_v43 = vsel %vm604_vm2, %v15431_v41, 0.0  ;;  %13376 = vmatprep.subr.msk.mxu1 %vm434_vm1, %v1020_v20 }
 0x266   :  { %v665_v44 = vsel %vm604_vm2, %v15433_v42, 0.0 }
 0x267   :  { %663 = vadd.xlane.f32.xlu1 %v662_v43  ;;  %666 = vadd.xlane.f32.xlu0 %v665_v44 }
 0x268   :  { %v15439_v45 = vpop.eup %14615  ;;  %13377 = vmatpush3.xpose.msk.msra.mxu1 %vm434_vm1, %v1020_v20 }
 0x269   :  { %v15441_v46 = vpop.eup %14617  ;;  %v668_v47 = vsel %vm604_vm2, %v15439_v45, 0.0  ;;  %13378 = vmatprep.subr.msk.mxu1 %vm434_vm1, %v1015_v21 }
 0x26a   :  { %v671_v48 = vsel %vm604_vm2, %v15441_v46, 0.0 }
 0x26b   :  { %669 = vadd.xlane.f32.xlu1 %v668_v47  ;;  %672 = vadd.xlane.f32.xlu0 %v671_v48 }
 0x26c   :  { %v15447_v49 = vpop.eup %14619  ;;  %13379 = vmatpush3.xpose.msk.msra.mxu1 %vm434_vm1, %v1015_v21 }
 0x26d   :  { %v674_v50 = vsel %vm604_vm2, %v15447_v49, 0.0 }
 0x26f   :  { %675 = vadd.xlane.f32.xlu1 %v674_v50 }
 0x2e7   :  { %v655_v22 = vpop.xlane.xlu0 %654 }
 0x2e8   :  { %14621 = vrcp.f32 %v655_v22 }
 0x2eb   :  { %v661_v25 = vpop.xlane.xlu0 %660 }
 0x2ec   :  { %v658_v26 = vpop.xlane.xlu1 %657  ;;  %14623 = vrcp.f32 %v661_v25 }
 0x2ed   :  { %14625 = vrcp.f32 %v658_v26 }
 0x2f0   :  { %v664_v28 = vpop.xlane.xlu1 %663  ;;  %v667_v61 = vpop.xlane.xlu0 %666 }
 0x2f1   :  { %14627 = vrcp.f32 %v664_v28 }
 0x2f2   :  { %14629 = vrcp.f32 %v667_v61 }
 0x2f4   :  { %v670_v29 = vpop.xlane.xlu1 %669  ;;  %v673_v30 = vpop.xlane.xlu0 %672 }
 0x2f5   :  { %v14622_v34 = vpop.eup %14621  ;;  %14631 = vrcp.f32 %v670_v29  ;;  %v11664_v29 = vld [vmem:[%s18592_s7 + $0x180] sm:$0xff] }
 0x2f6   :  { %14633 = vrcp.f32 %v673_v30  ;;  %v685_v8 = vmul.f32 %v14622_v34, %v15419_v16  ;;  %v11634_v16 = vld [vmem:[%s18592_s7 + $0x30] sm:$0xff]  ;;  %v11663_v30 = vld [vmem:[%s18592_s7 + $0x178] sm:$0xff] }
 0x2f7   :  { %v11662_v34 = vld [vmem:[%s18592_s7 + $0x170] sm:$0xff] }
 0x2f8   :  { %v676_v4 = vpop.xlane.xlu1 %675  ;;  %13292 = vmatprep.mubr.msk.f32.mxu0 %vm604_vm2, %v685_v8 }
 0x2f9   :  { %v14624_v35 = vpop.eup %14623  ;;  %14635 = vrcp.f32 %v676_v4 }
 0x2fa   :  { %v14626_v37 = vpop.eup %14625  ;;  %v687_v38 = vmul.f32 %v14624_v35, %v15423_v40 }
 0x2fb   :  { %v686_v24 = vmul.f32 %v14626_v37, %v15425_v31  ;;  %v11633_v31 = vld [vmem:[%s18592_s7 + $0x28] sm:$0xff] }
 0x2fd   :  { %13293 = vmatmul.mubr.msk.f32.vlgmr.msra.gmra.mxu0 %vm604_vm2, %v686_v24 }
 0x2fe   :  { %v14628_v33 = vpop.eup %14627  ;;  %13295 = vmatprep.mubr.msk.f32.mxu0 %vm604_vm2, %v687_v38  ;;  %13305 = vmatpush3.msra.mxu0 %v11636_v51 }
 0x2ff   :  { %v14630_v36 = vpop.eup %14629  ;;  %v688_v43 = vmul.f32 %v14628_v33, %v15431_v41  ;;  %13306 = vmatprep.subr.mxu0 %v11635_v39 }
 0x300   :  { %v689_v40 = vmul.f32 %v14630_v36, %v15433_v42  ;;  %13307 = vmatpush3.msra.mxu0 %v11635_v39 }
 0x301   :  { %13296 = vmatmul.mubr.msk.f32.gmra.mxu0 %vm604_vm2, %v688_v43  ;;  %13308 = vmatprep.subr.mxu0 %v11634_v16 }
 0x302   :  { %v14632_v44 = vpop.eup %14631  ;;  %13298 = vmatprep.mubr.msk.f32.mxu0 %vm604_vm2, %v689_v40  ;;  %13309 = vmatpush3.msra.mxu0 %v11634_v16 }
 0x303   :  { %v14634_v47 = vpop.eup %14633  ;;  %v690_v48 = vmul.f32 %v14632_v44, %v15439_v45  ;;  %13310 = vmatprep.subr.mxu0 %v11633_v31  ;;  %v822_v45 = vld [vmem:[%s18593_s8] sm:$0xff] }
 0x304   :  { %v691_v41 = vmul.f32 %v14634_v47, %v15441_v46  ;;  %13311 = vmatpush3.msra.mxu0 %v11633_v31  ;;  %13434 = vmatprep.subr.mxu1 %v822_v45 }
 0x305   :  { %13299 = vmatmul.mubr.msk.f32.gmra.mxu0 %vm604_vm2, %v690_v48  ;;  %13344 = vmatprep.subr.mxu0 %v11664_v29 }
 0x306   :  { %v14636_v42 = vpop.eup %14635  ;;  %13301 = vmatprep.mubr.msk.f32.mxu0 %vm604_vm2, %v691_v41 }
 0x307   :  { %v692_v50 = vmul.f32 %v14636_v42, %v15447_v49 }
 0x309   :  { %13302 = vmatmul.mubr.msk.f32.gmra.mxu0 %vm604_vm2, %v692_v50 }
 0x30a   :  { %13312 = vmatprep.mubr.msk.f32.mxu0 %vm74_vm0, %v15155_v2 }
 0x30d   :  { %13313 = vmatmul.mubr.msk.f32.vlgmr.msra.gmra.mxu0 %vm74_vm0, %v15176_v7 }
 0x30e   :  { %13315 = vmatprep.mubr.msk.f32.mxu0 %vm74_vm0, %v15184_v9  ;;  %13345 = vmatpush3.msra.mxu0 %v11664_v29 }
 0x30f   :  { %13346 = vmatprep.subr.mxu0 %v11663_v30 }
 0x310   :  { %13347 = vmatpush3.msra.mxu0 %v11663_v30 }
 0x311   :  { %13316 = vmatmul.mubr.msk.f32.gmra.mxu0 %vm74_vm0, %v15196_v11  ;;  %13348 = vmatprep.subr.mxu0 %v11662_v34 }
 0x312   :  { %13318 = vmatprep.mubr.msk.f32.mxu0 %vm74_vm0, %v15201_v12  ;;  %13349 = vmatpush3.msra.mxu0 %v11662_v34 }
 0x315   :  { %13319 = vmatmul.mubr.msk.f32.gmra.mxu0 %vm74_vm0, %v15212_v13 }
 0x316   :  { %13321 = vmatprep.mubr.msk.f32.mxu0 %vm74_vm0, %v15219_v14 }
 0x319   :  { %13322 = vmatmul.mubr.msk.f32.gmra.mxu0 %vm74_vm0, %v15230_v15 }
 0x31a   :  { %13352 = vmatprep.mubr.msk.f32.mxu0 %vm74_vm0, %v15155_v2 }
 0x3bd   :  { %v13294_v46 = vpop.f32.mrf.mxu0 }
 0x3bf   :  { %v783_v49 = vpop.f32.mrf.mxu0 }
 0x3c1   :  { %v13297_v51 = vpop.f32.mrf.mxu0 }
 0x3c3   :  { %v793_v52 = vpop.f32.mrf.mxu0 }
 0x3c5   :  { %v13300_v53 = vpop.f32.mrf.mxu0 }
 0x3c7   :  { %v803_v54 = vpop.f32.mrf.mxu0 }
 0x3c9   :  { %v13303_v55 = vpop.f32.mrf.mxu0 }
 0x3cb   :  { %v813_v57 = vpop.f32.mrf.mxu0 }
 0x3cd   :  { %v13314_v58 = vpop.f32.mrf.mxu0 }
 0x3ce   :  { %v905_v1 = vadd.f32 %v13314_v58, %v11638_v59 }
 0x3cf   :  { %v899_v62 = vpop.f32.mrf.mxu0 }
 0x3d0   :  { %v900_v63 = vadd.f32 %v11638_v59, %v899_v62 }
 0x3d1   :  { %v13317_v3 = vpop.f32.mrf.mxu0 }
 0x3d2   :  { %13380 = vmatprep.mubr.msk.f32.mxu1 %vm434_vm1, %v900_v63  ;;  %v915_v18 = vadd.f32 %v13317_v3, %v11638_v59 }
 0x3d3   :  { %v909_v6 = vpop.f32.mrf.mxu0  ;;  %13381 = vmatmul.mubr.msk.f32.vlgmr.msra.gmra.mxu1 %vm434_vm1, %v905_v1 }
 0x3d4   :  { %v910_v10 = vadd.f32 %v11638_v59, %v909_v6  ;;  %13435 = vmatpush3.msra.mxu1 %v822_v45 }
 0x3d5   :  { %v13320_v19 = vpop.f32.mrf.mxu0 }
 0x3d6   :  { %13383 = vmatprep.mubr.msk.f32.mxu1 %vm434_vm1, %v910_v10  ;;  %v925_v22 = vadd.f32 %v13320_v19, %v11638_v59 }
 0x3d7   :  { %v919_v20 = vpop.f32.mrf.mxu0  ;;  %13384 = vmatmul.mubr.msk.f32.gmra.mxu1 %vm434_vm1, %v915_v18 }
 0x3d8   :  { %v920_v21 = vadd.f32 %v11638_v59, %v919_v20 }
 0x3d9   :  { %v13323_v25 = vpop.f32.mrf.mxu0 }
 0x3da   :  { %13386 = vmatprep.mubr.msk.f32.mxu1 %vm434_vm1, %v920_v21  ;;  %v935_v61 = vadd.f32 %v13323_v25, %v11638_v59 }
 0x3db   :  { %v929_v26 = vpop.f32.mrf.mxu0  ;;  %13387 = vmatmul.mubr.msk.f32.gmra.mxu1 %vm434_vm1, %v925_v22 }
 0x3dc   :  { %v930_v28 = vadd.f32 %v11638_v59, %v929_v26 }
 0x3de   :  { %13389 = vmatprep.mubr.msk.f32.mxu1 %vm434_vm1, %v930_v28 }
 0x3df   :  { %13390 = vmatmul.mubr.msk.f32.gmra.mxu1 %vm434_vm1, %v935_v61 }
 0x3e0   :  { %13436 = vmatprep.mubr.msk.f32.mxu1 %vm434_vm1, %v783_v49 }
 0x3e3   :  { %13437 = vmatmul.mubr.msk.f32.vlgmr.msra.gmra.mxu1 %vm434_vm1, %v13294_v46 }
 0x3e4   :  { %13439 = vmatprep.mubr.msk.f32.mxu1 %vm434_vm1, %v793_v52 }
 0x3e7   :  { %13440 = vmatmul.mubr.msk.f32.gmra.mxu1 %vm434_vm1, %v13297_v51 }
 0x3e8   :  { %13442 = vmatprep.mubr.msk.f32.mxu1 %vm434_vm1, %v803_v54 }
 0x3eb   :  { %13443 = vmatmul.mubr.msk.f32.gmra.mxu1 %vm434_vm1, %v13300_v53 }
 0x3ec   :  { %13445 = vmatprep.mubr.msk.f32.mxu1 %vm434_vm1, %v813_v57 }
 0x3ef   :  { %13446 = vmatmul.mubr.msk.f32.gmra.mxu1 %vm434_vm1, %v13303_v55 }
 0x3f0   :  { %13476 = vmatprep.mubr.msk.f32.mxu1 %vm74_vm0, %v15155_v2  ;;  %v11661_v2 = vld [vmem:[%s18592_s7 + $0x168] sm:$0xff] }
 0x3f1   :  { %13350 = vmatprep.subr.mxu0 %v11661_v2 }
 0x3f2   :  { %13351 = vmatpush3.msra.mxu0 %v11661_v2 }
 0x3f3   :  { %13353 = vmatmul.mubr.msk.f32.vlgmr.msra.gmra.mxu0 %vm74_vm0, %v15176_v7 }
 0x3f4   :  { %13355 = vmatprep.mubr.msk.f32.mxu0 %vm74_vm0, %v15184_v9 }
 0x3f7   :  { %13356 = vmatmul.mubr.msk.f32.gmra.mxu0 %vm74_vm0, %v15196_v11 }
 0x3f8   :  { %13358 = vmatprep.mubr.msk.f32.mxu0 %vm74_vm0, %v15201_v12 }
 0x3fb   :  { %13359 = vmatmul.mubr.msk.f32.gmra.mxu0 %vm74_vm0, %v15212_v13 }
 0x3fc   :  { %13361 = vmatprep.mubr.msk.f32.mxu0 %vm74_vm0, %v15219_v14 }
 0x3ff   :  { %13362 = vmatmul.mubr.msk.f32.gmra.mxu0 %vm74_vm0, %v15230_v15 }
 0x493   :  { %v13382_v8 = vpop.f32.mrf.mxu1 }
 0x494   :  { %v1322_v7 = vmul.f32 0.35355338, %v13382_v8 }
 0x495   :  { %v1282_v4 = vpop.f32.mrf.mxu1 }
 0x496   :  { %v1321_v35 = vmul.f32 0.35355338, %v1282_v4  ;;  %v15567_v9 = vadd.f32 %v1322_v7, %v15310_v60 }
 0x497   :  { %v13385_v11 = vpop.f32.mrf.mxu1 }
 0x498   :  { %v1324_v37 = vmul.f32 0.35355338, %v13385_v11  ;;  %v1340_v12 = vsel %vm604_vm2, %v15567_v9, -inf  ;;  %v15572_v13 = vadd.f32 %v1321_v35, %v15305_v56 }
 0x499   :  { %1341 = vmax.xlane.f32.xlu1 %v1340_v12  ;;  %v1292_v14 = vpop.f32.mrf.mxu1 }
 0x49a   :  { %v1323_v38 = vmul.f32 0.35355338, %v1292_v14  ;;  %v1337_v15 = vsel %vm604_vm2, %v15572_v13, -inf  ;;  %v15577_v24 = vadd.f32 %v1324_v37, %v15328_v5 }
 0x49b   :  { %1338 = vmax.xlane.f32.xlu0 %v1337_v15  ;;  %v13388_v60 = vpop.f32.mrf.mxu1 }
 0x49c   :  { %v1326_v39 = vmul.f32 0.35355338, %v13388_v60  ;;  %v1346_v33 = vsel %vm604_vm2, %v15577_v24, -inf  ;;  %v15582_v16 = vadd.f32 %v1323_v38, %v15318_v0 }
 0x49d   :  { %1347 = vmax.xlane.f32.xlu1 %v1346_v33  ;;  %v1302_v56 = vpop.f32.mrf.mxu1 }
 0x49e   :  { %v1325_v36 = vmul.f32 0.35355338, %v1302_v56  ;;  %v1343_v43 = vsel %vm604_vm2, %v15582_v16, -inf  ;;  %v15587_v40 = vadd.f32 %v1326_v39, %v15348_v23 }
 0x49f   :  { %1344 = vmax.xlane.f32.xlu0 %v1343_v43  ;;  %v13391_v5 = vpop.f32.mrf.mxu1 }
 0x4a0   :  { %v1328_v31 = vmul.f32 0.35355338, %v13391_v5  ;;  %v1352_v44 = vsel %vm604_vm2, %v15587_v40, -inf  ;;  %v15592_v47 = vadd.f32 %v1325_v36, %v15339_v17 }
 0x4a1   :  { %1353 = vmax.xlane.f32.xlu1 %v1352_v44  ;;  %v1312_v0 = vpop.f32.mrf.mxu1 }
 0x4a2   :  { %v1327_v48 = vmul.f32 0.35355338, %v1312_v0  ;;  %v1349_v41 = vsel %vm604_vm2, %v15592_v47, -inf  ;;  %v15597_v42 = vadd.f32 %v1328_v31, %v15368_v32  ;;  %v11666_v32 = vld [vmem:[%s18592_s7 + $0x188] ss:$0 sm:$0xff] }
 0x4a3   :  { %1350 = vmax.xlane.f32.xlu0 %v1349_v41  ;;  %v11733_v0 = vld [vmem:[%s18592_s7 + $0x108] sm:$0xff] }
 0x4a4   :  { %v1358_v23 = vsel %vm604_vm2, %v15597_v42, -inf  ;;  %v15602_v50 = vadd.f32 %v1327_v48, %v15358_v27  ;;  %v11732_v48 = vld [vmem:[%s18592_s7 + $0x100] sm:$0xff]  ;;  %13468 = vmatprep.subr.mxu1 %v11733_v0  ;;  %v11699_v41 = vld [vmem:[%s18593_s8 + $0x8] sm:$0xff] }
 0x4a5   :  { %1359 = vmax.xlane.f32.xlu1 %v1358_v23  ;;  %13469 = vmatpush3.msra.mxu1 %v11733_v0  ;;  %v11730_v23 = vld [vmem:[%s18592_s7 + $0xf0] sm:$0xff]  ;;  %v11718_v0 = vld [vmem:[%s18592_s7 + $0x60] sm:$0xff] }
 0x4a6   :  { %v1355_v17 = vsel %vm604_vm2, %v15602_v50, -inf  ;;  %13470 = vmatprep.subr.mxu1 %v11732_v48 }
 0x4a7   :  { %1356 = vmax.xlane.f32.xlu0 %v1355_v17  ;;  %13471 = vmatpush3.msra.mxu1 %v11732_v48  ;;  %v15674_v17 = vld [vmem:[%s18585_s0 + $0x10] sm:$0xff] }
 0x4b3   :  { %v13354_v45 = vpop.f32.mrf.mxu0 }
 0x4b4   :  { %v1135_v1 = vadd.f32 %v13354_v45, %v11666_v32  ;;  %v15681_v45 = vld [vmem:[%s18585_s0 + $0x18] sm:$0xff] }
 0x4b5   :  { %v1129_v46 = vpop.f32.mrf.mxu0 }
 0x4b6   :  { %v1130_v3 = vadd.f32 %v11666_v32, %v1129_v46  ;;  %v15688_v46 = vld [vmem:[%s18585_s0 + $0x20] sm:$0xff] }
 0x4b7   :  { %v13357_v49 = vpop.f32.mrf.mxu0 }
 0x4b8   :  { %v1145_v62 = vadd.f32 %v13357_v49, %v11666_v32  ;;  %v15695_v49 = vld [vmem:[%s18585_s0 + $0x28] sm:$0xff] }
 0x4b9   :  { %v1139_v51 = vpop.f32.mrf.mxu0 }
 0x4ba   :  { %v1140_v63 = vadd.f32 %v11666_v32, %v1139_v51  ;;  %v15702_v51 = vld [vmem:[%s18585_s0 + $0x30] sm:$0xff] }
 0x4bb   :  { %v13360_v52 = vpop.f32.mrf.mxu0 }
 0x4bc   :  { %v1155_v27 = vadd.f32 %v13360_v52, %v11666_v32  ;;  %v15709_v52 = vld [vmem:[%s18585_s0 + $0x38] sm:$0xff] }
 0x4bd   :  { %v1149_v53 = vpop.f32.mrf.mxu0 }
 0x4be   :  { %v1150_v59 = vadd.f32 %v11666_v32, %v1149_v53 }
 0x4bf   :  { %v13363_v54 = vpop.f32.mrf.mxu0 }
 0x4c0   :  { %v1165_v55 = vadd.f32 %v13363_v54, %v11666_v32 }
 0x4c1   :  { %v1159_v57 = vpop.f32.mrf.mxu0 }
 0x4c2   :  { %v1160_v58 = vadd.f32 %v11666_v32, %v1159_v57  ;;  %13392 = vmatprep.subr.mxu0 %v1165_v55 }
 0x4c3   :  { %13393 = vmatpush3.msra.mxu0 %v1165_v55 }
 0x4c4   :  { %13394 = vmatprep.subr.mxu0 %v1160_v58 }
 0x4c5   :  { %13395 = vmatpush3.msra.mxu0 %v1160_v58 }
 0x4c6   :  { %13396 = vmatprep.subr.mxu0 %v1155_v27 }
 0x4c7   :  { %13397 = vmatpush3.msra.mxu0 %v1155_v27 }
 0x4c8   :  { %13398 = vmatprep.subr.mxu0 %v1150_v59 }
 0x4c9   :  { %13399 = vmatpush3.msra.mxu0 %v1150_v59 }
 0x4ca   :  { %13400 = vmatprep.subr.mxu0 %v1145_v62 }
 0x4cb   :  { %13401 = vmatpush3.msra.mxu0 %v1145_v62 }
 0x4cc   :  { %13402 = vmatprep.subr.mxu0 %v1140_v63 }
 0x4cd   :  { %13403 = vmatpush3.msra.mxu0 %v1140_v63 }
 0x4ce   :  { %13404 = vmatprep.subr.mxu0 %v1135_v1 }
 0x4cf   :  { %13405 = vmatpush3.msra.mxu0 %v1135_v1 }
 0x4d0   :  { %13406 = vmatprep.subr.mxu0 %v1130_v3 }
 0x4d1   :  { %13407 = vmatpush3.msra.mxu0 %v1130_v3 }
 0x4d2   :  { %13420 = vmatprep.subr.mxu0 %v11699_v41 }
 0x522   :  { %v1342_v6 = vpop.xlane.xlu1 %1341 }
 0x523   :  { %v1362_v10 = vsub.f32 %v15567_v9, %v1342_v6 }
 0x524   :  { %v1339_v18 = vpop.xlane.xlu0 %1338 }
 0x525   :  { %v1371_v19 = vmul.f32 1.442695, %v1362_v10  ;;  %v1361_v20 = vsub.f32 %v15572_v13, %v1339_v18 }
 0x526   :  { %v1348_v21 = vpop.xlane.xlu1 %1347 }
 0x527   :  { %14637 = vpow2.f32 %v1371_v19  ;;  %v1369_v22 = vmul.f32 1.442695, %v1361_v20  ;;  %v1364_v25 = vsub.f32 %v15577_v24, %v1348_v21 }
 0x528   :  { %v1345_v26 = vpop.xlane.xlu0 %1344 }
 0x529   :  { %14639 = vpow2.f32 %v1369_v22  ;;  %v1375_v28 = vmul.f32 1.442695, %v1364_v25  ;;  %v1363_v61 = vsub.f32 %v15582_v16, %v1345_v26 }
 0x52a   :  { %v1354_v29 = vpop.xlane.xlu1 %1353 }
 0x52b   :  { %14641 = vpow2.f32 %v1375_v28  ;;  %v1373_v30 = vmul.f32 1.442695, %v1363_v61  ;;  %v1366_v34 = vsub.f32 %v15587_v40, %v1354_v29 }
 0x52c   :  { %v1351_v2 = vpop.xlane.xlu0 %1350 }
 0x52d   :  { %14643 = vpow2.f32 %v1373_v30  ;;  %v1379_v8 = vmul.f32 1.442695, %v1366_v34  ;;  %v1365_v7 = vsub.f32 %v15592_v47, %v1351_v2  ;;  %v15729_v30 = vpop.f32.mrf.mxu1  ;;  %v11719_v34 = vld [vmem:[%s18592_s7 + $0x68] sm:$0xff] }
 0x52e   :  { %v1360_v4 = vpop.xlane.xlu1 %1359 }
 0x52f   :  { %14645 = vpow2.f32 %v1379_v8  ;;  %v1377_v35 = vmul.f32 1.442695, %v1365_v7  ;;  %v1368_v9 = vsub.f32 %v15597_v42, %v1360_v4  ;;  %v11731_v42 = vld [vmem:[%s18592_s7 + $0xf8] sm:$0xff]  ;;  %v15734_v2 = vpop.f32.mrf.mxu1 }
 0x530   :  { %v1357_v11 = vpop.xlane.xlu0 %1356  ;;  %13472 = vmatprep.subr.mxu1 %v11731_v42 }
 0x531   :  { %14647 = vpow2.f32 %v1377_v35  ;;  %v1383_v37 = vmul.f32 1.442695, %v1368_v9  ;;  %v1367_v12 = vsub.f32 %v15602_v50, %v1357_v11  ;;  %13473 = vmatpush3.msra.mxu1 %v11731_v42  ;;  %v15667_v50 = vld [vmem:[%s18585_s0 + $0x8] sm:$0xff]  ;;  %v15736_v8 = vpop.f32.mrf.mxu1 }
 0x532   :  { %13474 = vmatprep.subr.mxu1 %v11730_v23 }
 0x533   :  { %14649 = vpow2.f32 %v1383_v37  ;;  %v1381_v13 = vmul.f32 1.442695, %v1367_v12  ;;  %13475 = vmatpush3.msra.mxu1 %v11730_v23  ;;  %v15738_v7 = vpop.f32.mrf.mxu1  ;;  %v11716_v23 = vld [vmem:[%s18592_s7 + $0x50] sm:$0xff] }
 0x534   :  { %v15617_v14 = vpop.eup %14637  ;;  %13477 = vmatmul.mubr.msk.f32.vlgmr.msra.gmra.mxu1 %vm74_vm0, %v15667_v50 }
 0x535   :  { %14651 = vpow2.f32 %v1381_v13  ;;  %v1388_v38 = vsel %vm604_vm2, %v15617_v14, 0.0  ;;  %13479 = vmatprep.mubr.msk.f32.mxu1 %vm74_vm0, %v15674_v17  ;;  %v15740_v4 = vpop.f32.mrf.mxu1 }
 0x536   :  { %v15621_v15 = vpop.eup %14639  ;;  %1389 = vadd.xlane.f32.xlu1 %v1388_v38 }
 0x537   :  { %v1385_v24 = vsel %vm604_vm2, %v15621_v15, 0.0  ;;  %v15742_v35 = vpop.f32.mrf.mxu1 }
 0x538   :  { %v15625_v60 = vpop.eup %14641  ;;  %1386 = vadd.xlane.f32.xlu0 %v1385_v24  ;;  %13480 = vmatmul.mubr.msk.f32.gmra.mxu1 %vm74_vm0, %v15681_v45 }
 0x539   :  { %v1394_v39 = vsel %vm604_vm2, %v15625_v60, 0.0  ;;  %13482 = vmatprep.mubr.msk.f32.mxu1 %vm74_vm0, %v15688_v46  ;;  %v15744_v9 = vpop.f32.mrf.mxu1 }
 0x53a   :  { %v15629_v33 = vpop.eup %14643  ;;  %1395 = vadd.xlane.f32.xlu1 %v1394_v39 }
 0x53b   :  { %v1391_v16 = vsel %vm604_vm2, %v15629_v33, 0.0  ;;  %v15746_v11 = vpop.f32.mrf.mxu1 }
 0x53c   :  { %v15633_v56 = vpop.eup %14645  ;;  %1392 = vadd.xlane.f32.xlu0 %v1391_v16  ;;  %13483 = vmatmul.mubr.msk.f32.gmra.mxu1 %vm74_vm0, %v15695_v49 }
 0x53d   :  { %v1400_v36 = vsel %vm604_vm2, %v15633_v56, 0.0  ;;  %13485 = vmatprep.mubr.msk.f32.mxu1 %vm74_vm0, %v15702_v51 }
 0x53e   :  { %v15637_v43 = vpop.eup %14647  ;;  %1401 = vadd.xlane.f32.xlu1 %v1400_v36 }
 0x53f   :  { %v1397_v40 = vsel %vm604_vm2, %v15637_v43, 0.0 }
 0x540   :  { %v15641_v5 = vpop.eup %14649  ;;  %1398 = vadd.xlane.f32.xlu0 %v1397_v40  ;;  %13486 = vmatmul.mubr.msk.f32.gmra.mxu1 %vm74_vm0, %v15709_v52 }
 0x541   :  { %v1406_v31 = vsel %vm604_vm2, %v15641_v5, 0.0 }
 0x542   :  { %v15645_v44 = vpop.eup %14651  ;;  %1407 = vadd.xlane.f32.xlu1 %v1406_v31 }
 0x543   :  { %v1403_v47 = vsel %vm604_vm2, %v15645_v44, 0.0 }
 0x544   :  { %1404 = vadd.xlane.f32.xlu0 %v1403_v47 }
 0x5bf   :  { %v1390_v32 = vpop.xlane.xlu1 %1389 }
 0x5c0   :  { %14653 = vrcp.f32 %v1390_v32 }
 0x5c1   :  { %v1387_v53 = vpop.xlane.xlu0 %1386 }
 0x5c2   :  { %14655 = vrcp.f32 %v1387_v53 }
 0x5c3   :  { %v1396_v54 = vpop.xlane.xlu1 %1395 }
 0x5c4   :  { %14657 = vrcp.f32 %v1396_v54 }
 0x5c5   :  { %v1393_v55 = vpop.xlane.xlu0 %1392 }
 0x5c6   :  { %14659 = vrcp.f32 %v1393_v55 }
 0x5c7   :  { %v1402_v57 = vpop.xlane.xlu1 %1401 }
 0x5c8   :  { %14661 = vrcp.f32 %v1402_v57  ;;  %v15787_v57 = vld [vmem:[%s18585_s0] sm:$0xff] }
 0x5c9   :  { %v1399_v27 = vpop.xlane.xlu0 %1398 }
 0x5ca   :  { %14663 = vrcp.f32 %v1399_v27 }
 0x5cb   :  { %v1408_v58 = vpop.xlane.xlu1 %1407 }
 0x5cc   :  { %14665 = vrcp.f32 %v1408_v58 }
 0x5cd   :  { %v1405_v59 = vpop.xlane.xlu0 %1404  ;;  %v14654_v62 = vpop.eup %14653 }
 0x5ce   :  { %14667 = vrcp.f32 %v1405_v59  ;;  %v1418_v3 = vmul.f32 %v14654_v62, %v15617_v14 }
 0x5cf   :  { %v14656_v63 = vpop.eup %14655 }
 0x5d0   :  { %v1417_v1 = vmul.f32 %v14656_v63, %v15621_v15  ;;  %v11735_v15 = vld [vmem:[%s18592_s7 + $0x110] ss:$0 sm:$0xff] }
 0x5d1   :  { %v14658_v6 = vpop.eup %14657 }
 0x5d2   :  { %13408 = vmatprep.mubr.msk.f32.mxu0 %vm604_vm2, %v1417_v1  ;;  %v1420_v19 = vmul.f32 %v14658_v6, %v15625_v60 }
 0x5d3   :  { %v14660_v10 = vpop.eup %14659  ;;  %13409 = vmatmul.mubr.msk.f32.vlgmr.msra.gmra.mxu0 %vm604_vm2, %v1418_v3 }
 0x5d4   :  { %v1419_v18 = vmul.f32 %v14660_v10, %v15629_v33  ;;  %13421 = vmatpush3.msra.mxu0 %v11699_v41  ;;  %v11717_v41 = vld [vmem:[%s18592_s7 + $0x58] sm:$0xff] }
 0x5d5   :  { %v14662_v20 = vpop.eup %14661  ;;  %13448 = vmatprep.subr.mxu0 %v11719_v34 }
 0x5d6   :  { %13411 = vmatprep.mubr.msk.f32.mxu0 %vm604_vm2, %v1419_v18  ;;  %v1422_v25 = vmul.f32 %v14662_v20, %v15633_v56  ;;  %v11721_v18 = vld [vmem:[%s18592_s7 + $0x70] ss:$0 sm:$0xff] }
 0x5d7   :  { %v14664_v21 = vpop.eup %14663  ;;  %13412 = vmatmul.mubr.msk.f32.gmra.mxu0 %vm604_vm2, %v1420_v19 }
 0x5d8   :  { %v1421_v22 = vmul.f32 %v14664_v21, %v15637_v43 }
 0x5d9   :  { %v14666_v26 = vpop.eup %14665 }
 0x5da   :  { %13414 = vmatprep.mubr.msk.f32.mxu0 %vm604_vm2, %v1421_v22  ;;  %v1424_v29 = vmul.f32 %v14666_v26, %v15641_v5 }
 0x5db   :  { %v14668_v28 = vpop.eup %14667  ;;  %13415 = vmatmul.mubr.msk.f32.gmra.mxu0 %vm604_vm2, %v1422_v25 }
 0x5dc   :  { %v1423_v61 = vmul.f32 %v14668_v28, %v15645_v44 }
 0x5de   :  { %13417 = vmatprep.mubr.msk.f32.mxu0 %vm604_vm2, %v1423_v61 }
 0x5df   :  { %13418 = vmatmul.mubr.msk.f32.gmra.mxu0 %vm604_vm2, %v1424_v29 }
 0x5f4   :  { %v13478_v37 = vpop.f32.mrf.mxu1 }
 0x5f5   :  { %v2011_v5 = vadd.f32 %v13478_v37, %v11735_v15 }
 0x5f6   :  { %v2005_v12 = vpop.f32.mrf.mxu1 }
 0x5f7   :  { %v2006_v31 = vadd.f32 %v11735_v15, %v2005_v12 }
 0x5f8   :  { %v13481_v13 = vpop.f32.mrf.mxu1 }
 0x5f9   :  { %v2021_v43 = vadd.f32 %v13481_v13, %v11735_v15 }
 0x5fa   :  { %v2015_v14 = vpop.f32.mrf.mxu1 }
 0x5fb   :  { %v2016_v40 = vadd.f32 %v11735_v15, %v2015_v14 }
 0x5fc   :  { %v13484_v38 = vpop.f32.mrf.mxu1 }
 0x5fd   :  { %v2031_v56 = vadd.f32 %v13484_v38, %v11735_v15 }
 0x5fe   :  { %v2025_v24 = vpop.f32.mrf.mxu1 }
 0x5ff   :  { %v2026_v36 = vadd.f32 %v11735_v15, %v2025_v24  ;;  %v11746_v24 = vld [vmem:[%s18592_s7 + $0x1a0] sm:$0xff] }
 0x600   :  { %v13487_v60 = vpop.f32.mrf.mxu1 }
 0x601   :  { %v2041_v39 = vadd.f32 %v13487_v60, %v11735_v15  ;;  %v11745_v60 = vld [vmem:[%s18592_s7 + $0x198] sm:$0xff] }
 0x602   :  { %v2035_v33 = vpop.f32.mrf.mxu1 }
 0x603   :  { %13508 = vmatprep.subr.msk.mxu1 %vm434_vm1, %v2041_v39  ;;  %v2036_v16 = vadd.f32 %v11735_v15, %v2035_v33  ;;  %v11747_v15 = vld [vmem:[%s18592_s7 + $0x1a8] sm:$0xff] }
 0x604   :  { %13509 = vmatpush3.xpose.msk.msra.mxu1 %vm434_vm1, %v2041_v39  ;;  %v11744_v39 = vld [vmem:[%s18592_s7 + $0x190] sm:$0xff] }
 0x605   :  { %13510 = vmatprep.subr.msk.mxu1 %vm434_vm1, %v2036_v16 }
 0x608   :  { %13511 = vmatpush3.xpose.msk.msra.mxu1 %vm434_vm1, %v2036_v16 }
 0x609   :  { %13512 = vmatprep.subr.msk.mxu1 %vm434_vm1, %v2031_v56 }
 0x60c   :  { %13513 = vmatpush3.xpose.msk.msra.mxu1 %vm434_vm1, %v2031_v56 }
 0x60d   :  { %13514 = vmatprep.subr.msk.mxu1 %vm434_vm1, %v2026_v36 }
 0x610   :  { %13515 = vmatpush3.xpose.msk.msra.mxu1 %vm434_vm1, %v2026_v36 }
 0x611   :  { %13516 = vmatprep.subr.msk.mxu1 %vm434_vm1, %v2021_v43 }
 0x614   :  { %13517 = vmatpush3.xpose.msk.msra.mxu1 %vm434_vm1, %v2021_v43  ;;  %v15865_v43 = vld [vmem:[%s18586_s1 + $0x8] sm:$0xff] }
 0x615   :  { %13518 = vmatprep.subr.msk.mxu1 %vm434_vm1, %v2016_v40 }
 0x618   :  { %13519 = vmatpush3.xpose.msk.msra.mxu1 %vm434_vm1, %v2016_v40 }
 0x619   :  { %13520 = vmatprep.subr.msk.mxu1 %vm434_vm1, %v2011_v5 }
 0x61c   :  { %13521 = vmatpush3.xpose.msk.msra.mxu1 %vm434_vm1, %v2011_v5 }
 0x61d   :  { %13522 = vmatprep.subr.msk.mxu1 %vm434_vm1, %v2006_v31 }
 0x620   :  { %13523 = vmatpush3.xpose.msk.msra.mxu1 %vm434_vm1, %v2006_v31 }
 0x693   :  { %v13410_v44 = vpop.f32.mrf.mxu0 }
 0x695   :  { %v1515_v47 = vpop.f32.mrf.mxu0 }
 0x696   :  { %13422 = vmatprep.mubr.msk.f32.mxu0 %vm434_vm1, %v1515_v47  ;;  %v15875_v47 = vld [vmem:[%s18586_s1] sm:$0xff] }
 0x697   :  { %v13413_v48 = vpop.f32.mrf.mxu0  ;;  %13423 = vmatmul.mubr.msk.f32.vlgmr.msra.gmra.mxu0 %vm434_vm1, %v13410_v44 }
 0x698   :  { %13449 = vmatpush3.msra.mxu0 %v11719_v34 }
 0x699   :  { %v1525_v42 = vpop.f32.mrf.mxu0  ;;  %13450 = vmatprep.subr.mxu0 %v11718_v0 }
 0x69a   :  { %13425 = vmatprep.mubr.msk.f32.mxu0 %vm434_vm1, %v1525_v42  ;;  %13451 = vmatpush3.msra.mxu0 %v11718_v0 }
 0x69b   :  { %v13416_v32 = vpop.f32.mrf.mxu0  ;;  %13426 = vmatmul.mubr.msk.f32.gmra.mxu0 %vm434_vm1, %v13413_v48  ;;  %13452 = vmatprep.subr.mxu0 %v11717_v41 }
 0x69c   :  { %13453 = vmatpush3.msra.mxu0 %v11717_v41 }
 0x69d   :  { %v1535_v53 = vpop.f32.mrf.mxu0  ;;  %13454 = vmatprep.subr.mxu0 %v11716_v23 }
 0x69e   :  { %13428 = vmatprep.mubr.msk.f32.mxu0 %vm434_vm1, %v1535_v53  ;;  %13455 = vmatpush3.msra.mxu0 %v11716_v23  ;;  %v15885_v23 = vld [vmem:[%s18586_s1 + $0x18] sm:$0xff] }
 0x69f   :  { %v13419_v54 = vpop.f32.mrf.mxu0  ;;  %13429 = vmatmul.mubr.msk.f32.gmra.mxu0 %vm434_vm1, %v13416_v32  ;;  %13488 = vmatprep.subr.mxu0 %v11747_v15 }
 0x6a1   :  { %v1545_v55 = vpop.f32.mrf.mxu0 }
 0x6a2   :  { %13431 = vmatprep.mubr.msk.f32.mxu0 %vm434_vm1, %v1545_v55 }
 0x6a3   :  { %13432 = vmatmul.mubr.msk.f32.gmra.mxu0 %vm434_vm1, %v13419_v54 }
 0x6a4   :  { %13456 = vmatprep.mubr.msk.f32.mxu0 %vm74_vm0, %v15787_v57 }
 0x6a7   :  { %13457 = vmatmul.mubr.msk.f32.vlgmr.msra.gmra.mxu0 %vm74_vm0, %v15667_v50 }
 0x6a8   :  { %13459 = vmatprep.mubr.msk.f32.mxu0 %vm74_vm0, %v15674_v17  ;;  %13489 = vmatpush3.msra.mxu0 %v11747_v15 }
 0x6a9   :  { %13490 = vmatprep.subr.mxu0 %v11746_v24 }
 0x6aa   :  { %13491 = vmatpush3.msra.mxu0 %v11746_v24  ;;  %v15935_v24 = vld [vmem:[%s18586_s1 + $0x30] sm:$0xff] }
 0x6ab   :  { %13460 = vmatmul.mubr.msk.f32.gmra.mxu0 %vm74_vm0, %v15681_v45  ;;  %13492 = vmatprep.subr.mxu0 %v11745_v60 }
 0x6ac   :  { %13462 = vmatprep.mubr.msk.f32.mxu0 %vm74_vm0, %v15688_v46  ;;  %13493 = vmatpush3.msra.mxu0 %v11745_v60 }
 0x6ad   :  { %13494 = vmatprep.subr.mxu0 %v11744_v39 }
 0x6ae   :  { %13495 = vmatpush3.msra.mxu0 %v11744_v39 }
 0x6af   :  { %13463 = vmatmul.mubr.msk.f32.gmra.mxu0 %vm74_vm0, %v15695_v49 }
 0x6b0   :  { %13465 = vmatprep.mubr.msk.f32.mxu0 %vm74_vm0, %v15702_v51 }
 0x6b3   :  { %13466 = vmatmul.mubr.msk.f32.gmra.mxu0 %vm74_vm0, %v15709_v52 }
 0x6b4   :  { %13496 = vmatprep.mubr.msk.f32.mxu0 %vm74_vm0, %v15787_v57 }
 0x6b7   :  { %13497 = vmatmul.mubr.msk.f32.vlgmr.msra.gmra.mxu0 %vm74_vm0, %v15667_v50 }
 0x6b8   :  { %13499 = vmatprep.mubr.msk.f32.mxu0 %vm74_vm0, %v15674_v17 }
 0x6bb   :  { %13500 = vmatmul.mubr.msk.f32.gmra.mxu0 %vm74_vm0, %v15681_v45 }
 0x6bc   :  { %13502 = vmatprep.mubr.msk.f32.mxu0 %vm74_vm0, %v15688_v46 }
 0x6bf   :  { %13503 = vmatmul.mubr.msk.f32.gmra.mxu0 %vm74_vm0, %v15695_v49 }
 0x6c0   :  { %13505 = vmatprep.mubr.msk.f32.mxu0 %vm74_vm0, %v15702_v51 }
 0x6c3   :  { %13506 = vmatmul.mubr.msk.f32.gmra.mxu0 %vm74_vm0, %v15709_v52 }
 0x757   :  { %v15807_v27 = vpop.f32.mrf.mxu0 }
 0x759   :  { %v15809_v58 = vpop.f32.mrf.mxu0 }
 0x75b   :  { %v15811_v59 = vpop.f32.mrf.mxu0 }
 0x75d   :  { %v15813_v62 = vpop.f32.mrf.mxu0 }
 0x75f   :  { %v15815_v63 = vpop.f32.mrf.mxu0 }
 0x761   :  { %v15817_v1 = vpop.f32.mrf.mxu0 }
 0x763   :  { %v15819_v3 = vpop.f32.mrf.mxu0 }
 0x765   :  { %v15821_v6 = vpop.f32.mrf.mxu0 }
 0x767   :  { %v13458_v10 = vpop.f32.mrf.mxu0 }
 0x768   :  { %v1896_v21 = vadd.f32 %v13458_v10, %v11721_v18  ;;  %v15895_v10 = vld [vmem:[%s18586_s1 + $0x10] sm:$0xff] }
 0x769   :  { %v1890_v19 = vpop.f32.mrf.mxu0 }
 0x76a   :  { %v1891_v20 = vadd.f32 %v11721_v18, %v1890_v19 }
 0x76b   :  { %v13461_v22 = vpop.f32.mrf.mxu0 }
 0x76c   :  { %13524 = vmatprep.mubr.msk.f32.mxu1 %vm434_vm1, %v1891_v20  ;;  %v1906_v28 = vadd.f32 %v13461_v22, %v11721_v18  ;;  %v15905_v22 = vld [vmem:[%s18586_s1 + $0x28] sm:$0xff] }
 0x76d   :  { %v1900_v25 = vpop.f32.mrf.mxu0  ;;  %13525 = vmatmul.mubr.msk.f32.vlgmr.msra.gmra.mxu1 %vm434_vm1, %v1896_v21 }
 0x76e   :  { %v1901_v26 = vadd.f32 %v11721_v18, %v1900_v25 }
 0x76f   :  { %v13464_v61 = vpop.f32.mrf.mxu0 }
 0x770   :  { %13527 = vmatprep.mubr.msk.f32.mxu1 %vm434_vm1, %v1901_v26  ;;  %v1916_v37 = vadd.f32 %v13464_v61, %v11721_v18 }
 0x771   :  { %v1910_v29 = vpop.f32.mrf.mxu0  ;;  %13528 = vmatmul.mubr.msk.f32.gmra.mxu1 %vm434_vm1, %v1906_v28 }
 0x772   :  { %v1911_v34 = vadd.f32 %v11721_v18, %v1910_v29  ;;  %v15915_v29 = vld [vmem:[%s18586_s1 + $0x20] sm:$0xff] }
 0x773   :  { %v13467_v12 = vpop.f32.mrf.mxu0 }
 0x774   :  { %13530 = vmatprep.mubr.msk.f32.mxu1 %vm434_vm1, %v1911_v34  ;;  %v1926_v38 = vadd.f32 %v13467_v12, %v11721_v18 }
 0x775   :  { %v1920_v13 = vpop.f32.mrf.mxu0  ;;  %13531 = vmatmul.mubr.msk.f32.gmra.mxu1 %vm434_vm1, %v1916_v37 }
 0x776   :  { %v1921_v14 = vadd.f32 %v11721_v18, %v1920_v13 }
 0x778   :  { %13533 = vmatprep.mubr.msk.f32.mxu1 %vm434_vm1, %v1921_v14  ;;  %v15925_v14 = vld [vmem:[%s18586_s1 + $0x38] sm:$0xff] }
 0x779   :  { %13534 = vmatmul.mubr.msk.f32.gmra.mxu1 %vm434_vm1, %v1926_v38 }
 0x77a   :  { %13586 = vmatprep.mubr.msk.f32.mxu1 %vm74_vm0, %v15787_v57 }
 0x82d   :  { %v13526_v33 = vpop.f32.mrf.mxu1 }
 0x82e   :  { %v2313_v16 = vmul.f32 0.35355338, %v13526_v33  ;;  %v13498_v33 = vpop.f32.mrf.mxu0 }
 0x82f   :  { %v2273_v56 = vpop.f32.mrf.mxu1 }
 0x830   :  { %v2312_v36 = vmul.f32 0.35355338, %v2273_v56  ;;  %v15868_v40 = vadd.f32 %v15865_v43, %v2313_v16  ;;  %v2120_v16 = vpop.f32.mrf.mxu0 }
 0x831   :  { %v13529_v5 = vpop.f32.mrf.mxu1 }
 0x832   :  { %v2315_v31 = vmul.f32 0.35355338, %v13529_v5  ;;  %v2331_v44 = vsel %vm604_vm2, %v15868_v40, -inf  ;;  %v15878_v0 = vadd.f32 %v15875_v47, %v2312_v36  ;;  %v13501_v56 = vpop.f32.mrf.mxu0 }
 0x833   :  { %2332 = vmax.xlane.f32.xlu1 %v2331_v44  ;;  %v2283_v48 = vpop.f32.mrf.mxu1 }
 0x834   :  { %v2314_v41 = vmul.f32 0.35355338, %v2283_v48  ;;  %v2328_v42 = vsel %vm604_vm2, %v15878_v0, -inf  ;;  %v15888_v32 = vadd.f32 %v15885_v23, %v2315_v31  ;;  %v2130_v36 = vpop.f32.mrf.mxu0  ;;  %v11749_v31 = vld [vmem:[%s18592_s7 + $0x1b0] ss:$0 sm:$0xff] }
 0x835   :  { %2329 = vmax.xlane.f32.xlu0 %v2328_v42  ;;  %v13532_v53 = vpop.f32.mrf.mxu1 }
 0x836   :  { %v2317_v54 = vmul.f32 0.35355338, %v13532_v53  ;;  %v2337_v55 = vsel %vm604_vm2, %v15888_v32, -inf  ;;  %v15898_v18 = vadd.f32 %v15895_v10, %v2314_v41  ;;  %v13504_v5 = vpop.f32.mrf.mxu0 }
 0x837   :  { %2338 = vmax.xlane.f32.xlu1 %v2337_v55  ;;  %v2293_v19 = vpop.f32.mrf.mxu1  ;;  %v2146_v53 = vadd.f32 %v13504_v5, %v11749_v31 }
 0x838   :  { %v2316_v20 = vmul.f32 0.35355338, %v2293_v19  ;;  %v2334_v21 = vsel %vm604_vm2, %v15898_v18, -inf  ;;  %v15908_v25 = vadd.f32 %v15905_v22, %v2317_v54  ;;  %v2140_v44 = vpop.f32.mrf.mxu0  ;;  %v2136_v19 = vadd.f32 %v13501_v56, %v11749_v31 }
 0x839   :  { %2335 = vmax.xlane.f32.xlu0 %v2334_v21  ;;  %v13535_v26 = vpop.f32.mrf.mxu1  ;;  %v2141_v55 = vadd.f32 %v11749_v31, %v2140_v44  ;;  %v2126_v21 = vadd.f32 %v13498_v33, %v11749_v31 }
 0x83a   :  { %v2319_v28 = vmul.f32 0.35355338, %v13535_v26  ;;  %v2343_v61 = vsel %vm604_vm2, %v15908_v25, -inf  ;;  %v15918_v34 = vadd.f32 %v15915_v29, %v2316_v20  ;;  %v13507_v48 = vpop.f32.mrf.mxu0  ;;  %v2131_v20 = vadd.f32 %v11749_v31, %v2130_v36 }
 0x83b   :  { %2344 = vmax.xlane.f32.xlu1 %v2343_v61  ;;  %v2303_v37 = vpop.f32.mrf.mxu1  ;;  %v2156_v41 = vadd.f32 %v13507_v48, %v11749_v31  ;;  %v2121_v26 = vadd.f32 %v11749_v31, %v2120_v16 }
 0x83c   :  { %v2318_v12 = vmul.f32 0.35355338, %v2303_v37  ;;  %v2340_v13 = vsel %vm604_vm2, %v15918_v34, -inf  ;;  %v15928_v38 = vadd.f32 %v15925_v14, %v2319_v28  ;;  %v2150_v42 = vpop.f32.mrf.mxu0 }
 0x83d   :  { %2341 = vmax.xlane.f32.xlu0 %v2340_v13  ;;  %v2151_v54 = vadd.f32 %v11749_v31, %v2150_v42  ;;  %13536 = vmatprep.subr.mxu0 %v2156_v41 }
 0x83e   :  { %v2349_v15 = vsel %vm604_vm2, %v15928_v38, -inf  ;;  %v15938_v60 = vadd.f32 %v15935_v24, %v2318_v12  ;;  %13537 = vmatpush3.msra.mxu0 %v2156_v41 }
 0x83f   :  { %2350 = vmax.xlane.f32.xlu1 %v2349_v15  ;;  %13538 = vmatprep.subr.mxu0 %v2151_v54 }
 0x840   :  { %v2346_v39 = vsel %vm604_vm2, %v15938_v60, -inf  ;;  %13539 = vmatpush3.msra.mxu0 %v2151_v54 }
 0x841   :  { %2347 = vmax.xlane.f32.xlu0 %v2346_v39  ;;  %13540 = vmatprep.subr.mxu0 %v2146_v53 }
 0x842   :  { %13541 = vmatpush3.msra.mxu0 %v2146_v53 }
 0x843   :  { %13542 = vmatprep.subr.mxu0 %v2141_v55 }
 0x844   :  { %13543 = vmatpush3.msra.mxu0 %v2141_v55 }
 0x845   :  { %13544 = vmatprep.subr.mxu0 %v2136_v19 }
 0x846   :  { %13545 = vmatpush3.msra.mxu0 %v2136_v19 }
 0x847   :  { %13546 = vmatprep.subr.mxu0 %v2131_v20 }
 0x848   :  { %13547 = vmatpush3.msra.mxu0 %v2131_v20 }
 0x849   :  { %13548 = vmatprep.subr.mxu0 %v2126_v21 }
 0x84a   :  { %13549 = vmatpush3.msra.mxu0 %v2126_v21 }
 0x84b   :  { %13550 = vmatprep.subr.mxu0 %v2121_v26 }
 0x84c   :  { %13551 = vmatpush3.msra.mxu0 %v2121_v26 }
 0x8bc   :  { %v2333_v28 = vpop.xlane.xlu1 %2332 }
 0x8bd   :  { %v2353_v61 = vsub.f32 %v15868_v40, %v2333_v28 }
 0x8be   :  { %v2330_v37 = vpop.xlane.xlu0 %2329 }
 0x8bf   :  { %v2362_v12 = vmul.f32 1.442695, %v2353_v61  ;;  %v2352_v13 = vsub.f32 %v15878_v0, %v2330_v37 }
 0x8c0   :  { %v2339_v15 = vpop.xlane.xlu1 %2338 }
 0x8c1   :  { %14669 = vpow2.f32 %v2362_v12  ;;  %v2360_v39 = vmul.f32 1.442695, %v2352_v13  ;;  %v2355_v33 = vsub.f32 %v15888_v32, %v2339_v15 }
 0x8c2   :  { %v2336_v56 = vpop.xlane.xlu0 %2335 }
 0x8c3   :  { %14671 = vpow2.f32 %v2360_v39  ;;  %v2366_v16 = vmul.f32 1.442695, %v2355_v33  ;;  %v2354_v36 = vsub.f32 %v15898_v18, %v2336_v56  ;;  %v11782_v56 = vld [vmem:[%s18593_s8 + $0x10] sm:$0xff] }
 0x8c4   :  { %v2345_v5 = vpop.xlane.xlu1 %2344  ;;  %13564 = vmatprep.subr.mxu0 %v11782_v56 }
 0x8c5   :  { %14673 = vpow2.f32 %v2366_v16  ;;  %v2364_v31 = vmul.f32 1.442695, %v2354_v36  ;;  %v2357_v44 = vsub.f32 %v15908_v25, %v2345_v5 }
 0x8c6   :  { %v2342_v40 = vpop.xlane.xlu0 %2341 }
 0x8c7   :  { %14675 = vpow2.f32 %v2364_v31  ;;  %v2370_v48 = vmul.f32 1.442695, %v2357_v44  ;;  %v2356_v0 = vsub.f32 %v15918_v34, %v2342_v40 }
 0x8c8   :  { %v2351_v41 = vpop.xlane.xlu1 %2350 }
 0x8c9   :  { %14677 = vpow2.f32 %v2370_v48  ;;  %v2368_v42 = vmul.f32 1.442695, %v2356_v0  ;;  %v2359_v32 = vsub.f32 %v15928_v38, %v2351_v41 }
 0x8ca   :  { %v2348_v53 = vpop.xlane.xlu0 %2347 }
 0x8cb   :  { %14679 = vpow2.f32 %v2368_v42  ;;  %v2374_v54 = vmul.f32 1.442695, %v2359_v32  ;;  %v2358_v18 = vsub.f32 %v15938_v60, %v2348_v53 }
 0x8cd   :  { %14681 = vpow2.f32 %v2374_v54  ;;  %v2372_v55 = vmul.f32 1.442695, %v2358_v18 }
 0x8ce   :  { %v14670_v19 = vpop.eup %14669 }
 0x8cf   :  { %14683 = vpow2.f32 %v2372_v55  ;;  %v2379_v25 = vsel %vm604_vm2, %v14670_v19, 0.0 }
 0x8d0   :  { %v14672_v20 = vpop.eup %14671  ;;  %2380 = vadd.xlane.f32.xlu1 %v2379_v25 }
 0x8d1   :  { %v2376_v34 = vsel %vm604_vm2, %v14672_v20, 0.0 }
 0x8d2   :  { %v14674_v21 = vpop.eup %14673  ;;  %2377 = vadd.xlane.f32.xlu0 %v2376_v34 }
 0x8d3   :  { %v2385_v26 = vsel %vm604_vm2, %v14674_v21, 0.0 }
 0x8d4   :  { %v14676_v38 = vpop.eup %14675  ;;  %2386 = vadd.xlane.f32.xlu1 %v2385_v26 }
 0x8d5   :  { %v2382_v28 = vsel %vm604_vm2, %v14676_v38, 0.0 }
 0x8d6   :  { %v14678_v61 = vpop.eup %14677  ;;  %2383 = vadd.xlane.f32.xlu0 %v2382_v28 }
 0x8d7   :  { %v2391_v60 = vsel %vm604_vm2, %v14678_v61, 0.0 }
 0x8d8   :  { %v14680_v37 = vpop.eup %14679  ;;  %2392 = vadd.xlane.f32.xlu1 %v2391_v60 }
 0x8d9   :  { %v2388_v12 = vsel %vm604_vm2, %v14680_v37, 0.0 }
 0x8da   :  { %v14682_v13 = vpop.eup %14681  ;;  %2389 = vadd.xlane.f32.xlu0 %v2388_v12 }
 0x8db   :  { %v2397_v15 = vsel %vm604_vm2, %v14682_v13, 0.0 }
 0x8dc   :  { %v14684_v39 = vpop.eup %14683  ;;  %2398 = vadd.xlane.f32.xlu1 %v2397_v15 }
 0x8dd   :  { %v2394_v33 = vsel %vm604_vm2, %v14684_v39, 0.0 }
 0x8de   :  { %2395 = vadd.xlane.f32.xlu0 %v2394_v33 }
 0x959   :  { %v2381_v16 = vpop.xlane.xlu1 %2380 }
 0x95a   :  { %14685 = vrcp.f32 %v2381_v16 }
 0x95b   :  { %v2378_v36 = vpop.xlane.xlu0 %2377 }
 0x95c   :  { %14687 = vrcp.f32 %v2378_v36  ;;  %v11806_v36 = vld [vmem:[%s18592_s7 + $0x120] sm:$0xff] }
 0x95d   :  { %v2387_v5 = vpop.xlane.xlu1 %2386 }
 0x95e   :  { %14689 = vrcp.f32 %v2387_v5 }
 0x95f   :  { %v2384_v31 = vpop.xlane.xlu0 %2383 }
 0x960   :  { %14691 = vrcp.f32 %v2384_v31  ;;  %v11805_v31 = vld [vmem:[%s18592_s7 + $0x118] sm:$0xff] }
 0x961   :  { %v2393_v44 = vpop.xlane.xlu1 %2392 }
 0x962   :  { %14693 = vrcp.f32 %v2393_v44 }
 0x963   :  { %v2390_v40 = vpop.xlane.xlu0 %2389 }
 0x964   :  { %14695 = vrcp.f32 %v2390_v40 }
 0x965   :  { %v2399_v48 = vpop.xlane.xlu1 %2398 }
 0x966   :  { %14697 = vrcp.f32 %v2399_v48 }
 0x967   :  { %v2396_v0 = vpop.xlane.xlu0 %2395  ;;  %v14686_v41 = vpop.eup %14685 }
 0x968   :  { %14699 = vrcp.f32 %v2396_v0  ;;  %v2409_v53 = vmul.f32 %v14686_v41, %v14670_v19  ;;  %v16039_v41 = vld [vmem:[%s18592_s7 + $0x98] ss:$0 sm:$0xff] }
 0x969   :  { %v14688_v42 = vpop.eup %14687 }
 0x96a   :  { %v2408_v32 = vmul.f32 %v14688_v42, %v14672_v20 }
 0x96b   :  { %v14690_v54 = vpop.eup %14689 }
 0x96c   :  { %13552 = vmatprep.mubr.msk.f32.mxu0 %vm604_vm2, %v2408_v32  ;;  %v2411_v25 = vmul.f32 %v14690_v54, %v14674_v21  ;;  %v11808_v21 = vld [vmem:[%s18592_s7 + $0x130] sm:$0xff]  ;;  %v1781_v54 = vadd.f32 %v15729_v30, %v15807_v27  ;;  %v1811_v27 = vadd.f32 %v15744_v9, %v15819_v3 }
 0x96d   :  { %v14692_v18 = vpop.eup %14691  ;;  %13553 = vmatmul.mubr.msk.f32.vlgmr.msra.gmra.mxu0 %vm604_vm2, %v2409_v53 }
 0x96e   :  { %v2410_v55 = vmul.f32 %v14692_v18, %v14676_v38  ;;  %13565 = vmatpush3.msra.mxu0 %v11782_v56  ;;  %v11794_v38 = vld [vmem:[%s18592_s7 + $0x90] sm:$0xff]  ;;  %v11807_v56 = vld [vmem:[%s18592_s7 + $0x128] sm:$0xff] }
 0x96f   :  { %v14694_v34 = vpop.eup %14693  ;;  %13598 = vmatprep.subr.mxu0 %v11808_v21  ;;  %13578 = vmatprep.subr.mxu1 %v11794_v38 }
 0x970   :  { %13555 = vmatprep.mubr.msk.f32.mxu0 %vm604_vm2, %v2410_v55  ;;  %v2413_v60 = vmul.f32 %v14694_v34, %v14678_v61  ;;  %v11793_v61 = vld [vmem:[%s18592_s7 + $0x88] sm:$0xff]  ;;  %13579 = vmatpush3.msra.mxu1 %v11794_v38  ;;  %v1791_v34 = vadd.f32 %v15736_v8, %v15811_v59 }
 0x971   :  { %v14696_v26 = vpop.eup %14695  ;;  %13556 = vmatmul.mubr.msk.f32.gmra.mxu0 %vm604_vm2, %v2411_v25  ;;  %13580 = vmatprep.subr.mxu1 %v11793_v61 }
 0x972   :  { %v2412_v28 = vmul.f32 %v14696_v26, %v14680_v37  ;;  %v11792_v37 = vld [vmem:[%s18592_s7 + $0x80] sm:$0xff]  ;;  %13581 = vmatpush3.msra.mxu1 %v11793_v61 }
 0x973   :  { %v14698_v12 = vpop.eup %14697  ;;  %13582 = vmatprep.subr.mxu1 %v11792_v37 }
 0x974   :  { %13558 = vmatprep.mubr.msk.f32.mxu0 %vm604_vm2, %v2412_v28  ;;  %v2415_v15 = vmul.f32 %v14698_v12, %v14682_v13  ;;  %v11791_v13 = vld [vmem:[%s18592_s7 + $0x78] sm:$0xff]  ;;  %13583 = vmatpush3.msra.mxu1 %v11792_v37  ;;  %v1801_v12 = vadd.f32 %v15740_v4, %v15815_v63 }
 0x975   :  { %v14700_v19 = vpop.eup %14699  ;;  %13559 = vmatmul.mubr.msk.f32.gmra.mxu0 %vm604_vm2, %v2413_v60  ;;  %13584 = vmatprep.subr.mxu1 %v11791_v13  ;;  %v11810_v4 = vld [vmem:[%s18592_s7 + $0x138] ss:$0 sm:$0xff] }
 0x976   :  { %v2414_v20 = vmul.f32 %v14700_v19, %v14684_v39  ;;  %13585 = vmatpush3.msra.mxu1 %v11791_v13 }
 0x977   :  { %13587 = vmatmul.mubr.msk.f32.vlgmr.msra.gmra.mxu1 %vm74_vm0, %v15667_v50 }
 0x978   :  { %13561 = vmatprep.mubr.msk.f32.mxu0 %vm604_vm2, %v2414_v20  ;;  %13589 = vmatprep.mubr.msk.f32.mxu1 %vm74_vm0, %v15674_v17 }
 0x979   :  { %13562 = vmatmul.mubr.msk.f32.gmra.mxu0 %vm604_vm2, %v2415_v15 }
 0x97b   :  { %13590 = vmatmul.mubr.msk.f32.gmra.mxu1 %vm74_vm0, %v15681_v45 }
 0x97c   :  { %13592 = vmatprep.mubr.msk.f32.mxu1 %vm74_vm0, %v15688_v46 }
 0x97f   :  { %13593 = vmatmul.mubr.msk.f32.gmra.mxu1 %vm74_vm0, %v15695_v49 }
 0x980   :  { %13595 = vmatprep.mubr.msk.f32.mxu1 %vm74_vm0, %v15702_v51 }
 0x983   :  { %13596 = vmatmul.mubr.msk.f32.gmra.mxu1 %vm74_vm0, %v15709_v52 }
 0x984   :  { %13626 = vmatprep.mubr.msk.f32.mxu1 %vm74_vm0, %v15787_v57 }
 0xa2d   :  { %v13554_v39 = vpop.f32.mrf.mxu0 }
 0xa2f   :  { %v2506_v33 = vpop.f32.mrf.mxu0 }
 0xa30   :  { %13566 = vmatprep.mubr.msk.f32.mxu0 %vm434_vm1, %v2506_v33 }
 0xa31   :  { %v13557_v16 = vpop.f32.mrf.mxu0  ;;  %13567 = vmatmul.mubr.msk.f32.vlgmr.msra.gmra.mxu0 %vm434_vm1, %v13554_v39 }
 0xa32   :  { %13599 = vmatpush3.msra.mxu0 %v11808_v21 }
 0xa33   :  { %v2516_v5 = vpop.f32.mrf.mxu0  ;;  %13600 = vmatprep.subr.mxu0 %v11807_v56 }
 0xa34   :  { %13569 = vmatprep.mubr.msk.f32.mxu0 %vm434_vm1, %v2516_v5  ;;  %13601 = vmatpush3.msra.mxu0 %v11807_v56 }
 0xa35   :  { %v13560_v44 = vpop.f32.mrf.mxu0  ;;  %13570 = vmatmul.mubr.msk.f32.gmra.mxu0 %vm434_vm1, %v13557_v16  ;;  %13602 = vmatprep.subr.mxu0 %v11806_v36 }
 0xa36   :  { %13603 = vmatpush3.msra.mxu0 %v11806_v36 }
 0xa37   :  { %v2526_v40 = vpop.f32.mrf.mxu0  ;;  %13604 = vmatprep.subr.mxu0 %v11805_v31 }
 0xa38   :  { %13572 = vmatprep.mubr.msk.f32.mxu0 %vm434_vm1, %v2526_v40  ;;  %13605 = vmatpush3.msra.mxu0 %v11805_v31 }
 0xa39   :  { %v13563_v48 = vpop.f32.mrf.mxu0  ;;  %13573 = vmatmul.mubr.msk.f32.gmra.mxu0 %vm434_vm1, %v13560_v44 }
 0xa3b   :  { %v2536_v0 = vpop.f32.mrf.mxu0 }
 0xa3c   :  { %13575 = vmatprep.mubr.msk.f32.mxu0 %vm434_vm1, %v2536_v0 }
 0xa3d   :  { %13576 = vmatmul.mubr.msk.f32.gmra.mxu0 %vm434_vm1, %v13563_v48 }
 0xa3e   :  { %13606 = vmatprep.mubr.msk.f32.mxu0 %vm74_vm0, %v15787_v57  ;;  %v13588_v57 = vpop.f32.mrf.mxu1 }
 0xa3f   :  { %v2766_v42 = vadd.f32 %v13588_v57, %v16039_v41 }
 0xa40   :  { %v2760_v32 = vpop.f32.mrf.mxu1 }
 0xa41   :  { %13607 = vmatmul.mubr.msk.f32.vlgmr.msra.gmra.mxu0 %vm74_vm0, %v15667_v50  ;;  %v2761_v53 = vadd.f32 %v16039_v41, %v2760_v32 }
 0xa42   :  { %13609 = vmatprep.mubr.msk.f32.mxu0 %vm74_vm0, %v15674_v17  ;;  %v13591_v5 = vpop.f32.mrf.mxu1 }
 0xa44   :  { %v2770_v44 = vpop.f32.mrf.mxu1 }
 0xa45   :  { %13610 = vmatmul.mubr.msk.f32.gmra.mxu0 %vm74_vm0, %v15681_v45  ;;  %v2771_v32 = vadd.f32 %v16039_v41, %v2770_v44 }
 0xa46   :  { %13612 = vmatprep.mubr.msk.f32.mxu0 %vm74_vm0, %v15688_v46  ;;  %v13594_v48 = vpop.f32.mrf.mxu1 }
 0xa48   :  { %v2780_v57 = vpop.f32.mrf.mxu1 }
 0xa49   :  { %13613 = vmatmul.mubr.msk.f32.gmra.mxu0 %vm74_vm0, %v15695_v49 }
 0xa4a   :  { %13615 = vmatprep.mubr.msk.f32.mxu0 %vm74_vm0, %v15702_v51 }
 0xa4d   :  { %13616 = vmatmul.mubr.msk.f32.gmra.mxu0 %vm74_vm0, %v15709_v52 }
 0xa4e   :  { %13654 = vmatprep.mubr.msk.f32.mxu0 %vm434_vm1, %v2761_v53  ;;  %v13597_v53 = vpop.f32.mrf.mxu1 }
 0xaf1   :  { %v13568_v18 = vpop.f32.mrf.mxu0 }
 0xaf2   :  { %v16046_v55 = vadd.f32 %v13568_v18, %v1781_v54  ;;  %v2781_v54 = vadd.f32 %v16039_v41, %v2780_v57  ;;  %v2776_v18 = vadd.f32 %v13591_v5, %v16039_v41 }
 0xaf3   :  { %v16048_v25 = vpop.f32.mrf.mxu0 }
 0xaf5   :  { %v13571_v26 = vpop.f32.mrf.mxu0 }
 0xaf6   :  { %v16052_v28 = vadd.f32 %v13571_v26, %v1791_v34  ;;  %v2790_v34 = vpop.f32.mrf.mxu1 }
 0xaf7   :  { %v16054_v60 = vpop.f32.mrf.mxu0  ;;  %v2791_v26 = vadd.f32 %v16039_v41, %v2790_v34 }
 0xaf9   :  { %v13574_v19 = vpop.f32.mrf.mxu0 }
 0xafa   :  { %v16058_v20 = vadd.f32 %v13574_v19, %v1801_v12  ;;  %v2786_v12 = vadd.f32 %v13594_v48, %v16039_v41  ;;  %v11822_v19 = vld [vmem:[%s18592_s7 + $0x1d0] sm:$0xff] }
 0xafb   :  { %v16060_v30 = vpop.f32.mrf.mxu0  ;;  %13618 = vmatprep.subr.mxu1 %v11822_v19 }
 0xafc   :  { %13619 = vmatpush3.msra.mxu1 %v11822_v19 }
 0xafd   :  { %v13577_v15 = vpop.f32.mrf.mxu0 }
 0xafe   :  { %v16064_v21 = vadd.f32 %v13577_v15, %v1811_v27  ;;  %v11821_v27 = vld [vmem:[%s18592_s7 + $0x1c8] sm:$0xff]  ;;  %v11820_v15 = vld [vmem:[%s18592_s7 + $0x1c0] sm:$0xff] }
 0xaff   :  { %v16066_v8 = vpop.f32.mrf.mxu0  ;;  %13620 = vmatprep.subr.mxu1 %v11821_v27 }
 0xb00   :  { %13621 = vmatpush3.msra.mxu1 %v11821_v27 }
 0xb01   :  { %v13608_v59 = vpop.f32.mrf.mxu0  ;;  %13622 = vmatprep.subr.mxu1 %v11820_v15 }
 0xb02   :  { %v2881_v40 = vadd.f32 %v13608_v59, %v11810_v4  ;;  %13623 = vmatpush3.msra.mxu1 %v11820_v15 }
 0xb03   :  { %v2875_v38 = vpop.f32.mrf.mxu0 }
 0xb04   :  { %v2876_v0 = vadd.f32 %v11810_v4, %v2875_v38 }
 0xb05   :  { %v13611_v61 = vpop.f32.mrf.mxu0 }
 0xb06   :  { %v2891_v36 = vadd.f32 %v13611_v61, %v11810_v4 }
 0xb07   :  { %v2885_v37 = vpop.f32.mrf.mxu0 }
 0xb08   :  { %v2886_v31 = vadd.f32 %v11810_v4, %v2885_v37 }
 0xb09   :  { %v13614_v13 = vpop.f32.mrf.mxu0 }
 0xb0a   :  { %v2901_v9 = vadd.f32 %v13614_v13, %v11810_v4 }
 0xb0b   :  { %v2895_v39 = vpop.f32.mrf.mxu0 }
 0xb0c   :  { %v2896_v3 = vadd.f32 %v11810_v4, %v2895_v39 }
 0xb0d   :  { %v13617_v63 = vpop.f32.mrf.mxu0 }
 0xb0e   :  { %v2911_v33 = vadd.f32 %v13617_v63, %v11810_v4 }
 0xb0f   :  { %v2905_v56 = vpop.f32.mrf.mxu0 }
 0xb10   :  { %v2906_v16 = vadd.f32 %v11810_v4, %v2905_v56  ;;  %13638 = vmatprep.subr.msk.mxu0 %vm434_vm1, %v2911_v33 }
 0xb11   :  { %13639 = vmatpush3.xpose.msk.msra.mxu0 %vm434_vm1, %v2911_v33 }
 0xb12   :  { %13640 = vmatprep.subr.msk.mxu0 %vm434_vm1, %v2906_v16 }
 0xb15   :  { %13641 = vmatpush3.xpose.msk.msra.mxu0 %vm434_vm1, %v2906_v16 }
 0xb16   :  { %13642 = vmatprep.subr.msk.mxu0 %vm434_vm1, %v2901_v9 }
 0xb19   :  { %13643 = vmatpush3.xpose.msk.msra.mxu0 %vm434_vm1, %v2901_v9 }
 0xb1a   :  { %13644 = vmatprep.subr.msk.mxu0 %vm434_vm1, %v2896_v3 }
 0xb1d   :  { %13645 = vmatpush3.xpose.msk.msra.mxu0 %vm434_vm1, %v2896_v3 }
 0xb1e   :  { %13646 = vmatprep.subr.msk.mxu0 %vm434_vm1, %v2891_v36 }
 0xb21   :  { %13647 = vmatpush3.xpose.msk.msra.mxu0 %vm434_vm1, %v2891_v36 }
 0xb22   :  { %13648 = vmatprep.subr.msk.mxu0 %vm434_vm1, %v2886_v31 }
 0xb25   :  { %13649 = vmatpush3.xpose.msk.msra.mxu0 %vm434_vm1, %v2886_v31 }
 0xb26   :  { %13650 = vmatprep.subr.msk.mxu0 %vm434_vm1, %v2881_v40 }
 0xb29   :  { %13651 = vmatpush3.xpose.msk.msra.mxu0 %vm434_vm1, %v2881_v40 }
 0xb2a   :  { %13652 = vmatprep.subr.msk.mxu0 %vm434_vm1, %v2876_v0 }
 0xb2d   :  { %13653 = vmatpush3.xpose.msk.msra.mxu0 %vm434_vm1, %v2876_v0 }
 0xb30   :  { %13655 = vmatmul.mubr.msk.f32.vlgmr.msra.gmra.mxu0 %vm434_vm1, %v2766_v42  ;;  %v2796_v42 = vadd.f32 %v13597_v53, %v16039_v41  ;;  %v11819_v41 = vld [vmem:[%s18592_s7 + $0x1b8] sm:$0xff] }
 0xb31   :  { %13657 = vmatprep.mubr.msk.f32.mxu0 %vm434_vm1, %v2771_v32  ;;  %13624 = vmatprep.subr.mxu1 %v11819_v41 }
 0xb32   :  { %13625 = vmatpush3.msra.mxu1 %v11819_v41 }
 0xb33   :  { %13627 = vmatmul.mubr.msk.f32.vlgmr.msra.gmra.mxu1 %vm74_vm0, %v15667_v50 }
 0xb34   :  { %13658 = vmatmul.mubr.msk.f32.gmra.mxu0 %vm434_vm1, %v2776_v18  ;;  %13629 = vmatprep.mubr.msk.f32.mxu1 %vm74_vm0, %v15674_v17 }
 0xb35   :  { %13660 = vmatprep.mubr.msk.f32.mxu0 %vm434_vm1, %v2781_v54 }
 0xb37   :  { %13630 = vmatmul.mubr.msk.f32.gmra.mxu1 %vm74_vm0, %v15681_v45 }
 0xb38   :  { %13661 = vmatmul.mubr.msk.f32.gmra.mxu0 %vm434_vm1, %v2786_v12  ;;  %13632 = vmatprep.mubr.msk.f32.mxu1 %vm74_vm0, %v15688_v46 }
 0xb39   :  { %13663 = vmatprep.mubr.msk.f32.mxu0 %vm434_vm1, %v2791_v26 }
 0xb3b   :  { %13633 = vmatmul.mubr.msk.f32.gmra.mxu1 %vm74_vm0, %v15695_v49 }
 0xb3c   :  { %13664 = vmatmul.mubr.msk.f32.gmra.mxu0 %vm434_vm1, %v2796_v42  ;;  %13635 = vmatprep.mubr.msk.f32.mxu1 %vm74_vm0, %v15702_v51 }
 0xb3f   :  { %13636 = vmatmul.mubr.msk.f32.gmra.mxu1 %vm74_vm0, %v15709_v52 }
 0xbf0   :  { %v13656_v59 = vpop.f32.mrf.mxu0 }
 0xbf1   :  { %v3183_v50 = vmul.f32 0.35355338, %v13656_v59 }
 0xbf2   :  { %v3143_v38 = vpop.f32.mrf.mxu0 }
 0xbf3   :  { %v3182_v61 = vmul.f32 0.35355338, %v3143_v38  ;;  %v16127_v17 = vadd.f32 %v15865_v43, %v3183_v50  ;;  %v13628_v0 = vpop.f32.mrf.mxu1 }
 0xbf4   :  { %v13659_v45 = vpop.f32.mrf.mxu0 }
 0xbf5   :  { %v3185_v37 = vmul.f32 0.35355338, %v13659_v45  ;;  %v3201_v46 = vsel %vm604_vm2, %v16127_v17, -inf  ;;  %v16132_v49 = vadd.f32 %v15875_v47, %v3182_v61  ;;  %v2990_v57 = vpop.f32.mrf.mxu1 }
 0xbf6   :  { %3202 = vmax.xlane.f32.xlu1 %v3201_v46  ;;  %v3153_v51 = vpop.f32.mrf.mxu0 }
 0xbf7   :  { %v3184_v13 = vmul.f32 0.35355338, %v3153_v51  ;;  %v3198_v52 = vsel %vm604_vm2, %v16132_v49, -inf  ;;  %v16137_v39 = vadd.f32 %v15885_v23, %v3185_v37  ;;  %v13631_v32 = vpop.f32.mrf.mxu1 }
 0xbf8   :  { %3199 = vmax.xlane.f32.xlu0 %v3198_v52  ;;  %v13662_v43 = vpop.f32.mrf.mxu0 }
 0xbf9   :  { %v3187_v4 = vmul.f32 0.35355338, %v13662_v43  ;;  %v3207_v63 = vsel %vm604_vm2, %v16137_v39, -inf  ;;  %v16142_v33 = vadd.f32 %v15895_v10, %v3184_v13  ;;  %v3000_v53 = vpop.f32.mrf.mxu1 }
 0xbfa   :  { %3208 = vmax.xlane.f32.xlu1 %v3207_v63  ;;  %v3163_v47 = vpop.f32.mrf.mxu0 }
 0xbfb   :  { %v3186_v56 = vmul.f32 0.35355338, %v3163_v47  ;;  %v3204_v16 = vsel %vm604_vm2, %v16142_v33, -inf  ;;  %v16147_v9 = vadd.f32 %v15905_v22, %v3187_v4  ;;  %v13634_v54 = vpop.f32.mrf.mxu1 }
 0xbfc   :  { %3205 = vmax.xlane.f32.xlu0 %v3204_v16  ;;  %v13665_v23 = vpop.f32.mrf.mxu0 }
 0xbfd   :  { %v3189_v3 = vmul.f32 0.35355338, %v13665_v23  ;;  %v3213_v36 = vsel %vm604_vm2, %v16147_v9, -inf  ;;  %v16152_v5 = vadd.f32 %v15915_v29, %v3186_v56  ;;  %v3010_v18 = vpop.f32.mrf.mxu1 }
 0xbfe   :  { %3214 = vmax.xlane.f32.xlu1 %v3213_v36  ;;  %v3173_v10 = vpop.f32.mrf.mxu0 }
 0xbff   :  { %v3188_v31 = vmul.f32 0.35355338, %v3173_v10  ;;  %v3210_v44 = vsel %vm604_vm2, %v16152_v5, -inf  ;;  %v16157_v40 = vadd.f32 %v15925_v14, %v3189_v3  ;;  %v11824_v14 = vld [vmem:[%s18592_s7 + $0x1d8] ss:$0 sm:$0xff]  ;;  %v13637_v34 = vpop.f32.mrf.mxu1 }
 0xc00   :  { %3211 = vmax.xlane.f32.xlu0 %v3210_v44  ;;  %v3026_v26 = vadd.f32 %v13637_v34, %v11824_v14  ;;  %v3011_v19 = vadd.f32 %v11824_v14, %v3010_v18  ;;  %v3006_v27 = vadd.f32 %v13631_v32, %v11824_v14  ;;  %v3001_v15 = vadd.f32 %v11824_v14, %v3000_v53 }
 0xc01   :  { %v3219_v22 = vsel %vm604_vm2, %v16157_v40, -inf  ;;  %v16162_v48 = vadd.f32 %v15935_v24, %v3188_v31  ;;  %v3020_v12 = vpop.f32.mrf.mxu1  ;;  %v3016_v24 = vadd.f32 %v13634_v54, %v11824_v14  ;;  %v2996_v41 = vadd.f32 %v13628_v0, %v11824_v14 }
 0xc02   :  { %3220 = vmax.xlane.f32.xlu1 %v3219_v22  ;;  %v3021_v42 = vadd.f32 %v11824_v14, %v3020_v12  ;;  %13666 = vmatprep.subr.mxu1 %v3026_v26  ;;  %v2991_v59 = vadd.f32 %v11824_v14, %v2990_v57  ;;  %v11857_v12 = vld [vmem:[%s18593_s8 + $0x18] sm:$0xff] }
 0xc03   :  { %v3216_v29 = vsel %vm604_vm2, %v16162_v48, -inf  ;;  %13667 = vmatpush3.msra.mxu1 %v3026_v26 }
 0xc04   :  { %3217 = vmax.xlane.f32.xlu0 %v3216_v29  ;;  %13668 = vmatprep.subr.mxu1 %v3021_v42 }
 0xc05   :  { %13669 = vmatpush3.msra.mxu1 %v3021_v42 }
 0xc06   :  { %13670 = vmatprep.subr.mxu1 %v3016_v24 }
 0xc07   :  { %13671 = vmatpush3.msra.mxu1 %v3016_v24 }
 0xc08   :  { %13672 = vmatprep.subr.mxu1 %v3011_v19 }
 0xc09   :  { %13673 = vmatpush3.msra.mxu1 %v3011_v19 }
 0xc0a   :  { %13674 = vmatprep.subr.mxu1 %v3006_v27 }
 0xc0b   :  { %13675 = vmatpush3.msra.mxu1 %v3006_v27 }
 0xc0c   :  { %13676 = vmatprep.subr.mxu1 %v3001_v15 }
 0xc0d   :  { %13677 = vmatpush3.msra.mxu1 %v3001_v15 }
 0xc0e   :  { %13678 = vmatprep.subr.mxu1 %v2996_v41 }
 0xc0f   :  { %13679 = vmatpush3.msra.mxu1 %v2996_v41 }
 0xc10   :  { %13680 = vmatprep.subr.mxu1 %v2991_v59 }
 0xc11   :  { %13681 = vmatpush3.msra.mxu1 %v2991_v59 }
 0xc12   :  { %13694 = vmatprep.subr.mxu1 %v11857_v12 }
 0xc7f   :  { %v3203_v50 = vpop.xlane.xlu1 %3202 }
 0xc80   :  { %v3223_v38 = vsub.f32 %v16127_v17, %v3203_v50 }
 0xc81   :  { %v3200_v61 = vpop.xlane.xlu0 %3199 }
 0xc82   :  { %v3232_v45 = vmul.f32 1.442695, %v3223_v38  ;;  %v3222_v37 = vsub.f32 %v16132_v49, %v3200_v61 }
 0xc83   :  { %v3209_v46 = vpop.xlane.xlu1 %3208 }
 0xc84   :  { %14701 = vpow2.f32 %v3232_v45  ;;  %v3230_v51 = vmul.f32 1.442695, %v3222_v37  ;;  %v3225_v13 = vsub.f32 %v16137_v39, %v3209_v46 }
 0xc85   :  { %v3206_v52 = vpop.xlane.xlu0 %3205 }
 0xc86   :  { %14703 = vpow2.f32 %v3230_v51  ;;  %v3236_v43 = vmul.f32 1.442695, %v3225_v13  ;;  %v3224_v4 = vsub.f32 %v16142_v33, %v3206_v52 }
 0xc87   :  { %v3215_v63 = vpop.xlane.xlu1 %3214 }
 0xc88   :  { %14705 = vpow2.f32 %v3236_v43  ;;  %v3234_v47 = vmul.f32 1.442695, %v3224_v4  ;;  %v3227_v56 = vsub.f32 %v16147_v9, %v3215_v63 }
 0xc89   :  { %v3212_v17 = vpop.xlane.xlu0 %3211 }
 0xc8a   :  { %14707 = vpow2.f32 %v3234_v47  ;;  %v3240_v16 = vmul.f32 1.442695, %v3227_v56  ;;  %v3226_v49 = vsub.f32 %v16152_v5, %v3212_v17 }
 0xc8b   :  { %v3221_v23 = vpop.xlane.xlu1 %3220 }
 0xc8c   :  { %14709 = vpow2.f32 %v3240_v16  ;;  %v3238_v3 = vmul.f32 1.442695, %v3226_v49  ;;  %v3229_v39 = vsub.f32 %v16157_v40, %v3221_v23 }
 0xc8d   :  { %v3218_v36 = vpop.xlane.xlu0 %3217 }
 0xc8e   :  { %14711 = vpow2.f32 %v3238_v3  ;;  %v3244_v10 = vmul.f32 1.442695, %v3229_v39  ;;  %v3228_v33 = vsub.f32 %v16162_v48, %v3218_v36 }
 0xc90   :  { %14713 = vpow2.f32 %v3244_v10  ;;  %v3242_v31 = vmul.f32 1.442695, %v3228_v33 }
 0xc91   :  { %v14702_v44 = vpop.eup %14701 }
 0xc92   :  { %14715 = vpow2.f32 %v3242_v31  ;;  %v3249_v9 = vsel %vm604_vm2, %v14702_v44, 0.0 }
 0xc93   :  { %v14704_v22 = vpop.eup %14703  ;;  %3250 = vadd.xlane.f32.xlu1 %v3249_v9  ;;  %v1776_v9 = vadd.f32 %v15734_v2, %v15809_v58  ;;  %v15021_v58 = vld [vmem:[%s18585_s0 + $0x8] sm:$0xff] }
 0xc94   :  { %v3246_v5 = vsel %vm604_vm2, %v14704_v22, 0.0 }
 0xc95   :  { %v14706_v29 = vpop.eup %14705  ;;  %3247 = vadd.xlane.f32.xlu0 %v3246_v5  ;;  %v11866_v5 = vld [vmem:[%s18596_s11] ss:$0 sm:$0xff] }
 0xc96   :  { %v3255_v0 = vsel %vm604_vm2, %v14706_v29, 0.0 }
 0xc97   :  { %v14708_v40 = vpop.eup %14707  ;;  %3256 = vadd.xlane.f32.xlu1 %v3255_v0 }
 0xc98   :  { %v3252_v57 = vsel %vm604_vm2, %v14708_v40, 0.0 }
 0xc99   :  { %v14710_v32 = vpop.eup %14709  ;;  %3253 = vadd.xlane.f32.xlu0 %v3252_v57  ;;  %v1786_v57 = vadd.f32 %v15738_v7, %v15813_v62  ;;  %v15022_v62 = vld [vmem:[%s18585_s0] sm:$0xff] }
 0xc9a   :  { %v3261_v48 = vsel %vm604_vm2, %v14710_v32, 0.0 }
 0xc9b   :  { %v14712_v53 = vpop.eup %14711  ;;  %3262 = vadd.xlane.f32.xlu1 %v3261_v48 }
 0xc9c   :  { %v3258_v54 = vsel %vm604_vm2, %v14712_v53, 0.0 }
 0xc9d   :  { %v14714_v14 = vpop.eup %14713  ;;  %3259 = vadd.xlane.f32.xlu0 %v3258_v54  ;;  %v2678_v54 = vadd.f32 %v16054_v60, %v1786_v57 }
 0xc9e   :  { %v3267_v18 = vsel %vm604_vm2, %v14714_v14, 0.0 }
 0xc9f   :  { %v14716_v34 = vpop.eup %14715  ;;  %3268 = vadd.xlane.f32.xlu1 %v3267_v18 }
 0xca0   :  { %v3264_v26 = vsel %vm604_vm2, %v14716_v34, 0.0 }
 0xca1   :  { %3265 = vadd.xlane.f32.xlu0 %v3264_v26 }
 0xd1c   :  { %v3251_v24 = vpop.xlane.xlu1 %3250 }
 0xd1d   :  { %14717 = vrcp.f32 %v3251_v24 }
 0xd1e   :  { %v3248_v42 = vpop.xlane.xlu0 %3247 }
 0xd1f   :  { %14719 = vrcp.f32 %v3248_v42 }
 0xd20   :  { %v3257_v19 = vpop.xlane.xlu1 %3256 }
 0xd21   :  { %14721 = vrcp.f32 %v3257_v19 }
 0xd22   :  { %v3254_v27 = vpop.xlane.xlu0 %3253 }
 0xd23   :  { %14723 = vrcp.f32 %v3254_v27  ;;  %v1806_v27 = vadd.f32 %v15746_v11, %v15821_v6  ;;  %v15025_v6 = vld [vmem:[%s18585_s0 + $0x28] sm:$0xff] }
 0xd24   :  { %v3263_v15 = vpop.xlane.xlu1 %3262 }
 0xd25   :  { %14725 = vrcp.f32 %v3263_v15 }
 0xd26   :  { %v3260_v41 = vpop.xlane.xlu0 %3259 }
 0xd27   :  { %14727 = vrcp.f32 %v3260_v41 }
 0xd28   :  { %v3269_v59 = vpop.xlane.xlu1 %3268 }
 0xd29   :  { %14729 = vrcp.f32 %v3269_v59 }
 0xd2a   :  { %v3266_v50 = vpop.xlane.xlu0 %3265  ;;  %v14718_v38 = vpop.eup %14717 }
 0xd2b   :  { %14731 = vrcp.f32 %v3266_v50  ;;  %v3279_v37 = vmul.f32 %v14718_v38, %v14702_v44  ;;  %v2682_v38 = vadd.f32 %v16066_v8, %v1806_v27  ;;  %v15026_v8 = vld [vmem:[%s18585_s0 + $0x20] sm:$0xff] }
 0xd2c   :  { %v14720_v61 = vpop.eup %14719 }
 0xd2d   :  { %v3278_v45 = vmul.f32 %v14720_v61, %v14704_v22 }
 0xd2e   :  { %v14722_v46 = vpop.eup %14721 }
 0xd2f   :  { %13682 = vmatprep.mubr.msk.f32.mxu1 %vm604_vm2, %v3278_v45  ;;  %v3281_v52 = vmul.f32 %v14722_v46, %v14706_v29  ;;  %v2676_v29 = vadd.f32 %v16048_v25, %v1776_v9 }
 0xd30   :  { %v14724_v51 = vpop.eup %14723  ;;  %13683 = vmatmul.mubr.msk.f32.vlgmr.msra.gmra.mxu1 %vm604_vm2, %v3279_v37 }
 0xd31   :  { %v3280_v13 = vmul.f32 %v14724_v51, %v14708_v40  ;;  %13695 = vmatpush3.msra.mxu1 %v11857_v12 }
 0xd32   :  { %v14726_v43 = vpop.eup %14725 }
 0xd33   :  { %13685 = vmatprep.mubr.msk.f32.mxu1 %vm604_vm2, %v3280_v13  ;;  %v3283_v47 = vmul.f32 %v14726_v43, %v14710_v32 }
 0xd34   :  { %v14728_v4 = vpop.eup %14727  ;;  %13686 = vmatmul.mubr.msk.f32.gmra.mxu1 %vm604_vm2, %v3281_v52 }
 0xd35   :  { %v3282_v63 = vmul.f32 %v14728_v4, %v14712_v53 }
 0xd36   :  { %v14730_v56 = vpop.eup %14729 }
 0xd37   :  { %13688 = vmatprep.mubr.msk.f32.mxu1 %vm604_vm2, %v3282_v63  ;;  %v3285_v49 = vmul.f32 %v14730_v56, %v14714_v14 }
 0xd38   :  { %v14732_v17 = vpop.eup %14731  ;;  %13689 = vmatmul.mubr.msk.f32.gmra.mxu1 %vm604_vm2, %v3283_v47  ;;  %v15027_v47 = vld [vmem:[%s18585_s0 + $0x38] sm:$0xff] }
 0xd39   :  { %v3284_v16 = vmul.f32 %v14732_v17, %v14716_v34 }
 0xd3b   :  { %13691 = vmatprep.mubr.msk.f32.mxu1 %vm604_vm2, %v3284_v16  ;;  %v15028_v16 = vld [vmem:[%s18585_s0 + $0x30] sm:$0xff] }
 0xd3c   :  { %13692 = vmatmul.mubr.msk.f32.gmra.mxu1 %vm604_vm2, %v3285_v49 }
 0xdf0   :  { %v13684_v23 = vpop.f32.mrf.mxu1 }
 0xdf2   :  { %v3376_v3 = vpop.f32.mrf.mxu1 }
 0xdf3   :  { %13696 = vmatprep.mubr.msk.f32.mxu1 %vm434_vm1, %v3376_v3 }
 0xdf4   :  { %v13687_v39 = vpop.f32.mrf.mxu1  ;;  %13697 = vmatmul.mubr.msk.f32.vlgmr.msra.gmra.mxu1 %vm434_vm1, %v13684_v23 }
 0xdf6   :  { %v3386_v36 = vpop.f32.mrf.mxu1 }
 0xdf7   :  { %13699 = vmatprep.mubr.msk.f32.mxu1 %vm434_vm1, %v3386_v36 }
 0xdf8   :  { %v13690_v10 = vpop.f32.mrf.mxu1  ;;  %13700 = vmatmul.mubr.msk.f32.gmra.mxu1 %vm434_vm1, %v13687_v39 }
 0xdfa   :  { %v3396_v33 = vpop.f32.mrf.mxu1 }
 0xdfb   :  { %13702 = vmatprep.mubr.msk.f32.mxu1 %vm434_vm1, %v3396_v33 }
 0xdfc   :  { %v13693_v31 = vpop.f32.mrf.mxu1  ;;  %13703 = vmatmul.mubr.msk.f32.gmra.mxu1 %vm434_vm1, %v13690_v10 }
 0xdfe   :  { %v3406_v44 = vpop.f32.mrf.mxu1 }
 0xdff   :  { %13705 = vmatprep.mubr.msk.f32.mxu1 %vm434_vm1, %v3406_v44 }
 0xe00   :  { %13706 = vmatmul.mubr.msk.f32.gmra.mxu1 %vm434_vm1, %v13693_v31 }
 0xeb4   :  { %v13698_v22 = vpop.f32.mrf.mxu1 }
 0xeb5   :  { %v3547_v0 = vadd.f32 %v13698_v22, %v16046_v55  ;;  %v1796_v55 = vadd.f32 %v15742_v35, %v15817_v1  ;;  %v15023_v35 = vld [vmem:[%s18585_s0 + $0x18] sm:$0xff] }
 0xeb6   :  { %v3507_v40 = vpop.f32.mrf.mxu1 }
 0xeb7   :  { %v3560_v32 = vadd.f32 %v11866_v5, %v3547_v0  ;;  %v3546_v48 = vadd.f32 %v3507_v40, %v2676_v29 }
 0xeb8   :  { %v13701_v53 = vpop.f32.mrf.mxu1 }
 0xeb9   :  { %v3559_v14 = vadd.f32 %v11866_v5, %v3546_v48  ;;  %v3549_v2 = vadd.f32 %v13701_v53, %v16052_v28  ;;  %v3568_v18 = vadd.f32 %v15021_v58, %v3560_v32  ;;  %v2680_v28 = vadd.f32 %v16060_v30, %v1796_v55 }
 0xeba   :  { %v3517_v25 = vpop.f32.mrf.mxu1 }
 0xebb   :  { %v3562_v34 = vadd.f32 %v11866_v5, %v3549_v2  ;;  %v3548_v26 = vadd.f32 %v3517_v25, %v2678_v54  ;;  %v3580_v7 = vsel %vm74_vm0, %v3568_v18, 0.0  ;;  %v3567_v60 = vadd.f32 %v15022_v62, %v3559_v14 }
 0xebc   :  { %3581 = vadd.xlane.f32.xlu1 %v3580_v7  ;;  %v13704_v12 = vpop.f32.mrf.mxu1 }
 0xebd   :  { %v3561_v24 = vadd.f32 %v11866_v5, %v3548_v26  ;;  %v3551_v42 = vadd.f32 %v13704_v12, %v16058_v20  ;;  %v3577_v19 = vsel %vm74_vm0, %v3567_v60, 0.0  ;;  %v3570_v1 = vadd.f32 %v15023_v35, %v3562_v34  ;;  %v15024_v20 = vld [vmem:[%s18585_s0 + $0x10] sm:$0xff] }
 0xebe   :  { %3578 = vadd.xlane.f32.xlu0 %v3577_v19  ;;  %v3527_v15 = vpop.f32.mrf.mxu1 }
 0xebf   :  { %v3564_v41 = vadd.f32 %v11866_v5, %v3551_v42  ;;  %v3550_v59 = vadd.f32 %v3527_v15, %v2680_v28  ;;  %v3586_v30 = vsel %vm74_vm0, %v3570_v1, 0.0  ;;  %v3569_v50 = vadd.f32 %v15024_v20, %v3561_v24  ;;  %v3708_v20 = vld [vmem:[%s18594_s9 + $0x10] sm:$0xff] }
 0xec0   :  { %3587 = vadd.xlane.f32.xlu1 %v3586_v30  ;;  %v13707_v61 = vpop.f32.mrf.mxu1  ;;  %v3709_v30 = vld [vmem:[%s18594_s9 + $0x18] sm:$0xff] }
 0xec1   :  { %v3563_v45 = vadd.f32 %v11866_v5, %v3550_v59  ;;  %v3553_v37 = vadd.f32 %v13707_v61, %v16064_v21  ;;  %v3583_v11 = vsel %vm74_vm0, %v3569_v50, 0.0  ;;  %v3572_v46 = vadd.f32 %v15025_v6, %v3564_v41  ;;  %13708 = vmatprep.subr.mxu0 %v3709_v30  ;;  %v3859_v61 = vld [vmem:[%s18595_s10 + $0x38] sm:$0xff] }
 0xec2   :  { %3584 = vadd.xlane.f32.xlu0 %v3583_v11  ;;  %v3537_v51 = vpop.f32.mrf.mxu1  ;;  %13709 = vmatpush3.msra.mxu0 %v3709_v30  ;;  %v3856_v11 = vld [vmem:[%s18595_s10 + $0x20] sm:$0xff] }
 0xec3   :  { %v3566_v13 = vadd.f32 %v11866_v5, %v3553_v37  ;;  %v3552_v52 = vadd.f32 %v3537_v51, %v2682_v38  ;;  %v3592_v43 = vsel %vm74_vm0, %v3572_v46, 0.0  ;;  %v3571_v4 = vadd.f32 %v15026_v8, %v3563_v45  ;;  %13710 = vmatprep.subr.mxu0 %v3708_v20  ;;  %v3706_v38 = vld [vmem:[%s18594_s9] sm:$0xff]  ;;  %v3858_v45 = vld [vmem:[%s18595_s10 + $0x30] sm:$0xff]  ;;  %13728 = vmatprep.subr.mxu1 %v3859_v61  ;;  %v3857_v37 = vld [vmem:[%s18595_s10 + $0x28] sm:$0xff] }
 0xec4   :  { %3593 = vadd.xlane.f32.xlu1 %v3592_v43  ;;  %13711 = vmatpush3.msra.mxu0 %v3708_v20 }
 0xec5   :  { %v3565_v21 = vadd.f32 %v11866_v5, %v3552_v52  ;;  %v3589_v63 = vsel %vm74_vm0, %v3571_v4, 0.0  ;;  %v3574_v56 = vadd.f32 %v15027_v47, %v3566_v13  ;;  %13729 = vmatpush3.msra.mxu1 %v3859_v61  ;;  %v3853_v61 = vld [vmem:[%s18595_s10 + $0x8] sm:$0xff] }
 0xec6   :  { %3590 = vadd.xlane.f32.xlu0 %v3589_v63  ;;  %13730 = vmatprep.subr.mxu1 %v3858_v45 }
 0xec7   :  { %v3598_v17 = vsel %vm74_vm0, %v3574_v56, 0.0  ;;  %v3573_v49 = vadd.f32 %v15028_v16, %v3565_v21  ;;  %13731 = vmatpush3.msra.mxu1 %v3858_v45  ;;  %v3852_v45 = vld [vmem:[%s18595_s10] sm:$0xff] }
 0xec8   :  { %3599 = vadd.xlane.f32.xlu1 %v3598_v17  ;;  %13732 = vmatprep.subr.mxu1 %v3857_v37 }
 0xec9   :  { %v3595_v23 = vsel %vm74_vm0, %v3573_v49, 0.0  ;;  %13733 = vmatpush3.msra.mxu1 %v3857_v37  ;;  %v11869_v37 = vld [vmem:[%s18594_s9 + $0x20] ss:$0 sm:$0xff] }
 0xeca   :  { %3596 = vadd.xlane.f32.xlu0 %v3595_v23  ;;  %13734 = vmatprep.subr.mxu1 %v3856_v11 }
 0xecb   :  { %13735 = vmatpush3.msra.mxu1 %v3856_v11 }
 0xf45   :  { %v3582_v3 = vpop.xlane.xlu1 %3581 }
 0xf46   :  { %v3603_v39 = vmul.f32 0.03125, %v3582_v3 }
 0xf47   :  { %v3579_v36 = vpop.xlane.xlu0 %3578 }
 0xf48   :  { %v16255_v10 = vsub.f32 %v3568_v18, %v3603_v39  ;;  %v3602_v33 = vmul.f32 0.03125, %v3579_v36 }
 0xf49   :  { %v3588_v31 = vpop.xlane.xlu1 %3587 }
 0xf4a   :  { %v16257_v44 = vsub.f32 %v3567_v60, %v3602_v33  ;;  %v3605_v9 = vmul.f32 0.03125, %v3588_v31  ;;  %v3619_v22 = vmul.f32 %v16255_v10, %v16255_v10 }
 0xf4b   :  { %v3585_v5 = vpop.xlane.xlu0 %3584 }
 0xf4c   :  { %v16261_v29 = vsub.f32 %v3570_v1, %v3605_v9  ;;  %v3604_v0 = vmul.f32 0.03125, %v3585_v5  ;;  %v3629_v40 = vsel %vm74_vm0, %v3619_v22, 0.0  ;;  %v3618_v57 = vmul.f32 %v16257_v44, %v16257_v44 }
 0xf4d   :  { %v3594_v32 = vpop.xlane.xlu1 %3593  ;;  %3630 = vadd.xlane.f32.xlu1 %v3629_v40  ;;  %v11867_v40 = vld [vmem:[%s18596_s11 + $0x2] ss:$0 sm:$0xff] }
 0xf4e   :  { %v16266_v48 = vsub.f32 %v3569_v50, %v3604_v0  ;;  %v3607_v53 = vmul.f32 0.03125, %v3594_v32  ;;  %v3626_v54 = vsel %vm74_vm0, %v3618_v57, 0.0  ;;  %v3621_v14 = vmul.f32 %v16261_v29, %v16261_v29  ;;  %v3707_v50 = vld [vmem:[%s18594_s9 + $0x8] sm:$0xff] }
 0xf4f   :  { %v3591_v2 = vpop.xlane.xlu0 %3590  ;;  %3627 = vadd.xlane.f32.xlu0 %v3626_v54  ;;  %13712 = vmatprep.subr.mxu0 %v3707_v50 }
 0xf50   :  { %v16271_v58 = vsub.f32 %v3572_v46, %v3607_v53  ;;  %v3606_v18 = vmul.f32 0.03125, %v3591_v2  ;;  %v3635_v55 = vsel %vm74_vm0, %v3621_v14, 0.0  ;;  %v3620_v25 = vmul.f32 %v16266_v48, %v16266_v48  ;;  %13713 = vmatpush3.msra.mxu0 %v3707_v50  ;;  %v11868_v2 = vld [vmem:[%s18596_s11 + $0x3] ss:$0 sm:$0xff] }
 0xf51   :  { %3636 = vadd.xlane.f32.xlu1 %v3635_v55  ;;  %v3600_v34 = vpop.xlane.xlu1 %3599  ;;  %13714 = vmatprep.subr.mxu0 %v3706_v38 }
 0xf52   :  { %v16276_v26 = vsub.f32 %v3571_v4, %v3606_v18  ;;  %v3609_v7 = vmul.f32 0.03125, %v3600_v34  ;;  %v3632_v62 = vsel %vm74_vm0, %v3620_v25, 0.0  ;;  %v3623_v60 = vmul.f32 %v16271_v58, %v16271_v58  ;;  %13715 = vmatpush3.msra.mxu0 %v3706_v38  ;;  %v3854_v38 = vld [vmem:[%s18595_s10 + $0x10] sm:$0xff] }
 0xf53   :  { %3633 = vadd.xlane.f32.xlu0 %v3632_v62  ;;  %v3597_v28 = vpop.xlane.xlu0 %3596 }
 0xf54   :  { %v16281_v12 = vsub.f32 %v3574_v56, %v3609_v7  ;;  %v3608_v24 = vmul.f32 0.03125, %v3597_v28  ;;  %v3641_v42 = vsel %vm74_vm0, %v3623_v60, 0.0  ;;  %v3622_v19 = vmul.f32 %v16276_v26, %v16276_v26 }
 0xf55   :  { %3642 = vadd.xlane.f32.xlu1 %v3641_v42 }
 0xf56   :  { %v16286_v35 = vsub.f32 %v3573_v49, %v3608_v24  ;;  %v3638_v1 = vsel %vm74_vm0, %v3622_v19, 0.0  ;;  %v3625_v27 = vmul.f32 %v16281_v12, %v16281_v12 }
 0xf57   :  { %3639 = vadd.xlane.f32.xlu0 %v3638_v1 }
 0xf58   :  { %v3647_v15 = vsel %vm74_vm0, %v3625_v27, 0.0  ;;  %v3624_v41 = vmul.f32 %v16286_v35, %v16286_v35 }
 0xf59   :  { %3648 = vadd.xlane.f32.xlu1 %v3647_v15 }
 0xf5a   :  { %v3644_v59 = vsel %vm74_vm0, %v3624_v41, 0.0 }
 0xf5b   :  { %3645 = vadd.xlane.f32.xlu0 %v3644_v59 }
 0xfd6   :  { %v3631_v6 = vpop.xlane.xlu1 %3630 }
 0xfd7   :  { %v3651_v46 = vmul.f32 0.03125, %v3631_v6 }
 0xfd8   :  { %v3628_v51 = vpop.xlane.xlu0 %3627 }
 0xfd9   :  { %v3659_v13 = vadd.f32 1e-05, %v3651_v46  ;;  %v3650_v52 = vmul.f32 0.03125, %v3628_v51 }
 0xfda   :  { %v3637_v43 = vpop.xlane.xlu1 %3636 }
 0xfdb   :  { %14733 = vrsqrt.f32 %v3659_v13  ;;  %v3658_v8 = vadd.f32 1e-05, %v3650_v52  ;;  %v3653_v4 = vmul.f32 0.03125, %v3637_v43 }
 0xfdc   :  { %v3634_v21 = vpop.xlane.xlu0 %3633 }
 0xfdd   :  { %14735 = vrsqrt.f32 %v3658_v8  ;;  %v3661_v63 = vadd.f32 1e-05, %v3653_v4  ;;  %v3652_v47 = vmul.f32 0.03125, %v3634_v21 }
 0xfde   :  { %v3643_v56 = vpop.xlane.xlu1 %3642 }
 0xfdf   :  { %14737 = vrsqrt.f32 %v3661_v63  ;;  %v3660_v17 = vadd.f32 1e-05, %v3652_v47  ;;  %v3655_v16 = vmul.f32 0.03125, %v3643_v56 }
 0xfe0   :  { %v3640_v49 = vpop.xlane.xlu0 %3639 }
 0xfe1   :  { %14739 = vrsqrt.f32 %v3660_v17  ;;  %v3663_v23 = vadd.f32 1e-05, %v3655_v16  ;;  %v3654_v3 = vmul.f32 0.03125, %v3640_v49 }
 0xfe2   :  { %v3649_v39 = vpop.xlane.xlu1 %3648 }
 0xfe3   :  { %14741 = vrsqrt.f32 %v3663_v23  ;;  %v3662_v36 = vadd.f32 1e-05, %v3654_v3  ;;  %v3657_v33 = vmul.f32 0.03125, %v3649_v39 }
 0xfe4   :  { %v3646_v31 = vpop.xlane.xlu0 %3645 }
 0xfe5   :  { %14743 = vrsqrt.f32 %v3662_v36  ;;  %v3665_v9 = vadd.f32 1e-05, %v3657_v33  ;;  %v3656_v22 = vmul.f32 0.03125, %v3646_v31 }
 0xfe7   :  { %14745 = vrsqrt.f32 %v3665_v9  ;;  %v3664_v5 = vadd.f32 1e-05, %v3656_v22 }
 0xfe8   :  { %v14734_v0 = vpop.eup %14733 }
 0xfe9   :  { %v3675_v57 = vmul.f32 %v14734_v0, %v16255_v10  ;;  %14747 = vrsqrt.f32 %v3664_v5  ;;  %v11878_v5 = vld [vmem:[%s18596_s11 + $0x1] ss:$0 sm:$0xff] }
 0xfea   :  { %v14736_v32 = vpop.eup %14735 }
 0xfeb   :  { %v3674_v53 = vmul.f32 %v14736_v32, %v16257_v44  ;;  %v3687_v14 = vmul.f32 %v11867_v40, %v3675_v57 }
 0xfec   :  { %v14738_v54 = vpop.eup %14737 }
 0xfed   :  { %v3686_v18 = vmul.f32 %v11867_v40, %v3674_v53  ;;  %v3677_v55 = vmul.f32 %v14738_v54, %v16261_v29  ;;  %v16331_v10 = vadd.f32 %v11868_v2, %v3687_v14 }
 0xfee   :  { %v14740_v25 = vpop.eup %14739 }
 0xfef   :  { %v16328_v34 = vadd.f32 %v11868_v2, %v3686_v18  ;;  %v3676_v7 = vmul.f32 %v14740_v25, %v16266_v48  ;;  %v3689_v60 = vmul.f32 %v11867_v40, %v3677_v55 }
 0xff0   :  { %v14742_v62 = vpop.eup %14741 }
 0xff1   :  { %13716 = vmatprep.mubr.msk.f32.mxu0 %vm74_vm0, %v16328_v34  ;;  %v3688_v44 = vmul.f32 %v11867_v40, %v3676_v7  ;;  %v3679_v28 = vmul.f32 %v14742_v62, %v16271_v58  ;;  %v16341_v48 = vadd.f32 %v11868_v2, %v3689_v60 }
 0xff2   :  { %v14744_v24 = vpop.eup %14743  ;;  %13717 = vmatmul.mubr.msk.f32.vlgmr.msra.gmra.mxu0 %vm74_vm0, %v16331_v10 }
 0xff3   :  { %v16338_v29 = vadd.f32 %v11868_v2, %v3688_v44  ;;  %v3678_v42 = vmul.f32 %v14744_v24, %v16276_v26  ;;  %v3691_v1 = vmul.f32 %v11867_v40, %v3679_v28 }
 0xff4   :  { %v14746_v19 = vpop.eup %14745 }
 0xff5   :  { %13719 = vmatprep.mubr.msk.f32.mxu0 %vm74_vm0, %v16338_v29  ;;  %v3690_v27 = vmul.f32 %v11867_v40, %v3678_v42  ;;  %v3681_v15 = vmul.f32 %v14746_v19, %v16281_v12  ;;  %v16351_v30 = vadd.f32 %v11868_v2, %v3691_v1 }
 0xff6   :  { %v14748_v41 = vpop.eup %14747  ;;  %13720 = vmatmul.mubr.msk.f32.gmra.mxu0 %vm74_vm0, %v16341_v48 }
 0xff7   :  { %v16348_v58 = vadd.f32 %v11868_v2, %v3690_v27  ;;  %v3680_v59 = vmul.f32 %v14748_v41, %v16286_v35  ;;  %v3693_v26 = vmul.f32 %v11867_v40, %v3681_v15  ;;  %v3855_v35 = vld [vmem:[%s18595_s10 + $0x18] sm:$0xff] }
 0xff8   :  { %13736 = vmatprep.subr.mxu1 %v3855_v35 }
 0xff9   :  { %13722 = vmatprep.mubr.msk.f32.mxu0 %vm74_vm0, %v16348_v58  ;;  %v3692_v20 = vmul.f32 %v11867_v40, %v3680_v59  ;;  %v16359_v12 = vadd.f32 %v11868_v2, %v3693_v26  ;;  %13737 = vmatpush3.msra.mxu1 %v3855_v35 }
 0xffa   :  { %13723 = vmatmul.mubr.msk.f32.gmra.mxu0 %vm74_vm0, %v16351_v30  ;;  %13738 = vmatprep.subr.mxu1 %v3854_v38 }
 0xffb   :  { %v16357_v50 = vadd.f32 %v11868_v2, %v3692_v20  ;;  %13739 = vmatpush3.msra.mxu1 %v3854_v38 }
 0xffc   :  { %13740 = vmatprep.subr.mxu1 %v3853_v61 }
 0xffd   :  { %13725 = vmatprep.mubr.msk.f32.mxu0 %vm74_vm0, %v16357_v50  ;;  %13741 = vmatpush3.msra.mxu1 %v3853_v61 }
 0xffe   :  { %13726 = vmatmul.mubr.msk.f32.gmra.mxu0 %vm74_vm0, %v16359_v12  ;;  %13742 = vmatprep.subr.mxu1 %v3852_v45 }
 0xfff   :  { %13743 = vmatpush3.msra.mxu1 %v3852_v45 }
0x10b2   :  { %v13718_v11 = vpop.f32.mrf.mxu0 }
0x10b3   :  { %v3811_v6 = vadd.f32 %v13718_v11, %v11869_v37 }
0x10b4   :  { %v3805_v46 = vpop.f32.mrf.mxu0 }
0x10b5   :  { %v3806_v51 = vadd.f32 %v11869_v37, %v3805_v46  ;;  %v3845_v43 = vmax.f32 %v3811_v6, 0.0 }
0x10b6   :  { %v13721_v13 = vpop.f32.mrf.mxu0 }
0x10b7   :  { %v3844_v52 = vmax.f32 %v3806_v51, 0.0  ;;  %v3821_v8 = vadd.f32 %v13721_v13, %v11869_v37 }
0x10b8   :  { %v3815_v4 = vpop.f32.mrf.mxu0 }
0x10b9   :  { %v3816_v21 = vadd.f32 %v11869_v37, %v3815_v4  ;;  %13744 = vmatprep.mubr.msk.f32.mxu1 %vm604_vm2, %v3844_v52  ;;  %v3847_v56 = vmax.f32 %v3821_v8, 0.0 }
0x10ba   :  { %v13724_v63 = vpop.f32.mrf.mxu0  ;;  %13745 = vmatmul.mubr.msk.f32.vlgmr.msra.gmra.mxu1 %vm604_vm2, %v3845_v43 }
0x10bb   :  { %v3846_v47 = vmax.f32 %v3816_v21, 0.0  ;;  %v3831_v17 = vadd.f32 %v13724_v63, %v11869_v37 }
0x10bc   :  { %v3825_v16 = vpop.f32.mrf.mxu0 }
0x10bd   :  { %v3826_v49 = vadd.f32 %v11869_v37, %v3825_v16  ;;  %13747 = vmatprep.mubr.msk.f32.mxu1 %vm604_vm2, %v3846_v47  ;;  %v3849_v39 = vmax.f32 %v3831_v17, 0.0 }
0x10be   :  { %v13727_v23 = vpop.f32.mrf.mxu0  ;;  %13748 = vmatmul.mubr.msk.f32.gmra.mxu1 %vm604_vm2, %v3847_v56 }
0x10bf   :  { %v3848_v3 = vmax.f32 %v3826_v49, 0.0  ;;  %v3841_v36 = vadd.f32 %v13727_v23, %v11869_v37 }
0x10c0   :  { %v3835_v33 = vpop.f32.mrf.mxu0 }
0x10c1   :  { %v3836_v31 = vadd.f32 %v11869_v37, %v3835_v33  ;;  %13750 = vmatprep.mubr.msk.f32.mxu1 %vm604_vm2, %v3848_v3  ;;  %v3851_v22 = vmax.f32 %v3841_v36, 0.0 }
0x10c2   :  { %13751 = vmatmul.mubr.msk.f32.gmra.mxu1 %vm604_vm2, %v3849_v39 }
0x10c3   :  { %v3850_v9 = vmax.f32 %v3836_v31, 0.0 }
0x10c5   :  { %13753 = vmatprep.mubr.msk.f32.mxu1 %vm604_vm2, %v3850_v9 }
0x10c6   :  { %13754 = vmatmul.mubr.msk.f32.gmra.mxu1 %vm604_vm2, %v3851_v22 }
0x117a   :  { %v13746_v0 = vpop.f32.mrf.mxu1 }
0x117b   :  { %v3961_v40 = vadd.f32 %v13746_v0, %v11878_v5 }
0x117c   :  { %v3955_v57 = vpop.f32.mrf.mxu1 }
0x117d   :  { %v3956_v32 = vadd.f32 %v11878_v5, %v3955_v57  ;;  %v3995_v53 = vadd.f32 %v3961_v40, %v16331_v10 }
0x117e   :  { %v13749_v54 = vpop.f32.mrf.mxu1 }
0x117f   :  { %v3971_v14 = vadd.f32 %v13749_v54, %v11878_v5  ;;  %v4007_v2 = vsel %vm74_vm0, %v3995_v53, 0.0  ;;  %v3994_v18 = vadd.f32 %v3956_v32, %v16328_v34 }
0x1180   :  { %4008 = vadd.xlane.f32.xlu0 %v4007_v2  ;;  %v3965_v55 = vpop.f32.mrf.mxu1 }
0x1181   :  { %v3966_v25 = vadd.f32 %v11878_v5, %v3965_v55  ;;  %v3997_v7 = vadd.f32 %v3971_v14, %v16341_v48  ;;  %v4004_v44 = vsel %vm74_vm0, %v3994_v18, 0.0  ;;  %v11892_v55 = vld [vmem:[%s18592_s7 + $0x1f8] sm:$0xff] }
0x1182   :  { %v13752_v62 = vpop.f32.mrf.mxu1 }
0x1183   :  { %v3981_v60 = vadd.f32 %v13752_v62, %v11878_v5  ;;  %v4013_v28 = vsel %vm74_vm0, %v3997_v7, 0.0  ;;  %v3996_v24 = vadd.f32 %v3966_v25, %v16338_v29  ;;  %v11899_v25 = vld [vmem:[%s18592_s7 + $0x298] sm:$0xff]  ;;  %v11898_v62 = vld [vmem:[%s18592_s7 + $0x290] sm:$0xff] }
0x1184   :  { %4005 = vadd.xlane.f32.xlu0 %v4004_v44  ;;  %4014 = vadd.xlane.f32.xlu1 %v4013_v28  ;;  %v3975_v10 = vpop.f32.mrf.mxu1  ;;  %v11897_v44 = vld [vmem:[%s18592_s7 + $0x288] sm:$0xff]  ;;  %v11889_v28 = vld [vmem:[%s18592_s7 + $0x1e0] sm:$0xff] }
0x1185   :  { %v3976_v42 = vadd.f32 %v11878_v5, %v3975_v10  ;;  %v4010_v34 = vsel %vm74_vm0, %v3996_v24, 0.0  ;;  %v3999_v48 = vadd.f32 %v3981_v60, %v16351_v30  ;;  %v11890_v60 = vld [vmem:[%s18592_s7 + $0x1e8] sm:$0xff] }
0x1186   :  { %v13755_v19 = vpop.f32.mrf.mxu1 }
0x1187   :  { %v3991_v1 = vadd.f32 %v13755_v19, %v11878_v5  ;;  %v3998_v27 = vadd.f32 %v3976_v42, %v16348_v58  ;;  %v4019_v29 = vsel %vm74_vm0, %v3999_v48, 0.0 }
0x1188   :  { %4011 = vadd.xlane.f32.xlu1 %v4010_v34  ;;  %v3985_v15 = vpop.f32.mrf.mxu1 }
0x1189   :  { %v3986_v41 = vadd.f32 %v11878_v5, %v3985_v15  ;;  %v4016_v59 = vsel %vm74_vm0, %v3998_v27, 0.0  ;;  %v4001_v20 = vadd.f32 %v3991_v1, %v16359_v12 }
0x118a   :  { %4017 = vadd.xlane.f32.xlu0 %v4016_v59 }
0x118b   :  { %v4000_v26 = vadd.f32 %v3986_v41, %v16357_v50  ;;  %v4025_v58 = vsel %vm74_vm0, %v4001_v20, 0.0 }
0x118c   :  { %4020 = vadd.xlane.f32.xlu1 %v4019_v29 }
0x118d   :  { %v4022_v35 = vsel %vm74_vm0, %v4000_v26, 0.0 }
0x118e   :  { %4023 = vadd.xlane.f32.xlu0 %v4022_v35 }
0x1190   :  { %4026 = vadd.xlane.f32.xlu1 %v4025_v58 }
0x1209   :  { %v4009_v30 = vpop.xlane.xlu0 %4008 }
0x120a   :  { %v4029_v38 = vmul.f32 0.03125, %v4009_v30 }
0x120c   :  { %v16407_v61 = vsub.f32 %v3995_v53, %v4029_v38 }
0x120d   :  { %v4015_v45 = vpop.xlane.xlu1 %4014  ;;  %v4006_v37 = vpop.xlane.xlu0 %4005 }
0x120e   :  { %v4031_v11 = vmul.f32 0.03125, %v4015_v45  ;;  %v4028_v6 = vmul.f32 0.03125, %v4006_v37  ;;  %v4045_v50 = vmul.f32 %v16407_v61, %v16407_v61 }
0x1210   :  { %v16411_v46 = vsub.f32 %v3997_v7, %v4031_v11  ;;  %v16413_v12 = vsub.f32 %v3994_v18, %v4028_v6  ;;  %v4055_v51 = vsel %vm74_vm0, %v4045_v50, 0.0  ;;  %v18600_v18 = vmov 0.0   ;;  %v11891_v7 = vld [vmem:[%s18592_s7 + $0x1f0] sm:$0xff] }
0x1211   :  { %v4012_v13 = vpop.xlane.xlu1 %4011  ;;  %4056 = vadd.xlane.f32.xlu0 %v4055_v51  ;;  %13767 = vmatprep.subr.mxu1 %v18600_v18 }
0x1212   :  { %v4030_v52 = vmul.f32 0.03125, %v4012_v13  ;;  %v4047_v43 = vmul.f32 %v16411_v46, %v16411_v46  ;;  %v4044_v8 = vmul.f32 %v16413_v12, %v16413_v12  ;;  %13756 = vmatprep.subr.mxu0 %v18600_v18  ;;  %13768 = vmatpush3.msra.mxu1 %v11899_v25 }
0x1213   :  { %v4018_v4 = vpop.xlane.xlu0 %4017  ;;  %13757 = vmatpush3.msra.mxu0 %v11892_v55  ;;  %13769 = vmatprep.subr.mxu1 %v18600_v18 }
0x1214   :  { %v16420_v21 = vsub.f32 %v3996_v24, %v4030_v52  ;;  %v4032_v63 = vmul.f32 0.03125, %v4018_v4  ;;  %v4061_v47 = vsel %vm74_vm0, %v4047_v43, 0.0  ;;  %v4052_v56 = vsel %vm74_vm0, %v4044_v8, 0.0  ;;  %13758 = vmatprep.subr.mxu0 %v18600_v18  ;;  %13770 = vmatpush3.msra.mxu1 %v11898_v62  ;;  %v11896_v24 = vld [vmem:[%s18592_s7 + $0x280] sm:$0xff] }
0x1215   :  { %v4021_v17 = vpop.xlane.xlu1 %4020  ;;  %4062 = vadd.xlane.f32.xlu1 %v4061_v47  ;;  %4053 = vadd.xlane.f32.xlu0 %v4052_v56  ;;  %v11887_v52 = vld [vmem:[%s18596_s11 + $0x4] ss:$0 sm:$0xff]  ;;  %v11888_v56 = vld [vmem:[%s18596_s11 + $0x5] ss:$0 sm:$0xff] }
0x1216   :  { %v16424_v16 = vsub.f32 %v3998_v27, %v4032_v63  ;;  %v4033_v49 = vmul.f32 0.03125, %v4021_v17  ;;  %v4046_v23 = vmul.f32 %v16420_v21, %v16420_v21  ;;  %13759 = vmatpush3.msra.mxu0 %v11891_v7  ;;  %13771 = vmatprep.subr.mxu1 %v18600_v18  ;;  %v4132_v17 = vld [vmem:[%s18590_s5] sm:$0xf] }
0x1217   :  { %v4024_v3 = vpop.xlane.xlu0 %4023  ;;  %13760 = vmatprep.subr.mxu0 %v18600_v18  ;;  %13772 = vmatpush3.msra.mxu1 %v11897_v44 }
0x1218   :  { %v16428_v39 = vsub.f32 %v3999_v48, %v4033_v49  ;;  %v4034_v36 = vmul.f32 0.03125, %v4024_v3  ;;  %v4058_v33 = vsel %vm74_vm0, %v4046_v23, 0.0  ;;  %v4048_v31 = vmul.f32 %v16424_v16, %v16424_v16  ;;  %13761 = vmatpush3.msra.mxu0 %v11890_v60  ;;  %13773 = vmatprep.subr.mxu1 %v18600_v18 }
0x1219   :  { %4059 = vadd.xlane.f32.xlu1 %v4058_v33  ;;  %v4027_v9 = vpop.xlane.xlu1 %4026  ;;  %13762 = vmatprep.subr.mxu0 %v18600_v18 }
0x121a   :  { %v16433_v22 = vsub.f32 %v4000_v26, %v4034_v36  ;;  %v4035_v5 = vmul.f32 0.03125, %v4027_v9  ;;  %v4064_v0 = vsel %vm74_vm0, %v4048_v31, 0.0  ;;  %v4049_v40 = vmul.f32 %v16428_v39, %v16428_v39  ;;  %13763 = vmatpush3.msra.mxu0 %v11889_v28  ;;  %13774 = vmatpush3.msra.mxu1 %v11896_v24 }
0x121b   :  { %4065 = vadd.xlane.f32.xlu0 %v4064_v0  ;;  %13764 = vmatprep.mubr.msk.f32.mxu0 %vm15068_vm3, %v18600_v18  ;;  %v4136_v36 = vrot.slane %v4132_v17, 1  ;;  %v4138_v0 = vrot.slane %v4132_v17, 3 }
0x121c   :  { %v16438_v57 = vsub.f32 %v4001_v20, %v4035_v5  ;;  %v4067_v32 = vsel %vm74_vm0, %v4049_v40, 0.0  ;;  %v4050_v53 = vmul.f32 %v16433_v22, %v16433_v22  ;;  %13775 = vmatprep.mubr.msk.f32.mxu1 %vm15068_vm3, %v18600_v18  ;;  %13778 = vmatprep.subr.mxu0 %v18600_v18 }
0x121d   :  { %4068 = vadd.xlane.f32.xlu1 %v4067_v32  ;;  %13789 = vmatprep.subr.mxu1 %v18600_v18 }
0x121e   :  { %v4070_v54 = vsel %vm74_vm0, %v4050_v53, 0.0  ;;  %v4051_v14 = vmul.f32 %v16438_v57, %v16438_v57  ;;  %v4137_v53 = vrot.slane %v4132_v17, 2 }
0x121f   :  { %4071 = vadd.xlane.f32.xlu0 %v4070_v54 }
0x1220   :  { %v4073_v2 = vsel %vm74_vm0, %v4051_v14, 0.0 }
0x1221   :  { %4074 = vadd.xlane.f32.xlu1 %v4073_v2 }
0x129a   :  { %v4057_v10 = vpop.xlane.xlu0 %4056 }
0x129b   :  { %v4077_v42 = vmul.f32 0.03125, %v4057_v10 }
0x129d   :  { %v4085_v19 = vadd.f32 1e-05, %v4077_v42 }
0x129e   :  { %v4063_v1 = vpop.xlane.xlu1 %4062  ;;  %v4054_v34 = vpop.xlane.xlu0 %4053 }
0x129f   :  { %14749 = vrsqrt.f32 %v4085_v19  ;;  %v4079_v27 = vmul.f32 0.03125, %v4063_v1  ;;  %v4076_v48 = vmul.f32 0.03125, %v4054_v34 }
0x12a1   :  { %v4087_v15 = vadd.f32 1e-05, %v4079_v27  ;;  %v4084_v41 = vadd.f32 1e-05, %v4076_v48 }
0x12a2   :  { %v4060_v59 = vpop.xlane.xlu1 %4059 }
0x12a3   :  { %14751 = vrsqrt.f32 %v4087_v15  ;;  %v4078_v29 = vmul.f32 0.03125, %v4060_v59 }
0x12a4   :  { %14753 = vrsqrt.f32 %v4084_v41  ;;  %v4066_v26 = vpop.xlane.xlu0 %4065 }
0x12a5   :  { %v4086_v20 = vadd.f32 1e-05, %v4078_v29  ;;  %v4080_v35 = vmul.f32 0.03125, %v4066_v26 }
0x12a6   :  { %v4069_v58 = vpop.xlane.xlu1 %4068 }
0x12a7   :  { %14755 = vrsqrt.f32 %v4086_v20  ;;  %v4088_v30 = vadd.f32 1e-05, %v4080_v35  ;;  %v4081_v38 = vmul.f32 0.03125, %v4069_v58 }
0x12a8   :  { %v4072_v45 = vpop.xlane.xlu0 %4071 }
0x12a9   :  { %14757 = vrsqrt.f32 %v4088_v30  ;;  %v4089_v37 = vadd.f32 1e-05, %v4081_v38  ;;  %v4082_v11 = vmul.f32 0.03125, %v4072_v45 }
0x12aa   :  { %v4075_v6 = vpop.xlane.xlu1 %4074 }
0x12ab   :  { %14759 = vrsqrt.f32 %v4089_v37  ;;  %v4090_v50 = vadd.f32 1e-05, %v4082_v11  ;;  %v4083_v51 = vmul.f32 0.03125, %v4075_v6 }
0x12ac   :  { %v14750_v13 = vpop.eup %14749 }
0x12ad   :  { %v4101_v43 = vmul.f32 %v14750_v13, %v16407_v61  ;;  %14761 = vrsqrt.f32 %v4090_v50  ;;  %v4091_v8 = vadd.f32 1e-05, %v4083_v51 }
0x12af   :  { %14763 = vrsqrt.f32 %v4091_v8  ;;  %v4113_v63 = vmul.f32 %v11887_v52, %v4101_v43  ;;  %v11905_v8 = vld [vmem:[%s18592_s7 + $0x330] sm:$0xff] }
0x12b0   :  { %v14752_v4 = vpop.eup %14751 }
0x12b1   :  { %v14754_v47 = vpop.eup %14753  ;;  %v4103_v49 = vmul.f32 %v14752_v4, %v16411_v46  ;;  %v16497_v33 = vadd.f32 %v11888_v56, %v4113_v63  ;;  %v4133_v46 = vld [vmem:[%s18590_s5 + $0x4] sm:$0xf]  ;;  %v11904_v4 = vld [vmem:[%s18592_s7 + $0x328] sm:$0xff] }
0x12b2   :  { %v4100_v23 = vmul.f32 %v14754_v47, %v16413_v12  ;;  %v4139_v44 = vrot.slane %v4133_v46, 1  ;;  %v4140_v19 = vrot.slane %v4133_v46, 2  ;;  %v4141_v58 = vrot.slane %v4133_v46, 3  ;;  %v11903_v63 = vld [vmem:[%s18592_s7 + $0x320] sm:$0xff] }
0x12b3   :  { %v4115_v3 = vmul.f32 %v11887_v52, %v4103_v49  ;;  %v16509_v2 = vadd.f32 %v4136_v36, %v16497_v33  ;;  %v11917_v47 = vld [vmem:[%s18592_s7 + $0x220] sm:$0xff]  ;;  %v11914_v49 = vld [vmem:[%s18592_s7 + $0x208] sm:$0xff] }
0x12b4   :  { %v14756_v61 = vpop.eup %14755  ;;  %v4112_v31 = vmul.f32 %v11887_v52, %v4100_v23  ;;  %v11931_v23 = vld [vmem:[%s18592_s7 + $0x360] sm:$0xff]  ;;  %v11928_v36 = vld [vmem:[%s18592_s7 + $0x348] sm:$0xff] }
0x12b5   :  { %v4102_v9 = vmul.f32 %v14756_v61, %v16420_v21  ;;  %v16500_v40 = vadd.f32 %v11888_v56, %v4115_v3  ;;  %v11930_v3 = vld [vmem:[%s18592_s7 + $0x358] sm:$0xff]  ;;  %v11929_v61 = vld [vmem:[%s18592_s7 + $0x350] sm:$0xff] }
0x12b6   :  { %v14758_v5 = vpop.eup %14757  ;;  %v16502_v32 = vadd.f32 %v11888_v56, %v4112_v31  ;;  %v11901_v31 = vld [vmem:[%s18592_s7 + $0x2a0] ss:$0 sm:$0xff] }
0x12b7   :  { %v4114_v54 = vmul.f32 %v11887_v52, %v4102_v9  ;;  %v4104_v12 = vmul.f32 %v14758_v5, %v16424_v16  ;;  %v16515_v62 = vadd.f32 %v4138_v0, %v16500_v40  ;;  %v11894_v0 = vld [vmem:[%s18592_s7 + $0x200] ss:$0 sm:$0xff] }
0x12b8   :  { %v14760_v14 = vpop.eup %14759  ;;  %v16518_v60 = vadd.f32 %v4132_v17, %v16502_v32  ;;  %v11915_v17 = vld [vmem:[%s18592_s7 + $0x210] sm:$0xff] }
0x12b9   :  { %v16511_v55 = vadd.f32 %v11888_v56, %v4114_v54  ;;  %v4116_v21 = vmul.f32 %v11887_v52, %v4104_v12  ;;  %v4105_v25 = vmul.f32 %v14760_v14, %v16428_v39  ;;  %v4176_v39 = vrot.slane %v16509_v2, 7  ;;  %v11908_v14 = vld [vmem:[%s18592_s7 + $0x340] ss:$0 sm:$0xff] }
0x12ba   :  { %v14762_v7 = vpop.eup %14761  ;;  %v4182_v15 = vrot.slane %v16515_v62, 5 }
0x12bb   :  { %v16521_v16 = vadd.f32 %v4137_v53, %v16511_v55  ;;  %v16523_v28 = vadd.f32 %v11888_v56, %v4116_v21  ;;  %v4117_v24 = vmul.f32 %v11887_v52, %v4105_v25  ;;  %v4106_v10 = vmul.f32 %v14762_v7, %v16433_v22 }
0x12bc   :  { %v14764_v42 = vpop.eup %14763  ;;  %v4178_v41 = vsel %vm4177_vm4, %v4176_v39, %v16518_v60 }
0x12bd   :  { %v4179_v1 = vrot.slane %v16521_v16, 6  ;;  %v16529_v34 = vadd.f32 %v4133_v46, %v16523_v28  ;;  %v16531_v27 = vadd.f32 %v11888_v56, %v4117_v24  ;;  %v4118_v48 = vmul.f32 %v11887_v52, %v4106_v10 }
0x12be   :  { %v4107_v22 = vmul.f32 %v14764_v42, %v16438_v57 }
0x12bf   :  { %v4181_v59 = vsel %vm4180_vm5, %v4179_v1, %v4178_v41  ;;  %v4185_v29 = vrot.slane %v16529_v34, 4  ;;  %v16540_v26 = vadd.f32 %v4139_v44, %v16531_v27  ;;  %v16542_v20 = vadd.f32 %v11888_v56, %v4118_v48 }
0x12c0   :  { %v4184_v35 = vsel %vm4183_vm6, %v4182_v15, %v4181_v59  ;;  %v4119_v30 = vmul.f32 %v11887_v52, %v4107_v22  ;;  %v11906_v52 = vld [vmem:[%s18592_s7 + $0x338] sm:$0xff] }
0x12c1   :  { %v4187_v38 = vsel %vm4186_vm7, %v4185_v29, %v4184_v35  ;;  %v4188_v45 = vrot.slane %v16540_v26, 3  ;;  %v16548_v57 = vadd.f32 %v4140_v19, %v16542_v20  ;;  %v16648_v19 = vld [vmem:[%s18587_s2] sm:$0xff] }
0x12c2   :  { %v16550_v37 = vadd.f32 %v11888_v56, %v4119_v30  ;;  %v11916_v56 = vld [vmem:[%s18592_s7 + $0x218] sm:$0xff] }
0x12c3   :  { %v4190_v11 = vsel %vm4189_vm8, %v4188_v45, %v4187_v38  ;;  %v4191_v6 = vrot.slane %v16548_v57, 2 }
0x12c4   :  { %v16555_v50 = vadd.f32 %v4141_v58, %v16550_v37 }
0x12c5   :  { %v4193_v51 = vsel %vm4192_vm9, %v4191_v6, %v4190_v11  ;;  %v11924_v11 = vld [vmem:[%s18592_s7 + $0x2c0] sm:$0xff]  ;;  %v11923_v6 = vld [vmem:[%s18592_s7 + $0x2b8] sm:$0xff] }
0x12c6   :  { %v4194_v13 = vrot.slane %v16555_v50, 1 }
0x12c8   :  { %v16563_v43 = vsel %vm4195_vm10, %v4194_v13, %v4193_v51  ;;  %v11922_v51 = vld [vmem:[%s18592_s7 + $0x2b0] sm:$0xff]  ;;  %v11921_v13 = vld [vmem:[%s18592_s7 + $0x2a8] sm:$0xff] }
0x12c9   :  { %13765 = vmatmul.mubr.msk.f32.vlgmr.msra.gmra.mxu0 %vm74_vm0, %v16563_v43  ;;  %13776 = vmatmul.mubr.msk.f32.vlgmr.msra.gmra.mxu1 %vm74_vm0, %v16563_v43 }
0x12ca   :  { %13779 = vmatpush3.msra.mxu0 %v11906_v52  ;;  %13786 = vmatprep.mubr.msk.f32.mxu0 %vm15068_vm3, %v18600_v18 }
0x12cb   :  { %13780 = vmatprep.subr.mxu0 %v18600_v18  ;;  %13791 = vmatprep.mubr.msk.f32.mxu1 %vm15068_vm3, %v18600_v18 }
0x12cc   :  { %13781 = vmatpush3.msra.mxu0 %v11905_v8 }
0x12cd   :  { %13782 = vmatprep.subr.mxu0 %v18600_v18 }
0x12ce   :  { %13783 = vmatpush3.msra.mxu0 %v11904_v4  ;;  %v11926_v4 = vld [vmem:[%s18592_s7 + $0x2c8] ss:$0 sm:$0xff] }
0x12cf   :  { %13784 = vmatprep.subr.mxu0 %v18600_v18 }
0x12d0   :  { %13785 = vmatpush3.msra.mxu0 %v11903_v63 }
0x12d1   :  { %13787 = vmatmul.mubr.msk.f32.vlgmr.msra.gmra.mxu0 %vm74_vm0, %v16563_v43  ;;  %13799 = vmatprep.subr.mxu0 %v18600_v18 }
0x12d2   :  { %13800 = vmatpush3.msra.mxu0 %v11917_v47  ;;  %13807 = vmatprep.mubr.msk.f32.mxu0 %vm15068_vm3, %v18600_v18  ;;  %v11919_v47 = vld [vmem:[%s18592_s7 + $0x228] ss:$0 sm:$0xff] }
0x12d3   :  { %13801 = vmatprep.subr.mxu0 %v18600_v18 }
0x12d4   :  { %13802 = vmatpush3.msra.mxu0 %v11916_v56 }
0x12d5   :  { %13803 = vmatprep.subr.mxu0 %v18600_v18 }
0x12d6   :  { %13804 = vmatpush3.msra.mxu0 %v11915_v17  ;;  %v11933_v17 = vld [vmem:[%s18592_s7 + $0x368] ss:$0 sm:$0xff] }
0x12d7   :  { %13805 = vmatprep.subr.mxu0 %v18600_v18 }
0x12d8   :  { %13806 = vmatpush3.msra.mxu0 %v11914_v49 }
0x12d9   :  { %13808 = vmatmul.mubr.msk.f32.vlgmr.msra.gmra.mxu0 %vm74_vm0, %v16563_v43  ;;  %13821 = vmatprep.subr.mxu0 %v18600_v18 }
0x12da   :  { %13822 = vmatpush3.msra.mxu0 %v11931_v23  ;;  %13829 = vmatprep.mubr.msk.f32.mxu0 %vm15068_vm3, %v18600_v18 }
0x12db   :  { %13823 = vmatprep.subr.mxu0 %v18600_v18 }
0x12dc   :  { %13824 = vmatpush3.msra.mxu0 %v11930_v3 }
0x12dd   :  { %13825 = vmatprep.subr.mxu0 %v18600_v18 }
0x12de   :  { %13826 = vmatpush3.msra.mxu0 %v11929_v61 }
0x12df   :  { %13827 = vmatprep.subr.mxu0 %v18600_v18 }
0x12e0   :  { %13828 = vmatpush3.msra.mxu0 %v11928_v36 }
0x12e1   :  { %13830 = vmatmul.mubr.msk.f32.vlgmr.msra.gmra.mxu0 %vm74_vm0, %v16563_v43  ;;  %13842 = vmatprep.subr.mxu0 %v18600_v18 }
0x12e2   :  { %13844 = vmatprep.mubr.msk.f32.mxu0 %vm15068_vm3, %v18600_v18 }
0x1389   :  { %v4265_v9 = vpop.f32.mrf.mxu0  ;;  %v4345_v5 = vpop.f32.mrf.mxu1 }
0x138a   :  { %v4346_v53 = vadd.f32 %v11901_v31, %v4345_v5  ;;  %v4266_v12 = vadd.f32 %v11894_v0, %v4265_v9 }
0x138b   :  { %v13766_v54 = vpop.f32.mrf.mxu0  ;;  %v13777_v46 = vpop.f32.mrf.mxu1 }
0x138c   :  { %13790 = vmatpush3.xpose.msk.msra.mxu1 %vm434_vm1, %v4346_v53 }
0x138d   :  { %13794 = vmatprep.subr.mxu1 %v18600_v18 }
0x138f   :  { %13792 = vmatmul.mubr.msk.f32.vlgmr.msra.gmra.mxu1 %vm434_vm1, %v4266_v12 }
0x1390   :  { %13796 = vmatprep.mubr.msk.f32.mxu1 %vm15068_vm3, %v18600_v18 }
0x1391   :  { %v4425_v21 = vpop.f32.mrf.mxu0 }
0x1392   :  { %v4426_v25 = vadd.f32 %v11908_v14, %v4425_v21  ;;  %v11938_v14 = vld [vmem:[%s18593_s8 + $0x28] sm:$0xff] }
0x1393   :  { %v13788_v7 = vpop.f32.mrf.mxu0  ;;  %13843 = vmatpush3.msra.mxu0 %v11938_v14  ;;  %v11965_v14 = vld [vmem:[%s18593_s8 + $0x30] sm:$0xff] }
0x1394   :  { %13795 = vmatpush3.msra.mxu1 %v4426_v25  ;;  %13852 = vmatprep.subr.mxu0 %v18600_v18 }
0x1395   :  { %13810 = vmatprep.subr.mxu1 %v18600_v18 }
0x1399   :  { %v4669_v44 = vpop.f32.mrf.mxu0 }
0x139a   :  { %v4670_v23 = vadd.f32 %v11919_v47, %v4669_v44  ;;  %v11913_v44 = vld [vmem:[%s18593_s8 + $0x20] sm:$0xff] }
0x139b   :  { %v13809_v24 = vpop.f32.mrf.mxu0 }
0x139c   :  { %v11951_v24 = vld [vmem:[%s18592_s7 + $0x2e8] sm:$0xff] }
0x13a1   :  { %v4829_v10 = vpop.f32.mrf.mxu0 }
0x13a2   :  { %v4830_v3 = vadd.f32 %v11933_v17, %v4829_v10  ;;  %v11950_v10 = vld [vmem:[%s18592_s7 + $0x2e0] sm:$0xff]  ;;  %v11960_v17 = vld [vmem:[%s18592_s7 + $0x390] ss:$0 sm:$0xff] }
0x13a3   :  { %v13831_v42 = vpop.f32.mrf.mxu0 }
0x13a4   :  { %v11949_v42 = vld [vmem:[%s18592_s7 + $0x2d8] sm:$0xff] }
0x144f   :  { %v4501_v39 = vpop.f32.mrf.mxu1 }
0x1450   :  { %v4505_v1 = vmul.f32 0.35355338, %v4501_v39  ;;  %v11948_v39 = vld [vmem:[%s18592_s7 + $0x2d0] sm:$0xff] }
0x1451   :  { %v13793_v48 = vpop.f32.mrf.mxu1 }
0x1452   :  { %v4506_v15 = vadd.f32 %v4505_v1, %v16648_v19  ;;  %v11944_v1 = vld [vmem:[%s18592_s7 + $0x248] sm:$0xff] }
0x1454   :  { %v4507_v41 = vsel %vm434_vm1, %v4506_v15, -inf }
0x1455   :  { %4508 = vmax.xlane.f32.xlu0 %v4507_v41 }
0x14de   :  { %v4509_v22 = vpop.xlane.xlu0 %4508 }
0x14df   :  { %v4510_v59 = vsub.f32 %v4506_v15, %v4509_v22  ;;  %v11943_v15 = vld [vmem:[%s18592_s7 + $0x240] sm:$0xff]  ;;  %v11942_v22 = vld [vmem:[%s18592_s7 + $0x238] sm:$0xff] }
0x14e1   :  { %v4511_v29 = vmul.f32 1.442695, %v4510_v59 }
0x14e3   :  { %14765 = vpow2.f32 %v4511_v29  ;;  %v11941_v29 = vld [vmem:[%s18592_s7 + $0x230] sm:$0xff] }
0x14f0   :  { %v14766_v35 = vpop.eup %14765 }
0x14f1   :  { %v4513_v58 = vsel %vm434_vm1, %v14766_v35, 0.0 }
0x14f2   :  { %4514 = vadd.xlane.f32.xlu1 %v4513_v58  ;;  %v11958_v58 = vld [vmem:[%s18592_s7 + $0x388] sm:$0xff] }
0x157b   :  { %v4515_v30 = vpop.xlane.xlu1 %4514 }
0x157c   :  { %14767 = vrcp.f32 %v4515_v30  ;;  %v11957_v30 = vld [vmem:[%s18592_s7 + $0x380] sm:$0xff] }
0x1589   :  { %v14768_v38 = vpop.eup %14767 }
0x158a   :  { %v4517_v45 = vmul.f32 %v14768_v38, %v14766_v35  ;;  %v11953_v38 = vld [vmem:[%s18592_s7 + $0x2f0] ss:$0 sm:$0xff] }
0x158c   :  { %13797 = vmatmul.mubr.msk.f32.vlgmr.msra.gmra.mxu1 %vm434_vm1, %v4517_v45  ;;  %v11956_v45 = vld [vmem:[%s18592_s7 + $0x378] sm:$0xff] }
0x158d   :  { %13811 = vmatpush3.msra.mxu1 %v11924_v11  ;;  %13818 = vmatprep.mubr.msk.f32.mxu1 %vm15068_vm3, %v18600_v18 }
0x158e   :  { %13812 = vmatprep.subr.mxu1 %v18600_v18 }
0x158f   :  { %13813 = vmatpush3.msra.mxu1 %v11923_v6 }
0x1590   :  { %13814 = vmatprep.subr.mxu1 %v18600_v18 }
0x1591   :  { %13815 = vmatpush3.msra.mxu1 %v11922_v51  ;;  %v11955_v51 = vld [vmem:[%s18592_s7 + $0x370] sm:$0xff] }
0x1592   :  { %13816 = vmatprep.subr.mxu1 %v18600_v18 }
0x1593   :  { %13817 = vmatpush3.msra.mxu1 %v11921_v13 }
0x1594   :  { %13819 = vmatmul.mubr.msk.f32.vlgmr.msra.gmra.mxu1 %vm74_vm0, %v16563_v43  ;;  %13832 = vmatprep.subr.mxu1 %v18600_v18 }
0x1595   :  { %13834 = vmatprep.mubr.msk.f32.mxu1 %vm15068_vm3, %v18600_v18 }
0x164c   :  { %v4587_v52 = vpop.f32.mrf.mxu1 }
0x164e   :  { %v13798_v8 = vpop.f32.mrf.mxu1 }
0x1654   :  { %v4749_v63 = vpop.f32.mrf.mxu1 }
0x1655   :  { %v4750_v56 = vadd.f32 %v11926_v4, %v4749_v63  ;;  %v11946_v4 = vld [vmem:[%s18592_s7 + $0x250] ss:$0 sm:$0xff] }
0x1656   :  { %v13820_v49 = vpop.f32.mrf.mxu1 }
0x1657   :  { %13833 = vmatpush3.xpose.msk.msra.mxu1 %vm434_vm1, %v4750_v56 }
0x1658   :  { %13837 = vmatprep.subr.mxu1 %v18600_v18 }
0x165a   :  { %13835 = vmatmul.mubr.msk.f32.vlgmr.msra.gmra.mxu1 %vm434_vm1, %v4670_v23 }
0x165b   :  { %13838 = vmatpush3.msra.mxu1 %v4830_v3  ;;  %13839 = vmatprep.mubr.msk.f32.mxu1 %vm15068_vm3, %v18600_v18 }
0x165c   :  { %13847 = vmatprep.subr.mxu1 %v18600_v18 }
0x171a   :  { %v4905_v61 = vpop.f32.mrf.mxu1 }
0x171b   :  { %v4909_v36 = vmul.f32 0.35355338, %v4905_v61 }
0x171c   :  { %v13836_v31 = vpop.f32.mrf.mxu1 }
0x171d   :  { %v4910_v9 = vadd.f32 %v4909_v36, %v16648_v19 }
0x171f   :  { %v4911_v5 = vsel %vm434_vm1, %v4910_v9, -inf }
0x1720   :  { %4912 = vmax.xlane.f32.xlu0 %v4911_v5 }
0x17a9   :  { %v4913_v0 = vpop.xlane.xlu0 %4912 }
0x17aa   :  { %v4914_v53 = vsub.f32 %v4910_v9, %v4913_v0 }
0x17ac   :  { %v4915_v54 = vmul.f32 1.442695, %v4914_v53 }
0x17ae   :  { %14769 = vpow2.f32 %v4915_v54 }
0x17bb   :  { %v14770_v46 = vpop.eup %14769 }
0x17bc   :  { %v4917_v12 = vsel %vm434_vm1, %v14770_v46, 0.0 }
0x17bd   :  { %4918 = vadd.xlane.f32.xlu1 %v4917_v12 }
0x1846   :  { %v4919_v21 = vpop.xlane.xlu1 %4918 }
0x1847   :  { %14771 = vrcp.f32 %v4919_v21 }
0x1854   :  { %v14772_v25 = vpop.eup %14771 }
0x1855   :  { %v4921_v7 = vmul.f32 %v14772_v25, %v14770_v46 }
0x1857   :  { %13840 = vmatmul.mubr.msk.f32.vlgmr.msra.gmra.mxu1 %vm434_vm1, %v4921_v7 }
0x1858   :  { %13848 = vmatpush3.msra.mxu1 %v11913_v44  ;;  %13849 = vmatprep.mubr.msk.f32.mxu1 %vm15068_vm3, %v18600_v18  ;;  %v11970_v44 = vld [vmem:[%s18592_s7 + $0x270] sm:$0xff] }
0x1859   :  { %13863 = vmatprep.subr.mxu1 %v18600_v18 }
0x185b   :  { %13850 = vmatmul.mubr.msk.f32.vlgmr.msra.gmra.mxu1 %vm434_vm1, %v4587_v52 }
0x185c   :  { %13864 = vmatpush3.msra.mxu1 %v11951_v24  ;;  %13871 = vmatprep.mubr.msk.f32.mxu1 %vm15068_vm3, %v18600_v18  ;;  %v11969_v24 = vld [vmem:[%s18592_s7 + $0x268] sm:$0xff] }
0x185d   :  { %13865 = vmatprep.subr.mxu1 %v18600_v18 }
0x185e   :  { %13866 = vmatpush3.msra.mxu1 %v11950_v10  ;;  %v11968_v10 = vld [vmem:[%s18592_s7 + $0x260] sm:$0xff] }
0x185f   :  { %13867 = vmatprep.subr.mxu1 %v18600_v18 }
0x1860   :  { %13868 = vmatpush3.msra.mxu1 %v11949_v42  ;;  %v11967_v42 = vld [vmem:[%s18592_s7 + $0x258] sm:$0xff] }
0x1861   :  { %13869 = vmatprep.subr.mxu1 %v18600_v18 }
0x1862   :  { %13870 = vmatpush3.msra.mxu1 %v11948_v39  ;;  %v11984_v39 = vld [vmem:[%s18592_s7 + $0x3b0] sm:$0xff] }
0x1863   :  { %13872 = vmatmul.mubr.msk.f32.vlgmr.msra.gmra.mxu1 %vm74_vm0, %v16563_v43  ;;  %13885 = vmatprep.subr.mxu1 %v18600_v18 }
0x1864   :  { %13887 = vmatprep.mubr.msk.f32.mxu1 %vm15068_vm3, %v18600_v18 }
0x1917   :  { %v4991_v48 = vpop.f32.mrf.mxu1 }
0x1918   :  { %13845 = vmatmul.mubr.msk.f32.vlgmr.msra.gmra.mxu0 %vm434_vm1, %v4991_v48  ;;  %v11982_v48 = vld [vmem:[%s18592_s7 + $0x3a0] sm:$0xff] }
0x1919   :  { %13853 = vmatpush3.msra.mxu0 %v11944_v1  ;;  %v13841_v41 = vpop.f32.mrf.mxu1  ;;  %13860 = vmatprep.mubr.msk.f32.mxu0 %vm15068_vm3, %v18600_v18  ;;  %v11983_v1 = vld [vmem:[%s18592_s7 + $0x3a8] sm:$0xff] }
0x191a   :  { %13854 = vmatprep.subr.mxu0 %v18600_v18  ;;  %v11977_v41 = vld [vmem:[%s18592_s7 + $0x310] sm:$0xff] }
0x191b   :  { %13855 = vmatpush3.msra.mxu0 %v11943_v15  ;;  %v16741_v59 = vpop.f32.mrf.mxu1  ;;  %v11981_v15 = vld [vmem:[%s18592_s7 + $0x398] sm:$0xff] }
0x191c   :  { %13856 = vmatprep.subr.mxu0 %v18600_v18 }
0x191d   :  { %13857 = vmatpush3.msra.mxu0 %v11942_v22  ;;  %v13851_v35 = vpop.f32.mrf.mxu1 }
0x191e   :  { %13858 = vmatprep.subr.mxu0 %v18600_v18 }
0x191f   :  { %13859 = vmatpush3.msra.mxu0 %v11941_v29  ;;  %v11976_v29 = vld [vmem:[%s18592_s7 + $0x308] sm:$0xff] }
0x1920   :  { %13861 = vmatmul.mubr.msk.f32.vlgmr.msra.gmra.mxu0 %vm74_vm0, %v16563_v43  ;;  %13874 = vmatprep.subr.mxu0 %v18600_v18 }
0x1921   :  { %13875 = vmatpush3.msra.mxu0 %v11958_v58  ;;  %13882 = vmatprep.mubr.msk.f32.mxu0 %vm15068_vm3, %v18600_v18  ;;  %v11975_v58 = vld [vmem:[%s18592_s7 + $0x300] sm:$0xff] }
0x1922   :  { %13876 = vmatprep.subr.mxu0 %v18600_v18 }
0x1923   :  { %v5299_v11 = vpop.f32.mrf.mxu1  ;;  %13877 = vmatpush3.msra.mxu0 %v11957_v30  ;;  %v11974_v30 = vld [vmem:[%s18592_s7 + $0x2f8] sm:$0xff] }
0x1924   :  { %v5300_v6 = vadd.f32 %v11953_v38, %v5299_v11  ;;  %13878 = vmatprep.subr.mxu0 %v18600_v18 }
0x1925   :  { %v13873_v13 = vpop.f32.mrf.mxu1  ;;  %13879 = vmatpush3.msra.mxu0 %v11956_v45 }
0x1926   :  { %13880 = vmatprep.subr.mxu0 %v18600_v18  ;;  %13886 = vmatpush3.xpose.msk.msra.mxu1 %vm434_vm1, %v5300_v6 }
0x1927   :  { %13881 = vmatpush3.msra.mxu0 %v11955_v51  ;;  %13890 = vmatprep.subr.mxu1 %v18600_v18 }
0x1928   :  { %13883 = vmatmul.mubr.msk.f32.vlgmr.msra.gmra.mxu0 %vm74_vm0, %v16563_v43  ;;  %13895 = vmatprep.subr.mxu0 %v18600_v18 }
0x1929   :  { %13897 = vmatprep.mubr.msk.f32.mxu0 %vm15068_vm3, %v18600_v18  ;;  %13896 = vmatpush3.msra.mxu0 %v11965_v14 }
0x192a   :  { %13911 = vmatprep.subr.mxu0 %v18600_v18 }
0x19d8   :  { %v16778_v52 = vpop.f32.mrf.mxu0 }
0x19d9   :  { %v5140_v51 = vadd.f32 %v16741_v59, %v16778_v52 }
0x19da   :  { %v13846_v8 = vpop.f32.mrf.mxu0 }
0x19e0   :  { %v5219_v63 = vpop.f32.mrf.mxu0 }
0x19e1   :  { %v5220_v47 = vadd.f32 %v11946_v4, %v5219_v63  ;;  %v11979_v63 = vld [vmem:[%s18592_s7 + $0x318] ss:$0 sm:$0xff] }
0x19e2   :  { %v13862_v56 = vpop.f32.mrf.mxu0 }
0x19e3   :  { %13888 = vmatmul.mubr.msk.f32.vlgmr.msra.gmra.mxu1 %vm434_vm1, %v5220_v47 }
0x19e4   :  { %13892 = vmatprep.mubr.msk.f32.mxu1 %vm15068_vm3, %v18600_v18 }
0x19e8   :  { %v5379_v49 = vpop.f32.mrf.mxu0 }
0x19e9   :  { %v5380_v23 = vadd.f32 %v11960_v17, %v5379_v49  ;;  %v11986_v17 = vld [vmem:[%s18592_s7 + $0x3b8] ss:$0 sm:$0xff] }
0x19ea   :  { %v13884_v3 = vpop.f32.mrf.mxu0 }
0x19eb   :  { %13891 = vmatpush3.msra.mxu1 %v5380_v23 }
0x19ec   :  { %13900 = vmatprep.subr.mxu1 %v18600_v18 }
0x1aa3   :  { %v5455_v61 = vpop.f32.mrf.mxu1 }
0x1aa4   :  { %v5459_v36 = vmul.f32 0.35355338, %v5455_v61 }
0x1aa5   :  { %v13889_v31 = vpop.f32.mrf.mxu1 }
0x1aa6   :  { %v5460_v9 = vadd.f32 %v5459_v36, %v16648_v19 }
0x1aa8   :  { %v5461_v5 = vsel %vm434_vm1, %v5460_v9, -inf }
0x1aa9   :  { %5462 = vmax.xlane.f32.xlu0 %v5461_v5 }
0x1b32   :  { %v5463_v0 = vpop.xlane.xlu0 %5462 }
0x1b33   :  { %v5464_v53 = vsub.f32 %v5460_v9, %v5463_v0 }
0x1b35   :  { %v5465_v54 = vmul.f32 1.442695, %v5464_v53 }
0x1b37   :  { %14773 = vpow2.f32 %v5465_v54 }
0x1b44   :  { %v14774_v46 = vpop.eup %14773 }
0x1b45   :  { %v5467_v12 = vsel %vm434_vm1, %v14774_v46, 0.0 }
0x1b46   :  { %5468 = vadd.xlane.f32.xlu1 %v5467_v12 }
0x1bcf   :  { %v5469_v21 = vpop.xlane.xlu1 %5468 }
0x1bd0   :  { %14775 = vrcp.f32 %v5469_v21 }
0x1bdd   :  { %v14776_v25 = vpop.eup %14775 }
0x1bde   :  { %v5471_v7 = vmul.f32 %v14776_v25, %v14774_v46  ;;  %v11991_v46 = vld [vmem:[%s18593_s8 + $0x38] sm:$0xff] }
0x1be0   :  { %13893 = vmatmul.mubr.msk.f32.vlgmr.msra.gmra.mxu1 %vm434_vm1, %v5471_v7 }
0x1be1   :  { %13901 = vmatpush3.msra.mxu1 %v11970_v44  ;;  %13908 = vmatprep.mubr.msk.f32.mxu1 %vm15068_vm3, %v18600_v18  ;;  %v11994_v44 = vld [vmem:[%s18596_s11 + $0x8] ss:$0 sm:$0xff] }
0x1be2   :  { %13902 = vmatprep.subr.mxu1 %v18600_v18 }
0x1be3   :  { %13903 = vmatpush3.msra.mxu1 %v11969_v24 }
0x1be4   :  { %13904 = vmatprep.subr.mxu1 %v18600_v18 }
0x1be5   :  { %13905 = vmatpush3.msra.mxu1 %v11968_v10 }
0x1be6   :  { %13906 = vmatprep.subr.mxu1 %v18600_v18 }
0x1be7   :  { %13907 = vmatpush3.msra.mxu1 %v11967_v42 }
0x1be8   :  { %13909 = vmatmul.mubr.msk.f32.vlgmr.msra.gmra.mxu1 %vm74_vm0, %v16563_v43  ;;  %13922 = vmatprep.subr.mxu1 %v18600_v18 }
0x1be9   :  { %13923 = vmatpush3.msra.mxu1 %v11984_v39  ;;  %13930 = vmatprep.mubr.msk.f32.mxu1 %vm15068_vm3, %v18600_v18 }
0x1bea   :  { %13924 = vmatprep.subr.mxu1 %v18600_v18 }
0x1beb   :  { %13925 = vmatpush3.msra.mxu1 %v11983_v1 }
0x1bec   :  { %13926 = vmatprep.subr.mxu1 %v18600_v18 }
0x1bed   :  { %13927 = vmatpush3.msra.mxu1 %v11982_v48 }
0x1bee   :  { %13928 = vmatprep.subr.mxu1 %v18600_v18 }
0x1bef   :  { %13929 = vmatpush3.msra.mxu1 %v11981_v15 }
0x1bf0   :  { %13931 = vmatmul.mubr.msk.f32.vlgmr.msra.gmra.mxu1 %vm74_vm0, %v16563_v43  ;;  %13943 = vmatprep.subr.mxu1 %v18600_v18 }
0x1bf1   :  { %13945 = vmatprep.mubr.msk.f32.mxu1 %vm15068_vm3, %v18600_v18  ;;  %13944 = vmatpush3.msra.mxu1 %v11991_v46 }
0x1bf2   :  { %13959 = vmatprep.subr.mxu1 %v18600_v18 }
0x1ca0   :  { %v5541_v22 = vpop.f32.mrf.mxu1 }
0x1ca1   :  { %13898 = vmatmul.mubr.msk.f32.vlgmr.msra.gmra.mxu0 %vm434_vm1, %v5541_v22 }
0x1ca2   :  { %13912 = vmatpush3.msra.mxu0 %v11977_v41  ;;  %v13894_v35 = vpop.f32.mrf.mxu1  ;;  %13919 = vmatprep.mubr.msk.f32.mxu0 %vm15068_vm3, %v18600_v18 }
0x1ca3   :  { %13913 = vmatprep.subr.mxu0 %v18600_v18 }
0x1ca4   :  { %13914 = vmatpush3.msra.mxu0 %v11976_v29 }
0x1ca5   :  { %13915 = vmatprep.subr.mxu0 %v18600_v18 }
0x1ca6   :  { %13916 = vmatpush3.msra.mxu0 %v11975_v58 }
0x1ca7   :  { %13917 = vmatprep.subr.mxu0 %v18600_v18 }
0x1ca8   :  { %v5697_v38 = vpop.f32.mrf.mxu1  ;;  %13918 = vmatpush3.msra.mxu0 %v11974_v30 }
0x1ca9   :  { %13920 = vmatmul.mubr.msk.f32.vlgmr.msra.gmra.mxu0 %vm74_vm0, %v16563_v43  ;;  %13933 = vmatprep.subr.mxu0 %v18600_v18  ;;  %v11972_v43 = vld [vmem:[%s18592_s7 + $0x278] ss:$0 sm:$0xff] }
0x1caa   :  { %v13910_v45 = vpop.f32.mrf.mxu1  ;;  %13935 = vmatprep.mubr.msk.f32.mxu0 %vm15068_vm3, %v18600_v18  ;;  %v5698_v59 = vadd.f32 %v11972_v43, %v5697_v38 }
0x1cb0   :  { %v5857_v11 = vpop.f32.mrf.mxu1 }
0x1cb1   :  { %v5858_v52 = vadd.f32 %v11986_v17, %v5857_v11 }
0x1cb2   :  { %v13932_v6 = vpop.f32.mrf.mxu1 }
0x1d61   :  { %v5616_v13 = vpop.f32.mrf.mxu0 }
0x1d62   :  { %v5620_v8 = vadd.f32 %v5616_v13, %v5140_v51 }
0x1d63   :  { %v13899_v4 = vpop.f32.mrf.mxu0 }
0x1d69   :  { %v5777_v47 = vpop.f32.mrf.mxu0 }
0x1d6a   :  { %v5778_v56 = vadd.f32 %v11979_v63, %v5777_v47 }
0x1d6b   :  { %v13921_v49 = vpop.f32.mrf.mxu0 }
0x1d6c   :  { %13934 = vmatpush3.xpose.msk.msra.mxu0 %vm434_vm1, %v5778_v56 }
0x1d6d   :  { %13938 = vmatprep.subr.mxu0 %v18600_v18 }
0x1d6f   :  { %13936 = vmatmul.mubr.msk.f32.vlgmr.msra.gmra.mxu0 %vm434_vm1, %v5698_v59 }
0x1d70   :  { %13939 = vmatpush3.msra.mxu0 %v5858_v52  ;;  %13940 = vmatprep.mubr.msk.f32.mxu0 %vm15068_vm3, %v18600_v18 }
0x1d71   :  { %13948 = vmatprep.subr.mxu0 %v18600_v18 }
0x1e2f   :  { %v5933_v23 = vpop.f32.mrf.mxu0 }
0x1e30   :  { %v5937_v3 = vmul.f32 0.35355338, %v5933_v23 }
0x1e31   :  { %v13937_v61 = vpop.f32.mrf.mxu0 }
0x1e32   :  { %v5938_v36 = vadd.f32 %v5937_v3, %v16648_v19 }
0x1e34   :  { %v5939_v31 = vsel %vm434_vm1, %v5938_v36, -inf }
0x1e35   :  { %5940 = vmax.xlane.f32.xlu0 %v5939_v31 }
0x1ebe   :  { %v5941_v9 = vpop.xlane.xlu0 %5940 }
0x1ebf   :  { %v5942_v5 = vsub.f32 %v5938_v36, %v5941_v9 }
0x1ec1   :  { %v5943_v0 = vmul.f32 1.442695, %v5942_v5 }
0x1ec3   :  { %14777 = vpow2.f32 %v5943_v0 }
0x1ed0   :  { %v14778_v53 = vpop.eup %14777 }
0x1ed1   :  { %v5945_v54 = vsel %vm434_vm1, %v14778_v53, 0.0 }
0x1ed2   :  { %5946 = vadd.xlane.f32.xlu1 %v5945_v54 }
0x1f5b   :  { %v5947_v12 = vpop.xlane.xlu1 %5946 }
0x1f5c   :  { %14779 = vrcp.f32 %v5947_v12 }
0x1f69   :  { %v14780_v19 = vpop.eup %14779 }
0x1f6a   :  { %v5949_v14 = vmul.f32 %v14780_v19, %v14778_v53 }
0x1f6c   :  { %13941 = vmatmul.mubr.msk.f32.vlgmr.msra.gmra.mxu0 %vm434_vm1, %v5949_v14 }
0x1f6d   :  { %13956 = vmatprep.mubr.msk.f32.mxu0 %vm15068_vm3, %v18600_v18 }
0x202c   :  { %v6019_v21 = vpop.f32.mrf.mxu0 }
0x202d   :  { %13946 = vmatmul.mubr.msk.f32.vlgmr.msra.gmra.mxu1 %vm434_vm1, %v6019_v21 }
0x202e   :  { %v13942_v25 = vpop.f32.mrf.mxu0  ;;  %13975 = vmatprep.mubr.msk.f32.mxu1 %vm15068_vm3, %v18600_v18 }
0x20ed   :  { %v6094_v7 = vpop.f32.mrf.mxu1 }
0x20ee   :  { %v6098_v24 = vadd.f32 %v6094_v7, %v5620_v8 }
0x20ef   :  { %v13947_v10 = vpop.f32.mrf.mxu1 }
0x20f0   :  { %v6105_v42 = vadd.f32 %v11994_v44, %v6098_v24 }
0x20f2   :  { %v6107_v39 = vrot.slane %v6105_v42, 1  ;;  %v6108_v1 = vrot.slane %v6105_v42, 2  ;;  %v6109_v48 = vrot.slane %v6105_v42, 3  ;;  %v6110_v15 = vrot.slane %v6105_v42, 4 }
0x20f3   :  { %v6111_v41 = vrot.slane %v6105_v42, 5  ;;  %v6112_v22 = vrot.slane %v6105_v42, 6  ;;  %v6113_v29 = vrot.slane %v6105_v42, 7  ;;  %v6122_v45 = vadd.f32 %v6105_v42, %v16518_v60 }
0x20f4   :  { %v6123_v35 = vadd.f32 %v6107_v39, %v16509_v2  ;;  %v6124_v58 = vadd.f32 %v6108_v1, %v16521_v16  ;;  %v6125_v30 = vadd.f32 %v6109_v48, %v16515_v62  ;;  %v6126_v38 = vadd.f32 %v6110_v15, %v16529_v34 }
0x20f5   :  { %v6127_v11 = vadd.f32 %v6111_v41, %v16540_v26  ;;  %v6128_v13 = vadd.f32 %v6112_v22, %v16548_v57  ;;  %v6129_v8 = vadd.f32 %v6113_v29, %v16555_v50 }
0x20f6   :  { %v6140_v6 = vrot.slane %v6123_v35, 7  ;;  %v6142_v51 = vrot.slane %v6124_v58, 6  ;;  %v6144_v63 = vrot.slane %v6125_v30, 5  ;;  %v6146_v16 = vrot.slane %v6126_v38, 4 }
0x20f7   :  { %v6148_v47 = vrot.slane %v6127_v11, 3  ;;  %v6150_v60 = vrot.slane %v6128_v13, 2  ;;  %v6152_v43 = vrot.slane %v6129_v8, 1 }
0x20f8   :  { %v6141_v4 = vsel %vm4177_vm4, %v6140_v6, %v6122_v45 }
0x20f9   :  { %v6143_v2 = vsel %vm4180_vm5, %v6142_v51, %v6141_v4  ;;  %v12000_v4 = vld [vmem:[%s18594_s9 + $0x30] sm:$0xff] }
0x20fa   :  { %v6145_v62 = vsel %vm4183_vm6, %v6144_v63, %v6143_v2  ;;  %v11999_v63 = vld [vmem:[%s18594_s9 + $0x28] sm:$0xff]  ;;  %v12013_v2 = vld [vmem:[%s18595_s10 + $0x78] sm:$0xff] }
0x20fb   :  { %v6147_v34 = vsel %vm4186_vm7, %v6146_v16, %v6145_v62  ;;  %v12012_v16 = vld [vmem:[%s18595_s10 + $0x70] sm:$0xff]  ;;  %13960 = vmatpush3.msra.mxu1 %v12013_v2  ;;  %v12011_v62 = vld [vmem:[%s18595_s10 + $0x68] sm:$0xff] }
0x20fc   :  { %v6149_v26 = vsel %vm4189_vm8, %v6148_v47, %v6147_v34  ;;  %13961 = vmatprep.subr.mxu1 %v18600_v18  ;;  %v12010_v47 = vld [vmem:[%s18595_s10 + $0x60] sm:$0xff]  ;;  %v12009_v34 = vld [vmem:[%s18595_s10 + $0x58] sm:$0xff] }
0x20fd   :  { %v6151_v56 = vsel %vm4192_vm9, %v6150_v60, %v6149_v26  ;;  %13962 = vmatpush3.msra.mxu1 %v12012_v16  ;;  %v12008_v16 = vld [vmem:[%s18595_s10 + $0x50] sm:$0xff] }
0x20fe   :  { %v6153_v57 = vsel %vm4195_vm10, %v6152_v43, %v6151_v56  ;;  %13963 = vmatprep.subr.mxu1 %v18600_v18 }
0x20ff   :  { %v6155_v50 = vsel %vm74_vm0, %v6153_v57, 0.0  ;;  %13964 = vmatpush3.msra.mxu1 %v12011_v62  ;;  %v11997_v57 = vld [vmem:[%s18596_s11 + $0xa] ss:$0 sm:$0xff] }
0x2100   :  { %6156 = vadd.xlane.f32.xlu0 %v6155_v50  ;;  %13965 = vmatprep.subr.mxu1 %v18600_v18  ;;  %v12007_v62 = vld [vmem:[%s18595_s10 + $0x48] sm:$0xff] }
0x2101   :  { %13966 = vmatpush3.msra.mxu1 %v12010_v47  ;;  %v12006_v47 = vld [vmem:[%s18595_s10 + $0x40] sm:$0xff] }
0x2102   :  { %13967 = vmatprep.subr.mxu1 %v18600_v18 }
0x2103   :  { %13968 = vmatpush3.msra.mxu1 %v12009_v34  ;;  %v12004_v34 = vld [vmem:[%s18594_s9 + $0x48] ss:$0 sm:$0xff] }
0x2104   :  { %13969 = vmatprep.subr.mxu1 %v18600_v18 }
0x2105   :  { %13970 = vmatpush3.msra.mxu1 %v12008_v16 }
0x2106   :  { %13971 = vmatprep.subr.mxu1 %v18600_v18 }
0x2107   :  { %13972 = vmatpush3.msra.mxu1 %v12007_v62 }
0x2108   :  { %13973 = vmatprep.subr.mxu1 %v18600_v18 }
0x2109   :  { %13974 = vmatpush3.msra.mxu1 %v12006_v47 }
0x2189   :  { %v6157_v17 = vpop.xlane.xlu0 %6156 }
0x218a   :  { %v6158_v49 = vmul.f32 0.03125, %v6157_v17 }
0x218c   :  { %v6160_v59 = vrot.slane %v6158_v49, 1  ;;  %v6161_v52 = vrot.slane %v6158_v49, 2  ;;  %v6162_v23 = vrot.slane %v6158_v49, 3  ;;  %v6163_v3 = vrot.slane %v6158_v49, 4 }
0x218d   :  { %v6164_v61 = vrot.slane %v6158_v49, 5  ;;  %v6165_v36 = vrot.slane %v6158_v49, 6  ;;  %v6166_v31 = vrot.slane %v6158_v49, 7  ;;  %v16912_v9 = vsub.f32 %v6122_v45, %v6158_v49 }
0x218e   :  { %v16914_v5 = vsub.f32 %v6123_v35, %v6160_v59  ;;  %v16916_v0 = vsub.f32 %v6124_v58, %v6161_v52  ;;  %v16918_v53 = vsub.f32 %v6125_v30, %v6162_v23  ;;  %v16920_v54 = vsub.f32 %v6126_v38, %v6163_v3 }
0x218f   :  { %v16922_v46 = vsub.f32 %v6127_v11, %v6164_v61  ;;  %v16924_v12 = vsub.f32 %v6128_v13, %v6165_v36  ;;  %v16926_v19 = vsub.f32 %v6129_v8, %v6166_v31  ;;  %v6183_v44 = vmul.f32 %v16912_v9, %v16912_v9  ;;  %v12002_v13 = vld [vmem:[%s18594_s9 + $0x40] sm:$0xff]  ;;  %v12001_v8 = vld [vmem:[%s18594_s9 + $0x38] sm:$0xff] }
0x2190   :  { %v6184_v14 = vmul.f32 %v16914_v5, %v16914_v5  ;;  %v6185_v21 = vmul.f32 %v16916_v0, %v16916_v0  ;;  %v6186_v25 = vmul.f32 %v16918_v53, %v16918_v53  ;;  %v6187_v7 = vmul.f32 %v16920_v54, %v16920_v54  ;;  %13949 = vmatpush3.msra.mxu0 %v12002_v13 }
0x2191   :  { %v6188_v24 = vmul.f32 %v16922_v46, %v16922_v46  ;;  %v6189_v39 = vmul.f32 %v16924_v12, %v16924_v12  ;;  %v6190_v1 = vmul.f32 %v16926_v19, %v16926_v19  ;;  %13950 = vmatprep.subr.mxu0 %v18600_v18 }
0x2192   :  { %v6199_v10 = vrot.slane %v6184_v14, 7  ;;  %v6201_v42 = vrot.slane %v6185_v21, 6  ;;  %v6203_v15 = vrot.slane %v6186_v25, 5  ;;  %v6205_v22 = vrot.slane %v6187_v7, 4  ;;  %13951 = vmatpush3.msra.mxu0 %v12001_v8 }
0x2193   :  { %v6207_v35 = vrot.slane %v6188_v24, 3  ;;  %v6209_v30 = vrot.slane %v6189_v39, 2  ;;  %v6211_v45 = vrot.slane %v6190_v1, 1  ;;  %13952 = vmatprep.subr.mxu0 %v18600_v18 }
0x2194   :  { %v6200_v48 = vsel %vm4177_vm4, %v6199_v10, %v6183_v44  ;;  %13953 = vmatpush3.msra.mxu0 %v12000_v4 }
0x2195   :  { %v6202_v41 = vsel %vm4180_vm5, %v6201_v42, %v6200_v48  ;;  %13954 = vmatprep.subr.mxu0 %v18600_v18 }
0x2196   :  { %v6204_v29 = vsel %vm4183_vm6, %v6203_v15, %v6202_v41  ;;  %13955 = vmatpush3.msra.mxu0 %v11999_v63 }
0x2197   :  { %v6206_v58 = vsel %vm4186_vm7, %v6205_v22, %v6204_v29 }
0x2198   :  { %v6208_v38 = vsel %vm4189_vm8, %v6207_v35, %v6206_v58 }
0x2199   :  { %v6210_v11 = vsel %vm4192_vm9, %v6209_v30, %v6208_v38 }
0x219a   :  { %v6212_v6 = vsel %vm4195_vm10, %v6211_v45, %v6210_v11 }
0x219b   :  { %v6214_v51 = vsel %vm74_vm0, %v6212_v6, 0.0 }
0x219c   :  { %6215 = vadd.xlane.f32.xlu1 %v6214_v51 }
0x2225   :  { %v6216_v60 = vpop.xlane.xlu1 %6215 }
0x2226   :  { %v6217_v26 = vmul.f32 0.03125, %v6216_v60 }
0x2228   :  { %v6218_v43 = vadd.f32 1e-05, %v6217_v26 }
0x222a   :  { %14781 = vrsqrt.f32 %v6218_v43 }
0x2237   :  { %v14782_v56 = vpop.eup %14781 }
0x2238   :  { %v6221_v50 = vrot.slane %v14782_v56, 1  ;;  %v6222_v17 = vrot.slane %v14782_v56, 2  ;;  %v6223_v49 = vrot.slane %v14782_v56, 3  ;;  %v6224_v59 = vrot.slane %v14782_v56, 4 }
0x2239   :  { %v6225_v52 = vrot.slane %v14782_v56, 5  ;;  %v6226_v23 = vrot.slane %v14782_v56, 6  ;;  %v6227_v3 = vrot.slane %v14782_v56, 7  ;;  %v6236_v61 = vmul.f32 %v14782_v56, %v16912_v9  ;;  %v11998_v9 = vld [vmem:[%s18596_s11 + $0xb] ss:$0 sm:$0xff] }
0x223a   :  { %v6237_v36 = vmul.f32 %v6221_v50, %v16914_v5  ;;  %v6238_v31 = vmul.f32 %v6222_v17, %v16916_v0  ;;  %v6239_v14 = vmul.f32 %v6223_v49, %v16918_v53  ;;  %v6240_v21 = vmul.f32 %v6224_v59, %v16920_v54 }
0x223b   :  { %v6241_v25 = vmul.f32 %v6225_v52, %v16922_v46  ;;  %v6242_v7 = vmul.f32 %v6226_v23, %v16924_v12  ;;  %v6243_v44 = vmul.f32 %v6227_v3, %v16926_v19  ;;  %v6248_v24 = vmul.f32 %v11997_v57, %v6236_v61 }
0x223c   :  { %v6249_v10 = vmul.f32 %v11997_v57, %v6237_v36  ;;  %v6250_v42 = vmul.f32 %v11997_v57, %v6238_v31  ;;  %v6251_v39 = vmul.f32 %v11997_v57, %v6239_v14  ;;  %v6252_v1 = vmul.f32 %v11997_v57, %v6240_v21 }
0x223d   :  { %v6253_v5 = vmul.f32 %v11997_v57, %v6241_v25  ;;  %v6254_v0 = vmul.f32 %v11997_v57, %v6242_v7  ;;  %v6255_v53 = vmul.f32 %v11997_v57, %v6243_v44  ;;  %v6260_v41 = vadd.f32 %v11998_v9, %v6248_v24  ;;  %v12015_v57 = vld [vmem:[%s18596_s11 + $0x9] ss:$0 sm:$0xff] }
0x223e   :  { %v6261_v48 = vadd.f32 %v11998_v9, %v6249_v10  ;;  %v6262_v54 = vadd.f32 %v11998_v9, %v6250_v42  ;;  %v6263_v15 = vadd.f32 %v11998_v9, %v6251_v39  ;;  %v6264_v46 = vadd.f32 %v11998_v9, %v6252_v1 }
0x223f   :  { %v6265_v12 = vadd.f32 %v11998_v9, %v6253_v5  ;;  %v6266_v29 = vadd.f32 %v11998_v9, %v6254_v0  ;;  %v6267_v35 = vadd.f32 %v11998_v9, %v6255_v53 }
0x2240   :  { %v6286_v22 = vrot.slane %v6261_v48, 7  ;;  %v6288_v19 = vrot.slane %v6262_v54, 6  ;;  %v6290_v30 = vrot.slane %v6263_v15, 5  ;;  %v6292_v45 = vrot.slane %v6264_v46, 4 }
0x2241   :  { %v6294_v6 = vrot.slane %v6265_v12, 3  ;;  %v6296_v13 = vrot.slane %v6266_v29, 2  ;;  %v6298_v4 = vrot.slane %v6267_v35, 1 }
0x2242   :  { %v6287_v58 = vsel %vm4177_vm4, %v6286_v22, %v6260_v41 }
0x2243   :  { %v6289_v38 = vsel %vm4180_vm5, %v6288_v19, %v6287_v58 }
0x2244   :  { %v6291_v11 = vsel %vm4183_vm6, %v6290_v30, %v6289_v38 }
0x2245   :  { %v6293_v51 = vsel %vm4186_vm7, %v6292_v45, %v6291_v11 }
0x2246   :  { %v6295_v8 = vsel %vm4189_vm8, %v6294_v6, %v6293_v51 }
0x2247   :  { %v6297_v63 = vsel %vm4192_vm9, %v6296_v13, %v6295_v8 }
0x2248   :  { %v6299_v2 = vsel %vm4195_vm10, %v6298_v4, %v6297_v63 }
0x2249   :  { %13957 = vmatmul.mubr.msk.f32.vlgmr.msra.gmra.mxu0 %vm74_vm0, %v6299_v2 }
0x2309   :  { %v6368_v60 = vpop.f32.mrf.mxu0 }
0x230a   :  { %v6369_v26 = vadd.f32 %v12004_v34, %v6368_v60 }
0x230b   :  { %v13958_v43 = vpop.f32.mrf.mxu0 }
0x230c   :  { %v6372_v56 = vmax.f32 %v6369_v26, 0.0 }
0x230e   :  { %13976 = vmatmul.mubr.msk.f32.vlgmr.msra.gmra.mxu1 %vm604_vm2, %v6372_v56 }
0x23ce   :  { %v6456_v50 = vpop.f32.mrf.mxu1 }
0x23cf   :  { %v6457_v17 = vadd.f32 %v12015_v57, %v6456_v50 }
0x23d0   :  { %v13977_v49 = vpop.f32.mrf.mxu1 }
0x23d1   :  { %v6461_v59 = vrot.slane %v6457_v17, 1  ;;  %v6462_v52 = vrot.slane %v6457_v17, 2  ;;  %v6463_v23 = vrot.slane %v6457_v17, 3  ;;  %v6464_v3 = vrot.slane %v6457_v17, 4 }
0x23d2   :  { %v6465_v61 = vrot.slane %v6457_v17, 5  ;;  %v6466_v36 = vrot.slane %v6457_v17, 6  ;;  %v6467_v31 = vrot.slane %v6457_v17, 7  ;;  %v6476_v44 = vadd.f32 %v6457_v17, %v6260_v41 }
0x23d3   :  { %v6477_v14 = vadd.f32 %v6461_v59, %v6261_v48  ;;  %v6478_v21 = vadd.f32 %v6462_v52, %v6262_v54  ;;  %v6479_v25 = vadd.f32 %v6463_v23, %v6263_v15  ;;  %v6480_v7 = vadd.f32 %v6464_v3, %v6264_v46 }
0x23d4   :  { %v6481_v24 = vadd.f32 %v6465_v61, %v6265_v12  ;;  %v6482_v39 = vadd.f32 %v6466_v36, %v6266_v29  ;;  %v6483_v1 = vadd.f32 %v6467_v31, %v6267_v35 }
0x23d5   :  { %v6494_v10 = vrot.slane %v6477_v14, 7  ;;  %v6496_v42 = vrot.slane %v6478_v21, 6  ;;  %v6498_v5 = vrot.slane %v6479_v25, 5  ;;  %v6500_v53 = vrot.slane %v6480_v7, 4 }
0x23d6   :  { %v6502_v19 = vrot.slane %v6481_v24, 3  ;;  %v6504_v54 = vrot.slane %v6482_v39, 2  ;;  %v6506_v46 = vrot.slane %v6483_v1, 1 }
0x23d7   :  { %v6495_v9 = vsel %vm4177_vm4, %v6494_v10, %v6476_v44 }
0x23d8   :  { %v6497_v0 = vsel %vm4180_vm5, %v6496_v42, %v6495_v9  ;;  %v12023_v9 = vld [vmem:[%s18592_s7 + $0x3d0] sm:$0xff] }
0x23d9   :  { %v6499_v22 = vsel %vm4183_vm6, %v6498_v5, %v6497_v0  ;;  %v12037_v5 = vld [vmem:[%s18592_s7 + $0x470] sm:$0xff]  ;;  %v12022_v0 = vld [vmem:[%s18592_s7 + $0x3c8] sm:$0xff] }
0x23da   :  { %v6501_v48 = vsel %vm4186_vm7, %v6500_v53, %v6499_v22  ;;  %v12036_v53 = vld [vmem:[%s18592_s7 + $0x468] sm:$0xff]  ;;  %v12021_v22 = vld [vmem:[%s18592_s7 + $0x3c0] sm:$0xff] }
0x23db   :  { %v6503_v15 = vsel %vm4189_vm8, %v6502_v19, %v6501_v48  ;;  %v12035_v19 = vld [vmem:[%s18592_s7 + $0x460] sm:$0xff]  ;;  %v12052_v48 = vld [vmem:[%s18592_s7 + $0x518] sm:$0xff] }
0x23dc   :  { %v6505_v41 = vsel %vm4192_vm9, %v6504_v54, %v6503_v15 }
0x23dd   :  { %v6507_v12 = vsel %vm4195_vm10, %v6506_v46, %v6505_v41  ;;  %v6622_v41 = vlaneseq }
0x23de   :  { %v6509_v29 = vsel %vm74_vm0, %v6507_v12, 0.0 }
0x23df   :  { %6510 = vadd.xlane.f32.xlu0 %v6509_v29  ;;  %v17102_v12 = vshrl.u32 %v6622_v41, 7 }
0x23e1   :  { %vm6624_vm11 = vcmp.eq.s32.totalorder %v17102_v12, 0 }
0x2468   :  { %v6511_v35 = vpop.xlane.xlu0 %6510 }
0x2469   :  { %v6512_v58 = vmul.f32 0.03125, %v6511_v35  ;;  %v12019_v35 = vld [vmem:[%s18596_s11 + $0xc] ss:$0 sm:$0xff] }
0x246b   :  { %v6514_v30 = vrot.slane %v6512_v58, 1  ;;  %v6515_v38 = vrot.slane %v6512_v58, 2  ;;  %v6516_v45 = vrot.slane %v6512_v58, 3  ;;  %v6517_v11 = vrot.slane %v6512_v58, 4 }
0x246c   :  { %v6518_v6 = vrot.slane %v6512_v58, 5  ;;  %v6519_v51 = vrot.slane %v6512_v58, 6  ;;  %v6520_v13 = vrot.slane %v6512_v58, 7  ;;  %v17035_v8 = vsub.f32 %v6476_v44, %v6512_v58 }
0x246d   :  { %v17037_v4 = vsub.f32 %v6477_v14, %v6514_v30  ;;  %v17039_v63 = vsub.f32 %v6478_v21, %v6515_v38  ;;  %v17041_v2 = vsub.f32 %v6479_v25, %v6516_v45  ;;  %v17043_v16 = vsub.f32 %v6480_v7, %v6517_v11 }
0x246e   :  { %v17045_v62 = vsub.f32 %v6481_v24, %v6518_v6  ;;  %v17047_v47 = vsub.f32 %v6482_v39, %v6519_v51  ;;  %v17049_v34 = vsub.f32 %v6483_v1, %v6520_v13  ;;  %v6537_v57 = vmul.f32 %v17035_v8, %v17035_v8  ;;  %v12024_v39 = vld [vmem:[%s18592_s7 + $0x3d8] sm:$0xff]  ;;  %v12020_v6 = vld [vmem:[%s18596_s11 + $0xd] ss:$0 sm:$0xff] }
0x246f   :  { %v6538_v60 = vmul.f32 %v17037_v4, %v17037_v4  ;;  %v6539_v26 = vmul.f32 %v17039_v63, %v17039_v63  ;;  %v6540_v43 = vmul.f32 %v17041_v2, %v17041_v2  ;;  %v6541_v56 = vmul.f32 %v17043_v16, %v17043_v16  ;;  %v12038_v1 = vld [vmem:[%s18592_s7 + $0x478] sm:$0xff]  ;;  %13978 = vmatprep.subr.mxu0 %v12024_v39 }
0x2470   :  { %v6542_v50 = vmul.f32 %v17045_v62, %v17045_v62  ;;  %v6543_v59 = vmul.f32 %v17047_v47, %v17047_v47  ;;  %v6544_v52 = vmul.f32 %v17049_v34, %v17049_v34  ;;  %13998 = vmatprep.subr.mxu1 %v12038_v1  ;;  %13979 = vmatpush3.msra.mxu0 %v12024_v39  ;;  %v17108_v58 = vsub.s32 0, %v17102_v12 }
0x2471   :  { %v6553_v17 = vrot.slane %v6538_v60, 7  ;;  %v6555_v49 = vrot.slane %v6539_v26, 6  ;;  %v6557_v3 = vrot.slane %v6540_v43, 5  ;;  %v6559_v36 = vrot.slane %v6541_v56, 4  ;;  %13999 = vmatpush3.msra.mxu1 %v12038_v1  ;;  %13980 = vmatprep.subr.mxu0 %v12023_v9 }
0x2472   :  { %v6561_v14 = vrot.slane %v6542_v50, 3  ;;  %v6563_v25 = vrot.slane %v6543_v59, 2  ;;  %v6565_v44 = vrot.slane %v6544_v52, 1  ;;  %14000 = vmatprep.subr.mxu1 %v12037_v5  ;;  %13981 = vmatpush3.msra.mxu0 %v12023_v9 }
0x2473   :  { %v6554_v23 = vsel %vm4177_vm4, %v6553_v17, %v6537_v57  ;;  %14001 = vmatpush3.msra.mxu1 %v12037_v5  ;;  %13982 = vmatprep.subr.mxu0 %v12022_v0 }
0x2474   :  { %v6556_v61 = vsel %vm4180_vm5, %v6555_v49, %v6554_v23  ;;  %14002 = vmatprep.subr.mxu1 %v12036_v53  ;;  %13983 = vmatpush3.msra.mxu0 %v12022_v0 }
0x2475   :  { %v6558_v31 = vsel %vm4183_vm6, %v6557_v3, %v6556_v61  ;;  %14003 = vmatpush3.msra.mxu1 %v12036_v53  ;;  %13984 = vmatprep.subr.mxu0 %v12021_v22 }
0x2476   :  { %v6560_v21 = vsel %vm4186_vm7, %v6559_v36, %v6558_v31  ;;  %13985 = vmatpush3.msra.mxu0 %v12021_v22  ;;  %14004 = vmatprep.subr.mxu1 %v12035_v19  ;;  %v12049_v22 = vld [vmem:[%s18592_s7 + $0x500] sm:$0xff] }
0x2477   :  { %v6562_v7 = vsel %vm4189_vm8, %v6561_v14, %v6560_v21  ;;  %14005 = vmatpush3.msra.mxu1 %v12035_v19  ;;  %14018 = vmatprep.subr.mxu0 %v12052_v48  ;;  %v17232_v19 = vld [vmem:[%s18592_s7 + $0x3e0] ss:$0 sm:$0xff] }
0x2478   :  { %v6564_v24 = vsel %vm4192_vm9, %v6563_v25, %v6562_v7 }
0x2479   :  { %v6566_v10 = vsel %vm4195_vm10, %v6565_v44, %v6564_v24 }
0x247a   :  { %v6568_v42 = vsel %vm74_vm0, %v6566_v10, 0.0 }
0x247b   :  { %6569 = vadd.xlane.f32.xlu1 %v6568_v42 }
0x2504   :  { %v6570_v54 = vpop.xlane.xlu1 %6569 }
0x2505   :  { %v6571_v15 = vmul.f32 0.03125, %v6570_v54 }
0x2507   :  { %v6572_v46 = vadd.f32 1e-05, %v6571_v15 }
0x2509   :  { %14783 = vrsqrt.f32 %v6572_v46 }
0x2516   :  { %v14784_v29 = vpop.eup %14783 }
0x2517   :  { %v6590_v30 = vmul.f32 %v14784_v29, %v17035_v8  ;;  %v6575_v38 = vrot.slane %v14784_v29, 1  ;;  %v6576_v45 = vrot.slane %v14784_v29, 2  ;;  %v6577_v11 = vrot.slane %v14784_v29, 3 }
0x2518   :  { %v6578_v51 = vrot.slane %v14784_v29, 4  ;;  %v6579_v13 = vrot.slane %v14784_v29, 5  ;;  %v6580_v60 = vrot.slane %v14784_v29, 6  ;;  %v6581_v26 = vrot.slane %v14784_v29, 7 }
0x2519   :  { %v6602_v43 = vmul.f32 %v12019_v35, %v6590_v30  ;;  %v6591_v56 = vmul.f32 %v6575_v38, %v17037_v4  ;;  %v6592_v57 = vmul.f32 %v6576_v45, %v17039_v63  ;;  %v6593_v50 = vmul.f32 %v6577_v11, %v17041_v2  ;;  %v12040_v45 = vld [vmem:[%s18592_s7 + $0x480] ss:$0 sm:$0xff] }
0x251a   :  { %v6594_v8 = vmul.f32 %v6578_v51, %v17043_v16  ;;  %v6595_v17 = vmul.f32 %v6579_v13, %v17045_v62  ;;  %v6596_v49 = vmul.f32 %v6580_v60, %v17047_v47  ;;  %v6597_v4 = vmul.f32 %v6581_v26, %v17049_v34 }
0x251b   :  { %v6614_v59 = vadd.f32 %v12020_v6, %v6602_v43  ;;  %v6603_v52 = vmul.f32 %v12019_v35, %v6591_v56  ;;  %v6604_v23 = vmul.f32 %v12019_v35, %v6592_v57  ;;  %v6605_v3 = vmul.f32 %v12019_v35, %v6593_v50 }
0x251c   :  { %v6606_v61 = vmul.f32 %v12019_v35, %v6594_v8  ;;  %v6607_v36 = vmul.f32 %v12019_v35, %v6595_v17  ;;  %v6608_v21 = vmul.f32 %v12019_v35, %v6596_v49  ;;  %v6609_v34 = vmul.f32 %v12019_v35, %v6597_v4 }
0x251d   :  { %v6630_v63 = vrot.slane %v6614_v59, %v17108_v58  ;;  %v6615_v31 = vadd.f32 %v12020_v6, %v6603_v52  ;;  %v6616_v2 = vadd.f32 %v12020_v6, %v6604_v23  ;;  %v6617_v14 = vadd.f32 %v12020_v6, %v6605_v3  ;;  %v12054_v23 = vld [vmem:[%s18592_s7 + $0x520] ss:$0 sm:$0xff] }
0x251e   :  { %v6618_v16 = vadd.f32 %v12020_v6, %v6606_v61  ;;  %v6619_v24 = vadd.f32 %v12020_v6, %v6607_v36  ;;  %v6620_v42 = vadd.f32 %v12020_v6, %v6608_v21  ;;  %v6621_v1 = vadd.f32 %v12020_v6, %v6609_v34  ;;  %v12105_v34 = vld [vmem:[%s18592_s7 + $0x4a0] sm:$0xff] }
0x251f   :  { %v17126_v62 = vsel %vm6624_vm11, %v6630_v63, %v16502_v32  ;;  %v6634_v47 = vrot.slane %v6615_v31, %v17108_v58  ;;  %v6638_v25 = vrot.slane %v6616_v2, %v17108_v58  ;;  %v6642_v44 = vrot.slane %v6617_v14, %v17108_v58 }
0x2520   :  { %13986 = vmatprep.mubr.msk.f32.mxu0 %vm74_vm0, %v17126_v62  ;;  %14006 = vmatprep.mubr.msk.f32.mxu1 %vm74_vm0, %v17126_v62  ;;  %v6646_v10 = vrot.slane %v6618_v16, %v17108_v58  ;;  %v6650_v39 = vrot.slane %v6619_v24, %v17108_v58  ;;  %v6654_v5 = vrot.slane %v6620_v42, %v17108_v58  ;;  %v12104_v42 = vld [vmem:[%s18592_s7 + $0x498] sm:$0xff] }
0x2521   :  { %v17137_v7 = vsel %vm6624_vm11, %v6634_v47, %v16497_v33  ;;  %v17142_v32 = vsel %vm6624_vm11, %v6638_v25, %v16511_v55  ;;  %v12051_v33 = vld [vmem:[%s18592_s7 + $0x510] sm:$0xff]  ;;  %v17160_v55 = vsel %vm6624_vm11, %v6642_v44, %v16500_v40  ;;  %v12050_v40 = vld [vmem:[%s18592_s7 + $0x508] sm:$0xff] }
0x2522   :  { %13987 = vmatmul.mubr.msk.f32.vlgmr.msra.gmra.mxu0 %vm74_vm0, %v17137_v7  ;;  %14007 = vmatmul.mubr.msk.f32.vlgmr.msra.gmra.mxu1 %vm74_vm0, %v17137_v7  ;;  %v17170_v9 = vsel %vm6624_vm11, %v6646_v10, %v16523_v28  ;;  %v17183_v0 = vsel %vm6624_vm11, %v6650_v39, %v16531_v27  ;;  %v6658_v28 = vrot.slane %v6621_v1, %v17108_v58 }
0x2523   :  { %13989 = vmatprep.mubr.msk.f32.mxu0 %vm74_vm0, %v17142_v32  ;;  %14009 = vmatprep.mubr.msk.f32.mxu1 %vm74_vm0, %v17142_v32  ;;  %v17193_v53 = vsel %vm6624_vm11, %v6654_v5, %v16542_v20  ;;  %v12102_v5 = vld [vmem:[%s18592_s7 + $0x488] sm:$0xff] }
0x2524   :  { %14019 = vmatpush3.msra.mxu0 %v12052_v48  ;;  %v17205_v27 = vsel %vm6624_vm11, %v6658_v28, %v16550_v37 }
0x2525   :  { %14020 = vmatprep.subr.mxu0 %v12051_v33 }
0x2526   :  { %13990 = vmatmul.mubr.msk.f32.gmra.mxu0 %vm74_vm0, %v17160_v55  ;;  %14010 = vmatmul.mubr.msk.f32.gmra.mxu1 %vm74_vm0, %v17160_v55 }
0x2527   :  { %13992 = vmatprep.mubr.msk.f32.mxu0 %vm74_vm0, %v17170_v9  ;;  %14012 = vmatprep.mubr.msk.f32.mxu1 %vm74_vm0, %v17170_v9 }
0x2528   :  { %14021 = vmatpush3.msra.mxu0 %v12051_v33  ;;  %v12103_v33 = vld [vmem:[%s18592_s7 + $0x490] sm:$0xff] }
0x2529   :  { %14022 = vmatprep.subr.mxu0 %v12050_v40 }
0x252a   :  { %13993 = vmatmul.mubr.msk.f32.gmra.mxu0 %vm74_vm0, %v17183_v0  ;;  %14013 = vmatmul.mubr.msk.f32.gmra.mxu1 %vm74_vm0, %v17183_v0 }
0x252b   :  { %13995 = vmatprep.mubr.msk.f32.mxu0 %vm74_vm0, %v17193_v53  ;;  %14015 = vmatprep.mubr.msk.f32.mxu1 %vm74_vm0, %v17193_v53 }
0x252c   :  { %14023 = vmatpush3.msra.mxu0 %v12050_v40 }
0x252d   :  { %14024 = vmatprep.subr.mxu0 %v12049_v22 }
0x252e   :  { %13996 = vmatmul.mubr.msk.f32.gmra.mxu0 %vm74_vm0, %v17205_v27  ;;  %14016 = vmatmul.mubr.msk.f32.gmra.mxu1 %vm74_vm0, %v17205_v27 }
0x252f   :  { %14026 = vmatprep.mubr.msk.f32.mxu0 %vm74_vm0, %v17126_v62  ;;  %14025 = vmatpush3.msra.mxu0 %v12049_v22 }
0x2532   :  { %14027 = vmatmul.mubr.msk.f32.vlgmr.msra.gmra.mxu0 %vm74_vm0, %v17137_v7 }
0x2533   :  { %14029 = vmatprep.mubr.msk.f32.mxu0 %vm74_vm0, %v17142_v32 }
0x2536   :  { %14030 = vmatmul.mubr.msk.f32.gmra.mxu0 %vm74_vm0, %v17160_v55 }
0x2537   :  { %14032 = vmatprep.mubr.msk.f32.mxu0 %vm74_vm0, %v17170_v9 }
0x253a   :  { %14033 = vmatmul.mubr.msk.f32.gmra.mxu0 %vm74_vm0, %v17183_v0 }
0x253b   :  { %14035 = vmatprep.mubr.msk.f32.mxu0 %vm74_vm0, %v17193_v53 }
0x253e   :  { %14036 = vmatmul.mubr.msk.f32.gmra.mxu0 %vm74_vm0, %v17205_v27 }
0x25e2   :  { %v17227_v20 = vpop.f32.mrf.mxu0  ;;  %v14008_v37 = vpop.f32.mrf.mxu1 }
0x25e3   :  { %v6888_v2 = vadd.f32 %v14008_v37, %v12040_v45  ;;  %v6773_v24 = vadd.f32 %v17227_v20, %v17232_v19 }
0x25e4   :  { %v6767_v48 = vpop.f32.mrf.mxu0  ;;  %v6882_v54 = vpop.f32.mrf.mxu1 }
0x25e5   :  { %v6768_v15 = vadd.f32 %v17232_v19, %v6767_v48  ;;  %v6883_v21 = vadd.f32 %v12040_v45, %v6882_v54  ;;  %v17322_v48 = vld [vmem:[%s18586_s1 + $0x8] sm:$0xff] }
0x25e6   :  { %v17235_v46 = vpop.f32.mrf.mxu0  ;;  %v14011_v41 = vpop.f32.mrf.mxu1 }
0x25e7   :  { %14054 = vmatprep.mubr.msk.f32.mxu1 %vm434_vm1, %v6768_v15  ;;  %v6898_v52 = vadd.f32 %v14011_v41, %v12040_v45  ;;  %v6783_v39 = vadd.f32 %v17235_v46, %v17232_v19  ;;  %v17330_v41 = vld [vmem:[%s18586_s1] sm:$0xff] }
0x25e8   :  { %v17238_v12 = vpop.f32.mrf.mxu0  ;;  %v6892_v29 = vpop.f32.mrf.mxu1 }
0x25e9   :  { %v6893_v4 = vadd.f32 %v12040_v45, %v6892_v29  ;;  %v6778_v10 = vadd.f32 %v17232_v19, %v17238_v12 }
0x25ea   :  { %v17240_v35 = vpop.f32.mrf.mxu0  ;;  %v14014_v58 = vpop.f32.mrf.mxu1 }
0x25eb   :  { %v6908_v57 = vadd.f32 %v14014_v58, %v12040_v45  ;;  %v6793_v40 = vadd.f32 %v17240_v35, %v17232_v19 }
0x25ec   :  { %v17242_v30 = vpop.f32.mrf.mxu0  ;;  %v6902_v38 = vpop.f32.mrf.mxu1 }
0x25ed   :  { %v6903_v17 = vadd.f32 %v12040_v45, %v6902_v38  ;;  %v6788_v1 = vadd.f32 %v17232_v19, %v17242_v30  ;;  %v17340_v30 = vld [vmem:[%s18586_s1 + $0x18] sm:$0xff] }
0x25ee   :  { %v17247_v11 = vpop.f32.mrf.mxu0  ;;  %v14017_v6 = vpop.f32.mrf.mxu1 }
0x25ef   :  { %v6918_v51 = vadd.f32 %v14017_v6, %v12040_v45  ;;  %v6803_v22 = vadd.f32 %v17247_v11, %v17232_v19 }
0x25f0   :  { %v17249_v13 = vpop.f32.mrf.mxu0  ;;  %v6912_v60 = vpop.f32.mrf.mxu1 }
0x25f1   :  { %v6913_v26 = vadd.f32 %v12040_v45, %v6912_v60  ;;  %14038 = vmatprep.subr.msk.mxu1 %vm434_vm1, %v6918_v51  ;;  %v6798_v28 = vadd.f32 %v17232_v19, %v17249_v13 }
0x25f2   :  { %v14028_v43 = vpop.f32.mrf.mxu0  ;;  %14039 = vmatpush3.xpose.msk.msra.mxu1 %vm434_vm1, %v6918_v51  ;;  %v17350_v51 = vld [vmem:[%s18586_s1 + $0x10] sm:$0xff] }
0x25f3   :  { %14040 = vmatprep.subr.msk.mxu1 %vm434_vm1, %v6913_v26  ;;  %v7003_v25 = vadd.f32 %v14028_v43, %v12054_v23 }
0x25f4   :  { %v6997_v56 = vpop.f32.mrf.mxu0 }
0x25f5   :  { %v6998_v44 = vadd.f32 %v12054_v23, %v6997_v56  ;;  %v17360_v56 = vld [vmem:[%s18586_s1 + $0x28] sm:$0xff] }
0x25f6   :  { %v14031_v50 = vpop.f32.mrf.mxu0  ;;  %14041 = vmatpush3.xpose.msk.msra.mxu1 %vm434_vm1, %v6913_v26 }
0x25f7   :  { %14042 = vmatprep.subr.msk.mxu1 %vm434_vm1, %v6908_v57  ;;  %v7013_v16 = vadd.f32 %v14031_v50, %v12054_v23 }
0x25f8   :  { %v7007_v8 = vpop.f32.mrf.mxu0 }
0x25f9   :  { %v7008_v47 = vadd.f32 %v12054_v23, %v7007_v8 }
0x25fa   :  { %v14034_v49 = vpop.f32.mrf.mxu0  ;;  %14043 = vmatpush3.xpose.msk.msra.mxu1 %vm434_vm1, %v6908_v57 }
0x25fb   :  { %14044 = vmatprep.subr.msk.mxu1 %vm434_vm1, %v6903_v17  ;;  %v7023_v31 = vadd.f32 %v14034_v49, %v12054_v23  ;;  %v17370_v49 = vld [vmem:[%s18586_s1 + $0x20] sm:$0xff] }
0x25fc   :  { %v7017_v59 = vpop.f32.mrf.mxu0 }
0x25fd   :  { %v7018_v14 = vadd.f32 %v12054_v23, %v7017_v59 }
0x25fe   :  { %v14037_v3 = vpop.f32.mrf.mxu0  ;;  %14045 = vmatpush3.xpose.msk.msra.mxu1 %vm434_vm1, %v6903_v17 }
0x25ff   :  { %v7033_v61 = vadd.f32 %v14037_v3, %v12054_v23  ;;  %14046 = vmatprep.subr.msk.mxu1 %vm434_vm1, %v6898_v52 }
0x2600   :  { %v7027_v36 = vpop.f32.mrf.mxu0 }
0x2601   :  { %v7028_v63 = vadd.f32 %v12054_v23, %v7027_v36  ;;  %14066 = vmatprep.subr.mxu0 %v7033_v61 }
0x2602   :  { %14047 = vmatpush3.xpose.msk.msra.mxu1 %vm434_vm1, %v6898_v52  ;;  %14067 = vmatpush3.msra.mxu0 %v7033_v61  ;;  %v17380_v61 = vld [vmem:[%s18586_s1 + $0x38] sm:$0xff] }
0x2603   :  { %14048 = vmatprep.subr.msk.mxu1 %vm434_vm1, %v6893_v4  ;;  %14068 = vmatprep.subr.mxu0 %v7028_v63 }
0x2604   :  { %14069 = vmatpush3.msra.mxu0 %v7028_v63 }
0x2605   :  { %14070 = vmatprep.subr.mxu0 %v7023_v31 }
0x2606   :  { %14049 = vmatpush3.xpose.msk.msra.mxu1 %vm434_vm1, %v6893_v4  ;;  %14071 = vmatpush3.msra.mxu0 %v7023_v31 }
0x2607   :  { %14050 = vmatprep.subr.msk.mxu1 %vm434_vm1, %v6888_v2  ;;  %14072 = vmatprep.subr.mxu0 %v7018_v14 }
0x2608   :  { %14073 = vmatpush3.msra.mxu0 %v7018_v14 }
0x2609   :  { %14074 = vmatprep.subr.mxu0 %v7013_v16 }
0x260a   :  { %14051 = vmatpush3.xpose.msk.msra.mxu1 %vm434_vm1, %v6888_v2  ;;  %14075 = vmatpush3.msra.mxu0 %v7013_v16  ;;  %v17390_v2 = vld [vmem:[%s18586_s1 + $0x30] sm:$0xff] }
0x260b   :  { %14052 = vmatprep.subr.msk.mxu1 %vm434_vm1, %v6883_v21  ;;  %14076 = vmatprep.subr.mxu0 %v7008_v47 }
0x260c   :  { %14077 = vmatpush3.msra.mxu0 %v7008_v47 }
0x260d   :  { %14078 = vmatprep.subr.mxu0 %v7003_v25 }
0x260e   :  { %14053 = vmatpush3.xpose.msk.msra.mxu1 %vm434_vm1, %v6883_v21  ;;  %14079 = vmatpush3.msra.mxu0 %v7003_v25 }
0x260f   :  { %14080 = vmatprep.subr.mxu0 %v6998_v44  ;;  %14114 = vmatprep.subr.mxu1 %v12105_v34 }
0x2610   :  { %14081 = vmatpush3.msra.mxu0 %v6998_v44 }
0x2611   :  { %14055 = vmatmul.mubr.msk.f32.vlgmr.msra.gmra.mxu1 %vm434_vm1, %v6773_v24 }
0x2612   :  { %14057 = vmatprep.mubr.msk.f32.mxu1 %vm434_vm1, %v6778_v10  ;;  %14115 = vmatpush3.msra.mxu1 %v12105_v34  ;;  %v12107_v10 = vld [vmem:[%s18592_s7 + $0x4a8] ss:$0 sm:$0xff] }
0x2613   :  { %14116 = vmatprep.subr.mxu1 %v12104_v42 }
0x2614   :  { %14117 = vmatpush3.msra.mxu1 %v12104_v42 }
0x2615   :  { %14058 = vmatmul.mubr.msk.f32.gmra.mxu1 %vm434_vm1, %v6783_v39  ;;  %14118 = vmatprep.subr.mxu1 %v12103_v33 }
0x2616   :  { %14060 = vmatprep.mubr.msk.f32.mxu1 %vm434_vm1, %v6788_v1  ;;  %14119 = vmatpush3.msra.mxu1 %v12103_v33 }
0x2617   :  { %14120 = vmatprep.subr.mxu1 %v12102_v5 }
0x2618   :  { %14121 = vmatpush3.msra.mxu1 %v12102_v5 }
0x2619   :  { %14061 = vmatmul.mubr.msk.f32.gmra.mxu1 %vm434_vm1, %v6793_v40 }
0x261a   :  { %14063 = vmatprep.mubr.msk.f32.mxu1 %vm434_vm1, %v6798_v28 }
0x261d   :  { %14064 = vmatmul.mubr.msk.f32.gmra.mxu1 %vm434_vm1, %v6803_v22 }
0x261e   :  { %14122 = vmatprep.mubr.msk.f32.mxu1 %vm74_vm0, %v17126_v62 }
0x2621   :  { %14123 = vmatmul.mubr.msk.f32.vlgmr.msra.gmra.mxu1 %vm74_vm0, %v17137_v7 }
0x2622   :  { %14125 = vmatprep.mubr.msk.f32.mxu1 %vm74_vm0, %v17142_v32 }
0x2625   :  { %14126 = vmatmul.mubr.msk.f32.gmra.mxu1 %vm74_vm0, %v17160_v55 }
0x2626   :  { %14128 = vmatprep.mubr.msk.f32.mxu1 %vm74_vm0, %v17170_v9 }
0x2629   :  { %14129 = vmatmul.mubr.msk.f32.gmra.mxu1 %vm74_vm0, %v17183_v0 }
0x262a   :  { %14131 = vmatprep.mubr.msk.f32.mxu1 %vm74_vm0, %v17193_v53 }
0x262d   :  { %14132 = vmatmul.mubr.msk.f32.gmra.mxu1 %vm74_vm0, %v17205_v27 }
0x26d1   :  { %v14056_v20 = vpop.f32.mrf.mxu1 }
0x26d2   :  { %v7190_v37 = vmul.f32 0.35355338, %v14056_v20 }
0x26d3   :  { %v7150_v19 = vpop.f32.mrf.mxu1 }
0x26d4   :  { %v17325_v54 = vadd.f32 %v17322_v48, %v7190_v37  ;;  %v7189_v15 = vmul.f32 0.35355338, %v7150_v19 }
0x26d5   :  { %v14059_v46 = vpop.f32.mrf.mxu1 }
0x26d6   :  { %v17333_v12 = vadd.f32 %v17330_v41, %v7189_v15  ;;  %v7192_v29 = vmul.f32 0.35355338, %v14059_v46  ;;  %v7208_v35 = vsel %vm604_vm2, %v17325_v54, -inf }
0x26d7   :  { %7209 = vmax.xlane.f32.xlu1 %v7208_v35  ;;  %v7160_v58 = vpop.f32.mrf.mxu1 }
0x26d8   :  { %v17343_v38 = vadd.f32 %v17340_v30, %v7192_v29  ;;  %v7191_v45 = vmul.f32 0.35355338, %v7160_v58  ;;  %v7205_v11 = vsel %vm604_vm2, %v17333_v12, -inf }
0x26d9   :  { %7206 = vmax.xlane.f32.xlu0 %v7205_v11  ;;  %v14062_v6 = vpop.f32.mrf.mxu1 }
0x26da   :  { %v17353_v13 = vadd.f32 %v17350_v51, %v7191_v45  ;;  %v7194_v60 = vmul.f32 0.35355338, %v14062_v6  ;;  %v7214_v26 = vsel %vm604_vm2, %v17343_v38, -inf }
0x26db   :  { %7215 = vmax.xlane.f32.xlu1 %v7214_v26  ;;  %v7170_v43 = vpop.f32.mrf.mxu1 }
0x26dc   :  { %v17363_v57 = vadd.f32 %v17360_v56, %v7194_v60  ;;  %v7193_v50 = vmul.f32 0.35355338, %v7170_v43  ;;  %v7211_v8 = vsel %vm604_vm2, %v17353_v13, -inf }
0x26dd   :  { %7212 = vmax.xlane.f32.xlu0 %v7211_v8  ;;  %v14065_v17 = vpop.f32.mrf.mxu1 }
0x26de   :  { %v17373_v59 = vadd.f32 %v17370_v49, %v7193_v50  ;;  %v7196_v52 = vmul.f32 0.35355338, %v14065_v17  ;;  %v7220_v23 = vsel %vm604_vm2, %v17363_v57, -inf }
0x26df   :  { %7221 = vmax.xlane.f32.xlu1 %v7220_v23  ;;  %v7180_v3 = vpop.f32.mrf.mxu1 }
0x26e0   :  { %v17383_v36 = vadd.f32 %v17380_v61, %v7196_v52  ;;  %v7195_v4 = vmul.f32 0.35355338, %v7180_v3  ;;  %v7217_v63 = vsel %vm604_vm2, %v17373_v59, -inf }
0x26e1   :  { %7218 = vmax.xlane.f32.xlu0 %v7217_v63  ;;  %v14124_v31 = vpop.f32.mrf.mxu1 }
0x26e2   :  { %v17393_v14 = vadd.f32 %v17390_v2, %v7195_v4  ;;  %v7226_v16 = vsel %vm604_vm2, %v17383_v36, -inf  ;;  %v7621_v20 = vadd.f32 %v14124_v31, %v12107_v10 }
0x26e3   :  { %7227 = vmax.xlane.f32.xlu1 %v7226_v16  ;;  %v7615_v21 = vpop.f32.mrf.mxu1 }
0x26e4   :  { %v7223_v47 = vsel %vm604_vm2, %v17393_v14, -inf  ;;  %v7616_v37 = vadd.f32 %v12107_v10, %v7615_v21 }
0x26e5   :  { %v14127_v25 = vpop.f32.mrf.mxu1  ;;  %7224 = vmax.xlane.f32.xlu0 %v7223_v47 }
0x26e6   :  { %v7631_v28 = vadd.f32 %v14127_v25, %v12107_v10 }
0x26e7   :  { %v7625_v34 = vpop.f32.mrf.mxu1 }
0x26e8   :  { %v7626_v22 = vadd.f32 %v12107_v10, %v7625_v34 }
0x26e9   :  { %v14130_v44 = vpop.f32.mrf.mxu1 }
0x26ea   :  { %v7641_v5 = vadd.f32 %v14130_v44, %v12107_v10 }
0x26eb   :  { %v7635_v24 = vpop.f32.mrf.mxu1 }
0x26ec   :  { %v7636_v40 = vadd.f32 %v12107_v10, %v7635_v24 }
0x26ed   :  { %v14133_v42 = vpop.f32.mrf.mxu1 }
0x26ee   :  { %v7651_v33 = vadd.f32 %v14133_v42, %v12107_v10 }
0x26ef   :  { %v7645_v39 = vpop.f32.mrf.mxu1 }
0x26f0   :  { %v7646_v1 = vadd.f32 %v12107_v10, %v7645_v39  ;;  %14154 = vmatprep.subr.msk.mxu1 %vm434_vm1, %v7651_v33 }
0x26f1   :  { %14155 = vmatpush3.xpose.msk.msra.mxu1 %vm434_vm1, %v7651_v33 }
0x26f2   :  { %14156 = vmatprep.subr.msk.mxu1 %vm434_vm1, %v7646_v1 }
0x26f5   :  { %14157 = vmatpush3.xpose.msk.msra.mxu1 %vm434_vm1, %v7646_v1  ;;  %v12091_v1 = vld [vmem:[%s18592_s7 + $0x400] sm:$0xff] }
0x26f6   :  { %14158 = vmatprep.subr.msk.mxu1 %vm434_vm1, %v7641_v5  ;;  %14094 = vmatprep.subr.mxu0 %v12091_v1 }
0x26f9   :  { %14159 = vmatpush3.xpose.msk.msra.mxu1 %vm434_vm1, %v7641_v5 }
0x26fa   :  { %14160 = vmatprep.subr.msk.mxu1 %vm434_vm1, %v7636_v40 }
0x26fd   :  { %14161 = vmatpush3.xpose.msk.msra.mxu1 %vm434_vm1, %v7636_v40 }
0x26fe   :  { %14162 = vmatprep.subr.msk.mxu1 %vm434_vm1, %v7631_v28 }
0x2701   :  { %14163 = vmatpush3.xpose.msk.msra.mxu1 %vm434_vm1, %v7631_v28 }
0x2702   :  { %14164 = vmatprep.subr.msk.mxu1 %vm434_vm1, %v7626_v22 }
0x2705   :  { %14165 = vmatpush3.xpose.msk.msra.mxu1 %vm434_vm1, %v7626_v22 }
0x2706   :  { %14166 = vmatprep.subr.msk.mxu1 %vm434_vm1, %v7621_v20 }
0x2709   :  { %14167 = vmatpush3.xpose.msk.msra.mxu1 %vm434_vm1, %v7621_v20 }
0x270a   :  { %14168 = vmatprep.subr.msk.mxu1 %vm434_vm1, %v7616_v37 }
0x270d   :  { %14169 = vmatpush3.xpose.msk.msra.mxu1 %vm434_vm1, %v7616_v37 }
0x2760   :  { %v7210_v19 = vpop.xlane.xlu1 %7209 }
0x2761   :  { %v7230_v15 = vsub.f32 %v17325_v54, %v7210_v19 }
0x2762   :  { %v7207_v46 = vpop.xlane.xlu0 %7206 }
0x2763   :  { %v7239_v29 = vmul.f32 1.442695, %v7230_v15  ;;  %v7229_v35 = vsub.f32 %v17333_v12, %v7207_v46 }
0x2764   :  { %v7216_v58 = vpop.xlane.xlu1 %7215 }
0x2765   :  { %14785 = vpow2.f32 %v7239_v29  ;;  %v7237_v45 = vmul.f32 1.442695, %v7229_v35  ;;  %v7232_v11 = vsub.f32 %v17343_v38, %v7216_v58 }
0x2766   :  { %v7213_v6 = vpop.xlane.xlu0 %7212 }
0x2767   :  { %14787 = vpow2.f32 %v7237_v45  ;;  %v7243_v60 = vmul.f32 1.442695, %v7232_v11  ;;  %v7231_v26 = vsub.f32 %v17353_v13, %v7213_v6  ;;  %v12090_v11 = vld [vmem:[%s18592_s7 + $0x3f8] sm:$0xff] }
0x2768   :  { %v7222_v43 = vpop.xlane.xlu1 %7221 }
0x2769   :  { %14789 = vpow2.f32 %v7243_v60  ;;  %v7241_v50 = vmul.f32 1.442695, %v7231_v26  ;;  %v7234_v8 = vsub.f32 %v17363_v57, %v7222_v43  ;;  %v12089_v26 = vld [vmem:[%s18592_s7 + $0x3f0] sm:$0xff] }
0x276a   :  { %v7219_v54 = vpop.xlane.xlu0 %7218 }
0x276b   :  { %14791 = vpow2.f32 %v7241_v50  ;;  %v7247_v17 = vmul.f32 1.442695, %v7234_v8  ;;  %v7233_v12 = vsub.f32 %v17373_v59, %v7219_v54  ;;  %v12088_v8 = vld [vmem:[%s18592_s7 + $0x3e8] sm:$0xff] }
0x276c   :  { %v7228_v52 = vpop.xlane.xlu1 %7227 }
0x276d   :  { %14793 = vpow2.f32 %v7247_v17  ;;  %v7245_v23 = vmul.f32 1.442695, %v7233_v12  ;;  %v7236_v38 = vsub.f32 %v17383_v36, %v7228_v52  ;;  %v12119_v12 = vld [vmem:[%s18592_s7 + $0x540] sm:$0xff] }
0x276e   :  { %v7225_v3 = vpop.xlane.xlu0 %7224 }
0x276f   :  { %14795 = vpow2.f32 %v7245_v23  ;;  %v7251_v4 = vmul.f32 1.442695, %v7236_v38  ;;  %v7235_v13 = vsub.f32 %v17393_v14, %v7225_v3 }
0x2771   :  { %14797 = vpow2.f32 %v7251_v4  ;;  %v7249_v63 = vmul.f32 1.442695, %v7235_v13  ;;  %v12118_v13 = vld [vmem:[%s18592_s7 + $0x538] sm:$0xff] }
0x2772   :  { %v14786_v31 = vpop.eup %14785 }
0x2773   :  { %14799 = vpow2.f32 %v7249_v63  ;;  %v7256_v57 = vsel %vm604_vm2, %v14786_v31, 0.0  ;;  %v12117_v63 = vld [vmem:[%s18592_s7 + $0x530] sm:$0xff] }
0x2774   :  { %v14788_v16 = vpop.eup %14787  ;;  %7257 = vadd.xlane.f32.xlu1 %v7256_v57  ;;  %v12087_v57 = vld [vmem:[%s18593_s8 + $0x40] sm:$0xff] }
0x2775   :  { %v7253_v59 = vsel %vm604_vm2, %v14788_v16, 0.0  ;;  %14224 = vmatprep.subr.mxu1 %v12087_v57 }
0x2776   :  { %v14790_v21 = vpop.eup %14789  ;;  %7254 = vadd.xlane.f32.xlu0 %v7253_v59 }
0x2777   :  { %v7262_v47 = vsel %vm604_vm2, %v14790_v21, 0.0 }
0x2778   :  { %v14792_v36 = vpop.eup %14791  ;;  %7263 = vadd.xlane.f32.xlu1 %v7262_v47 }
0x2779   :  { %v7259_v25 = vsel %vm604_vm2, %v14792_v36, 0.0 }
0x277a   :  { %v14794_v34 = vpop.eup %14793  ;;  %7260 = vadd.xlane.f32.xlu0 %v7259_v25 }
0x277b   :  { %v7268_v14 = vsel %vm604_vm2, %v14794_v34, 0.0 }
0x277c   :  { %v14796_v44 = vpop.eup %14795  ;;  %7269 = vadd.xlane.f32.xlu1 %v7268_v14 }
0x277d   :  { %v7265_v24 = vsel %vm604_vm2, %v14796_v44, 0.0 }
0x277e   :  { %v14798_v10 = vpop.eup %14797  ;;  %7266 = vadd.xlane.f32.xlu0 %v7265_v24  ;;  %v12093_v24 = vld [vmem:[%s18592_s7 + $0x408] ss:$0 sm:$0xff] }
0x277f   :  { %v7274_v42 = vsel %vm604_vm2, %v14798_v10, 0.0 }
0x2780   :  { %v14800_v33 = vpop.eup %14799  ;;  %7275 = vadd.xlane.f32.xlu1 %v7274_v42 }
0x2781   :  { %v7271_v39 = vsel %vm604_vm2, %v14800_v33, 0.0 }
0x2782   :  { %7272 = vadd.xlane.f32.xlu0 %v7271_v39 }
0x27fd   :  { %v7258_v5 = vpop.xlane.xlu1 %7257 }
0x27fe   :  { %14801 = vrcp.f32 %v7258_v5 }
0x27ff   :  { %v7255_v40 = vpop.xlane.xlu0 %7254 }
0x2800   :  { %14803 = vrcp.f32 %v7255_v40 }
0x2801   :  { %v7264_v28 = vpop.xlane.xlu1 %7263 }
0x2802   :  { %14805 = vrcp.f32 %v7264_v28 }
0x2803   :  { %v7261_v22 = vpop.xlane.xlu0 %7260 }
0x2804   :  { %14807 = vrcp.f32 %v7261_v22 }
0x2805   :  { %v7270_v20 = vpop.xlane.xlu1 %7269 }
0x2806   :  { %14809 = vrcp.f32 %v7270_v20 }
0x2807   :  { %v7267_v37 = vpop.xlane.xlu0 %7266 }
0x2808   :  { %14811 = vrcp.f32 %v7267_v37 }
0x2809   :  { %v7276_v19 = vpop.xlane.xlu1 %7275 }
0x280a   :  { %14813 = vrcp.f32 %v7276_v19 }
0x280b   :  { %v7273_v15 = vpop.xlane.xlu0 %7272  ;;  %v14802_v46 = vpop.eup %14801 }
0x280c   :  { %14815 = vrcp.f32 %v7273_v15  ;;  %v7286_v58 = vmul.f32 %v14802_v46, %v14786_v31  ;;  %v12116_v31 = vld [vmem:[%s18592_s7 + $0x528] sm:$0xff] }
0x280d   :  { %v14804_v29 = vpop.eup %14803 }
0x280e   :  { %v7285_v35 = vmul.f32 %v14804_v29, %v14788_v16 }
0x280f   :  { %v14806_v45 = vpop.eup %14805 }
0x2810   :  { %14082 = vmatprep.mubr.msk.f32.mxu0 %vm604_vm2, %v7285_v35  ;;  %v7288_v43 = vmul.f32 %v14806_v45, %v14790_v21 }
0x2811   :  { %v14808_v6 = vpop.eup %14807  ;;  %14083 = vmatmul.mubr.msk.f32.vlgmr.msra.gmra.mxu0 %vm604_vm2, %v7286_v58 }
0x2812   :  { %14095 = vmatpush3.msra.mxu0 %v12091_v1  ;;  %v7287_v60 = vmul.f32 %v14808_v6, %v14792_v36  ;;  %v12188_v1 = vld [vmem:[%s18592_s7 + $0x4c8] sm:$0xff]  ;;  %v12187_v6 = vld [vmem:[%s18592_s7 + $0x4c0] sm:$0xff] }
0x2813   :  { %14096 = vmatprep.subr.mxu0 %v12090_v11  ;;  %v14810_v50 = vpop.eup %14809 }
0x2814   :  { %14085 = vmatprep.mubr.msk.f32.mxu0 %vm604_vm2, %v7287_v60  ;;  %14097 = vmatpush3.msra.mxu0 %v12090_v11  ;;  %v7290_v52 = vmul.f32 %v14810_v50, %v14794_v34  ;;  %v12185_v50 = vld [vmem:[%s18592_s7 + $0x4b0] sm:$0xff] }
0x2815   :  { %v14812_v54 = vpop.eup %14811  ;;  %14086 = vmatmul.mubr.msk.f32.gmra.mxu0 %vm604_vm2, %v7288_v43  ;;  %14098 = vmatprep.subr.mxu0 %v12089_v26 }
0x2816   :  { %v7289_v17 = vmul.f32 %v14812_v54, %v14796_v44  ;;  %14099 = vmatpush3.msra.mxu0 %v12089_v26  ;;  %v12186_v26 = vld [vmem:[%s18592_s7 + $0x4b8] sm:$0xff]  ;;  %v12121_v54 = vld [vmem:[%s18592_s7 + $0x548] ss:$0 sm:$0xff] }
0x2817   :  { %14100 = vmatprep.subr.mxu0 %v12088_v8  ;;  %v14814_v23 = vpop.eup %14813 }
0x2818   :  { %14088 = vmatprep.mubr.msk.f32.mxu0 %vm604_vm2, %v7289_v17  ;;  %14101 = vmatpush3.msra.mxu0 %v12088_v8  ;;  %v7292_v4 = vmul.f32 %v14814_v23, %v14798_v10 }
0x2819   :  { %v14816_v38 = vpop.eup %14815  ;;  %14089 = vmatmul.mubr.msk.f32.gmra.mxu0 %vm604_vm2, %v7290_v52  ;;  %14134 = vmatprep.subr.mxu0 %v12119_v12 }
0x281a   :  { %v7291_v3 = vmul.f32 %v14816_v38, %v14800_v33 }
0x281c   :  { %14091 = vmatprep.mubr.msk.f32.mxu0 %vm604_vm2, %v7291_v3 }
0x281d   :  { %14092 = vmatmul.mubr.msk.f32.gmra.mxu0 %vm604_vm2, %v7292_v4 }
0x281e   :  { %14102 = vmatprep.mubr.msk.f32.mxu0 %vm74_vm0, %v17126_v62 }
0x2821   :  { %14103 = vmatmul.mubr.msk.f32.vlgmr.msra.gmra.mxu0 %vm74_vm0, %v17137_v7 }
0x2822   :  { %14105 = vmatprep.mubr.msk.f32.mxu0 %vm74_vm0, %v17142_v32  ;;  %14135 = vmatpush3.msra.mxu0 %v12119_v12 }
0x2823   :  { %14136 = vmatprep.subr.mxu0 %v12118_v13 }
0x2824   :  { %14137 = vmatpush3.msra.mxu0 %v12118_v13 }
0x2825   :  { %14106 = vmatmul.mubr.msk.f32.gmra.mxu0 %vm74_vm0, %v17160_v55  ;;  %14138 = vmatprep.subr.mxu0 %v12117_v63 }
0x2826   :  { %14108 = vmatprep.mubr.msk.f32.mxu0 %vm74_vm0, %v17170_v9  ;;  %14139 = vmatpush3.msra.mxu0 %v12117_v63 }
0x2827   :  { %14140 = vmatprep.subr.mxu0 %v12116_v31 }
0x2828   :  { %14141 = vmatpush3.msra.mxu0 %v12116_v31 }
0x2829   :  { %14109 = vmatmul.mubr.msk.f32.gmra.mxu0 %vm74_vm0, %v17183_v0 }
0x282a   :  { %14111 = vmatprep.mubr.msk.f32.mxu0 %vm74_vm0, %v17193_v53 }
0x282d   :  { %14112 = vmatmul.mubr.msk.f32.gmra.mxu0 %vm74_vm0, %v17205_v27 }
0x282e   :  { %14142 = vmatprep.mubr.msk.f32.mxu0 %vm74_vm0, %v17126_v62 }
0x2831   :  { %14143 = vmatmul.mubr.msk.f32.vlgmr.msra.gmra.mxu0 %vm74_vm0, %v17137_v7 }
0x2832   :  { %14145 = vmatprep.mubr.msk.f32.mxu0 %vm74_vm0, %v17142_v32 }
0x2835   :  { %14146 = vmatmul.mubr.msk.f32.gmra.mxu0 %vm74_vm0, %v17160_v55 }
0x2836   :  { %14148 = vmatprep.mubr.msk.f32.mxu0 %vm74_vm0, %v17170_v9 }
0x2839   :  { %14149 = vmatmul.mubr.msk.f32.gmra.mxu0 %vm74_vm0, %v17183_v0 }
0x283a   :  { %14151 = vmatprep.mubr.msk.f32.mxu0 %vm74_vm0, %v17193_v53 }
0x283d   :  { %14152 = vmatmul.mubr.msk.f32.gmra.mxu0 %vm74_vm0, %v17205_v27 }
0x28d1   :  { %v14084_v16 = vpop.f32.mrf.mxu0 }
0x28d3   :  { %v7383_v59 = vpop.f32.mrf.mxu0 }
0x28d5   :  { %v14087_v21 = vpop.f32.mrf.mxu0 }
0x28d7   :  { %v7393_v47 = vpop.f32.mrf.mxu0 }
0x28d9   :  { %v14090_v36 = vpop.f32.mrf.mxu0 }
0x28db   :  { %v7403_v25 = vpop.f32.mrf.mxu0 }
0x28dd   :  { %v17501_v34 = vpop.f32.mrf.mxu0 }
0x28df   :  { %v7413_v14 = vpop.f32.mrf.mxu0 }
0x28e1   :  { %v14104_v44 = vpop.f32.mrf.mxu0 }
0x28e2   :  { %v7506_v33 = vadd.f32 %v14104_v44, %v12093_v24 }
0x28e3   :  { %v7500_v10 = vpop.f32.mrf.mxu0 }
0x28e4   :  { %v7501_v42 = vadd.f32 %v12093_v24, %v7500_v10 }
0x28e5   :  { %v14107_v39 = vpop.f32.mrf.mxu0 }
0x28e6   :  { %14170 = vmatprep.mubr.msk.f32.mxu1 %vm434_vm1, %v7501_v42  ;;  %v7516_v28 = vadd.f32 %v14107_v39, %v12093_v24 }
0x28e7   :  { %v7510_v5 = vpop.f32.mrf.mxu0  ;;  %14171 = vmatmul.mubr.msk.f32.vlgmr.msra.gmra.mxu1 %vm434_vm1, %v7506_v33 }
0x28e8   :  { %v7511_v40 = vadd.f32 %v12093_v24, %v7510_v5  ;;  %14225 = vmatpush3.msra.mxu1 %v12087_v57 }
0x28e9   :  { %v14110_v22 = vpop.f32.mrf.mxu0  ;;  %14258 = vmatprep.subr.mxu1 %v12188_v1 }
0x28ea   :  { %14173 = vmatprep.mubr.msk.f32.mxu1 %vm434_vm1, %v7511_v40  ;;  %v7526_v19 = vadd.f32 %v14110_v22, %v12093_v24 }
0x28eb   :  { %v7520_v20 = vpop.f32.mrf.mxu0  ;;  %14174 = vmatmul.mubr.msk.f32.gmra.mxu1 %vm434_vm1, %v7516_v28 }
0x28ec   :  { %v7521_v37 = vadd.f32 %v12093_v24, %v7520_v20 }
0x28ed   :  { %v14113_v15 = vpop.f32.mrf.mxu0 }
0x28ee   :  { %14176 = vmatprep.mubr.msk.f32.mxu1 %vm434_vm1, %v7521_v37  ;;  %v7536_v35 = vadd.f32 %v14113_v15, %v12093_v24 }
0x28ef   :  { %v7530_v46 = vpop.f32.mrf.mxu0  ;;  %14177 = vmatmul.mubr.msk.f32.gmra.mxu1 %vm434_vm1, %v7526_v19 }
0x28f0   :  { %v7531_v29 = vadd.f32 %v12093_v24, %v7530_v46 }
0x28f1   :  { %v14144_v58 = vpop.f32.mrf.mxu0 }
0x28f2   :  { %14179 = vmatprep.mubr.msk.f32.mxu1 %vm434_vm1, %v7531_v29  ;;  %v7736_v63 = vadd.f32 %v14144_v58, %v12121_v54 }
0x28f3   :  { %v7730_v45 = vpop.f32.mrf.mxu0  ;;  %14180 = vmatmul.mubr.msk.f32.gmra.mxu1 %vm434_vm1, %v7536_v35 }
0x28f4   :  { %14226 = vmatprep.mubr.msk.f32.mxu1 %vm434_vm1, %v7383_v59  ;;  %v7731_v31 = vadd.f32 %v12121_v54, %v7730_v45 }
0x28f5   :  { %v14147_v11 = vpop.f32.mrf.mxu0 }
0x28f6   :  { %v7746_v4 = vadd.f32 %v14147_v11, %v12121_v54 }
0x28f7   :  { %v7740_v60 = vpop.f32.mrf.mxu0  ;;  %14227 = vmatmul.mubr.msk.f32.vlgmr.msra.gmra.mxu1 %vm434_vm1, %v14084_v16 }
0x28f8   :  { %14229 = vmatprep.mubr.msk.f32.mxu1 %vm434_vm1, %v7393_v47  ;;  %14259 = vmatpush3.msra.mxu1 %v12188_v1  ;;  %v7741_v13 = vadd.f32 %v12121_v54, %v7740_v60 }
0x28f9   :  { %v14150_v43 = vpop.f32.mrf.mxu0  ;;  %14260 = vmatprep.subr.mxu1 %v12187_v6 }
0x28fa   :  { %14261 = vmatpush3.msra.mxu1 %v12187_v6  ;;  %v7756_v38 = vadd.f32 %v14150_v43, %v12121_v54 }
0x28fb   :  { %v7750_v8 = vpop.f32.mrf.mxu0  ;;  %14230 = vmatmul.mubr.msk.f32.gmra.mxu1 %vm434_vm1, %v14087_v21  ;;  %14262 = vmatprep.subr.mxu1 %v12186_v26 }
0x28fc   :  { %14232 = vmatprep.mubr.msk.f32.mxu1 %vm434_vm1, %v7403_v25  ;;  %14263 = vmatpush3.msra.mxu1 %v12186_v26  ;;  %v7751_v3 = vadd.f32 %v12121_v54, %v7750_v8 }
0x28fd   :  { %v14153_v17 = vpop.f32.mrf.mxu0  ;;  %14264 = vmatprep.subr.mxu1 %v12185_v50 }
0x28fe   :  { %v7766_v12 = vadd.f32 %v14153_v17, %v12121_v54  ;;  %14265 = vmatpush3.msra.mxu1 %v12185_v50 }
0x28ff   :  { %v7760_v52 = vpop.f32.mrf.mxu0  ;;  %14233 = vmatmul.mubr.msk.f32.gmra.mxu1 %vm434_vm1, %v14090_v36 }
0x2900   :  { %v7761_v23 = vadd.f32 %v12121_v54, %v7760_v52  ;;  %14182 = vmatprep.subr.mxu0 %v7766_v12  ;;  %14235 = vmatprep.mubr.msk.f32.mxu1 %vm434_vm1, %v7413_v14 }
0x2901   :  { %14183 = vmatpush3.msra.mxu0 %v7766_v12  ;;  %v12190_v12 = vld [vmem:[%s18592_s7 + $0x4d0] ss:$0 sm:$0xff] }
0x2902   :  { %14184 = vmatprep.subr.mxu0 %v7761_v23 }
0x2903   :  { %14185 = vmatpush3.msra.mxu0 %v7761_v23  ;;  %14236 = vmatmul.mubr.msk.f32.gmra.mxu1 %vm434_vm1, %v17501_v34 }
0x2904   :  { %14186 = vmatprep.subr.mxu0 %v7756_v38  ;;  %14266 = vmatprep.mubr.msk.f32.mxu1 %vm74_vm0, %v17126_v62 }
0x2905   :  { %14187 = vmatpush3.msra.mxu0 %v7756_v38 }
0x2906   :  { %14188 = vmatprep.subr.mxu0 %v7751_v3 }
0x2907   :  { %14189 = vmatpush3.msra.mxu0 %v7751_v3  ;;  %14267 = vmatmul.mubr.msk.f32.vlgmr.msra.gmra.mxu1 %vm74_vm0, %v17137_v7 }
0x2908   :  { %14190 = vmatprep.subr.mxu0 %v7746_v4  ;;  %14269 = vmatprep.mubr.msk.f32.mxu1 %vm74_vm0, %v17142_v32 }
0x2909   :  { %14191 = vmatpush3.msra.mxu0 %v7746_v4 }
0x290a   :  { %14192 = vmatprep.subr.mxu0 %v7741_v13 }
0x290b   :  { %14193 = vmatpush3.msra.mxu0 %v7741_v13  ;;  %14270 = vmatmul.mubr.msk.f32.gmra.mxu1 %vm74_vm0, %v17160_v55 }
0x290c   :  { %14194 = vmatprep.subr.mxu0 %v7736_v63  ;;  %14272 = vmatprep.mubr.msk.f32.mxu1 %vm74_vm0, %v17170_v9 }
0x290d   :  { %14195 = vmatpush3.msra.mxu0 %v7736_v63 }
0x290e   :  { %14196 = vmatprep.subr.mxu0 %v7731_v31 }
0x290f   :  { %14197 = vmatpush3.msra.mxu0 %v7731_v31  ;;  %14273 = vmatmul.mubr.msk.f32.gmra.mxu1 %vm74_vm0, %v17183_v0 }
0x2910   :  { %14275 = vmatprep.mubr.msk.f32.mxu1 %vm74_vm0, %v17193_v53 }
0x2913   :  { %14276 = vmatmul.mubr.msk.f32.gmra.mxu1 %vm74_vm0, %v17205_v27 }
0x29a7   :  { %v14172_v57 = vpop.f32.mrf.mxu1 }
0x29a8   :  { %v7923_v16 = vmul.f32 0.35355338, %v14172_v57 }
0x29a9   :  { %v7883_v59 = vpop.f32.mrf.mxu1 }
0x29aa   :  { %v17555_v21 = vadd.f32 %v17322_v48, %v7923_v16  ;;  %v7922_v47 = vmul.f32 0.35355338, %v7883_v59 }
0x29ab   :  { %v14175_v36 = vpop.f32.mrf.mxu1 }
0x29ac   :  { %v17558_v25 = vadd.f32 %v17330_v41, %v7922_v47  ;;  %v7925_v34 = vmul.f32 0.35355338, %v14175_v36  ;;  %v7941_v14 = vsel %vm604_vm2, %v17555_v21, -inf }
0x29ad   :  { %7942 = vmax.xlane.f32.xlu1 %v7941_v14  ;;  %v7893_v44 = vpop.f32.mrf.mxu1 }
0x29ae   :  { %v17563_v24 = vadd.f32 %v17340_v30, %v7925_v34  ;;  %v7924_v10 = vmul.f32 0.35355338, %v7893_v44  ;;  %v7938_v42 = vsel %vm604_vm2, %v17558_v25, -inf }
0x29af   :  { %7939 = vmax.xlane.f32.xlu0 %v7938_v42  ;;  %v14178_v48 = vpop.f32.mrf.mxu1 }
0x29b0   :  { %v17568_v33 = vadd.f32 %v17350_v51, %v7924_v10  ;;  %v7927_v41 = vmul.f32 0.35355338, %v14178_v48  ;;  %v7947_v39 = vsel %vm604_vm2, %v17563_v24, -inf }
0x29b1   :  { %7948 = vmax.xlane.f32.xlu1 %v7947_v39  ;;  %v7903_v1 = vpop.f32.mrf.mxu1 }
0x29b2   :  { %v17573_v5 = vadd.f32 %v17360_v56, %v7927_v41  ;;  %v7926_v30 = vmul.f32 0.35355338, %v7903_v1  ;;  %v7944_v40 = vsel %vm604_vm2, %v17568_v33, -inf }
0x29b3   :  { %7945 = vmax.xlane.f32.xlu0 %v7944_v40  ;;  %v14181_v28 = vpop.f32.mrf.mxu1 }
0x29b4   :  { %v17578_v22 = vadd.f32 %v17370_v49, %v7926_v30  ;;  %v7929_v51 = vmul.f32 0.35355338, %v14181_v28  ;;  %v7953_v20 = vsel %vm604_vm2, %v17573_v5, -inf }
0x29b5   :  { %7954 = vmax.xlane.f32.xlu1 %v7953_v20  ;;  %v7913_v37 = vpop.f32.mrf.mxu1 }
0x29b6   :  { %v17583_v19 = vadd.f32 %v17380_v61, %v7929_v51  ;;  %v7928_v56 = vmul.f32 0.35355338, %v7913_v37  ;;  %v7950_v15 = vsel %vm604_vm2, %v17578_v22, -inf }
0x29b7   :  { %7951 = vmax.xlane.f32.xlu0 %v7950_v15  ;;  %v17587_v46 = vpop.f32.mrf.mxu1 }
0x29b8   :  { %v17590_v29 = vadd.f32 %v17390_v2, %v7928_v56  ;;  %v7959_v49 = vsel %vm604_vm2, %v17583_v19, -inf }
0x29b9   :  { %7960 = vmax.xlane.f32.xlu1 %v7959_v49  ;;  %v17594_v35 = vpop.f32.mrf.mxu1 }
0x29ba   :  { %v7956_v61 = vsel %vm604_vm2, %v17590_v29, -inf }
0x29bb   :  { %v17598_v58 = vpop.f32.mrf.mxu1  ;;  %7957 = vmax.xlane.f32.xlu0 %v7956_v61 }
0x29bd   :  { %v17600_v45 = vpop.f32.mrf.mxu1 }
0x29bf   :  { %v17602_v11 = vpop.f32.mrf.mxu1 }
0x29c1   :  { %v17604_v6 = vpop.f32.mrf.mxu1 }
0x29c3   :  { %v17606_v2 = vpop.f32.mrf.mxu1 }
0x29c5   :  { %v17608_v60 = vpop.f32.mrf.mxu1 }
0x29c7   :  { %v14268_v26 = vpop.f32.mrf.mxu1 }
0x29c8   :  { %v8612_v57 = vadd.f32 %v14268_v26, %v12190_v12 }
0x29c9   :  { %v8606_v43 = vpop.f32.mrf.mxu1 }
0x29ca   :  { %v8607_v16 = vadd.f32 %v12190_v12, %v8606_v43 }
0x29cb   :  { %v14271_v50 = vpop.f32.mrf.mxu1 }
0x29cc   :  { %v8622_v63 = vadd.f32 %v14271_v50, %v12190_v12 }
0x29cd   :  { %v8616_v8 = vpop.f32.mrf.mxu1 }
0x29ce   :  { %v8617_v31 = vadd.f32 %v12190_v12, %v8616_v8 }
0x29cf   :  { %v14274_v54 = vpop.f32.mrf.mxu1 }
0x29d0   :  { %v8632_v4 = vadd.f32 %v14274_v54, %v12190_v12 }
0x29d1   :  { %v8626_v17 = vpop.f32.mrf.mxu1 }
0x29d2   :  { %v8627_v13 = vadd.f32 %v12190_v12, %v8626_v17 }
0x29d3   :  { %v14277_v52 = vpop.f32.mrf.mxu1 }
0x29d4   :  { %v8642_v23 = vadd.f32 %v14277_v52, %v12190_v12 }
0x29d5   :  { %v8636_v38 = vpop.f32.mrf.mxu1 }
0x29d6   :  { %v8637_v3 = vadd.f32 %v12190_v12, %v8636_v38  ;;  %14298 = vmatprep.subr.msk.mxu1 %vm434_vm1, %v8642_v23 }
0x29d7   :  { %14299 = vmatpush3.xpose.msk.msra.mxu1 %vm434_vm1, %v8642_v23 }
0x29d8   :  { %14300 = vmatprep.subr.msk.mxu1 %vm434_vm1, %v8637_v3 }
0x29db   :  { %14301 = vmatpush3.xpose.msk.msra.mxu1 %vm434_vm1, %v8637_v3  ;;  %v12154_v3 = vld [vmem:[%s18593_s8 + $0x48] sm:$0xff] }
0x29dc   :  { %14302 = vmatprep.subr.msk.mxu1 %vm434_vm1, %v8632_v4  ;;  %14210 = vmatprep.subr.mxu0 %v12154_v3 }
0x29df   :  { %14303 = vmatpush3.xpose.msk.msra.mxu1 %vm434_vm1, %v8632_v4 }
0x29e0   :  { %14304 = vmatprep.subr.msk.mxu1 %vm434_vm1, %v8627_v13 }
0x29e3   :  { %14305 = vmatpush3.xpose.msk.msra.mxu1 %vm434_vm1, %v8627_v13 }
0x29e4   :  { %14306 = vmatprep.subr.msk.mxu1 %vm434_vm1, %v8622_v63 }
0x29e7   :  { %14307 = vmatpush3.xpose.msk.msra.mxu1 %vm434_vm1, %v8622_v63 }
0x29e8   :  { %14308 = vmatprep.subr.msk.mxu1 %vm434_vm1, %v8617_v31 }
0x29eb   :  { %14309 = vmatpush3.xpose.msk.msra.mxu1 %vm434_vm1, %v8617_v31 }
0x29ec   :  { %14310 = vmatprep.subr.msk.mxu1 %vm434_vm1, %v8612_v57 }
0x29ef   :  { %14311 = vmatpush3.xpose.msk.msra.mxu1 %vm434_vm1, %v8612_v57 }
0x29f0   :  { %14312 = vmatprep.subr.msk.mxu1 %vm434_vm1, %v8607_v16 }
0x29f3   :  { %14313 = vmatpush3.xpose.msk.msra.mxu1 %vm434_vm1, %v8607_v16 }
0x2a36   :  { %v7943_v59 = vpop.xlane.xlu1 %7942 }
0x2a37   :  { %v7963_v47 = vsub.f32 %v17555_v21, %v7943_v59 }
0x2a38   :  { %v7940_v36 = vpop.xlane.xlu0 %7939 }
0x2a39   :  { %v7972_v34 = vmul.f32 1.442695, %v7963_v47  ;;  %v7962_v14 = vsub.f32 %v17558_v25, %v7940_v36 }
0x2a3a   :  { %v7949_v44 = vpop.xlane.xlu1 %7948 }
0x2a3b   :  { %14817 = vpow2.f32 %v7972_v34  ;;  %v7970_v10 = vmul.f32 1.442695, %v7962_v14  ;;  %v7965_v42 = vsub.f32 %v17563_v24, %v7949_v44 }
0x2a3c   :  { %v7946_v48 = vpop.xlane.xlu0 %7945 }
0x2a3d   :  { %14819 = vpow2.f32 %v7970_v10  ;;  %v7976_v41 = vmul.f32 1.442695, %v7965_v42  ;;  %v7964_v39 = vsub.f32 %v17568_v33, %v7946_v48 }
0x2a3e   :  { %v7955_v1 = vpop.xlane.xlu1 %7954 }
0x2a3f   :  { %14821 = vpow2.f32 %v7976_v41  ;;  %v7974_v30 = vmul.f32 1.442695, %v7964_v39  ;;  %v7967_v40 = vsub.f32 %v17573_v5, %v7955_v1 }
0x2a40   :  { %v7952_v21 = vpop.xlane.xlu0 %7951 }
0x2a41   :  { %14823 = vpow2.f32 %v7974_v30  ;;  %v7980_v28 = vmul.f32 1.442695, %v7967_v40  ;;  %v7966_v25 = vsub.f32 %v17578_v22, %v7952_v21 }
0x2a42   :  { %v7961_v51 = vpop.xlane.xlu1 %7960 }
0x2a43   :  { %14825 = vpow2.f32 %v7980_v28  ;;  %v7978_v20 = vmul.f32 1.442695, %v7966_v25  ;;  %v7969_v24 = vsub.f32 %v17583_v19, %v7961_v51 }
0x2a44   :  { %v7958_v37 = vpop.xlane.xlu0 %7957 }
0x2a45   :  { %14827 = vpow2.f32 %v7978_v20  ;;  %v7984_v56 = vmul.f32 1.442695, %v7969_v24  ;;  %v7968_v33 = vsub.f32 %v17590_v29, %v7958_v37  ;;  %v12174_v20 = vld [vmem:[%s18592_s7 + $0x428] sm:$0xff] }
0x2a47   :  { %14829 = vpow2.f32 %v7984_v56  ;;  %v7982_v15 = vmul.f32 1.442695, %v7968_v33  ;;  %v12173_v56 = vld [vmem:[%s18592_s7 + $0x420] sm:$0xff] }
0x2a48   :  { %v14818_v49 = vpop.eup %14817 }
0x2a49   :  { %14831 = vpow2.f32 %v7982_v15  ;;  %v7989_v5 = vsel %vm604_vm2, %v14818_v49, 0.0  ;;  %v12172_v15 = vld [vmem:[%s18592_s7 + $0x418] sm:$0xff] }
0x2a4a   :  { %v14820_v61 = vpop.eup %14819  ;;  %7990 = vadd.xlane.f32.xlu1 %v7989_v5  ;;  %v12171_v5 = vld [vmem:[%s18592_s7 + $0x410] sm:$0xff] }
0x2a4b   :  { %v7986_v22 = vsel %vm604_vm2, %v14820_v61, 0.0 }
0x2a4c   :  { %v14822_v26 = vpop.eup %14821  ;;  %7987 = vadd.xlane.f32.xlu0 %v7986_v22  ;;  %v12202_v22 = vld [vmem:[%s18592_s7 + $0x568] sm:$0xff] }
0x2a4d   :  { %v7995_v43 = vsel %vm604_vm2, %v14822_v26, 0.0 }
0x2a4e   :  { %v14824_v19 = vpop.eup %14823  ;;  %7996 = vadd.xlane.f32.xlu1 %v7995_v43 }
0x2a4f   :  { %v7992_v50 = vsel %vm604_vm2, %v14824_v19, 0.0 }
0x2a50   :  { %v14826_v8 = vpop.eup %14825  ;;  %7993 = vadd.xlane.f32.xlu0 %v7992_v50  ;;  %v12201_v50 = vld [vmem:[%s18592_s7 + $0x560] sm:$0xff] }
0x2a51   :  { %v8001_v29 = vsel %vm604_vm2, %v14826_v8, 0.0 }
0x2a52   :  { %v14828_v54 = vpop.eup %14827  ;;  %8002 = vadd.xlane.f32.xlu1 %v8001_v29  ;;  %v12199_v29 = vld [vmem:[%s18592_s7 + $0x550] sm:$0xff] }
0x2a53   :  { %v7998_v17 = vsel %vm604_vm2, %v14828_v54, 0.0 }
0x2a54   :  { %v14830_v12 = vpop.eup %14829  ;;  %7999 = vadd.xlane.f32.xlu0 %v7998_v17 }
0x2a55   :  { %v8007_v52 = vsel %vm604_vm2, %v14830_v12, 0.0 }
0x2a56   :  { %v14832_v23 = vpop.eup %14831  ;;  %8008 = vadd.xlane.f32.xlu1 %v8007_v52 }
0x2a57   :  { %v8004_v38 = vsel %vm604_vm2, %v14832_v23, 0.0 }
0x2a58   :  { %8005 = vadd.xlane.f32.xlu0 %v8004_v38 }
0x2ad3   :  { %v7991_v4 = vpop.xlane.xlu1 %7990 }
0x2ad4   :  { %14833 = vrcp.f32 %v7991_v4 }
0x2ad5   :  { %v7988_v13 = vpop.xlane.xlu0 %7987 }
0x2ad6   :  { %14835 = vrcp.f32 %v7988_v13 }
0x2ad7   :  { %v7997_v63 = vpop.xlane.xlu1 %7996 }
0x2ad8   :  { %14837 = vrcp.f32 %v7997_v63 }
0x2ad9   :  { %v7994_v31 = vpop.xlane.xlu0 %7993 }
0x2ada   :  { %14839 = vrcp.f32 %v7994_v31  ;;  %v12176_v31 = vld [vmem:[%s18592_s7 + $0x430] ss:$0 sm:$0xff] }
0x2adb   :  { %v8003_v57 = vpop.xlane.xlu1 %8002 }
0x2adc   :  { %14841 = vrcp.f32 %v8003_v57 }
0x2add   :  { %v8000_v16 = vpop.xlane.xlu0 %7999 }
0x2ade   :  { %14843 = vrcp.f32 %v8000_v16 }
0x2adf   :  { %v8009_v59 = vpop.xlane.xlu1 %8008 }
0x2ae0   :  { %14845 = vrcp.f32 %v8009_v59 }
0x2ae1   :  { %v8006_v47 = vpop.xlane.xlu0 %8005  ;;  %v14834_v36 = vpop.eup %14833 }
0x2ae2   :  { %14847 = vrcp.f32 %v8006_v47  ;;  %v8019_v44 = vmul.f32 %v14834_v36, %v14818_v49  ;;  %v12248_v36 = vld [vmem:[%s18592_s7 + $0x448] sm:$0xff] }
0x2ae3   :  { %v14836_v34 = vpop.eup %14835 }
0x2ae4   :  { %v8018_v14 = vmul.f32 %v14836_v34, %v14820_v61 }
0x2ae5   :  { %v14838_v10 = vpop.eup %14837 }
0x2ae6   :  { %14198 = vmatprep.mubr.msk.f32.mxu0 %vm604_vm2, %v8018_v14  ;;  %v8021_v41 = vmul.f32 %v14838_v10, %v14822_v26 }
0x2ae7   :  { %v14840_v42 = vpop.eup %14839  ;;  %14199 = vmatmul.mubr.msk.f32.vlgmr.msra.gmra.mxu0 %vm604_vm2, %v8019_v44  ;;  %v12247_v44 = vld [vmem:[%s18592_s7 + $0x440] sm:$0xff] }
0x2ae8   :  { %v8020_v48 = vmul.f32 %v14840_v42, %v14824_v19  ;;  %14211 = vmatpush3.msra.mxu0 %v12154_v3 }
0x2ae9   :  { %v14842_v39 = vpop.eup %14841  ;;  %14238 = vmatprep.subr.mxu0 %v12174_v20 }
0x2aea   :  { %14201 = vmatprep.mubr.msk.f32.mxu0 %vm604_vm2, %v8020_v48  ;;  %v8023_v40 = vmul.f32 %v14842_v39, %v14826_v8  ;;  %v12200_v8 = vld [vmem:[%s18592_s7 + $0x558] sm:$0xff] }
0x2aeb   :  { %v14844_v1 = vpop.eup %14843  ;;  %14202 = vmatmul.mubr.msk.f32.gmra.mxu0 %vm604_vm2, %v8021_v41  ;;  %v12246_v48 = vld [vmem:[%s18592_s7 + $0x438] sm:$0xff] }
0x2aec   :  { %v8022_v30 = vmul.f32 %v14844_v1, %v14828_v54  ;;  %v12249_v54 = vld [vmem:[%s18592_s7 + $0x450] sm:$0xff] }
0x2aed   :  { %v14846_v21 = vpop.eup %14845  ;;  %14368 = vmatprep.subr.mxu1 %v12249_v54  ;;  %v12277_v1 = vld [vmem:[%s18592_s7 + $0x590] sm:$0xff] }
0x2aee   :  { %14204 = vmatprep.mubr.msk.f32.mxu0 %vm604_vm2, %v8022_v30  ;;  %v8025_v51 = vmul.f32 %v14846_v21, %v14830_v12 }
0x2aef   :  { %v14848_v28 = vpop.eup %14847  ;;  %14205 = vmatmul.mubr.msk.f32.gmra.mxu0 %vm604_vm2, %v8023_v40 }
0x2af0   :  { %v8024_v25 = vmul.f32 %v14848_v28, %v14832_v23 }
0x2af2   :  { %14207 = vmatprep.mubr.msk.f32.mxu0 %vm604_vm2, %v8024_v25 }
0x2af3   :  { %14208 = vmatmul.mubr.msk.f32.gmra.mxu0 %vm604_vm2, %v8025_v51 }
0x2ba7   :  { %v14200_v24 = vpop.f32.mrf.mxu0 }
0x2ba9   :  { %v8116_v37 = vpop.f32.mrf.mxu0 }
0x2baa   :  { %14212 = vmatprep.mubr.msk.f32.mxu0 %vm434_vm1, %v8116_v37  ;;  %v12276_v37 = vld [vmem:[%s18592_s7 + $0x588] sm:$0xff] }
0x2bab   :  { %v14203_v33 = vpop.f32.mrf.mxu0  ;;  %14213 = vmatmul.mubr.msk.f32.vlgmr.msra.gmra.mxu0 %vm434_vm1, %v14200_v24 }
0x2bac   :  { %14239 = vmatpush3.msra.mxu0 %v12174_v20 }
0x2bad   :  { %v8126_v49 = vpop.f32.mrf.mxu0  ;;  %14240 = vmatprep.subr.mxu0 %v12173_v56 }
0x2bae   :  { %14215 = vmatprep.mubr.msk.f32.mxu0 %vm434_vm1, %v8126_v49  ;;  %14241 = vmatpush3.msra.mxu0 %v12173_v56  ;;  %v12274_v49 = vld [vmem:[%s18592_s7 + $0x578] sm:$0xff] }
0x2baf   :  { %v14206_v61 = vpop.f32.mrf.mxu0  ;;  %14216 = vmatmul.mubr.msk.f32.gmra.mxu0 %vm434_vm1, %v14203_v33  ;;  %14242 = vmatprep.subr.mxu0 %v12172_v15  ;;  %v12275_v33 = vld [vmem:[%s18592_s7 + $0x580] sm:$0xff] }
0x2bb0   :  { %14243 = vmatpush3.msra.mxu0 %v12172_v15 }
0x2bb1   :  { %v8136_v26 = vpop.f32.mrf.mxu0  ;;  %14244 = vmatprep.subr.mxu0 %v12171_v5 }
0x2bb2   :  { %14218 = vmatprep.mubr.msk.f32.mxu0 %vm434_vm1, %v8136_v26  ;;  %14245 = vmatpush3.msra.mxu0 %v12171_v5 }
0x2bb3   :  { %v14209_v43 = vpop.f32.mrf.mxu0  ;;  %14219 = vmatmul.mubr.msk.f32.gmra.mxu0 %vm434_vm1, %v14206_v61  ;;  %14278 = vmatprep.subr.mxu0 %v12202_v22  ;;  %v12204_v61 = vld [vmem:[%s18592_s7 + $0x570] ss:$0 sm:$0xff] }
0x2bb5   :  { %v8146_v19 = vpop.f32.mrf.mxu0 }
0x2bb6   :  { %14221 = vmatprep.mubr.msk.f32.mxu0 %vm434_vm1, %v8146_v19 }
0x2bb7   :  { %14222 = vmatmul.mubr.msk.f32.gmra.mxu0 %vm434_vm1, %v14209_v43 }
0x2bb8   :  { %14246 = vmatprep.mubr.msk.f32.mxu0 %vm74_vm0, %v17126_v62 }
0x2bbb   :  { %14247 = vmatmul.mubr.msk.f32.vlgmr.msra.gmra.mxu0 %vm74_vm0, %v17137_v7 }
0x2bbc   :  { %14249 = vmatprep.mubr.msk.f32.mxu0 %vm74_vm0, %v17142_v32  ;;  %14279 = vmatpush3.msra.mxu0 %v12202_v22 }
0x2bbd   :  { %14280 = vmatprep.subr.mxu0 %v12201_v50 }
0x2bbe   :  { %14281 = vmatpush3.msra.mxu0 %v12201_v50 }
0x2bbf   :  { %14250 = vmatmul.mubr.msk.f32.gmra.mxu0 %vm74_vm0, %v17160_v55  ;;  %14282 = vmatprep.subr.mxu0 %v12200_v8 }
0x2bc0   :  { %14252 = vmatprep.mubr.msk.f32.mxu0 %vm74_vm0, %v17170_v9  ;;  %14283 = vmatpush3.msra.mxu0 %v12200_v8 }
0x2bc1   :  { %14284 = vmatprep.subr.mxu0 %v12199_v29 }
0x2bc2   :  { %14285 = vmatpush3.msra.mxu0 %v12199_v29 }
0x2bc3   :  { %14253 = vmatmul.mubr.msk.f32.gmra.mxu0 %vm74_vm0, %v17183_v0 }
0x2bc4   :  { %14255 = vmatprep.mubr.msk.f32.mxu0 %vm74_vm0, %v17193_v53 }
0x2bc7   :  { %14256 = vmatmul.mubr.msk.f32.gmra.mxu0 %vm74_vm0, %v17205_v27 }
0x2bc8   :  { %14286 = vmatprep.mubr.msk.f32.mxu0 %vm74_vm0, %v17126_v62 }
0x2bcb   :  { %14287 = vmatmul.mubr.msk.f32.vlgmr.msra.gmra.mxu0 %vm74_vm0, %v17137_v7 }
0x2bcc   :  { %14289 = vmatprep.mubr.msk.f32.mxu0 %vm74_vm0, %v17142_v32 }
0x2bcf   :  { %14290 = vmatmul.mubr.msk.f32.gmra.mxu0 %vm74_vm0, %v17160_v55 }
0x2bd0   :  { %14292 = vmatprep.mubr.msk.f32.mxu0 %vm74_vm0, %v17170_v9 }
0x2bd3   :  { %14293 = vmatmul.mubr.msk.f32.gmra.mxu0 %vm74_vm0, %v17183_v0 }
0x2bd4   :  { %14295 = vmatprep.mubr.msk.f32.mxu0 %vm74_vm0, %v17193_v53 }
0x2bd7   :  { %14296 = vmatmul.mubr.msk.f32.gmra.mxu0 %vm74_vm0, %v17205_v27 }
0x2c6b   :  { %v17723_v17 = vpop.f32.mrf.mxu0 }
0x2c6d   :  { %v17725_v12 = vpop.f32.mrf.mxu0 }
0x2c6f   :  { %v17727_v52 = vpop.f32.mrf.mxu0 }
0x2c71   :  { %v17729_v23 = vpop.f32.mrf.mxu0 }
0x2c73   :  { %v17731_v38 = vpop.f32.mrf.mxu0 }
0x2c75   :  { %v17733_v3 = vpop.f32.mrf.mxu0 }
0x2c77   :  { %v17735_v4 = vpop.f32.mrf.mxu0 }
0x2c79   :  { %v17737_v13 = vpop.f32.mrf.mxu0 }
0x2c7b   :  { %v14248_v63 = vpop.f32.mrf.mxu0 }
0x2c7c   :  { %v8497_v59 = vadd.f32 %v14248_v63, %v12176_v31 }
0x2c7d   :  { %v8491_v57 = vpop.f32.mrf.mxu0 }
0x2c7e   :  { %v8492_v16 = vadd.f32 %v12176_v31, %v8491_v57 }
0x2c7f   :  { %v14251_v47 = vpop.f32.mrf.mxu0 }
0x2c80   :  { %14314 = vmatprep.mubr.msk.f32.mxu1 %vm434_vm1, %v8492_v16  ;;  %v8507_v10 = vadd.f32 %v14251_v47, %v12176_v31  ;;  %v17809_v47 = vld [vmem:[%s18586_s1 + $0x8] sm:$0xff] }
0x2c81   :  { %v8501_v34 = vpop.f32.mrf.mxu0  ;;  %14315 = vmatmul.mubr.msk.f32.vlgmr.msra.gmra.mxu1 %vm434_vm1, %v8497_v59 }
0x2c82   :  { %v8502_v14 = vadd.f32 %v12176_v31, %v8501_v34  ;;  %14369 = vmatpush3.msra.mxu1 %v12249_v54 }
0x2c83   :  { %v14254_v42 = vpop.f32.mrf.mxu0  ;;  %14370 = vmatprep.subr.mxu1 %v12248_v36 }
0x2c84   :  { %14317 = vmatprep.mubr.msk.f32.mxu1 %vm434_vm1, %v8502_v14  ;;  %14371 = vmatpush3.msra.mxu1 %v12248_v36  ;;  %v8517_v30 = vadd.f32 %v14254_v42, %v12176_v31 }
0x2c85   :  { %v8511_v41 = vpop.f32.mrf.mxu0  ;;  %14318 = vmatmul.mubr.msk.f32.gmra.mxu1 %vm434_vm1, %v8507_v10  ;;  %14372 = vmatprep.subr.mxu1 %v12247_v44 }
0x2c86   :  { %v8512_v39 = vadd.f32 %v12176_v31, %v8511_v41  ;;  %14373 = vmatpush3.msra.mxu1 %v12247_v44  ;;  %v17817_v44 = vld [vmem:[%s18586_s1] sm:$0xff] }
0x2c87   :  { %v14257_v40 = vpop.f32.mrf.mxu0  ;;  %14374 = vmatprep.subr.mxu1 %v12246_v48 }
0x2c88   :  { %14320 = vmatprep.mubr.msk.f32.mxu1 %vm434_vm1, %v8512_v39  ;;  %14375 = vmatpush3.msra.mxu1 %v12246_v48  ;;  %v8527_v25 = vadd.f32 %v14257_v40, %v12176_v31  ;;  %v17827_v39 = vld [vmem:[%s18586_s1 + $0x18] sm:$0xff] }
0x2c89   :  { %v8521_v21 = vpop.f32.mrf.mxu0  ;;  %14321 = vmatmul.mubr.msk.f32.gmra.mxu1 %vm434_vm1, %v8517_v30  ;;  %14408 = vmatprep.subr.mxu1 %v12277_v1 }
0x2c8a   :  { %v8522_v28 = vadd.f32 %v12176_v31, %v8521_v21 }
0x2c8b   :  { %v14288_v51 = vpop.f32.mrf.mxu0 }
0x2c8c   :  { %14323 = vmatprep.mubr.msk.f32.mxu1 %vm434_vm1, %v8522_v28  ;;  %v8727_v63 = vadd.f32 %v14288_v51, %v12204_v61  ;;  %v17837_v28 = vld [vmem:[%s18586_s1 + $0x10] sm:$0xff] }
0x2c8d   :  { %v8721_v20 = vpop.f32.mrf.mxu0  ;;  %14324 = vmatmul.mubr.msk.f32.gmra.mxu1 %vm434_vm1, %v8527_v25 }
0x2c8e   :  { %14376 = vmatprep.mubr.msk.f32.mxu1 %vm74_vm0, %v17126_v62  ;;  %v8722_v31 = vadd.f32 %v12204_v61, %v8721_v20 }
0x2c8f   :  { %v14291_v24 = vpop.f32.mrf.mxu0 }
0x2c90   :  { %v8737_v29 = vadd.f32 %v14291_v24, %v12204_v61 }
0x2c91   :  { %v8731_v56 = vpop.f32.mrf.mxu0  ;;  %14377 = vmatmul.mubr.msk.f32.vlgmr.msra.gmra.mxu1 %vm74_vm0, %v17137_v7 }
0x2c92   :  { %14379 = vmatprep.mubr.msk.f32.mxu1 %vm74_vm0, %v17142_v32  ;;  %14409 = vmatpush3.msra.mxu1 %v12277_v1  ;;  %v8732_v54 = vadd.f32 %v12204_v61, %v8731_v56 }
0x2c93   :  { %v14294_v15 = vpop.f32.mrf.mxu0  ;;  %14410 = vmatprep.subr.mxu1 %v12276_v37 }
0x2c94   :  { %14411 = vmatpush3.msra.mxu1 %v12276_v37  ;;  %v8747_v50 = vadd.f32 %v14294_v15, %v12204_v61  ;;  %v17847_v37 = vld [vmem:[%s18586_s1 + $0x28] sm:$0xff] }
0x2c95   :  { %v8741_v5 = vpop.f32.mrf.mxu0  ;;  %14380 = vmatmul.mubr.msk.f32.gmra.mxu1 %vm74_vm0, %v17160_v55  ;;  %14412 = vmatprep.subr.mxu1 %v12275_v33 }
0x2c96   :  { %14382 = vmatprep.mubr.msk.f32.mxu1 %vm74_vm0, %v17170_v9  ;;  %14413 = vmatpush3.msra.mxu1 %v12275_v33  ;;  %v8742_v8 = vadd.f32 %v12204_v61, %v8741_v5  ;;  %v17857_v5 = vld [vmem:[%s18586_s1 + $0x20] sm:$0xff] }
0x2c97   :  { %v14297_v22 = vpop.f32.mrf.mxu0  ;;  %14414 = vmatprep.subr.mxu1 %v12274_v49 }
0x2c98   :  { %v8757_v26 = vadd.f32 %v14297_v22, %v12204_v61  ;;  %14415 = vmatpush3.msra.mxu1 %v12274_v49 }
0x2c99   :  { %v8751_v43 = vpop.f32.mrf.mxu0  ;;  %14383 = vmatmul.mubr.msk.f32.gmra.mxu1 %vm74_vm0, %v17183_v0 }
0x2c9a   :  { %v8752_v19 = vadd.f32 %v12204_v61, %v8751_v43  ;;  %14326 = vmatprep.subr.mxu0 %v8757_v26  ;;  %14385 = vmatprep.mubr.msk.f32.mxu1 %vm74_vm0, %v17193_v53 }
0x2c9b   :  { %14327 = vmatpush3.msra.mxu0 %v8757_v26 }
0x2c9c   :  { %14328 = vmatprep.subr.mxu0 %v8752_v19 }
0x2c9d   :  { %14329 = vmatpush3.msra.mxu0 %v8752_v19  ;;  %14386 = vmatmul.mubr.msk.f32.gmra.mxu1 %vm74_vm0, %v17205_v27  ;;  %v17867_v19 = vld [vmem:[%s18592_s7 + $0x458] ss:$0 sm:$0xff] }
0x2c9e   :  { %14330 = vmatprep.subr.mxu0 %v8747_v50  ;;  %14416 = vmatprep.mubr.msk.f32.mxu1 %vm74_vm0, %v17126_v62 }
0x2c9f   :  { %14331 = vmatpush3.msra.mxu0 %v8747_v50  ;;  %v17872_v50 = vld [vmem:[%s18586_s1 + $0x38] sm:$0xff] }
0x2ca0   :  { %14332 = vmatprep.subr.mxu0 %v8742_v8 }
0x2ca1   :  { %14333 = vmatpush3.msra.mxu0 %v8742_v8  ;;  %14417 = vmatmul.mubr.msk.f32.vlgmr.msra.gmra.mxu1 %vm74_vm0, %v17137_v7 }
0x2ca2   :  { %14334 = vmatprep.subr.mxu0 %v8737_v29  ;;  %14419 = vmatprep.mubr.msk.f32.mxu1 %vm74_vm0, %v17142_v32 }
0x2ca3   :  { %14335 = vmatpush3.msra.mxu0 %v8737_v29 }
0x2ca4   :  { %14336 = vmatprep.subr.mxu0 %v8732_v54 }
0x2ca5   :  { %14337 = vmatpush3.msra.mxu0 %v8732_v54  ;;  %14420 = vmatmul.mubr.msk.f32.gmra.mxu1 %vm74_vm0, %v17160_v55 }
0x2ca6   :  { %14338 = vmatprep.subr.mxu0 %v8727_v63  ;;  %14422 = vmatprep.mubr.msk.f32.mxu1 %vm74_vm0, %v17170_v9 }
0x2ca7   :  { %14339 = vmatpush3.msra.mxu0 %v8727_v63 }
0x2ca8   :  { %14340 = vmatprep.subr.mxu0 %v8722_v31 }
0x2ca9   :  { %14341 = vmatpush3.msra.mxu0 %v8722_v31  ;;  %14423 = vmatmul.mubr.msk.f32.gmra.mxu1 %vm74_vm0, %v17183_v0  ;;  %v17882_v31 = vld [vmem:[%s18586_s1 + $0x30] sm:$0xff] }
0x2caa   :  { %14425 = vmatprep.mubr.msk.f32.mxu1 %vm74_vm0, %v17193_v53  ;;  %18603 = vst [vmem:[#allocation5_spill] sm:$0xff] %v17882_v31 }
0x2cad   :  { %14426 = vmatmul.mubr.msk.f32.gmra.mxu1 %vm74_vm0, %v17205_v27 }
0x2d41   :  { %v14316_v57 = vpop.f32.mrf.mxu1 }
0x2d42   :  { %v8914_v16 = vmul.f32 0.35355338, %v14316_v57 }
0x2d43   :  { %v8874_v59 = vpop.f32.mrf.mxu1 }
0x2d44   :  { %v17812_v36 = vadd.f32 %v17809_v47, %v8914_v16  ;;  %v8913_v34 = vmul.f32 0.35355338, %v8874_v59 }
0x2d45   :  { %v14319_v14 = vpop.f32.mrf.mxu1 }
0x2d46   :  { %v17820_v10 = vadd.f32 %v17817_v44, %v8913_v34  ;;  %v8916_v42 = vmul.f32 0.35355338, %v14319_v14  ;;  %v8932_v48 = vsel %vm604_vm2, %v17812_v36, -inf }
0x2d47   :  { %8933 = vmax.xlane.f32.xlu1 %v8932_v48  ;;  %v8884_v41 = vpop.f32.mrf.mxu1 }
0x2d48   :  { %v17830_v1 = vadd.f32 %v17827_v39, %v8916_v42  ;;  %v8915_v30 = vmul.f32 0.35355338, %v8884_v41  ;;  %v8929_v40 = vsel %vm604_vm2, %v17820_v10, -inf }
0x2d49   :  { %8930 = vmax.xlane.f32.xlu0 %v8929_v40  ;;  %v14322_v21 = vpop.f32.mrf.mxu1 }
0x2d4a   :  { %v17840_v25 = vadd.f32 %v17837_v28, %v8915_v30  ;;  %v8918_v51 = vmul.f32 0.35355338, %v14322_v21  ;;  %v8938_v20 = vsel %vm604_vm2, %v17830_v1, -inf }
0x2d4b   :  { %8939 = vmax.xlane.f32.xlu1 %v8938_v20  ;;  %v8894_v24 = vpop.f32.mrf.mxu1 }
0x2d4c   :  { %v17850_v56 = vadd.f32 %v17847_v37, %v8918_v51  ;;  %v8917_v33 = vmul.f32 0.35355338, %v8894_v24  ;;  %v8935_v15 = vsel %vm604_vm2, %v17840_v25, -inf }
0x2d4d   :  { %8936 = vmax.xlane.f32.xlu0 %v8935_v15  ;;  %v14325_v49 = vpop.f32.mrf.mxu1 }
0x2d4e   :  { %v17860_v61 = vadd.f32 %v17857_v5, %v8917_v33  ;;  %v8920_v22 = vmul.f32 0.35355338, %v14325_v49  ;;  %v8944_v26 = vsel %vm604_vm2, %v17850_v56, -inf }
0x2d4f   :  { %8945 = vmax.xlane.f32.xlu1 %v8944_v26  ;;  %v8904_v43 = vpop.f32.mrf.mxu1 }
0x2d50   :  { %v17875_v8 = vadd.f32 %v17872_v50, %v8920_v22  ;;  %v8919_v29 = vmul.f32 0.35355338, %v8904_v43  ;;  %v8941_v54 = vsel %vm604_vm2, %v17860_v61, -inf }
0x2d51   :  { %8942 = vmax.xlane.f32.xlu0 %v8941_v54  ;;  %v14378_v63 = vpop.f32.mrf.mxu1 }
0x2d52   :  { %v17885_v57 = vadd.f32 %v17882_v31, %v8919_v29  ;;  %v17888_v16 = vadd.f32 %v14378_v63, %v17867_v19  ;;  %v8950_v59 = vsel %vm604_vm2, %v17875_v8, -inf }
0x2d53   :  { %8951 = vmax.xlane.f32.xlu1 %v8950_v59  ;;  %v17892_v34 = vpop.f32.mrf.mxu1  ;;  %v12279_v59 = vld [vmem:[%s18592_s7 + $0x598] ss:$0 sm:$0xff] }
0x2d54   :  { %v8947_v14 = vsel %vm604_vm2, %v17885_v57, -inf }
0x2d55   :  { %v14381_v42 = vpop.f32.mrf.mxu1  ;;  %8948 = vmax.xlane.f32.xlu0 %v8947_v14 }
0x2d56   :  { %v17897_v48 = vadd.f32 %v14381_v42, %v17867_v19 }
0x2d57   :  { %v9371_v41 = vpop.f32.mrf.mxu1 }
0x2d58   :  { %v17900_v30 = vadd.f32 %v17867_v19, %v9371_v41 }
0x2d59   :  { %v14384_v40 = vpop.f32.mrf.mxu1 }
0x2d5a   :  { %v17903_v21 = vadd.f32 %v14384_v40, %v17867_v19 }
0x2d5b   :  { %v9381_v51 = vpop.f32.mrf.mxu1 }
0x2d5c   :  { %v17906_v20 = vadd.f32 %v17867_v19, %v9381_v51 }
0x2d5d   :  { %v14387_v24 = vpop.f32.mrf.mxu1 }
0x2d5e   :  { %v17909_v33 = vadd.f32 %v14387_v24, %v17867_v19 }
0x2d5f   :  { %v9391_v15 = vpop.f32.mrf.mxu1 }
0x2d60   :  { %v17912_v49 = vadd.f32 %v17867_v19, %v9391_v15 }
0x2d61   :  { %v14418_v22 = vpop.f32.mrf.mxu1 }
0x2d62   :  { %v9597_v31 = vadd.f32 %v14418_v22, %v12279_v59 }
0x2d63   :  { %v9591_v26 = vpop.f32.mrf.mxu1 }
0x2d65   :  { %v14421_v43 = vpop.f32.mrf.mxu1 }
0x2d66   :  { %v9607_v15 = vadd.f32 %v14421_v43, %v12279_v59 }
0x2d67   :  { %v9601_v29 = vpop.f32.mrf.mxu1 }
0x2d68   :  { %v9602_v18 = vadd.f32 %v12279_v59, %v9601_v29 }
0x2d69   :  { %v14424_v54 = vpop.f32.mrf.mxu1 }
0x2d6a   :  { %v9617_v51 = vadd.f32 %v14424_v54, %v12279_v59 }
0x2d6b   :  { %v9611_v63 = vpop.f32.mrf.mxu1 }
0x2d6c   :  { %v9612_v24 = vadd.f32 %v12279_v59, %v9611_v63 }
0x2d6d   :  { %v14427_v14 = vpop.f32.mrf.mxu1 }
0x2d6e   :  { %v9627_v42 = vadd.f32 %v14427_v14, %v12279_v59  ;;  %v9592_v14 = vadd.f32 %v12279_v59, %v9591_v26 }
0x2d6f   :  { %v9621_v41 = vpop.f32.mrf.mxu1 }
0x2d70   :  { %v9622_v40 = vadd.f32 %v12279_v59, %v9621_v41  ;;  %14456 = vmatprep.subr.mxu1 %v9627_v42 }
0x2d71   :  { %14457 = vmatpush3.msra.mxu1 %v9627_v42 }
0x2d72   :  { %14458 = vmatprep.subr.mxu1 %v9622_v40 }
0x2d73   :  { %14459 = vmatpush3.msra.mxu1 %v9622_v40 }
0x2d74   :  { %14460 = vmatprep.subr.mxu1 %v9617_v51 }
0x2d75   :  { %14461 = vmatpush3.msra.mxu1 %v9617_v51 }
0x2d76   :  { %14462 = vmatprep.subr.mxu1 %v9612_v24 }
0x2d77   :  { %14463 = vmatpush3.msra.mxu1 %v9612_v24 }
0x2d78   :  { %14464 = vmatprep.subr.mxu1 %v9607_v15 }
0x2d79   :  { %14465 = vmatpush3.msra.mxu1 %v9607_v15 }
0x2d7a   :  { %14466 = vmatprep.subr.mxu1 %v9602_v18 }
0x2d7b   :  { %14467 = vmatpush3.msra.mxu1 %v9602_v18 }
0x2d7c   :  { %14468 = vmatprep.subr.mxu1 %v9597_v31 }
0x2d7d   :  { %14469 = vmatpush3.msra.mxu1 %v9597_v31 }
0x2d7e   :  { %14470 = vmatprep.subr.mxu1 %v9592_v14 }
0x2d7f   :  { %14471 = vmatpush3.msra.mxu1 %v9592_v14 }
0x2dd0   :  { %v8934_v54 = vpop.xlane.xlu1 %8933 }
0x2dd1   :  { %v8954_v42 = vsub.f32 %v17812_v36, %v8934_v54 }
0x2dd2   :  { %v8931_v63 = vpop.xlane.xlu0 %8930 }
0x2dd3   :  { %v8963_v41 = vmul.f32 1.442695, %v8954_v42  ;;  %v8953_v43 = vsub.f32 %v17820_v10, %v8931_v63 }
0x2dd4   :  { %v8940_v40 = vpop.xlane.xlu1 %8939 }
0x2dd5   :  { %14849 = vpow2.f32 %v8963_v41  ;;  %v8961_v29 = vmul.f32 1.442695, %v8953_v43  ;;  %v8956_v51 = vsub.f32 %v17830_v1, %v8940_v40 }
0x2dd6   :  { %v8937_v22 = vpop.xlane.xlu0 %8936 }
0x2dd7   :  { %14851 = vpow2.f32 %v8961_v29  ;;  %v8967_v18 = vmul.f32 1.442695, %v8956_v51  ;;  %v8955_v26 = vsub.f32 %v17840_v25, %v8937_v22 }
0x2dd8   :  { %v8946_v31 = vpop.xlane.xlu1 %8945 }
0x2dd9   :  { %14853 = vpow2.f32 %v8967_v18  ;;  %v8965_v59 = vmul.f32 1.442695, %v8955_v26  ;;  %v8958_v24 = vsub.f32 %v17850_v56, %v8946_v31 }
0x2dda   :  { %v8943_v36 = vpop.xlane.xlu0 %8942 }
0x2ddb   :  { %14855 = vpow2.f32 %v8965_v59  ;;  %v8971_v15 = vmul.f32 1.442695, %v8958_v24  ;;  %v8957_v10 = vsub.f32 %v17860_v61, %v8943_v36 }
0x2ddc   :  { %v8952_v14 = vpop.xlane.xlu1 %8951 }
0x2ddd   :  { %14857 = vpow2.f32 %v8971_v15  ;;  %v8969_v54 = vmul.f32 1.442695, %v8957_v10  ;;  %v8960_v1 = vsub.f32 %v17875_v8, %v8952_v14  ;;  %v12237_v10 = vld [vmem:[%s18593_s8 + $0x50] sm:$0xff] }
0x2dde   :  { %v8949_v42 = vpop.xlane.xlu0 %8948  ;;  %14354 = vmatprep.subr.mxu0 %v12237_v10 }
0x2ddf   :  { %14859 = vpow2.f32 %v8969_v54  ;;  %v8975_v63 = vmul.f32 1.442695, %v8960_v1  ;;  %v8959_v25 = vsub.f32 %v17885_v57, %v8949_v42 }
0x2de1   :  { %14861 = vpow2.f32 %v8975_v63  ;;  %v8973_v41 = vmul.f32 1.442695, %v8959_v25 }
0x2de2   :  { %v14850_v43 = vpop.eup %14849 }
0x2de3   :  { %14863 = vpow2.f32 %v8973_v41  ;;  %v8980_v56 = vsel %vm604_vm2, %v14850_v43, 0.0 }
0x2de4   :  { %v14852_v40 = vpop.eup %14851  ;;  %8981 = vadd.xlane.f32.xlu1 %v8980_v56 }
0x2de5   :  { %v8977_v61 = vsel %vm604_vm2, %v14852_v40, 0.0 }
0x2de6   :  { %v14854_v29 = vpop.eup %14853  ;;  %8978 = vadd.xlane.f32.xlu0 %v8977_v61 }
0x2de7   :  { %v8986_v51 = vsel %vm604_vm2, %v14854_v29, 0.0 }
0x2de8   :  { %v14856_v8 = vpop.eup %14855  ;;  %8987 = vadd.xlane.f32.xlu1 %v8986_v51 }
0x2de9   :  { %v8983_v22 = vsel %vm604_vm2, %v14856_v8, 0.0 }
0x2dea   :  { %v14858_v18 = vpop.eup %14857  ;;  %8984 = vadd.xlane.f32.xlu0 %v8983_v22 }
0x2deb   :  { %v8992_v57 = vsel %vm604_vm2, %v14858_v18, 0.0 }
0x2dec   :  { %v14860_v26 = vpop.eup %14859  ;;  %8993 = vadd.xlane.f32.xlu1 %v8992_v57 }
0x2ded   :  { %v8989_v31 = vsel %vm604_vm2, %v14860_v26, 0.0 }
0x2dee   :  { %v14862_v59 = vpop.eup %14861  ;;  %8990 = vadd.xlane.f32.xlu0 %v8989_v31 }
0x2def   :  { %v8998_v24 = vsel %vm604_vm2, %v14862_v59, 0.0 }
0x2df0   :  { %v14864_v36 = vpop.eup %14863  ;;  %8999 = vadd.xlane.f32.xlu1 %v8998_v24 }
0x2df1   :  { %v8995_v15 = vsel %vm604_vm2, %v14864_v36, 0.0 }
0x2df2   :  { %8996 = vadd.xlane.f32.xlu0 %v8995_v15 }
0x2e6d   :  { %v8982_v14 = vpop.xlane.xlu1 %8981 }
0x2e6e   :  { %14865 = vrcp.f32 %v8982_v14 }
0x2e6f   :  { %v8979_v54 = vpop.xlane.xlu0 %8978 }
0x2e70   :  { %14867 = vrcp.f32 %v8979_v54 }
0x2e71   :  { %v8988_v1 = vpop.xlane.xlu1 %8987 }
0x2e72   :  { %14869 = vrcp.f32 %v8988_v1 }
0x2e73   :  { %v8985_v42 = vpop.xlane.xlu0 %8984 }
0x2e74   :  { %14871 = vrcp.f32 %v8985_v42 }
0x2e75   :  { %v8994_v63 = vpop.xlane.xlu1 %8993 }
0x2e76   :  { %14873 = vrcp.f32 %v8994_v63 }
0x2e77   :  { %v8991_v25 = vpop.xlane.xlu0 %8990 }
0x2e78   :  { %14875 = vrcp.f32 %v8991_v25 }
0x2e79   :  { %v9000_v41 = vpop.xlane.xlu1 %8999 }
0x2e7a   :  { %14877 = vrcp.f32 %v9000_v41 }
0x2e7b   :  { %v8997_v56 = vpop.xlane.xlu0 %8996  ;;  %v14866_v61 = vpop.eup %14865 }
0x2e7c   :  { %14879 = vrcp.f32 %v8997_v56  ;;  %v9010_v57 = vmul.f32 %v14866_v61, %v14850_v43  ;;  %v12260_v56 = vld [vmem:[%s18592_s7 + $0x4d8] sm:$0xff] }
0x2e7d   :  { %v14868_v51 = vpop.eup %14867 }
0x2e7e   :  { %v9009_v22 = vmul.f32 %v14868_v51, %v14852_v40 }
0x2e7f   :  { %v14870_v31 = vpop.eup %14869 }
0x2e80   :  { %14342 = vmatprep.mubr.msk.f32.mxu0 %vm604_vm2, %v9009_v22  ;;  %v9012_v14 = vmul.f32 %v14870_v31, %v14854_v29  ;;  %v12263_v29 = vld [vmem:[%s18592_s7 + $0x4f0] sm:$0xff]  ;;  %v9362_v31 = vadd.f32 %v17867_v19, %v17892_v34  ;;  %v8387_v34 = vadd.f32 %v17600_v45, %v17729_v23  ;;  %v8407_v23 = vadd.f32 %v17608_v60, %v17737_v13 }
0x2e81   :  { %v14872_v24 = vpop.eup %14871  ;;  %14343 = vmatmul.mubr.msk.f32.vlgmr.msra.gmra.mxu0 %vm604_vm2, %v9010_v57 }
0x2e82   :  { %v9011_v15 = vmul.f32 %v14872_v24, %v14856_v8  ;;  %14355 = vmatpush3.msra.mxu0 %v12237_v10  ;;  %v8382_v24 = vadd.f32 %v17587_v46, %v17723_v17  ;;  %v8402_v46 = vadd.f32 %v17602_v11, %v17731_v38 }
0x2e83   :  { %v14874_v54 = vpop.eup %14873  ;;  %14388 = vmatprep.subr.mxu0 %v12263_v29 }
0x2e84   :  { %14345 = vmatprep.mubr.msk.f32.mxu0 %vm604_vm2, %v9011_v15  ;;  %v9014_v63 = vmul.f32 %v14874_v54, %v14858_v18  ;;  %v12262_v18 = vld [vmem:[%s18592_s7 + $0x4e8] sm:$0xff] }
0x2e85   :  { %v14876_v1 = vpop.eup %14875  ;;  %14346 = vmatmul.mubr.msk.f32.gmra.mxu0 %vm604_vm2, %v9012_v14  ;;  %v8377_v14 = vadd.f32 %v17594_v35, %v17725_v12  ;;  %v8397_v12 = vadd.f32 %v17604_v6, %v17733_v3 }
0x2e86   :  { %v9013_v42 = vmul.f32 %v14876_v1, %v14860_v26 }
0x2e87   :  { %v14878_v25 = vpop.eup %14877 }
0x2e88   :  { %14348 = vmatprep.mubr.msk.f32.mxu0 %vm604_vm2, %v9013_v42  ;;  %v9016_v41 = vmul.f32 %v14878_v25, %v14862_v59  ;;  %v12261_v59 = vld [vmem:[%s18592_s7 + $0x4e0] sm:$0xff]  ;;  %v8392_v42 = vadd.f32 %v17598_v58, %v17727_v52  ;;  %v8412_v52 = vadd.f32 %v17606_v2, %v17735_v4  ;;  %v12265_v2 = vld [vmem:[%s18592_s7 + $0x4f8] ss:$0 sm:$0xff] }
0x2e89   :  { %v14880_v43 = vpop.eup %14879  ;;  %14349 = vmatmul.mubr.msk.f32.gmra.mxu0 %vm604_vm2, %v9014_v63 }
0x2e8a   :  { %v9015_v40 = vmul.f32 %v14880_v43, %v14864_v36 }
0x2e8c   :  { %14351 = vmatprep.mubr.msk.f32.mxu0 %vm604_vm2, %v9015_v40 }
0x2e8d   :  { %14352 = vmatmul.mubr.msk.f32.gmra.mxu0 %vm604_vm2, %v9016_v41 }
0x2f41   :  { %v14344_v8 = vpop.f32.mrf.mxu0 }
0x2f43   :  { %v9107_v26 = vpop.f32.mrf.mxu0 }
0x2f44   :  { %14356 = vmatprep.mubr.msk.f32.mxu0 %vm434_vm1, %v9107_v26 }
0x2f45   :  { %v14347_v10 = vpop.f32.mrf.mxu0  ;;  %14357 = vmatmul.mubr.msk.f32.vlgmr.msra.gmra.mxu0 %vm434_vm1, %v14344_v8 }
0x2f46   :  { %14389 = vmatpush3.msra.mxu0 %v12263_v29 }
0x2f47   :  { %v9117_v36 = vpop.f32.mrf.mxu0  ;;  %14390 = vmatprep.subr.mxu0 %v12262_v18 }
0x2f48   :  { %14359 = vmatprep.mubr.msk.f32.mxu0 %vm434_vm1, %v9117_v36  ;;  %14391 = vmatpush3.msra.mxu0 %v12262_v18 }
0x2f49   :  { %v14350_v61 = vpop.f32.mrf.mxu0  ;;  %14360 = vmatmul.mubr.msk.f32.gmra.mxu0 %vm434_vm1, %v14347_v10  ;;  %14392 = vmatprep.subr.mxu0 %v12261_v59 }
0x2f4a   :  { %14393 = vmatpush3.msra.mxu0 %v12261_v59 }
0x2f4b   :  { %v9127_v51 = vpop.f32.mrf.mxu0  ;;  %14394 = vmatprep.subr.mxu0 %v12260_v56 }
0x2f4c   :  { %14362 = vmatprep.mubr.msk.f32.mxu0 %vm434_vm1, %v9127_v51  ;;  %14395 = vmatpush3.msra.mxu0 %v12260_v56 }
0x2f4d   :  { %v14353_v22 = vpop.f32.mrf.mxu0  ;;  %14363 = vmatmul.mubr.msk.f32.gmra.mxu0 %vm434_vm1, %v14350_v61 }
0x2f4f   :  { %v9137_v57 = vpop.f32.mrf.mxu0 }
0x2f50   :  { %14365 = vmatprep.mubr.msk.f32.mxu0 %vm434_vm1, %v9137_v57 }
0x2f51   :  { %14366 = vmatmul.mubr.msk.f32.gmra.mxu0 %vm434_vm1, %v14353_v22 }
0x2f52   :  { %14396 = vmatprep.mubr.msk.f32.mxu0 %vm74_vm0, %v17126_v62 }
0x2f55   :  { %14397 = vmatmul.mubr.msk.f32.vlgmr.msra.gmra.mxu0 %vm74_vm0, %v17137_v7 }
0x2f56   :  { %14399 = vmatprep.mubr.msk.f32.mxu0 %vm74_vm0, %v17142_v32 }
0x2f59   :  { %14400 = vmatmul.mubr.msk.f32.gmra.mxu0 %vm74_vm0, %v17160_v55 }
0x2f5a   :  { %14402 = vmatprep.mubr.msk.f32.mxu0 %vm74_vm0, %v17170_v9 }
0x2f5d   :  { %14403 = vmatmul.mubr.msk.f32.gmra.mxu0 %vm74_vm0, %v17183_v0 }
0x2f5e   :  { %14405 = vmatprep.mubr.msk.f32.mxu0 %vm74_vm0, %v17193_v53 }
0x2f61   :  { %14406 = vmatmul.mubr.msk.f32.gmra.mxu0 %vm74_vm0, %v17205_v27 }
0x2f62   :  { %14444 = vmatprep.mubr.msk.f32.mxu0 %vm434_vm1, %v9362_v31 }
0x3005   :  { %v14358_v15 = vpop.f32.mrf.mxu0 }
0x3006   :  { %v17987_v54 = vadd.f32 %v14358_v15, %v8382_v24 }
0x3007   :  { %v9238_v1 = vpop.f32.mrf.mxu0 }
0x3008   :  { %v17991_v63 = vadd.f32 %v9238_v1, %v8377_v14 }
0x3009   :  { %v14361_v19 = vpop.f32.mrf.mxu0 }
0x300a   :  { %v17995_v25 = vadd.f32 %v14361_v19, %v8392_v42 }
0x300b   :  { %v9248_v43 = vpop.f32.mrf.mxu0 }
0x300c   :  { %v17999_v17 = vadd.f32 %v9248_v43, %v8387_v34 }
0x300d   :  { %v14364_v35 = vpop.f32.mrf.mxu0 }
0x300e   :  { %v18003_v40 = vadd.f32 %v14364_v35, %v8402_v46 }
0x300f   :  { %v9258_v58 = vpop.f32.mrf.mxu0 }
0x3010   :  { %v18007_v41 = vadd.f32 %v9258_v58, %v8397_v12 }
0x3011   :  { %v14367_v45 = vpop.f32.mrf.mxu0 }
0x3012   :  { %v18011_v29 = vadd.f32 %v14367_v45, %v8412_v52 }
0x3013   :  { %v9268_v11 = vpop.f32.mrf.mxu0 }
0x3014   :  { %v18013_v38 = vadd.f32 %v9268_v11, %v8407_v23 }
0x3015   :  { %v14398_v8 = vpop.f32.mrf.mxu0 }
0x3016   :  { %v9482_v22 = vadd.f32 %v14398_v8, %v12265_v2 }
0x3017   :  { %v9476_v26 = vpop.f32.mrf.mxu0 }
0x3018   :  { %v9477_v57 = vadd.f32 %v12265_v2, %v9476_v26  ;;  %v18604_v26 = vld [vmem:[#allocation5_spill] sm:$0xff] }
0x3019   :  { %v14401_v6 = vpop.f32.mrf.mxu0 }
0x301a   :  { %v9492_v61 = vadd.f32 %v14401_v6, %v12265_v2 }
0x301b   :  { %v9486_v3 = vpop.f32.mrf.mxu0 }
0x301c   :  { %v9487_v51 = vadd.f32 %v12265_v2, %v9486_v3 }
0x301d   :  { %v14404_v18 = vpop.f32.mrf.mxu0 }
0x301e   :  { %v9502_v60 = vadd.f32 %v14404_v18, %v12265_v2 }
0x301f   :  { %v9496_v10 = vpop.f32.mrf.mxu0 }
0x3020   :  { %v9497_v13 = vadd.f32 %v12265_v2, %v9496_v10 }
0x3021   :  { %v14407_v4 = vpop.f32.mrf.mxu0 }
0x3022   :  { %v9512_v59 = vadd.f32 %v14407_v4, %v12265_v2 }
0x3023   :  { %v9506_v36 = vpop.f32.mrf.mxu0 }
0x3024   :  { %v9507_v56 = vadd.f32 %v12265_v2, %v9506_v36  ;;  %14428 = vmatprep.subr.msk.mxu0 %vm434_vm1, %v9512_v59 }
0x3025   :  { %14429 = vmatpush3.xpose.msk.msra.mxu0 %vm434_vm1, %v9512_v59 }
0x3026   :  { %14430 = vmatprep.subr.msk.mxu0 %vm434_vm1, %v9507_v56 }
0x3029   :  { %14431 = vmatpush3.xpose.msk.msra.mxu0 %vm434_vm1, %v9507_v56 }
0x302a   :  { %14432 = vmatprep.subr.msk.mxu0 %vm434_vm1, %v9502_v60 }
0x302d   :  { %14433 = vmatpush3.xpose.msk.msra.mxu0 %vm434_vm1, %v9502_v60 }
0x302e   :  { %14434 = vmatprep.subr.msk.mxu0 %vm434_vm1, %v9497_v13 }
0x3031   :  { %14435 = vmatpush3.xpose.msk.msra.mxu0 %vm434_vm1, %v9497_v13 }
0x3032   :  { %14436 = vmatprep.subr.msk.mxu0 %vm434_vm1, %v9492_v61 }
0x3035   :  { %14437 = vmatpush3.xpose.msk.msra.mxu0 %vm434_vm1, %v9492_v61 }
0x3036   :  { %14438 = vmatprep.subr.msk.mxu0 %vm434_vm1, %v9487_v51 }
0x3039   :  { %14439 = vmatpush3.xpose.msk.msra.mxu0 %vm434_vm1, %v9487_v51 }
0x303a   :  { %14440 = vmatprep.subr.msk.mxu0 %vm434_vm1, %v9482_v22 }
0x303d   :  { %14441 = vmatpush3.xpose.msk.msra.mxu0 %vm434_vm1, %v9482_v22 }
0x303e   :  { %14442 = vmatprep.subr.msk.mxu0 %vm434_vm1, %v9477_v57 }
0x3041   :  { %14443 = vmatpush3.xpose.msk.msra.mxu0 %vm434_vm1, %v9477_v57 }
0x3044   :  { %14445 = vmatmul.mubr.msk.f32.vlgmr.msra.gmra.mxu0 %vm434_vm1, %v17888_v16 }
0x3045   :  { %14447 = vmatprep.mubr.msk.f32.mxu0 %vm434_vm1, %v17900_v30 }
0x3048   :  { %14448 = vmatmul.mubr.msk.f32.gmra.mxu0 %vm434_vm1, %v17897_v48 }
0x3049   :  { %14450 = vmatprep.mubr.msk.f32.mxu0 %vm434_vm1, %v17906_v20 }
0x304c   :  { %14451 = vmatmul.mubr.msk.f32.gmra.mxu0 %vm434_vm1, %v17903_v21 }
0x304d   :  { %14453 = vmatprep.mubr.msk.f32.mxu0 %vm434_vm1, %v17912_v49 }
0x3050   :  { %14454 = vmatmul.mubr.msk.f32.gmra.mxu0 %vm434_vm1, %v17909_v33 }
0x3104   :  { %v14446_v31 = vpop.f32.mrf.mxu0 }
0x3105   :  { %v9784_v16 = vmul.f32 0.35355338, %v14446_v31 }
0x3106   :  { %v9744_v24 = vpop.f32.mrf.mxu0 }
0x3107   :  { %v9792_v30 = vadd.f32 %v17809_v47, %v9784_v16  ;;  %v9783_v15 = vmul.f32 0.35355338, %v9744_v24 }
0x3108   :  { %v14449_v14 = vpop.f32.mrf.mxu0 }
0x3109   :  { %v9791_v48 = vadd.f32 %v17817_v44, %v9783_v15  ;;  %v9786_v1 = vmul.f32 0.35355338, %v14449_v14  ;;  %v9802_v20 = vsel %vm604_vm2, %v9792_v30, -inf }
0x310a   :  { %9803 = vmax.xlane.f32.xlu1 %v9802_v20  ;;  %v9754_v21 = vpop.f32.mrf.mxu0 }
0x310b   :  { %v9794_v42 = vadd.f32 %v17827_v39, %v9786_v1  ;;  %v9785_v49 = vmul.f32 0.35355338, %v9754_v21  ;;  %v9799_v19 = vsel %vm604_vm2, %v9791_v48, -inf }
0x310c   :  { %9800 = vmax.xlane.f32.xlu0 %v9799_v19  ;;  %v14452_v33 = vpop.f32.mrf.mxu0 }
0x310d   :  { %v9793_v34 = vadd.f32 %v17837_v28, %v9785_v49  ;;  %v9788_v43 = vmul.f32 0.35355338, %v14452_v33  ;;  %v9808_v47 = vsel %vm604_vm2, %v9794_v42, -inf }
0x310e   :  { %9809 = vmax.xlane.f32.xlu1 %v9808_v47  ;;  %v9764_v46 = vpop.f32.mrf.mxu0 }
0x310f   :  { %v9796_v44 = vadd.f32 %v17847_v37, %v9788_v43  ;;  %v9787_v35 = vmul.f32 0.35355338, %v9764_v46  ;;  %v9805_v12 = vsel %vm604_vm2, %v9793_v34, -inf }
0x3110   :  { %9806 = vmax.xlane.f32.xlu0 %v9805_v12  ;;  %v14455_v58 = vpop.f32.mrf.mxu0 }
0x3111   :  { %v9795_v39 = vadd.f32 %v17857_v5, %v9787_v35  ;;  %v9790_v52 = vmul.f32 0.35355338, %v14455_v58  ;;  %v9814_v45 = vsel %vm604_vm2, %v9796_v44, -inf }
0x3112   :  { %9815 = vmax.xlane.f32.xlu1 %v9814_v45  ;;  %v9774_v23 = vpop.f32.mrf.mxu0 }
0x3113   :  { %v9798_v28 = vadd.f32 %v17872_v50, %v9790_v52  ;;  %v9789_v11 = vmul.f32 0.35355338, %v9774_v23  ;;  %v9811_v8 = vsel %vm604_vm2, %v9795_v39, -inf  ;;  %v12312_v23 = vld [vmem:[%s18593_s8 + $0x58] sm:$0xff] }
0x3114   :  { %9812 = vmax.xlane.f32.xlu0 %v9811_v8  ;;  %14484 = vmatprep.subr.mxu1 %v12312_v23 }
0x3115   :  { %v9797_v37 = vadd.f32 %v18604_v26, %v9789_v11  ;;  %v9820_v6 = vsel %vm604_vm2, %v9798_v28, -inf }
0x3116   :  { %9821 = vmax.xlane.f32.xlu1 %v9820_v6 }
0x3117   :  { %v9817_v3 = vsel %vm604_vm2, %v9797_v37, -inf }
0x3118   :  { %9818 = vmax.xlane.f32.xlu0 %v9817_v3 }
0x3193   :  { %v9804_v5 = vpop.xlane.xlu1 %9803 }
0x3194   :  { %v9824_v18 = vsub.f32 %v9792_v30, %v9804_v5 }
0x3195   :  { %v9801_v10 = vpop.xlane.xlu0 %9800 }
0x3196   :  { %v9833_v2 = vmul.f32 1.442695, %v9824_v18  ;;  %v9823_v4 = vsub.f32 %v9791_v48, %v9801_v10 }
0x3197   :  { %v9810_v59 = vpop.xlane.xlu1 %9809 }
0x3198   :  { %14881 = vpow2.f32 %v9833_v2  ;;  %v9831_v50 = vmul.f32 1.442695, %v9823_v4  ;;  %v9826_v36 = vsub.f32 %v9794_v42, %v9810_v59 }
0x3199   :  { %v9807_v56 = vpop.xlane.xlu0 %9806 }
0x319a   :  { %14883 = vpow2.f32 %v9831_v50  ;;  %v9837_v60 = vmul.f32 1.442695, %v9826_v36  ;;  %v9825_v13 = vsub.f32 %v9793_v34, %v9807_v56 }
0x319b   :  { %v9816_v61 = vpop.xlane.xlu1 %9815 }
0x319c   :  { %14885 = vpow2.f32 %v9837_v60  ;;  %v9835_v51 = vmul.f32 1.442695, %v9825_v13  ;;  %v9828_v22 = vsub.f32 %v9796_v44, %v9816_v61 }
0x319d   :  { %v9813_v57 = vpop.xlane.xlu0 %9812 }
0x319e   :  { %14887 = vpow2.f32 %v9835_v51  ;;  %v9841_v31 = vmul.f32 1.442695, %v9828_v22  ;;  %v9827_v16 = vsub.f32 %v9795_v39, %v9813_v57 }
0x319f   :  { %v9822_v24 = vpop.xlane.xlu1 %9821 }
0x31a0   :  { %14889 = vpow2.f32 %v9841_v31  ;;  %v9839_v30 = vmul.f32 1.442695, %v9827_v16  ;;  %v9830_v15 = vsub.f32 %v9798_v28, %v9822_v24 }
0x31a1   :  { %v9819_v14 = vpop.xlane.xlu0 %9818 }
0x31a2   :  { %14891 = vpow2.f32 %v9839_v30  ;;  %v9845_v48 = vmul.f32 1.442695, %v9830_v15  ;;  %v9829_v1 = vsub.f32 %v9797_v37, %v9819_v14 }
0x31a4   :  { %14893 = vpow2.f32 %v9845_v48  ;;  %v9843_v20 = vmul.f32 1.442695, %v9829_v1 }
0x31a5   :  { %v14882_v21 = vpop.eup %14881 }
0x31a6   :  { %14895 = vpow2.f32 %v9843_v20  ;;  %v9850_v42 = vsel %vm604_vm2, %v14882_v21, 0.0 }
0x31a7   :  { %v14884_v49 = vpop.eup %14883  ;;  %9851 = vadd.xlane.f32.xlu1 %v9850_v42 }
0x31a8   :  { %v9847_v19 = vsel %vm604_vm2, %v14884_v49, 0.0 }
0x31a9   :  { %v14886_v33 = vpop.eup %14885  ;;  %9848 = vadd.xlane.f32.xlu0 %v9847_v19 }
0x31aa   :  { %v9856_v34 = vsel %vm604_vm2, %v14886_v33, 0.0 }
0x31ab   :  { %v14888_v43 = vpop.eup %14887  ;;  %9857 = vadd.xlane.f32.xlu1 %v9856_v34 }
0x31ac   :  { %v9853_v47 = vsel %vm604_vm2, %v14888_v43, 0.0 }
0x31ad   :  { %v14890_v46 = vpop.eup %14889  ;;  %9854 = vadd.xlane.f32.xlu0 %v9853_v47 }
0x31ae   :  { %v9862_v44 = vsel %vm604_vm2, %v14890_v46, 0.0 }
0x31af   :  { %v14892_v35 = vpop.eup %14891  ;;  %9863 = vadd.xlane.f32.xlu1 %v9862_v44 }
0x31b0   :  { %v9859_v12 = vsel %vm604_vm2, %v14892_v35, 0.0 }
0x31b1   :  { %v14894_v58 = vpop.eup %14893  ;;  %9860 = vadd.xlane.f32.xlu0 %v9859_v12 }
0x31b2   :  { %v9868_v39 = vsel %vm604_vm2, %v14894_v58, 0.0 }
0x31b3   :  { %v14896_v52 = vpop.eup %14895  ;;  %9869 = vadd.xlane.f32.xlu1 %v9868_v39 }
0x31b4   :  { %v9865_v45 = vsel %vm604_vm2, %v14896_v52, 0.0 }
0x31b5   :  { %9866 = vadd.xlane.f32.xlu0 %v9865_v45 }
0x3230   :  { %v9852_v28 = vpop.xlane.xlu1 %9851 }
0x3231   :  { %14897 = vrcp.f32 %v9852_v28 }
0x3232   :  { %v9849_v11 = vpop.xlane.xlu0 %9848 }
0x3233   :  { %14899 = vrcp.f32 %v9849_v11 }
0x3234   :  { %v9858_v8 = vpop.xlane.xlu1 %9857 }
0x3235   :  { %14901 = vrcp.f32 %v9858_v8 }
0x3236   :  { %v9855_v26 = vpop.xlane.xlu0 %9854 }
0x3237   :  { %14903 = vrcp.f32 %v9855_v26 }
0x3238   :  { %v9864_v37 = vpop.xlane.xlu1 %9863 }
0x3239   :  { %14905 = vrcp.f32 %v9864_v37 }
0x323a   :  { %v9861_v6 = vpop.xlane.xlu0 %9860 }
0x323b   :  { %14907 = vrcp.f32 %v9861_v6 }
0x323c   :  { %v9870_v3 = vpop.xlane.xlu1 %9869 }
0x323d   :  { %14909 = vrcp.f32 %v9870_v3 }
0x323e   :  { %v9867_v5 = vpop.xlane.xlu0 %9866  ;;  %v14898_v18 = vpop.eup %14897 }
0x323f   :  { %14911 = vrcp.f32 %v9867_v5  ;;  %v9880_v4 = vmul.f32 %v14898_v18, %v14882_v21 }
0x3240   :  { %v14900_v10 = vpop.eup %14899 }
0x3241   :  { %v9879_v2 = vmul.f32 %v14900_v10, %v14884_v49  ;;  %v12322_v49 = vld [vmem:[%s18596_s11 + $0x10] ss:$0 sm:$0xff] }
0x3242   :  { %v14902_v59 = vpop.eup %14901 }
0x3243   :  { %14472 = vmatprep.mubr.msk.f32.mxu1 %vm604_vm2, %v9879_v2  ;;  %v9882_v56 = vmul.f32 %v14902_v59, %v14886_v33 }
0x3244   :  { %v14904_v50 = vpop.eup %14903  ;;  %14473 = vmatmul.mubr.msk.f32.vlgmr.msra.gmra.mxu1 %vm604_vm2, %v9880_v4 }
0x3245   :  { %v9881_v36 = vmul.f32 %v14904_v50, %v14888_v43  ;;  %14485 = vmatpush3.msra.mxu1 %v12312_v23 }
0x3246   :  { %v14906_v60 = vpop.eup %14905 }
0x3247   :  { %14475 = vmatprep.mubr.msk.f32.mxu1 %vm604_vm2, %v9881_v36  ;;  %v9884_v51 = vmul.f32 %v14906_v60, %v14890_v46 }
0x3248   :  { %v14908_v13 = vpop.eup %14907  ;;  %14476 = vmatmul.mubr.msk.f32.gmra.mxu1 %vm604_vm2, %v9882_v56 }
0x3249   :  { %v9883_v61 = vmul.f32 %v14908_v13, %v14892_v35 }
0x324a   :  { %v14910_v22 = vpop.eup %14909 }
0x324b   :  { %14478 = vmatprep.mubr.msk.f32.mxu1 %vm604_vm2, %v9883_v61  ;;  %v9886_v16 = vmul.f32 %v14910_v22, %v14894_v58 }
0x324c   :  { %v14912_v57 = vpop.eup %14911  ;;  %14479 = vmatmul.mubr.msk.f32.gmra.mxu1 %vm604_vm2, %v9884_v51 }
0x324d   :  { %v9885_v31 = vmul.f32 %v14912_v57, %v14896_v52 }
0x324f   :  { %14481 = vmatprep.mubr.msk.f32.mxu1 %vm604_vm2, %v9885_v31 }
0x3250   :  { %14482 = vmatmul.mubr.msk.f32.gmra.mxu1 %vm604_vm2, %v9886_v16 }
0x3304   :  { %v14474_v24 = vpop.f32.mrf.mxu1 }
0x3306   :  { %v9977_v30 = vpop.f32.mrf.mxu1 }
0x3307   :  { %14486 = vmatprep.mubr.msk.f32.mxu1 %vm434_vm1, %v9977_v30 }
0x3308   :  { %v14477_v15 = vpop.f32.mrf.mxu1  ;;  %14487 = vmatmul.mubr.msk.f32.vlgmr.msra.gmra.mxu1 %vm434_vm1, %v14474_v24 }
0x330a   :  { %v9987_v14 = vpop.f32.mrf.mxu1 }
0x330b   :  { %14489 = vmatprep.mubr.msk.f32.mxu1 %vm434_vm1, %v9987_v14 }
0x330c   :  { %v14480_v48 = vpop.f32.mrf.mxu1  ;;  %14490 = vmatmul.mubr.msk.f32.gmra.mxu1 %vm434_vm1, %v14477_v15 }
0x330e   :  { %v9997_v1 = vpop.f32.mrf.mxu1 }
0x330f   :  { %14492 = vmatprep.mubr.msk.f32.mxu1 %vm434_vm1, %v9997_v1 }
0x3310   :  { %v14483_v20 = vpop.f32.mrf.mxu1  ;;  %14493 = vmatmul.mubr.msk.f32.gmra.mxu1 %vm434_vm1, %v14480_v48 }
0x3312   :  { %v10007_v21 = vpop.f32.mrf.mxu1 }
0x3313   :  { %14495 = vmatprep.mubr.msk.f32.mxu1 %vm434_vm1, %v10007_v21 }
0x3314   :  { %14496 = vmatmul.mubr.msk.f32.gmra.mxu1 %vm434_vm1, %v14483_v20 }
0x33c8   :  { %v14488_v42 = vpop.f32.mrf.mxu1 }
0x33c9   :  { %v10148_v19 = vadd.f32 %v14488_v42, %v17987_v54 }
0x33ca   :  { %v10108_v33 = vpop.f32.mrf.mxu1 }
0x33cb   :  { %v10162_v34 = vadd.f32 %v12322_v49, %v10148_v19  ;;  %v10147_v43 = vadd.f32 %v10108_v33, %v17991_v63 }
0x33cc   :  { %v14491_v47 = vpop.f32.mrf.mxu1 }
0x33cd   :  { %v10161_v46 = vadd.f32 %v12322_v49, %v10147_v43  ;;  %v10150_v44 = vadd.f32 %v14491_v47, %v17995_v25  ;;  %v10170_v35 = vadd.f32 %v10162_v34, %v17137_v7 }
0x33ce   :  { %v10118_v12 = vpop.f32.mrf.mxu1 }
0x33cf   :  { %v10164_v58 = vadd.f32 %v12322_v49, %v10150_v44  ;;  %v10149_v39 = vadd.f32 %v10118_v12, %v17999_v17  ;;  %v10182_v52 = vsel %vm74_vm0, %v10170_v35, 0.0  ;;  %v10169_v45 = vadd.f32 %v10161_v46, %v17126_v62 }
0x33d0   :  { %10183 = vadd.xlane.f32.xlu1 %v10182_v52  ;;  %v14494_v54 = vpop.f32.mrf.mxu1 }
0x33d1   :  { %v10163_v23 = vadd.f32 %v12322_v49, %v10149_v39  ;;  %v10152_v28 = vadd.f32 %v14494_v54, %v18003_v40  ;;  %v10179_v63 = vsel %vm74_vm0, %v10169_v45, 0.0  ;;  %v10172_v11 = vadd.f32 %v10164_v58, %v17160_v55 }
0x33d2   :  { %10180 = vadd.xlane.f32.xlu0 %v10179_v63  ;;  %v10128_v25 = vpop.f32.mrf.mxu1  ;;  %v12329_v63 = vld [vmem:[%s18594_s9 + $0x60] sm:$0xff] }
0x33d3   :  { %v10166_v7 = vadd.f32 %v12322_v49, %v10152_v28  ;;  %v10151_v8 = vadd.f32 %v10128_v25, %v18007_v41  ;;  %v10188_v17 = vsel %vm74_vm0, %v10172_v11, 0.0  ;;  %v10171_v26 = vadd.f32 %v10163_v23, %v17142_v32  ;;  %v12330_v28 = vld [vmem:[%s18594_s9 + $0x68] sm:$0xff]  ;;  %v12327_v25 = vld [vmem:[%s18594_s9 + $0x50] sm:$0xff] }
0x33d4   :  { %10189 = vadd.xlane.f32.xlu1 %v10188_v17  ;;  %v14497_v62 = vpop.f32.mrf.mxu1  ;;  %14498 = vmatprep.subr.mxu0 %v12330_v28  ;;  %v12346_v17 = vld [vmem:[%s18595_s10 + $0xa8] sm:$0xff] }
0x33d5   :  { %v10165_v37 = vadd.f32 %v12322_v49, %v10151_v8  ;;  %v10154_v6 = vadd.f32 %v14497_v62, %v18011_v29  ;;  %v10185_v40 = vsel %vm74_vm0, %v10171_v26, 0.0  ;;  %v10174_v3 = vadd.f32 %v10166_v7, %v17183_v0  ;;  %14499 = vmatpush3.msra.mxu0 %v12330_v28  ;;  %v12348_v7 = vld [vmem:[%s18595_s10 + $0xb8] sm:$0xff]  ;;  %v12347_v8 = vld [vmem:[%s18595_s10 + $0xb0] sm:$0xff] }
0x33d6   :  { %10186 = vadd.xlane.f32.xlu0 %v10185_v40  ;;  %v10138_v55 = vpop.f32.mrf.mxu1  ;;  %14500 = vmatprep.subr.mxu0 %v12329_v63 }
0x33d7   :  { %v10168_v5 = vadd.f32 %v12322_v49, %v10154_v6  ;;  %v10153_v18 = vadd.f32 %v10138_v55, %v18013_v38  ;;  %v10194_v41 = vsel %vm74_vm0, %v10174_v3, 0.0  ;;  %v10173_v10 = vadd.f32 %v10165_v37, %v17170_v9  ;;  %14501 = vmatpush3.msra.mxu0 %v12329_v63  ;;  %14518 = vmatprep.subr.mxu1 %v12348_v7 }
0x33d8   :  { %10195 = vadd.xlane.f32.xlu1 %v10194_v41  ;;  %14519 = vmatpush3.msra.mxu1 %v12348_v7  ;;  %v12342_v7 = vld [vmem:[%s18595_s10 + $0x88] sm:$0xff] }
0x33d9   :  { %v10167_v32 = vadd.f32 %v12322_v49, %v10153_v18  ;;  %v10191_v2 = vsel %vm74_vm0, %v10173_v10, 0.0  ;;  %v10176_v4 = vadd.f32 %v10168_v5, %v17205_v27  ;;  %14520 = vmatprep.subr.mxu1 %v12347_v8 }
0x33da   :  { %10192 = vadd.xlane.f32.xlu0 %v10191_v2  ;;  %14521 = vmatpush3.msra.mxu1 %v12347_v8  ;;  %v12341_v8 = vld [vmem:[%s18595_s10 + $0x80] sm:$0xff] }
0x33db   :  { %v10200_v29 = vsel %vm74_vm0, %v10176_v4, 0.0  ;;  %v10175_v0 = vadd.f32 %v10167_v32, %v17193_v53  ;;  %14522 = vmatprep.subr.mxu1 %v12346_v17 }
0x33dc   :  { %10201 = vadd.xlane.f32.xlu1 %v10200_v29  ;;  %14523 = vmatpush3.msra.mxu1 %v12346_v17  ;;  %v18605_v17 = vmov 0.0  }
0x33dd   :  { %v10197_v59 = vsel %vm74_vm0, %v10175_v0, 0.0 }
0x33de   :  { %10198 = vadd.xlane.f32.xlu0 %v10197_v59 }
0x3459   :  { %v10184_v38 = vpop.xlane.xlu1 %10183 }
0x345a   :  { %v10204_v50 = vmul.f32 0.03125, %v10184_v38 }
0x345b   :  { %v10181_v36 = vpop.xlane.xlu0 %10180 }
0x345c   :  { %v18118_v56 = vsub.f32 %v10170_v35, %v10204_v50  ;;  %v10203_v9 = vmul.f32 0.03125, %v10181_v36 }
0x345d   :  { %v10190_v60 = vpop.xlane.xlu1 %10189 }
0x345e   :  { %v18120_v13 = vsub.f32 %v10169_v45, %v10203_v9  ;;  %v10206_v61 = vmul.f32 0.03125, %v10190_v60  ;;  %v10220_v27 = vmul.f32 %v18118_v56, %v18118_v56 }
0x345f   :  { %v10187_v51 = vpop.xlane.xlu0 %10186 }
0x3460   :  { %v18124_v22 = vsub.f32 %v10172_v11, %v10206_v61  ;;  %v10205_v53 = vmul.f32 0.03125, %v10187_v51  ;;  %v10230_v57 = vsel %vm74_vm0, %v10220_v27, 0.0  ;;  %v10219_v31 = vmul.f32 %v18120_v13, %v18120_v13  ;;  %v12328_v11 = vld [vmem:[%s18594_s9 + $0x58] sm:$0xff] }
0x3461   :  { %v10196_v16 = vpop.xlane.xlu1 %10195  ;;  %10231 = vadd.xlane.f32.xlu1 %v10230_v57  ;;  %14502 = vmatprep.subr.mxu0 %v12328_v11  ;;  %v12325_v57 = vld [vmem:[%s18596_s11 + $0x12] ss:$0 sm:$0xff] }
0x3462   :  { %v18129_v24 = vsub.f32 %v10171_v26, %v10205_v53  ;;  %v10208_v30 = vmul.f32 0.03125, %v10196_v16  ;;  %v10227_v15 = vsel %vm74_vm0, %v10219_v31, 0.0  ;;  %v10222_v14 = vmul.f32 %v18124_v22, %v18124_v22  ;;  %14503 = vmatpush3.msra.mxu0 %v12328_v11  ;;  %v12345_v26 = vld [vmem:[%s18595_s10 + $0xa0] sm:$0xff] }
0x3463   :  { %v10193_v48 = vpop.xlane.xlu0 %10192  ;;  %10228 = vadd.xlane.f32.xlu0 %v10227_v15  ;;  %14504 = vmatprep.subr.mxu0 %v12327_v25 }
0x3464   :  { %v18134_v1 = vsub.f32 %v10174_v3, %v10208_v30  ;;  %v10207_v20 = vmul.f32 0.03125, %v10193_v48  ;;  %v10236_v21 = vsel %vm74_vm0, %v10222_v14, 0.0  ;;  %v10221_v42 = vmul.f32 %v18129_v24, %v18129_v24  ;;  %14505 = vmatpush3.msra.mxu0 %v12327_v25  ;;  %14524 = vmatprep.subr.mxu1 %v12345_v26  ;;  %v12326_v48 = vld [vmem:[%s18596_s11 + $0x13] ss:$0 sm:$0xff] }
0x3465   :  { %10237 = vadd.xlane.f32.xlu1 %v10236_v21  ;;  %v10202_v49 = vpop.xlane.xlu1 %10201  ;;  %14525 = vmatpush3.msra.mxu1 %v12345_v26  ;;  %v12343_v25 = vld [vmem:[%s18595_s10 + $0x90] sm:$0xff] }
0x3466   :  { %v18139_v19 = vsub.f32 %v10173_v10, %v10207_v20  ;;  %v10210_v33 = vmul.f32 0.03125, %v10202_v49  ;;  %v10233_v34 = vsel %vm74_vm0, %v10221_v42, 0.0  ;;  %v10224_v43 = vmul.f32 %v18134_v1, %v18134_v1  ;;  %v12332_v26 = vld [vmem:[%s18594_s9 + $0x70] ss:$0 sm:$0xff] }
0x3467   :  { %10234 = vadd.xlane.f32.xlu0 %v10233_v34  ;;  %v10199_v47 = vpop.xlane.xlu0 %10198 }
0x3468   :  { %v18144_v46 = vsub.f32 %v10176_v4, %v10210_v33  ;;  %v10209_v44 = vmul.f32 0.03125, %v10199_v47  ;;  %v10242_v35 = vsel %vm74_vm0, %v10224_v43, 0.0  ;;  %v10223_v12 = vmul.f32 %v18139_v19, %v18139_v19 }
0x3469   :  { %10243 = vadd.xlane.f32.xlu1 %v10242_v35 }
0x346a   :  { %v18149_v58 = vsub.f32 %v10175_v0, %v10209_v44  ;;  %v10239_v39 = vsel %vm74_vm0, %v10223_v12, 0.0  ;;  %v10226_v52 = vmul.f32 %v18144_v46, %v18144_v46 }
0x346b   :  { %10240 = vadd.xlane.f32.xlu0 %v10239_v39 }
0x346c   :  { %v10248_v45 = vsel %vm74_vm0, %v10226_v52, 0.0  ;;  %v10225_v54 = vmul.f32 %v18149_v58, %v18149_v58 }
0x346d   :  { %10249 = vadd.xlane.f32.xlu1 %v10248_v45 }
0x346e   :  { %v10245_v23 = vsel %vm74_vm0, %v10225_v54, 0.0 }
0x346f   :  { %10246 = vadd.xlane.f32.xlu0 %v10245_v23 }
0x34ea   :  { %v10232_v62 = vpop.xlane.xlu1 %10231 }
0x34eb   :  { %v10252_v37 = vmul.f32 0.03125, %v10232_v62 }
0x34ec   :  { %v10229_v6 = vpop.xlane.xlu0 %10228 }
0x34ed   :  { %v10260_v40 = vadd.f32 1e-05, %v10252_v37  ;;  %v10251_v3 = vmul.f32 0.03125, %v10229_v6 }
0x34ee   :  { %v10238_v55 = vpop.xlane.xlu1 %10237 }
0x34ef   :  { %14913 = vrsqrt.f32 %v10260_v40  ;;  %v10259_v5 = vadd.f32 1e-05, %v10251_v3  ;;  %v10254_v18 = vmul.f32 0.03125, %v10238_v55 }
0x34f0   :  { %v10235_v41 = vpop.xlane.xlu0 %10234 }
0x34f1   :  { %14915 = vrsqrt.f32 %v10259_v5  ;;  %v10262_v10 = vadd.f32 1e-05, %v10254_v18  ;;  %v10253_v32 = vmul.f32 0.03125, %v10235_v41 }
0x34f2   :  { %v10244_v2 = vpop.xlane.xlu1 %10243 }
0x34f3   :  { %14917 = vrsqrt.f32 %v10262_v10  ;;  %v10261_v4 = vadd.f32 1e-05, %v10253_v32  ;;  %v10256_v29 = vmul.f32 0.03125, %v10244_v2 }
0x34f4   :  { %v10241_v0 = vpop.xlane.xlu0 %10240 }
0x34f5   :  { %14919 = vrsqrt.f32 %v10261_v4  ;;  %v10264_v59 = vadd.f32 1e-05, %v10256_v29  ;;  %v10255_v38 = vmul.f32 0.03125, %v10241_v0 }
0x34f6   :  { %v10250_v50 = vpop.xlane.xlu1 %10249 }
0x34f7   :  { %14921 = vrsqrt.f32 %v10264_v59  ;;  %v10263_v36 = vadd.f32 1e-05, %v10255_v38  ;;  %v10258_v9 = vmul.f32 0.03125, %v10250_v50 }
0x34f8   :  { %v10247_v60 = vpop.xlane.xlu0 %10246 }
0x34f9   :  { %14923 = vrsqrt.f32 %v10263_v36  ;;  %v10266_v61 = vadd.f32 1e-05, %v10258_v9  ;;  %v10257_v27 = vmul.f32 0.03125, %v10247_v60 }
0x34fb   :  { %14925 = vrsqrt.f32 %v10266_v61  ;;  %v10265_v51 = vadd.f32 1e-05, %v10257_v27 }
0x34fc   :  { %v14914_v53 = vpop.eup %14913 }
0x34fd   :  { %v10276_v31 = vmul.f32 %v14914_v53, %v18118_v56  ;;  %14927 = vrsqrt.f32 %v10265_v51  ;;  %v12350_v53 = vld [vmem:[%s18596_s11 + $0x11] ss:$0 sm:$0xff] }
0x34fe   :  { %v14916_v16 = vpop.eup %14915 }
0x34ff   :  { %v10275_v30 = vmul.f32 %v14916_v16, %v18120_v13  ;;  %v10288_v14 = vmul.f32 %v12325_v57, %v10276_v31 }
0x3500   :  { %v14918_v15 = vpop.eup %14917 }
0x3501   :  { %v10278_v20 = vmul.f32 %v14918_v15, %v18124_v22  ;;  %v10287_v21 = vmul.f32 %v12325_v57, %v10275_v30  ;;  %v18194_v56 = vadd.f32 %v12326_v48, %v10288_v14 }
0x3502   :  { %v14920_v42 = vpop.eup %14919 }
0x3503   :  { %v18191_v49 = vadd.f32 %v12326_v48, %v10287_v21  ;;  %v10277_v33 = vmul.f32 %v14920_v42, %v18129_v24  ;;  %v10290_v43 = vmul.f32 %v12325_v57, %v10278_v20 }
0x3504   :  { %v14922_v34 = vpop.eup %14921 }
0x3505   :  { %v10280_v13 = vmul.f32 %v14922_v34, %v18134_v1  ;;  %14506 = vmatprep.mubr.msk.f32.mxu0 %vm74_vm0, %v18191_v49  ;;  %v10289_v47 = vmul.f32 %v12325_v57, %v10277_v33  ;;  %v18204_v24 = vadd.f32 %v12326_v48, %v10290_v43 }
0x3506   :  { %v14924_v44 = vpop.eup %14923  ;;  %14507 = vmatmul.mubr.msk.f32.vlgmr.msra.gmra.mxu0 %vm74_vm0, %v18194_v56 }
0x3507   :  { %v18201_v22 = vadd.f32 %v12326_v48, %v10289_v47  ;;  %v10279_v35 = vmul.f32 %v14924_v44, %v18139_v19  ;;  %v10292_v39 = vmul.f32 %v12325_v57, %v10280_v13 }
0x3508   :  { %v14926_v12 = vpop.eup %14925 }
0x3509   :  { %v10282_v52 = vmul.f32 %v14926_v12, %v18144_v46  ;;  %14509 = vmatprep.mubr.msk.f32.mxu0 %vm74_vm0, %v18201_v22  ;;  %v10291_v1 = vmul.f32 %v12325_v57, %v10279_v35  ;;  %v18214_v28 = vadd.f32 %v12326_v48, %v10292_v39 }
0x350a   :  { %v14928_v45 = vpop.eup %14927  ;;  %14510 = vmatmul.mubr.msk.f32.gmra.mxu0 %vm74_vm0, %v18204_v24 }
0x350b   :  { %v18211_v54 = vadd.f32 %v12326_v48, %v10291_v1  ;;  %v10281_v23 = vmul.f32 %v14928_v45, %v18149_v58  ;;  %v10294_v19 = vmul.f32 %v12325_v57, %v10282_v52  ;;  %v12344_v58 = vld [vmem:[%s18595_s10 + $0x98] sm:$0xff] }
0x350c   :  { %14526 = vmatprep.subr.mxu1 %v12344_v58 }
0x350d   :  { %14512 = vmatprep.mubr.msk.f32.mxu0 %vm74_vm0, %v18211_v54  ;;  %v10293_v63 = vmul.f32 %v12325_v57, %v10281_v23  ;;  %v18222_v11 = vadd.f32 %v12326_v48, %v10294_v19  ;;  %14527 = vmatpush3.msra.mxu1 %v12344_v58 }
0x350e   :  { %14513 = vmatmul.mubr.msk.f32.gmra.mxu0 %vm74_vm0, %v18214_v28  ;;  %14528 = vmatprep.subr.mxu1 %v12343_v25 }
0x350f   :  { %v18220_v46 = vadd.f32 %v12326_v48, %v10293_v63  ;;  %14529 = vmatpush3.msra.mxu1 %v12343_v25 }
0x3510   :  { %14530 = vmatprep.subr.mxu1 %v12342_v7 }
0x3511   :  { %14515 = vmatprep.mubr.msk.f32.mxu0 %vm74_vm0, %v18220_v46  ;;  %14531 = vmatpush3.msra.mxu1 %v12342_v7 }
0x3512   :  { %14516 = vmatmul.mubr.msk.f32.gmra.mxu0 %vm74_vm0, %v18222_v11  ;;  %14532 = vmatprep.subr.mxu1 %v12341_v8 }
0x3513   :  { %14533 = vmatpush3.msra.mxu1 %v12341_v8 }
0x3514   :  { %14566 = vmatprep.subr.mxu1 %v18605_v17 }
0x35c6   :  { %v14508_v62 = vpop.f32.mrf.mxu0 }
0x35c7   :  { %v10413_v37 = vadd.f32 %v14508_v62, %v12332_v26 }
0x35c8   :  { %v10407_v6 = vpop.f32.mrf.mxu0 }
0x35c9   :  { %v10408_v40 = vadd.f32 %v12332_v26, %v10407_v6  ;;  %v10447_v5 = vmax.f32 %v10413_v37, 0.0 }
0x35ca   :  { %v14511_v3 = vpop.f32.mrf.mxu0 }
0x35cb   :  { %v10446_v55 = vmax.f32 %v10408_v40, 0.0  ;;  %v10423_v18 = vadd.f32 %v14511_v3, %v12332_v26 }
0x35cc   :  { %v10417_v41 = vpop.f32.mrf.mxu0 }
0x35cd   :  { %v10418_v10 = vadd.f32 %v12332_v26, %v10417_v41  ;;  %14534 = vmatprep.mubr.msk.f32.mxu1 %vm604_vm2, %v10446_v55  ;;  %v10449_v4 = vmax.f32 %v10423_v18, 0.0 }
0x35ce   :  { %v14514_v32 = vpop.f32.mrf.mxu0  ;;  %14535 = vmatmul.mubr.msk.f32.vlgmr.msra.gmra.mxu1 %vm604_vm2, %v10447_v5 }
0x35cf   :  { %v10448_v2 = vmax.f32 %v10418_v10, 0.0  ;;  %v10433_v29 = vadd.f32 %v14514_v32, %v12332_v26 }
0x35d0   :  { %v10427_v0 = vpop.f32.mrf.mxu0 }
0x35d1   :  { %v10428_v59 = vadd.f32 %v12332_v26, %v10427_v0  ;;  %14537 = vmatprep.mubr.msk.f32.mxu1 %vm604_vm2, %v10448_v2  ;;  %v10451_v36 = vmax.f32 %v10433_v29, 0.0 }
0x35d2   :  { %v14517_v38 = vpop.f32.mrf.mxu0  ;;  %14538 = vmatmul.mubr.msk.f32.gmra.mxu1 %vm604_vm2, %v10449_v4 }
0x35d3   :  { %v10450_v50 = vmax.f32 %v10428_v59, 0.0  ;;  %v10443_v9 = vadd.f32 %v14517_v38, %v12332_v26 }
0x35d4   :  { %v10437_v60 = vpop.f32.mrf.mxu0 }
0x35d5   :  { %v10438_v61 = vadd.f32 %v12332_v26, %v10437_v60  ;;  %14540 = vmatprep.mubr.msk.f32.mxu1 %vm604_vm2, %v10450_v50  ;;  %v10453_v51 = vmax.f32 %v10443_v9, 0.0 }
0x35d6   :  { %14541 = vmatmul.mubr.msk.f32.gmra.mxu1 %vm604_vm2, %v10451_v36 }
0x35d7   :  { %v10452_v27 = vmax.f32 %v10438_v61, 0.0 }
0x35d9   :  { %14543 = vmatprep.mubr.msk.f32.mxu1 %vm604_vm2, %v10452_v27 }
0x35da   :  { %14544 = vmatmul.mubr.msk.f32.gmra.mxu1 %vm604_vm2, %v10453_v51 }
0x35db   :  { %14574 = vmatprep.mubr.msk.f32.mxu1 %vm15068_vm3, %v18605_v17 }
0x368e   :  { %v14536_v57 = vpop.f32.mrf.mxu1 }
0x368f   :  { %v10564_v31 = vadd.f32 %v14536_v57, %v12350_v53 }
0x3690   :  { %v10558_v16 = vpop.f32.mrf.mxu1 }
0x3691   :  { %v10598_v30 = vadd.f32 %v10564_v31, %v18194_v56  ;;  %v10559_v15 = vadd.f32 %v12350_v53, %v10558_v16 }
0x3692   :  { %v14539_v14 = vpop.f32.mrf.mxu1 }
0x3693   :  { %v10597_v48 = vadd.f32 %v10559_v15, %v18191_v49  ;;  %v10574_v20 = vadd.f32 %v14539_v14, %v12350_v53  ;;  %v10610_v21 = vsel %vm74_vm0, %v10598_v30, 0.0 }
0x3694   :  { %10611 = vadd.xlane.f32.xlu1 %v10610_v21  ;;  %v10568_v42 = vpop.f32.mrf.mxu1 }
0x3695   :  { %v10600_v33 = vadd.f32 %v10574_v20, %v18204_v24  ;;  %v10569_v34 = vadd.f32 %v12350_v53, %v10568_v42  ;;  %v10607_v43 = vsel %vm74_vm0, %v10597_v48, 0.0  ;;  %v10738_v42 = vld [vmem:[%s18597_s12 + $0x18] sm:$0xff] }
0x3696   :  { %10608 = vadd.xlane.f32.xlu0 %v10607_v43  ;;  %v14542_v13 = vpop.f32.mrf.mxu1  ;;  %14546 = vmatprep.subr.mxu0 %v10738_v42  ;;  %v10735_v43 = vld [vmem:[%s18597_s12] sm:$0xff] }
0x3697   :  { %v10599_v47 = vadd.f32 %v10569_v34, %v18201_v22  ;;  %v10584_v44 = vadd.f32 %v14542_v13, %v12350_v53  ;;  %v10616_v56 = vsel %vm74_vm0, %v10600_v33, 0.0  ;;  %14547 = vmatpush3.msra.mxu0 %v10738_v42  ;;  %v10736_v34 = vld [vmem:[%s18597_s12 + $0x8] sm:$0xff] }
0x3698   :  { %10617 = vadd.xlane.f32.xlu1 %v10616_v56  ;;  %v10578_v35 = vpop.f32.mrf.mxu1 }
0x3699   :  { %v10602_v49 = vadd.f32 %v10584_v44, %v18214_v28  ;;  %v10579_v12 = vadd.f32 %v12350_v53, %v10578_v35  ;;  %v10613_v39 = vsel %vm74_vm0, %v10599_v47, 0.0 }
0x369a   :  { %10614 = vadd.xlane.f32.xlu0 %v10613_v39  ;;  %v14545_v52 = vpop.f32.mrf.mxu1 }
0x369b   :  { %v10601_v24 = vadd.f32 %v10579_v12, %v18211_v54  ;;  %v10594_v1 = vadd.f32 %v14545_v52, %v12350_v53  ;;  %v10622_v45 = vsel %vm74_vm0, %v10602_v49, 0.0 }
0x369c   :  { %10623 = vadd.xlane.f32.xlu1 %v10622_v45  ;;  %v10588_v23 = vpop.f32.mrf.mxu1 }
0x369d   :  { %v10604_v22 = vadd.f32 %v10594_v1, %v18222_v11  ;;  %v10589_v19 = vadd.f32 %v12350_v53, %v10588_v23  ;;  %v10619_v63 = vsel %vm74_vm0, %v10601_v24, 0.0 }
0x369e   :  { %10620 = vadd.xlane.f32.xlu0 %v10619_v63 }
0x369f   :  { %v10603_v28 = vadd.f32 %v10589_v19, %v18220_v46  ;;  %v10628_v58 = vsel %vm74_vm0, %v10604_v22, 0.0 }
0x36a0   :  { %10629 = vadd.xlane.f32.xlu1 %v10628_v58 }
0x36a1   :  { %v10625_v25 = vsel %vm74_vm0, %v10603_v28, 0.0 }
0x36a2   :  { %10626 = vadd.xlane.f32.xlu0 %v10625_v25 }
0x371d   :  { %v10612_v54 = vpop.xlane.xlu1 %10611 }
0x371e   :  { %v10632_v7 = vmul.f32 0.03125, %v10612_v54 }
0x371f   :  { %v10609_v8 = vpop.xlane.xlu0 %10608 }
0x3720   :  { %v18273_v26 = vsub.f32 %v10598_v30, %v10632_v7  ;;  %v10631_v62 = vmul.f32 0.03125, %v10609_v8 }
0x3721   :  { %v10618_v37 = vpop.xlane.xlu1 %10617 }
0x3722   :  { %v18275_v11 = vsub.f32 %v10597_v48, %v10631_v62  ;;  %v10634_v6 = vmul.f32 0.03125, %v10618_v37  ;;  %v10648_v40 = vmul.f32 %v18273_v26, %v18273_v26 }
0x3723   :  { %v10615_v46 = vpop.xlane.xlu0 %10614 }
0x3724   :  { %v18279_v3 = vsub.f32 %v10600_v33, %v10634_v6  ;;  %v10633_v55 = vmul.f32 0.03125, %v10615_v46  ;;  %v10658_v5 = vsel %vm74_vm0, %v10648_v40, 0.0  ;;  %v10647_v18 = vmul.f32 %v18275_v11, %v18275_v11  ;;  %v10737_v33 = vld [vmem:[%s18597_s12 + $0x10] sm:$0xff] }
0x3725   :  { %v10624_v41 = vpop.xlane.xlu1 %10623  ;;  %10659 = vadd.xlane.f32.xlu1 %v10658_v5  ;;  %14548 = vmatprep.subr.mxu0 %v10737_v33  ;;  %v12361_v40 = vld [vmem:[%s18596_s11 + $0x14] ss:$0 sm:$0xff] }
0x3726   :  { %v18284_v10 = vsub.f32 %v10599_v47, %v10633_v55  ;;  %v10636_v32 = vmul.f32 0.03125, %v10624_v41  ;;  %v10655_v2 = vsel %vm74_vm0, %v10647_v18, 0.0  ;;  %v10650_v4 = vmul.f32 %v18279_v3, %v18279_v3  ;;  %14549 = vmatpush3.msra.mxu0 %v10737_v33 }
0x3727   :  { %10656 = vadd.xlane.f32.xlu0 %v10655_v2  ;;  %v10621_v29 = vpop.xlane.xlu0 %10620  ;;  %14550 = vmatprep.subr.mxu0 %v10736_v34 }
0x3728   :  { %v18289_v0 = vsub.f32 %v10602_v49, %v10636_v32  ;;  %v10635_v59 = vmul.f32 0.03125, %v10621_v29  ;;  %v10664_v38 = vsel %vm74_vm0, %v10650_v4, 0.0  ;;  %v10649_v50 = vmul.f32 %v18284_v10, %v18284_v10  ;;  %14551 = vmatpush3.msra.mxu0 %v10736_v34  ;;  %v12362_v32 = vld [vmem:[%s18596_s11 + $0x15] ss:$0 sm:$0xff] }
0x3729   :  { %10665 = vadd.xlane.f32.xlu1 %v10664_v38  ;;  %v10630_v36 = vpop.xlane.xlu1 %10629  ;;  %14552 = vmatprep.subr.mxu0 %v10735_v43 }
0x372a   :  { %v18294_v9 = vsub.f32 %v10601_v24, %v10635_v59  ;;  %v10638_v60 = vmul.f32 0.03125, %v10630_v36  ;;  %v10661_v61 = vsel %vm74_vm0, %v10649_v50, 0.0  ;;  %v10652_v27 = vmul.f32 %v18289_v0, %v18289_v0  ;;  %14553 = vmatpush3.msra.mxu0 %v10735_v43 }
0x372b   :  { %10662 = vadd.xlane.f32.xlu0 %v10661_v61  ;;  %v10627_v51 = vpop.xlane.xlu0 %10626  ;;  %14577 = vmatprep.subr.mxu0 %v18605_v17 }
0x372c   :  { %v18299_v53 = vsub.f32 %v10604_v22, %v10638_v60  ;;  %v10637_v57 = vmul.f32 0.03125, %v10627_v51  ;;  %v10670_v31 = vsel %vm74_vm0, %v10652_v27, 0.0  ;;  %v10651_v16 = vmul.f32 %v18294_v9, %v18294_v9 }
0x372d   :  { %10671 = vadd.xlane.f32.xlu1 %v10670_v31 }
0x372e   :  { %v18304_v30 = vsub.f32 %v10603_v28, %v10637_v57  ;;  %v10667_v15 = vsel %vm74_vm0, %v10651_v16, 0.0  ;;  %v10654_v14 = vmul.f32 %v18299_v53, %v18299_v53 }
0x372f   :  { %10668 = vadd.xlane.f32.xlu0 %v10667_v15 }
0x3730   :  { %v10676_v48 = vsel %vm74_vm0, %v10654_v14, 0.0  ;;  %v10653_v20 = vmul.f32 %v18304_v30, %v18304_v30 }
0x3731   :  { %10677 = vadd.xlane.f32.xlu1 %v10676_v48 }
0x3732   :  { %v10673_v21 = vsel %vm74_vm0, %v10653_v20, 0.0 }
0x3733   :  { %10674 = vadd.xlane.f32.xlu0 %v10673_v21 }
0x37ae   :  { %v10660_v13 = vpop.xlane.xlu1 %10659 }
0x37af   :  { %v10680_v47 = vmul.f32 0.03125, %v10660_v13 }
0x37b0   :  { %v10657_v44 = vpop.xlane.xlu0 %10656 }
0x37b1   :  { %v10688_v56 = vadd.f32 1e-05, %v10680_v47  ;;  %v10679_v35 = vmul.f32 0.03125, %v10657_v44 }
0x37b2   :  { %v10666_v49 = vpop.xlane.xlu1 %10665 }
0x37b3   :  { %14929 = vrsqrt.f32 %v10688_v56  ;;  %v10687_v12 = vadd.f32 1e-05, %v10679_v35  ;;  %v10682_v39 = vmul.f32 0.03125, %v10666_v49 }
0x37b4   :  { %v10663_v52 = vpop.xlane.xlu0 %10662 }
0x37b5   :  { %14931 = vrsqrt.f32 %v10687_v12  ;;  %v10690_v24 = vadd.f32 1e-05, %v10682_v39  ;;  %v10681_v1 = vmul.f32 0.03125, %v10663_v52 }
0x37b6   :  { %v10672_v45 = vpop.xlane.xlu1 %10671 }
0x37b7   :  { %14933 = vrsqrt.f32 %v10690_v24  ;;  %v10689_v23 = vadd.f32 1e-05, %v10681_v1  ;;  %v10684_v22 = vmul.f32 0.03125, %v10672_v45  ;;  %v12372_v45 = vld [vmem:[%s18597_s12 + $0x28] ss:$0 sm:$0xff] }
0x37b8   :  { %v10669_v19 = vpop.xlane.xlu0 %10668 }
0x37b9   :  { %14935 = vrsqrt.f32 %v10689_v23  ;;  %v10692_v63 = vadd.f32 1e-05, %v10684_v22  ;;  %v10683_v28 = vmul.f32 0.03125, %v10669_v19 }
0x37ba   :  { %v10678_v58 = vpop.xlane.xlu1 %10677 }
0x37bb   :  { %14937 = vrsqrt.f32 %v10692_v63  ;;  %v10691_v25 = vadd.f32 1e-05, %v10683_v28  ;;  %v10686_v54 = vmul.f32 0.03125, %v10678_v58 }
0x37bc   :  { %v10675_v7 = vpop.xlane.xlu0 %10674 }
0x37bd   :  { %14939 = vrsqrt.f32 %v10691_v25  ;;  %v10694_v8 = vadd.f32 1e-05, %v10686_v54  ;;  %v10685_v62 = vmul.f32 0.03125, %v10675_v7 }
0x37bf   :  { %14941 = vrsqrt.f32 %v10694_v8  ;;  %v10693_v37 = vadd.f32 1e-05, %v10685_v62 }
0x37c0   :  { %v14930_v6 = vpop.eup %14929 }
0x37c1   :  { %v10704_v46 = vmul.f32 %v14930_v6, %v18273_v26  ;;  %14943 = vrsqrt.f32 %v10693_v37 }
0x37c2   :  { %v14932_v55 = vpop.eup %14931 }
0x37c3   :  { %v10703_v5 = vmul.f32 %v14932_v55, %v18275_v11  ;;  %v10716_v41 = vmul.f32 %v12361_v40, %v10704_v46 }
0x37c4   :  { %v14934_v18 = vpop.eup %14933 }
0x37c5   :  { %v10706_v2 = vmul.f32 %v14934_v18, %v18279_v3  ;;  %v10715_v4 = vmul.f32 %v12361_v40, %v10703_v5  ;;  %v18338_v26 = vadd.f32 %v12362_v32, %v10716_v41 }
0x37c6   :  { %v14936_v29 = vpop.eup %14935 }
0x37c7   :  { %v18335_v59 = vadd.f32 %v12362_v32, %v10715_v4  ;;  %v10705_v38 = vmul.f32 %v14936_v29, %v18284_v10  ;;  %v10718_v36 = vmul.f32 %v12361_v40, %v10706_v2 }
0x37c8   :  { %v14938_v50 = vpop.eup %14937 }
0x37c9   :  { %v10708_v11 = vmul.f32 %v14938_v50, %v18289_v0  ;;  %14554 = vmatprep.mubr.msk.f32.mxu0 %vm74_vm0, %v18335_v59  ;;  %v10717_v60 = vmul.f32 %v12361_v40, %v10705_v38  ;;  %v18348_v10 = vadd.f32 %v12362_v32, %v10718_v36  ;;  %v15069_v36 = vmov 0  }
0x37ca   :  { %v14940_v61 = vpop.eup %14939  ;;  %14555 = vmatmul.mubr.msk.f32.vlgmr.msra.gmra.mxu0 %vm74_vm0, %v18338_v26  ;;  %14604 = vset.pattern.permute.xlu1 %v15069_v36 }
0x37cb   :  { %v18345_v3 = vadd.f32 %v12362_v32, %v10717_v60  ;;  %v10707_v27 = vmul.f32 %v14940_v61, %v18294_v9  ;;  %v10720_v57 = vmul.f32 %v12361_v40, %v10708_v11  ;;  %14603 = vset.pattern.permute.xlu0 %v15069_v36  ;;  %v10919_v11 = vld [vmem:[%s18588_s3 + $0x8] sm:$0xff]  ;;  %v10918_v61 = vld [vmem:[%s18588_s3] sm:$0xff] }
0x37cc   :  { %v14942_v51 = vpop.eup %14941 }
0x37cd   :  { %v10710_v31 = vmul.f32 %v14942_v51, %v18299_v53  ;;  %14557 = vmatprep.mubr.msk.f32.mxu0 %vm74_vm0, %v18345_v3  ;;  %v10719_v0 = vmul.f32 %v12361_v40, %v10707_v27  ;;  %v18358_v48 = vadd.f32 %v12362_v32, %v10720_v57  ;;  %v10921_v57 = vld [vmem:[%s18588_s3 + $0x18] sm:$0xff] }
0x37ce   :  { %v14944_v16 = vpop.eup %14943  ;;  %14558 = vmatmul.mubr.msk.f32.gmra.mxu0 %vm74_vm0, %v18348_v10 }
0x37cf   :  { %v18355_v15 = vadd.f32 %v12362_v32, %v10719_v0  ;;  %v10709_v14 = vmul.f32 %v14944_v16, %v18304_v30  ;;  %v10722_v9 = vmul.f32 %v12361_v40, %v10710_v31  ;;  %v12363_v30 = vld [vmem:[%s18597_s12 + $0x20] ss:$0 sm:$0xff] }
0x37d1   :  { %14560 = vmatprep.mubr.msk.f32.mxu0 %vm74_vm0, %v18355_v15  ;;  %v10721_v20 = vmul.f32 %v12361_v40, %v10709_v14  ;;  %v18366_v21 = vadd.f32 %v12362_v32, %v10722_v9  ;;  %v10920_v9 = vld [vmem:[%s18588_s3 + $0x10] sm:$0xff] }
0x37d2   :  { %14561 = vmatmul.mubr.msk.f32.gmra.mxu0 %vm74_vm0, %v18358_v48 }
0x37d3   :  { %v18364_v53 = vadd.f32 %v12362_v32, %v10721_v20 }
0x37d5   :  { %14563 = vmatprep.mubr.msk.f32.mxu0 %vm74_vm0, %v18364_v53 }
0x37d6   :  { %14564 = vmatmul.mubr.msk.f32.gmra.mxu0 %vm74_vm0, %v18366_v21 }
0x37d7   :  { %14585 = vmatprep.mubr.msk.f32.mxu0 %vm15068_vm3, %v18605_v17 }
0x388a   :  { %v14556_v42 = vpop.f32.mrf.mxu0 }
0x388b   :  { %v10840_v33 = vadd.f32 %v14556_v42, %v12363_v30 }
0x388c   :  { %v10834_v34 = vpop.f32.mrf.mxu0 }
0x388d   :  { %14945 = vtanh.f32 %v10840_v33  ;;  %v10835_v43 = vadd.f32 %v12363_v30, %v10834_v34 }
0x388e   :  { %v14559_v13 = vpop.f32.mrf.mxu0 }
0x388f   :  { %14947 = vtanh.f32 %v10835_v43  ;;  %v10850_v47 = vadd.f32 %v14559_v13, %v12363_v30  ;;  %v10923_v43 = vld [vmem:[%s18588_s3 + $0x28] sm:$0xff] }
0x3890   :  { %v10844_v44 = vpop.f32.mrf.mxu0 }
0x3891   :  { %14949 = vtanh.f32 %v10850_v47  ;;  %v10845_v56 = vadd.f32 %v12363_v30, %v10844_v44 }
0x3892   :  { %v14562_v35 = vpop.f32.mrf.mxu0 }
0x3893   :  { %14951 = vtanh.f32 %v10845_v56  ;;  %v10860_v49 = vadd.f32 %v14562_v35, %v12363_v30 }
0x3894   :  { %v10854_v12 = vpop.f32.mrf.mxu0 }
0x3895   :  { %14953 = vtanh.f32 %v10860_v49  ;;  %v10855_v39 = vadd.f32 %v12363_v30, %v10854_v12  ;;  %v10922_v12 = vld [vmem:[%s18588_s3 + $0x20] sm:$0xff] }
0x3896   :  { %v14565_v52 = vpop.f32.mrf.mxu0 }
0x3897   :  { %14955 = vtanh.f32 %v10855_v39  ;;  %v10870_v24 = vadd.f32 %v14565_v52, %v12363_v30 }
0x3898   :  { %v10864_v1 = vpop.f32.mrf.mxu0 }
0x3899   :  { %14957 = vtanh.f32 %v10870_v24  ;;  %v10865_v23 = vadd.f32 %v12363_v30, %v10864_v1 }
0x389a   :  { %v14946_v22 = vpop.eup %14945 }
0x389b   :  { %14959 = vtanh.f32 %v10865_v23  ;;  %v10887_v19 = vmul.f32 %v14946_v22, %v12372_v45 }
0x389c   :  { %v14948_v63 = vpop.eup %14947 }
0x389d   :  { %v10897_v28 = vsel %vm74_vm0, %v10887_v19, 0.0  ;;  %v10886_v58 = vmul.f32 %v14948_v63, %v12372_v45  ;;  %v10925_v19 = vld [vmem:[%s18588_s3 + $0x38] sm:$0xff] }
0x389e   :  { %v14950_v25 = vpop.eup %14949  ;;  %10898 = vadd.xlane.f32.xlu1 %v10897_v28 }
0x389f   :  { %v10894_v54 = vsel %vm74_vm0, %v10886_v58, 0.0  ;;  %v10889_v7 = vmul.f32 %v14950_v25, %v12372_v45 }
0x38a0   :  { %v14952_v8 = vpop.eup %14951  ;;  %10895 = vadd.xlane.f32.xlu0 %v10894_v54 }
0x38a1   :  { %v10903_v62 = vsel %vm74_vm0, %v10889_v7, 0.0  ;;  %v10888_v37 = vmul.f32 %v14952_v8, %v12372_v45 }
0x38a2   :  { %v14954_v6 = vpop.eup %14953  ;;  %10904 = vadd.xlane.f32.xlu1 %v10903_v62  ;;  %v10924_v62 = vld [vmem:[%s18588_s3 + $0x30] sm:$0xff] }
0x38a3   :  { %v10900_v40 = vsel %vm74_vm0, %v10888_v37, 0.0  ;;  %v10891_v46 = vmul.f32 %v14954_v6, %v12372_v45 }
0x38a4   :  { %v14956_v55 = vpop.eup %14955  ;;  %10901 = vadd.xlane.f32.xlu0 %v10900_v40 }
0x38a5   :  { %v10909_v5 = vsel %vm74_vm0, %v10891_v46, 0.0  ;;  %v10890_v18 = vmul.f32 %v14956_v55, %v12372_v45 }
0x38a6   :  { %v14958_v41 = vpop.eup %14957  ;;  %10910 = vadd.xlane.f32.xlu1 %v10909_v5 }
0x38a7   :  { %v10906_v32 = vsel %vm74_vm0, %v10890_v18, 0.0  ;;  %v10893_v2 = vmul.f32 %v14958_v41, %v12372_v45 }
0x38a8   :  { %v14960_v4 = vpop.eup %14959  ;;  %10907 = vadd.xlane.f32.xlu0 %v10906_v32 }
0x38a9   :  { %v10915_v29 = vsel %vm74_vm0, %v10893_v2, 0.0  ;;  %v10892_v38 = vmul.f32 %v14960_v4, %v12372_v45 }
0x38aa   :  { %10916 = vadd.xlane.f32.xlu1 %v10915_v29 }
0x38ab   :  { %v10912_v50 = vsel %vm74_vm0, %v10892_v38, 0.0 }
0x38ac   :  { %10913 = vadd.xlane.f32.xlu0 %v10912_v50 }
0x3927   :  { %v10899_v60 = vpop.xlane.xlu1 %10898 }
0x3928   :  { %v10927_v27 = vadd.f32 %v10919_v11, %v10899_v60 }
0x3929   :  { %v10896_v51 = vpop.xlane.xlu0 %10895 }
0x392a   :  { %v10942_v31 = vsel %vm10934_vm12, %v10927_v27, -inf  ;;  %v10926_v0 = vadd.f32 %v10918_v61, %v10896_v51 }
0x392b   :  { %v10943_v16 = vrot.slane %v10942_v31, 4  ;;  %v10905_v14 = vpop.xlane.xlu1 %10904 }
0x392c   :  { %v10935_v20 = vsel %vm10934_vm12, %v10926_v0, -inf  ;;  %v18402_v30 = vadd.f32 %v10921_v57, %v10905_v14 }
0x392d   :  { %v10944_v42 = vmax.f32 %v10942_v31, %v10943_v16  ;;  %v10936_v33 = vrot.slane %v10935_v20, 4  ;;  %v10902_v34 = vpop.xlane.xlu0 %10901 }
0x392e   :  { %v10956_v13 = vsel %vm10934_vm12, %v18402_v30, -inf  ;;  %v18409_v47 = vadd.f32 %v10920_v9, %v10902_v34 }
0x392f   :  { %v10945_v44 = vrot.slane %v10944_v42, 2  ;;  %v10937_v56 = vmax.f32 %v10935_v20, %v10936_v33  ;;  %v10957_v35 = vrot.slane %v10956_v13, 4  ;;  %v10911_v49 = vpop.xlane.xlu1 %10910 }
0x3930   :  { %v10949_v39 = vsel %vm10934_vm12, %v18409_v47, -inf  ;;  %v18416_v52 = vadd.f32 %v10923_v43, %v10911_v49 }
0x3931   :  { %v10946_v24 = vmax.f32 %v10944_v42, %v10945_v44  ;;  %v10938_v1 = vrot.slane %v10937_v56, 2  ;;  %v10958_v45 = vmax.f32 %v10956_v13, %v10957_v35  ;;  %v10950_v23 = vrot.slane %v10949_v39, 4  ;;  %v10908_v22 = vpop.xlane.xlu0 %10907 }
0x3932   :  { %v10970_v63 = vsel %vm10934_vm12, %v18416_v52, -inf  ;;  %v10930_v28 = vadd.f32 %v10922_v12, %v10908_v22 }
0x3933   :  { %v10947_v58 = vrot.slane %v10946_v24, 1  ;;  %v10939_v25 = vmax.f32 %v10937_v56, %v10938_v1  ;;  %v10959_v54 = vrot.slane %v10958_v45, 2  ;;  %v10951_v7 = vmax.f32 %v10949_v39, %v10950_v23  ;;  %v10917_v8 = vpop.xlane.xlu1 %10916 }
0x3934   :  { %v10971_v37 = vrot.slane %v10970_v63, 4  ;;  %v10963_v6 = vsel %vm10934_vm12, %v10930_v28, -inf  ;;  %v10933_v40 = vadd.f32 %v10925_v19, %v10917_v8 }
0x3935   :  { %v10948_v46 = vmax.f32 %v10946_v24, %v10947_v58  ;;  %v10940_v55 = vrot.slane %v10939_v25, 1  ;;  %v10960_v5 = vmax.f32 %v10958_v45, %v10959_v54  ;;  %v10952_v18 = vrot.slane %v10951_v7, 2  ;;  %v10914_v41 = vpop.xlane.xlu0 %10913 }
0x3936   :  { %v10972_v32 = vmax.f32 %v10970_v63, %v10971_v37  ;;  %v10964_v2 = vrot.slane %v10963_v6, 4  ;;  %v10984_v4 = vsel %vm10934_vm12, %v10933_v40, -inf  ;;  %v10932_v29 = vadd.f32 %v10924_v62, %v10914_v41 }
0x3937   :  { %v10992_v38 = vsub.f32 %v10927_v27, %v10948_v46  ;;  %v10941_v50 = vmax.f32 %v10939_v25, %v10940_v55  ;;  %v10961_v36 = vrot.slane %v10960_v5, 1  ;;  %v10953_v11 = vmax.f32 %v10951_v7, %v10952_v18 }
0x3938   :  { %v10973_v60 = vrot.slane %v10972_v32, 2  ;;  %v10965_v61 = vmax.f32 %v10963_v6, %v10964_v2  ;;  %v10985_v51 = vrot.slane %v10984_v4, 4  ;;  %v10977_v57 = vsel %vm10934_vm12, %v10932_v29, -inf }
0x3939   :  { %v11001_v31 = vmul.f32 1.442695, %v10992_v38  ;;  %v10991_v16 = vsub.f32 %v10926_v0, %v10941_v50  ;;  %v10962_v14 = vmax.f32 %v10960_v5, %v10961_v36  ;;  %v10954_v9 = vrot.slane %v10953_v11, 1 }
0x393a   :  { %v10974_v20 = vmax.f32 %v10972_v32, %v10973_v60  ;;  %v10966_v42 = vrot.slane %v10965_v61, 2  ;;  %v10986_v33 = vmax.f32 %v10984_v4, %v10985_v51  ;;  %v10978_v34 = vrot.slane %v10977_v57, 4 }
0x393b   :  { %14961 = vpow2.f32 %v11001_v31  ;;  %v10999_v43 = vmul.f32 1.442695, %v10991_v16  ;;  %v10994_v27 = vsub.f32 %v18402_v30, %v10962_v14  ;;  %v10955_v13 = vmax.f32 %v10953_v11, %v10954_v9 }
0x393c   :  { %v10975_v44 = vrot.slane %v10974_v20, 1  ;;  %v10967_v56 = vmax.f32 %v10965_v61, %v10966_v42  ;;  %v10987_v35 = vrot.slane %v10986_v33, 2  ;;  %v10979_v49 = vmax.f32 %v10977_v57, %v10978_v34 }
0x393d   :  { %14963 = vpow2.f32 %v10999_v43  ;;  %v11005_v12 = vmul.f32 1.442695, %v10994_v27  ;;  %v10993_v39 = vsub.f32 %v18409_v47, %v10955_v13 }
0x393e   :  { %v10976_v0 = vmax.f32 %v10974_v20, %v10975_v44  ;;  %v10968_v24 = vrot.slane %v10967_v56, 1  ;;  %v10988_v1 = vmax.f32 %v10986_v33, %v10987_v35  ;;  %v10980_v45 = vrot.slane %v10979_v49, 2 }
0x393f   :  { %14965 = vpow2.f32 %v11005_v12  ;;  %v11003_v23 = vmul.f32 1.442695, %v10993_v39 }
0x3940   :  { %v10996_v22 = vsub.f32 %v18416_v52, %v10976_v0  ;;  %v10969_v19 = vmax.f32 %v10967_v56, %v10968_v24  ;;  %v10989_v63 = vrot.slane %v10988_v1, 1  ;;  %v10981_v30 = vmax.f32 %v10979_v49, %v10980_v45 }
0x3941   :  { %14967 = vpow2.f32 %v11003_v23 }
0x3942   :  { %v11009_v58 = vmul.f32 1.442695, %v10996_v22  ;;  %v10995_v25 = vsub.f32 %v10930_v28, %v10969_v19  ;;  %v10990_v54 = vmax.f32 %v10988_v1, %v10989_v63  ;;  %v10982_v7 = vrot.slane %v10981_v30, 1 }
0x3944   :  { %14969 = vpow2.f32 %v11009_v58  ;;  %v11007_v8 = vmul.f32 1.442695, %v10995_v25  ;;  %v10998_v62 = vsub.f32 %v10933_v40, %v10990_v54  ;;  %v10983_v47 = vmax.f32 %v10981_v30, %v10982_v7 }
0x3946   :  { %14971 = vpow2.f32 %v11007_v8  ;;  %v11013_v37 = vmul.f32 1.442695, %v10998_v62  ;;  %v10997_v6 = vsub.f32 %v10932_v29, %v10983_v47 }
0x3948   :  { %v18432_v46 = vpop.eup %14961  ;;  %14973 = vpow2.f32 %v11013_v37  ;;  %v11011_v55 = vmul.f32 1.442695, %v10997_v6 }
0x3949   :  { %v11022_v52 = vsel %vm10934_vm12, %v18432_v46, 0.0 }
0x394a   :  { %v18436_v5 = vpop.eup %14963  ;;  %v11023_v18 = vrot.slane %v11022_v52, 4  ;;  %14975 = vpow2.f32 %v11011_v55 }
0x394b   :  { %v11015_v28 = vsel %vm10934_vm12, %v18436_v5, 0.0 }
0x394c   :  { %v18440_v41 = vpop.eup %14965  ;;  %v11024_v40 = vadd.f32 %v11023_v18, %v11022_v52  ;;  %v11016_v32 = vrot.slane %v11015_v28, 4 }
0x394d   :  { %v11036_v2 = vsel %vm10934_vm12, %v18440_v41, 0.0 }
0x394e   :  { %v18444_v4 = vpop.eup %14967  ;;  %v11025_v29 = vrot.slane %v11024_v40, 2  ;;  %v11017_v38 = vadd.f32 %v11016_v32, %v11015_v28  ;;  %v11037_v50 = vrot.slane %v11036_v2, 4 }
0x394f   :  { %v11029_v36 = vsel %vm10934_vm12, %v18444_v4, 0.0 }
0x3950   :  { %v11026_v11 = vadd.f32 %v11025_v29, %v11024_v40  ;;  %v11018_v60 = vrot.slane %v11017_v38, 2  ;;  %v11038_v61 = vadd.f32 %v11037_v50, %v11036_v2  ;;  %v11030_v51 = vrot.slane %v11029_v36, 4 }
0x3951   :  { %v18448_v57 = vpop.eup %14969 }
0x3952   :  { %v11027_v31 = vrot.slane %v11026_v11, 1  ;;  %v11019_v16 = vadd.f32 %v11018_v60, %v11017_v38  ;;  %v11039_v14 = vrot.slane %v11038_v61, 2  ;;  %v11031_v9 = vadd.f32 %v11030_v51, %v11029_v36 }
0x3953   :  { %v18450_v20 = vpop.eup %14971  ;;  %v11050_v42 = vsel %vm10934_vm12, %v18448_v57, 0.0 }
0x3954   :  { %v11020_v33 = vrot.slane %v11019_v16, 1  ;;  %v11040_v34 = vadd.f32 %v11039_v14, %v11038_v61  ;;  %v11032_v43 = vrot.slane %v11031_v9, 2  ;;  %v11051_v27 = vrot.slane %v11050_v42, 4 }
0x3955   :  { %v18454_v13 = vpop.eup %14973  ;;  %v11043_v44 = vsel %vm10934_vm12, %v18450_v20, 0.0  ;;  %v11028_v56 = vadd.f32 %v11027_v31, %v11026_v11 }
0x3956   :  { %v11041_v35 = vrot.slane %v11040_v34, 1  ;;  %v11033_v49 = vadd.f32 %v11032_v43, %v11031_v9  ;;  %v11052_v12 = vadd.f32 %v11051_v27, %v11050_v42  ;;  %v11044_v39 = vrot.slane %v11043_v44, 4  ;;  %v12373_v27 = vld [vmem:[%s18597_s12 + $0x30] sm:$0xff] }
0x3957   :  { %v14976_v0 = vpop.eup %14975  ;;  %v11064_v24 = vsel %vm10934_vm12, %v18454_v13, 0.0  ;;  %14977 = vrcp.f32 %v11028_v56  ;;  %v11021_v1 = vadd.f32 %v11020_v33, %v11019_v16 }
0x3958   :  { %v11034_v45 = vrot.slane %v11033_v49, 1  ;;  %v11053_v23 = vrot.slane %v11052_v12, 2  ;;  %v11045_v22 = vadd.f32 %v11044_v39, %v11043_v44  ;;  %v11065_v19 = vrot.slane %v11064_v24, 4 }
0x3959   :  { %v11057_v63 = vsel %vm10934_vm12, %v14976_v0, 0.0  ;;  %14979 = vrcp.f32 %v11021_v1  ;;  %v11042_v30 = vadd.f32 %v11041_v35, %v11040_v34 }
0x395a   :  { %v11054_v58 = vadd.f32 %v11053_v23, %v11052_v12  ;;  %v11046_v25 = vrot.slane %v11045_v22, 2  ;;  %v11066_v54 = vadd.f32 %v11065_v19, %v11064_v24  ;;  %v11058_v7 = vrot.slane %v11057_v63, 4 }
0x395b   :  { %14981 = vrcp.f32 %v11042_v30  ;;  %v11035_v8 = vadd.f32 %v11034_v45, %v11033_v49 }
0x395c   :  { %v11055_v62 = vrot.slane %v11054_v58, 1  ;;  %v11047_v47 = vadd.f32 %v11046_v25, %v11045_v22  ;;  %v11059_v37 = vadd.f32 %v11058_v7, %v11057_v63  ;;  %v11067_v6 = vrot.slane %v11066_v54, 2 }
0x395d   :  { %14983 = vrcp.f32 %v11035_v8 }
0x395e   :  { %v11048_v55 = vrot.slane %v11047_v47, 1  ;;  %v11060_v52 = vrot.slane %v11059_v37, 2  ;;  %v11056_v18 = vadd.f32 %v11055_v62, %v11054_v58  ;;  %v11068_v40 = vadd.f32 %v11067_v6, %v11066_v54 }
0x3960   :  { %v11061_v28 = vadd.f32 %v11060_v52, %v11059_v37  ;;  %14985 = vrcp.f32 %v11056_v18  ;;  %v11049_v32 = vadd.f32 %v11048_v55, %v11047_v47  ;;  %v11069_v38 = vrot.slane %v11068_v40, 1 }
0x3962   :  { %v11062_v2 = vrot.slane %v11061_v28, 1  ;;  %14987 = vrcp.f32 %v11049_v32  ;;  %v11070_v31 = vadd.f32 %v11069_v38, %v11068_v40 }
0x3964   :  { %v14978_v29 = vpop.eup %14977  ;;  %v11063_v36 = vadd.f32 %v11062_v2, %v11061_v28 }
0x3965   :  { %v11080_v50 = vmul.f32 %v14978_v29, %v18432_v46 }
0x3966   :  { %v14980_v11 = vpop.eup %14979  ;;  %14989 = vrcp.f32 %v11063_v36 }
0x3967   :  { %11094 = vperm.xlu1 %14604, %v11080_v50   ;;  %v11079_v60 = vmul.f32 %v14980_v11, %v18436_v5  ;;  %14991 = vrcp.f32 %v11070_v31 }
0x3968   :  { %v14982_v61 = vpop.eup %14981 }
0x3969   :  { %11089 = vperm.xlu0 %14603, %v11079_v60   ;;  %v11082_v51 = vmul.f32 %v14982_v61, %v18440_v41 }
0x396a   :  { %v14984_v16 = vpop.eup %14983 }
0x396b   :  { %11104 = vperm.xlu1 %14604, %v11082_v51   ;;  %v11081_v14 = vmul.f32 %v14984_v16, %v18444_v4  ;;  %v12376_v4 = vld [vmem:[%s18597_s12 + $0x48] sm:$0xff] }
0x396c   :  { %14567 = vmatpush3.msra.mxu1 %v12376_v4 }
0x396d   :  { %v14986_v9 = vpop.eup %14985  ;;  %14568 = vmatprep.subr.mxu1 %v18605_v17 }
0x396e   :  { %v11084_v46 = vmul.f32 %v14986_v9, %v18448_v57  ;;  %v12375_v57 = vld [vmem:[%s18597_s12 + $0x40] sm:$0xff] }
0x396f   :  { %11099 = vperm.xlu1 %14604, %v11081_v14   ;;  %v14988_v42 = vpop.eup %14987  ;;  %14569 = vmatpush3.msra.mxu1 %v12375_v57 }
0x3970   :  { %v11083_v33 = vmul.f32 %v14988_v42, %v18450_v20  ;;  %14570 = vmatprep.subr.mxu1 %v18605_v17  ;;  %v12374_v20 = vld [vmem:[%s18597_s12 + $0x38] sm:$0xff] }
0x3971   :  { %14571 = vmatpush3.msra.mxu1 %v12374_v20 }
0x3972   :  { %14572 = vmatprep.subr.mxu1 %v18605_v17 }
0x3973   :  { %11114 = vperm.xlu1 %14604, %v11084_v46   ;;  %v14990_v5 = vpop.eup %14989  ;;  %14573 = vmatpush3.msra.mxu1 %v12373_v27 }
0x3974   :  { %v11085_v34 = vmul.f32 %v14990_v5, %v14976_v0  ;;  %v14992_v43 = vpop.eup %14991  ;;  %14588 = vmatprep.subr.mxu1 %v18605_v17 }
0x3975   :  { %v11086_v41 = vmul.f32 %v14992_v43, %v18454_v13 }
0x3977   :  { %11109 = vperm.xlu1 %14604, %v11083_v33  }
0x397b   :  { %11119 = vperm.xlu1 %14604, %v11085_v34  }
0x397f   :  { %11124 = vperm.xlu1 %14604, %v11086_v41  }
0x39e2   :  { %v11095_v13 = vpop.permute.xlu1 %11094 }
0x39e3   :  { %v11128_v44 = vmul.f32 %v11095_v13, %v18338_v26 }
0x39e4   :  { %v11090_v56 = vpop.permute.xlu0 %11089 }
0x39e5   :  { %v11127_v35 = vmul.f32 %v11090_v56, %v18335_v59  ;;  %v11142_v49 = vsel %vm74_vm0, %v11128_v44, 0.0 }
0x39e6   :  { %v11105_v12 = vpop.permute.xlu1 %11104  ;;  %v11143_v1 = vrot.slane %v11142_v49, 4 }
0x39e7   :  { %v11135_v39 = vsel %vm74_vm0, %v11127_v35, 0.0  ;;  %v11130_v0 = vmul.f32 %v11105_v12, %v18348_v10 }
0x39e8   :  { %v11136_v24 = vrot.slane %v11135_v39, 4  ;;  %v11144_v63 = vadd.f32 %v11143_v1, %v11142_v49 }
0x39e9   :  { %v11156_v22 = vsel %vm74_vm0, %v11130_v0, 0.0 }
0x39ea   :  { %v11100_v45 = vpop.permute.xlu1 %11099  ;;  %v11137_v23 = vadd.f32 %v11136_v24, %v11135_v39  ;;  %v11157_v30 = vrot.slane %v11156_v22, 4  ;;  %v11145_v8 = vrot.slane %v11144_v63, 2 }
0x39eb   :  { %v11129_v19 = vmul.f32 %v11100_v45, %v18345_v3 }
0x39ec   :  { %v11138_v25 = vrot.slane %v11137_v23, 2  ;;  %v11158_v62 = vadd.f32 %v11157_v30, %v11156_v22  ;;  %v11146_v18 = vadd.f32 %v11145_v8, %v11144_v63 }
0x39ed   :  { %v11149_v26 = vsel %vm74_vm0, %v11129_v19, 0.0 }
0x39ee   :  { %v11150_v59 = vrot.slane %v11149_v26, 4  ;;  %v11115_v58 = vpop.permute.xlu1 %11114  ;;  %v11139_v55 = vadd.f32 %v11138_v25, %v11137_v23  ;;  %v11159_v32 = vrot.slane %v11158_v62, 2  ;;  %v11147_v60 = vrot.slane %v11146_v18, 1  ;;  %v12378_v25 = vld [vmem:[%s18597_s12 + $0x50] ss:$0 sm:$0xff] }
0x39ef   :  { %v11132_v54 = vmul.f32 %v11115_v58, %v18358_v48 }
0x39f0   :  { %v11151_v7 = vadd.f32 %v11150_v59, %v11149_v26  ;;  %v11140_v38 = vrot.slane %v11139_v55, 1  ;;  %v11160_v31 = vadd.f32 %v11159_v32, %v11158_v62  ;;  %v11148_v34 = vadd.f32 %v11147_v60, %v11146_v18  ;;  %v11315_v18 = vld [vmem:[%s18589_s4] sm:$0xf] }
0x39f1   :  { %v11170_v10 = vsel %vm74_vm0, %v11132_v54, 0.0 }
0x39f2   :  { %v11152_v47 = vrot.slane %v11151_v7, 2  ;;  %v11171_v37 = vrot.slane %v11170_v10, 4  ;;  %v11110_v6 = vpop.permute.xlu1 %11109  ;;  %v11141_v9 = vadd.f32 %v11140_v38, %v11139_v55  ;;  %v11161_v41 = vrot.slane %v11160_v31, 1 }
0x39f3   :  { %v11131_v3 = vmul.f32 %v11110_v6, %v18355_v15 }
0x39f4   :  { %v11172_v52 = vadd.f32 %v11171_v37, %v11170_v10  ;;  %v11153_v28 = vadd.f32 %v11152_v47, %v11151_v7  ;;  %v11209_v27 = vsel %vm4177_vm4, %v11148_v34, %v11141_v9  ;;  %v12380_v10 = vld [vmem:[%s18591_s6] ss:$0 sm:$0xff]  ;;  %v12381_v47 = vld [vmem:[%s18591_s6 + $0x1] ss:$0 sm:$0xff] }
0x39f5   :  { %v11163_v40 = vsel %vm74_vm0, %v11131_v3, 0.0 }
0x39f6   :  { %v11173_v2 = vrot.slane %v11172_v52, 2  ;;  %v11164_v29 = vrot.slane %v11163_v40, 4  ;;  %v11120_v48 = vpop.permute.xlu1 %11119  ;;  %v11154_v61 = vrot.slane %v11153_v28, 1 }
0x39f7   :  { %v11133_v50 = vmul.f32 %v11120_v48, %v18364_v53 }
0x39f8   :  { %v11174_v36 = vadd.f32 %v11173_v2, %v11172_v52  ;;  %v11165_v11 = vadd.f32 %v11164_v29, %v11163_v40  ;;  %v11155_v43 = vadd.f32 %v11154_v61, %v11153_v28  ;;  %v11316_v40 = vld [vmem:[%s18589_s4 + $0x4] sm:$0xf] }
0x39f9   :  { %v11177_v51 = vsel %vm74_vm0, %v11133_v50, 0.0 }
0x39fa   :  { %v11166_v15 = vrot.slane %v11165_v11, 2  ;;  %v11178_v16 = vrot.slane %v11177_v51, 4  ;;  %v11125_v14 = vpop.permute.xlu1 %11124  ;;  %v11175_v42 = vrot.slane %v11174_v36, 1  ;;  %v11210_v49 = vsel %vm4180_vm5, %v11155_v43, %v11209_v27 }
0x39fb   :  { %v11134_v46 = vmul.f32 %v11125_v14, %v18366_v21  ;;  %v11162_v21 = vadd.f32 %v11161_v41, %v11160_v31 }
0x39fc   :  { %v11167_v33 = vadd.f32 %v11166_v15, %v11165_v11  ;;  %v11179_v5 = vadd.f32 %v11178_v16, %v11177_v51  ;;  %v11176_v13 = vadd.f32 %v11175_v42, %v11174_v36 }
0x39fd   :  { %v11184_v53 = vsel %vm74_vm0, %v11134_v46, 0.0  ;;  %v18504_v24 = vsel %vm4183_vm6, %v11162_v21, %v11210_v49 }
0x39fe   :  { %v11168_v4 = vrot.slane %v11167_v33, 1  ;;  %v11180_v57 = vrot.slane %v11179_v5, 2  ;;  %v11185_v20 = vrot.slane %v11184_v53, 4 }
0x3a00   :  { %v11169_v44 = vadd.f32 %v11168_v4, %v11167_v33  ;;  %v11181_v56 = vadd.f32 %v11180_v57, %v11179_v5  ;;  %v11186_v35 = vadd.f32 %v11185_v20, %v11184_v53 }
0x3a02   :  { %v11182_v12 = vrot.slane %v11181_v56, 1  ;;  %v11187_v39 = vrot.slane %v11186_v35, 2  ;;  %v11368_v0 = vsel %vm4177_vm4, %v11176_v13, %v11169_v44  ;;  %v11212_v23 = vsel %vm4186_vm7, %v11169_v44, %v18504_v24 }
0x3a03   :  { %v11213_v63 = vsel %vm4189_vm8, %v11176_v13, %v11212_v23 }
0x3a04   :  { %v11183_v1 = vadd.f32 %v11182_v12, %v11181_v56  ;;  %v11188_v45 = vadd.f32 %v11187_v39, %v11186_v35 }
0x3a06   :  { %v11189_v22 = vrot.slane %v11188_v45, 1  ;;  %v11369_v19 = vsel %vm4180_vm5, %v11183_v1, %v11368_v0  ;;  %v11214_v30 = vsel %vm4192_vm9, %v11183_v1, %v11213_v63  ;;  %v12384_v63 = vld [vmem:[%s18597_s12 + $0x70] sm:$0xff] }
0x3a08   :  { %v11190_v26 = vadd.f32 %v11189_v22, %v11188_v45 }
0x3a0a   :  { %v11215_v59 = vsel %vm4195_vm10, %v11190_v26, %v11214_v30  ;;  %v18513_v58 = vsel %vm4183_vm6, %v11190_v26, %v11369_v19  ;;  %v12385_v19 = vld [vmem:[%s18597_s12 + $0x78] sm:$0xff]  ;;  %v12383_v26 = vld [vmem:[%s18597_s12 + $0x68] sm:$0xff]  ;;  %v12382_v30 = vld [vmem:[%s18597_s12 + $0x60] sm:$0xff] }
0x3a0b   :  { %14575 = vmatmul.mubr.msk.f32.vlgmr.msra.gmra.mxu1 %vm74_vm0, %v11215_v59  ;;  %14578 = vmatpush3.msra.mxu0 %v12385_v19 }
0x3a0c   :  { %14596 = vmatprep.mubr.msk.f32.mxu1 %vm15068_vm3, %v18605_v17  ;;  %14579 = vmatprep.subr.mxu0 %v18605_v17 }
0x3a0d   :  { %14580 = vmatpush3.msra.mxu0 %v12384_v63 }
0x3a0e   :  { %14581 = vmatprep.subr.mxu0 %v18605_v17 }
0x3a0f   :  { %14582 = vmatpush3.msra.mxu0 %v12383_v26 }
0x3a10   :  { %14583 = vmatprep.subr.mxu0 %v18605_v17 }
0x3a11   :  { %14584 = vmatpush3.msra.mxu0 %v12382_v30 }
0x3acb   :  { %v11284_v54 = vpop.f32.mrf.mxu1 }
0x3acc   :  { %v11285_v7 = vadd.f32 %v12378_v25, %v11284_v54 }
0x3acd   :  { %v14576_v8 = vpop.f32.mrf.mxu1 }
0x3ace   :  { %14993 = vtanh.f32 %v11285_v7 }
0x3adb   :  { %v14994_v62 = vpop.eup %14993 }
0x3adc   :  { %v11306_v37 = vmul.f32 %v14994_v62, %v12380_v10  ;;  %v11290_v6 = vcombine.high %v14994_v62, %v14994_v62 }
0x3ade   :  { %v11309_v55 = vsel %vm11308_vm13, %v11306_v37, 0.0  ;;  %v11307_v3 = vmul.f32 %v12381_v47, %v11290_v6 }
0x3adf   :  { %11310 = vadd.xlane.f32.xlu1 %v11309_v55 }
0x3ae0   :  { %v11312_v52 = vsel %vm11308_vm13, %v11307_v3, 0.0 }
0x3ae1   :  { %11313 = vadd.xlane.f32.xlu0 %v11312_v52 }
0x3b68   :  { %v11311_v28 = vpop.xlane.xlu1 %11310 }
0x3b69   :  { %v11317_v32 = vadd.f32 %v11315_v18, %v11311_v28 }
0x3b6a   :  { %v11314_v2 = vpop.xlane.xlu0 %11313 }
0x3b6b   :  { %v11320_v29 = vsel %vm11319_vm14, %v11317_v32, -inf  ;;  %v11318_v48 = vadd.f32 %v11316_v40, %v11314_v2 }
0x3b6c   :  { %v11321_v38 = vrot.slane %v11320_v29, 4 }
0x3b6d   :  { %v11327_v50 = vsel %vm11319_vm14, %v11318_v48, -inf }
0x3b6e   :  { %v11322_v36 = vmax.f32 %v11320_v29, %v11321_v38  ;;  %v11328_v11 = vrot.slane %v11327_v50, 4  ;;  %v11477_v29 = vld [vmem:[%s18598_s13 + $0x10] sm:$0xff]  ;;  %v11475_v38 = vld [vmem:[%s18598_s13] sm:$0xff] }
0x3b70   :  { %v11323_v60 = vrot.slane %v11322_v36, 2  ;;  %v11329_v61 = vmax.f32 %v11327_v50, %v11328_v11  ;;  %v12387_v50 = vld [vmem:[%s18597_s12 + $0x80] ss:$0 sm:$0xff] }
0x3b72   :  { %v11324_v51 = vmax.f32 %v11322_v36, %v11323_v60  ;;  %v11330_v31 = vrot.slane %v11329_v61, 2 }
0x3b74   :  { %v11325_v15 = vrot.slane %v11324_v51, 1  ;;  %v11331_v16 = vmax.f32 %v11329_v61, %v11330_v31 }
0x3b76   :  { %v11326_v14 = vmax.f32 %v11324_v51, %v11325_v15  ;;  %v11332_v9 = vrot.slane %v11331_v16, 1  ;;  %v12389_v51 = vld [vmem:[%s18598_s13 + $0x20] ss:$0 sm:$0xff] }
0x3b78   :  { %v11334_v46 = vsub.f32 %v11317_v32, %v11326_v14  ;;  %v11333_v42 = vmax.f32 %v11331_v16, %v11332_v9 }
0x3b7a   :  { %v11336_v33 = vmul.f32 1.442695, %v11334_v46  ;;  %v11335_v5 = vsub.f32 %v11318_v48, %v11333_v42  ;;  %v11476_v48 = vld [vmem:[%s18598_s13 + $0x8] sm:$0xff] }
0x3b7c   :  { %14995 = vpow2.f32 %v11336_v33  ;;  %v11338_v34 = vmul.f32 1.442695, %v11335_v5 }
0x3b7e   :  { %14997 = vpow2.f32 %v11338_v34 }
0x3b89   :  { %v14996_v43 = vpop.eup %14995 }
0x3b8a   :  { %v11340_v53 = vsel %vm11319_vm14, %v14996_v43, 0.0 }
0x3b8b   :  { %v14998_v41 = vpop.eup %14997  ;;  %v11341_v4 = vrot.slane %v11340_v53, 4 }
0x3b8c   :  { %v11347_v57 = vsel %vm11319_vm14, %v14998_v41, 0.0 }
0x3b8d   :  { %v11342_v20 = vadd.f32 %v11341_v4, %v11340_v53  ;;  %v11348_v27 = vrot.slane %v11347_v57, 4 }
0x3b8f   :  { %v11343_v13 = vrot.slane %v11342_v20, 2  ;;  %v11349_v44 = vadd.f32 %v11348_v27, %v11347_v57 }
0x3b91   :  { %v11344_v56 = vadd.f32 %v11343_v13, %v11342_v20  ;;  %v11350_v35 = vrot.slane %v11349_v44, 2 }
0x3b93   :  { %v11345_v49 = vrot.slane %v11344_v56, 1  ;;  %v11351_v21 = vadd.f32 %v11350_v35, %v11349_v44 }
0x3b95   :  { %v11346_v12 = vadd.f32 %v11345_v49, %v11344_v56  ;;  %v11352_v39 = vrot.slane %v11351_v21, 1 }
0x3b97   :  { %14999 = vrcp.f32 %v11346_v12  ;;  %v11353_v0 = vadd.f32 %v11352_v39, %v11351_v21 }
0x3b99   :  { %15001 = vrcp.f32 %v11353_v0 }
0x3ba4   :  { %v15000_v1 = vpop.eup %14999 }
0x3ba5   :  { %v11356_v45 = vmul.f32 %v15000_v1, %v14996_v43 }
0x3ba6   :  { %v15002_v23 = vpop.eup %15001 }
0x3ba7   :  { %11360 = vperm.xlu0 %14603, %v11356_v45   ;;  %v11357_v22 = vmul.f32 %v15002_v23, %v14998_v41 }
0x3ba9   :  { %11365 = vperm.xlu1 %14604, %v11357_v22  }
0x3c22   :  { %v11361_v59 = vpop.permute.xlu0 %11360 }
0x3c23   :  { %v11373_v25 = vmul.f32 %v11361_v59, %v18504_v24 }
0x3c24   :  { %v11366_v54 = vpop.permute.xlu1 %11365 }
0x3c25   :  { %v11375_v7 = vsel %vm11308_vm13, %v11373_v25, 0.0  ;;  %v11374_v8 = vmul.f32 %v18513_v58, %v11366_v54  ;;  %v11478_v58 = vld [vmem:[%s18598_s13 + $0x18] sm:$0xff] }
0x3c26   :  { %v11376_v10 = vrot.slane %v11375_v7, 4  ;;  %14589 = vmatpush3.msra.mxu1 %v11478_v58 }
0x3c27   :  { %v11382_v62 = vsel %vm11308_vm13, %v11374_v8, 0.0  ;;  %14590 = vmatprep.subr.mxu1 %v18605_v17 }
0x3c28   :  { %v11377_v47 = vadd.f32 %v11376_v10, %v11375_v7  ;;  %v11383_v37 = vrot.slane %v11382_v62, 4  ;;  %14591 = vmatpush3.msra.mxu1 %v11477_v29 }
0x3c29   :  { %14592 = vmatprep.subr.mxu1 %v18605_v17 }
0x3c2a   :  { %v11378_v6 = vrot.slane %v11377_v47, 2  ;;  %v11384_v55 = vadd.f32 %v11383_v37, %v11382_v62  ;;  %14593 = vmatpush3.msra.mxu1 %v11476_v48 }
0x3c2b   :  { %14594 = vmatprep.subr.mxu1 %v18605_v17 }
0x3c2c   :  { %v11379_v3 = vadd.f32 %v11378_v6, %v11377_v47  ;;  %v11385_v52 = vrot.slane %v11384_v55, 2  ;;  %14595 = vmatpush3.msra.mxu1 %v11475_v38 }
0x3c2e   :  { %v11380_v18 = vrot.slane %v11379_v3, 1  ;;  %v11386_v28 = vadd.f32 %v11385_v52, %v11384_v55 }
0x3c30   :  { %v11387_v40 = vrot.slane %v11386_v28, 1  ;;  %v11381_v32 = vadd.f32 %v11380_v18, %v11379_v3 }
0x3c32   :  { %v11388_v2 = vadd.f32 %v11387_v40, %v11386_v28 }
0x3c34   :  { %v11401_v24 = vsel %vm4177_vm4, %v11388_v2, %v11381_v32 }
0x3c35   :  { %14586 = vmatmul.mubr.msk.f32.vlgmr.msra.gmra.mxu0 %vm74_vm0, %v11401_v24 }
0x3cf5   :  { %v11470_v36 = vpop.f32.mrf.mxu0 }
0x3cf6   :  { %v11471_v11 = vadd.f32 %v12387_v50, %v11470_v36 }
0x3cf7   :  { %v14587_v60 = vpop.f32.mrf.mxu0 }
0x3cf8   :  { %15003 = vtanh.f32 %v11471_v11 }
0x3d05   :  { %v15004_v61 = vpop.eup %15003 }
0x3d06   :  { %14597 = vmatmul.mubr.msk.f32.vlgmr.msra.gmra.mxu1 %vm74_vm0, %v15004_v61 }
0x3dc6   :  { %v11553_v31 = vpop.f32.mrf.mxu1 }
0x3dc7   :  { %v11554_v17 = vadd.f32 %v12389_v51, %v11553_v31 }
0x3dc8   :  { %v14598_v15 = vpop.f32.mrf.mxu1 }
0x3dc9   :  { %11557 = vst [vmem:[#allocation2] sm:$0x3] %v11554_v17 }
0x3dca   :  { %15056 = shalt.err (!%p15053_p4)
}
0x3dcb   :  { %11567 = dma.vmem_to_hbm [thread:$0]  %s11565_s28, 32, %s18599_s14, [#allocation3]  }
0x3dcc   :  { %15065 = dma.done.wait [#allocation3], 32  }
0x3dcd   :  { %15066 = vsyncadd [#allocation3], 4294967264 }
0x3dce   :  { %11571 = vsyncpa [#allocation3], 1 }

</bundles_post_ra>
